<compile_context>
chip_gen: v7x
topology: tpu7x:2x2x1
jax: 0.10.0
libtpu: 0.0.40
codegen_flags: <defaults>
</compile_context>

<pallas_src>
import functools

import jax
import jax.numpy as jnp
from jax import lax
from jax.experimental import pallas as pl
from jax.experimental.pallas import tpu as pltpu


def attention_block_kernel(x_ref, wqkv_ref, bqkv_ref, wop_ref, bop_ref, o_ref,
                           *, num_heads):
    """One grid step == `block_b` batch elements, everything in VMEM.

    wqkv_ref : (D, 3D) bf16, pre-transposed, Q columns pre-scaled by 1/sqrt(hd)
    bqkv_ref : (1, 3D) f32, Q part pre-scaled
    wop_ref  : (H, hd, D) bf16, fused (out_proj @ proj) weight, head-major rows
    bop_ref  : (1, D) f32, fused bias
    """
    block_b, S, D = x_ref.shape
    H = num_heads
    hd = D // H
    R = block_b * S

    # --- fused QKV in-projection on the flattened (R, D) slab (MXU, bf16) ---
    xf = x_ref[...].reshape(R, D).astype(jnp.bfloat16)
    qkv = jnp.dot(xf, wqkv_ref[...], preferred_element_type=jnp.float32)
    qkv = qkv + bqkv_ref[...]                                   # (R, 3D) f32

    q = qkv[:, :D].reshape(block_b, S, D).astype(jnp.bfloat16)  # already scaled
    k = qkv[:, D:2 * D].reshape(block_b, S, D).astype(jnp.bfloat16)
    v = qkv[:, 2 * D:].reshape(block_b, S, D).astype(jnp.bfloat16)

    # --- per-head attention, each head folded straight into the fused
    #     out-projection (f32 accumulator; no scratch, no masked stores) ---
    acc = jnp.zeros((R, D), jnp.float32)
    for h in range(H):                                          # static unroll
        sl = slice(h * hd, (h + 1) * hd)
        qh = q[:, :, sl]                                        # (block_b, S, hd)
        kh = k[:, :, sl]
        vh = v[:, :, sl]
        # scores: contract shared last axis, batch over block_b (no transpose)
        s = lax.dot_general(qh, kh,
                            dimension_numbers=(((2,), (2,)), ((0,), (0,))),
                            preferred_element_type=jnp.float32)  # (b, S, S) f32
        s = s - jnp.max(s, axis=-1, keepdims=True)
        p = jnp.exp(s)
        inv = pl.reciprocal(jnp.sum(p, axis=-1, keepdims=True), approx=True)
        p = (p * inv).astype(jnp.bfloat16)
        oh = lax.dot_general(p, vh,
                             dimension_numbers=(((2,), (1,)), ((0,), (0,))),
                             preferred_element_type=jnp.float32)  # (b, S, hd)
        oh = oh.reshape(R, hd).astype(jnp.bfloat16)
        # this head's rows of the fused projection weight: (hd, D)
        acc = acc + jnp.dot(oh, wop_ref[h], preferred_element_type=jnp.float32)

    y = acc + bop_ref[...]                                      # (R, D) f32
    o_ref[...] = y.reshape(block_b, S, D).astype(o_ref.dtype)


def attention_block(x, wqkv, bqkv, wo, bo, wp, bp, *, num_heads, block_b=None):
    """x: (B, S, D); weights in torch layout: wqkv (3D, D), wo/wp (D, D),
    biases bqkv (3D,), bo/bp (D,)."""
    B, S, D = x.shape
    H = num_heads
    assert D % H == 0
    hd = D // H
    f32 = jnp.float32

    wqkv = jnp.asarray(wqkv, f32)
    bqkv = jnp.asarray(bqkv, f32).reshape(3 * D)
    wo = jnp.asarray(wo, f32)
    bo = jnp.asarray(bo, f32).reshape(D)
    wp = jnp.asarray(wp, f32)
    bp = jnp.asarray(bp, f32).reshape(D)

    # ---- one-time host prep ----
    # fold 1/sqrt(hd) into the Q rows of the in-projection, pre-transpose
    scale = 1.0 / (hd ** 0.5)
    q_scale = jnp.concatenate([jnp.full((D,), scale, f32), jnp.ones((2 * D,), f32)])
    wqkv_t = (wqkv * q_scale[:, None]).T                     # (D, 3D)
    bqkv_s = (bqkv * q_scale).reshape(1, 3 * D)
    # fuse out_proj and proj (both linear, exact in f32):
    #   (a @ wo^T + bo) @ wp^T + bp == a @ (wo^T wp^T) + (bo wp^T + bp)
    w_op = wo.T @ wp.T                                       # (D, D)
    b_op = (bo @ wp.T + bp).reshape(1, D)
    # bf16 weights for the MXU (f32 accumulation kept in-kernel);
    # w_op stored head-major so the kernel slices full sublane-aligned rows.
    wqkv_b = wqkv_t.astype(jnp.bfloat16)
    w_op_b = w_op.reshape(H, hd, D).astype(jnp.bfloat16)

    # ---- generation-aware VMEM limit ----
    try:
        vmem_cap = int(pltpu.get_tpu_info().vmem_capacity_bytes)
    except Exception:
        vmem_cap = 64 * 1024 * 1024                          # conservative (v7x)
    vmem_limit = min(vmem_cap * 3 // 4, 112 * 1024 * 1024)

    # v7x has 2 TensorCores/chip -> keep >= 2 grid steps when B allows;
    # single-TC chips (v5e/v6e) prefer one big step (grid is a serial loop).
    try:
        kind = jax.devices()[0].device_kind.lower()
    except Exception:
        kind = ""
    min_steps = 2 if ("v7" in kind or "7x" in kind) else 1

    def _block_bytes(bb):
        r = bb * S
        est = r * D * 4 * 2 * 2                              # x tile + out tile, 2x buffered
        est += r * 3 * D * (4 + 2)                           # qkv f32 + q/k/v bf16
        est += bb * S * S * 4 * 3                            # scores / p temporaries
        est += r * D * 4 * 2                                 # f32 accumulator + y
        est += (D * 3 * D + D * D) * 2 * 2                   # bf16 weights, 2x buffered
        est += 8 * D * 4                                     # biases
        return est

    if block_b is None:
        budget = int(vmem_limit * 0.6)
        divisors = [d for d in range(B, 0, -1) if B % d == 0]
        cands = [d for d in divisors if B // d >= min_steps] or divisors
        block_b = next((d for d in cands if _block_bytes(d) <= budget), cands[-1])
    assert B % block_b == 0, "batch must be divisible by block_b"
    grid = (B // block_b,)

    kernel = functools.partial(attention_block_kernel, num_heads=H)
    return pl.pallas_call(
        kernel,
        out_shape=jax.ShapeDtypeStruct((B, S, D), x.dtype),
        grid=grid,
        in_specs=[
            pl.BlockSpec((block_b, S, D), lambda b: (b, 0, 0)),   # x tile
            pl.BlockSpec((D, 3 * D), lambda b: (0, 0)),           # in_proj weight^T (scaled, bf16)
            pl.BlockSpec((1, 3 * D), lambda b: (0, 0)),           # in_proj bias (scaled, f32)
            pl.BlockSpec((H, hd, D), lambda b: (0, 0, 0)),        # fused out_proj@proj weight (bf16)
            pl.BlockSpec((1, D), lambda b: (0, 0)),               # fused bias (f32)
        ],
        out_specs=pl.BlockSpec((block_b, S, D), lambda b: (b, 0, 0)),
        compiler_params=pltpu.CompilerParams(
            dimension_semantics=("parallel",),
            vmem_limit_bytes=int(vmem_limit)),
    )(x, wqkv_b, bqkv_s, w_op_b, b_op)


def reference(x, wqkv, bqkv, wo, bo, wp, bp, *, num_heads):
    """Pure-JAX f32 reference of torch.nn.MultiheadAttention + Linear."""
    B, S, D = x.shape
    hd = D // num_heads
    qkv = jnp.einsum("bsd,ed->bse", x, wqkv) + bqkv              # (B, S, 3D)
    q, k, v = qkv[..., :D], qkv[..., D:2 * D], qkv[..., 2 * D:]
    q = q.reshape(B, S, num_heads, hd).transpose(0, 2, 1, 3)
    k = k.reshape(B, S, num_heads, hd).transpose(0, 2, 1, 3)
    v = v.reshape(B, S, num_heads, hd).transpose(0, 2, 1, 3)
    s = jnp.einsum("bhqd,bhkd->bhqk", q, k) / jnp.sqrt(hd)
    p = jax.nn.softmax(s, axis=-1)
    o = jnp.einsum("bhqk,bhkd->bhqd", p, v)
    o = o.transpose(0, 2, 1, 3).reshape(B, S, D)
    o = jnp.einsum("bsd,ed->bse", o, wo) + bo
    o = jnp.einsum("bsd,ed->bse", o, wp) + bp
    return o


if __name__ == "__main__":
    # Shapes per the PyTorch spec: dim=512, num_heads=8; small batch/seq.
    B, S, D, H = 8, 8, 512, 8

    key = jax.random.PRNGKey(0)
    k_x, k_wqkv, k_bqkv, k_wo, k_bo, k_wp, k_bp = jax.random.split(key, 7)

    x    = jax.random.normal(k_x,    (B, S, D), dtype=jnp.float32)
    wqkv = jax.random.normal(k_wqkv, (3 * D, D), dtype=jnp.float32) * 0.05   # in_proj_weight
    bqkv = jax.random.normal(k_bqkv, (3 * D,),   dtype=jnp.float32) * 0.05   # in_proj_bias
    wo   = jax.random.normal(k_wo,   (D, D),     dtype=jnp.float32) * 0.05   # out_proj.weight
    bo   = jax.random.normal(k_bo,   (D,),       dtype=jnp.float32) * 0.05   # out_proj.bias
    wp   = jax.random.normal(k_wp,   (D, D),     dtype=jnp.float32) * 0.05   # proj.weight
    bp   = jax.random.normal(k_bp,   (D,),       dtype=jnp.float32) * 0.05   # proj.bias

    out = attention_block(x, wqkv, bqkv, wo, bo, wp, bp, num_heads=H)
    out = jax.block_until_ready(out)

    ref = reference(x, wqkv, bqkv, wo, bo, wp, bp, num_heads=H)
    assert out.shape == (B, S, D)
    # bf16 MXU operands (f32 accumulate) + approx reciprocal => looser tolerance
    # than pure f32, but the softmax itself is computed in f32.
    max_err = float(jnp.max(jnp.abs(out - ref)))
    assert jnp.allclose(out, ref, atol=7.5e-2, rtol=5e-2), (
        f"mismatch vs JAX reference (max abs err {max_err})")

    print("KERNEL_OK")
</pallas_src>

<mosaic_0001>
module attributes {stable_mosaic.version = 11 : i64} {
  func.func @attention_block_kernel(%arg0: i32, %arg1: memref<8x8x512xf32, #tpu.memory_space<vmem>>, %arg2: memref<512x1536xbf16, #tpu.memory_space<vmem>>, %arg3: memref<1x1536xf32, #tpu.memory_space<vmem>>, %arg4: memref<8x64x512xbf16, #tpu.memory_space<vmem>>, %arg5: memref<1x512xf32, #tpu.memory_space<vmem>>, %arg6: memref<8x8x512xf32, #tpu.memory_space<vmem>>) attributes {dimension_semantics = [#tpu.dimension_semantics<parallel>], iteration_bounds = array<i64: 1>, scalar_prefetch = 0 : i64, scratch_operands = 0 : i64, tpu.core_type = #tpu.core_type<tc>, window_params = [{transform_indices = @transform_0, window_bounds = array<i64: 8, 8, 512>}, {pipeline_mode = #tpu.pipeline_mode<synchronous>, transform_indices = @transform_1, window_bounds = array<i64: 512, 1536>}, {pipeline_mode = #tpu.pipeline_mode<synchronous>, transform_indices = @transform_2, window_bounds = array<i64: 1, 1536>}, {pipeline_mode = #tpu.pipeline_mode<synchronous>, transform_indices = @transform_3, window_bounds = array<i64: 8, 64, 512>}, {pipeline_mode = #tpu.pipeline_mode<synchronous>, transform_indices = @transform_4, window_bounds = array<i64: 1, 512>}, {transform_indices = @transform_5, window_bounds = array<i64: 8, 8, 512>}]} {
    %c0 = arith.constant 0 : index
    %c0_0 = arith.constant 0 : index
    %c0_1 = arith.constant 0 : index
    %0 = vector.load %arg1[%c0, %c0_0, %c0_1] : memref<8x8x512xf32, #tpu.memory_space<vmem>>, vector<8x8x512xf32>
    %1 = vector.shape_cast %0 : vector<8x8x512xf32> to vector<64x512xf32>
    %2 = arith.truncf %1 : vector<64x512xf32> to vector<64x512xbf16>
    %c0_2 = arith.constant 0 : index
    %c0_3 = arith.constant 0 : index
    %3 = vector.load %arg2[%c0_2, %c0_3] : memref<512x1536xbf16, #tpu.memory_space<vmem>>, vector<512x1536xbf16>
    %cst = arith.constant dense<0.000000e+00> : vector<64x1536xf32>
    %4 = tpu.matmul %2, %3, %cst {dimension_numbers = #tpu.dot_dimension_numbers<[1], [0], [0], [1], [0, 0, 1, 1], [], []>} : vector<64x512xbf16>, vector<512x1536xbf16>, vector<64x1536xf32> -> vector<64x1536xf32>
    %c0_4 = arith.constant 0 : index
    %c0_5 = arith.constant 0 : index
    %5 = vector.load %arg3[%c0_4, %c0_5] : memref<1x1536xf32, #tpu.memory_space<vmem>>, vector<1x1536xf32>
    %6 = vector.broadcast %5 : vector<1x1536xf32> to vector<64x1536xf32>
    %7 = arith.addf %4, %6 : vector<64x1536xf32>
    %8 = vector.extract_strided_slice %7 {offsets = [0, 0], sizes = [64, 512], strides = [1, 1]} : vector<64x1536xf32> to vector<64x512xf32>
    %9 = vector.shape_cast %8 : vector<64x512xf32> to vector<8x8x512xf32>
    %10 = arith.truncf %9 : vector<8x8x512xf32> to vector<8x8x512xbf16>
    %11 = vector.extract_strided_slice %7 {offsets = [0, 512], sizes = [64, 512], strides = [1, 1]} : vector<64x1536xf32> to vector<64x512xf32>
    %12 = vector.shape_cast %11 : vector<64x512xf32> to vector<8x8x512xf32>
    %13 = arith.truncf %12 : vector<8x8x512xf32> to vector<8x8x512xbf16>
    %14 = vector.extract_strided_slice %7 {offsets = [0, 1024], sizes = [64, 512], strides = [1, 1]} : vector<64x1536xf32> to vector<64x512xf32>
    %15 = vector.shape_cast %14 : vector<64x512xf32> to vector<8x8x512xf32>
    %16 = arith.truncf %15 : vector<8x8x512xf32> to vector<8x8x512xbf16>
    %cst_6 = arith.constant 0.000000e+00 : f32
    %17 = vector.broadcast %cst_6 : f32 to vector<64x512xf32>
    %18 = vector.extract_strided_slice %10 {offsets = [0, 0, 0], sizes = [8, 8, 64], strides = [1, 1, 1]} : vector<8x8x512xbf16> to vector<8x8x64xbf16>
    %19 = vector.extract_strided_slice %13 {offsets = [0, 0, 0], sizes = [8, 8, 64], strides = [1, 1, 1]} : vector<8x8x512xbf16> to vector<8x8x64xbf16>
    %20 = vector.extract_strided_slice %16 {offsets = [0, 0, 0], sizes = [8, 8, 64], strides = [1, 1, 1]} : vector<8x8x512xbf16> to vector<8x8x64xbf16>
    %cst_7 = arith.constant dense<0.000000e+00> : vector<8x8x8xf32>
    %21 = tpu.matmul %18, %19, %cst_7 {dimension_numbers = #tpu.dot_dimension_numbers<[2], [2], [1], [1], [0, 0, 0, 1, 1, 1], [0], [0]>} : vector<8x8x64xbf16>, vector<8x8x64xbf16>, vector<8x8x8xf32> -> vector<8x8x8xf32>
    %cst_8 = arith.constant dense<0xFF800000> : vector<8x8xf32>
    %22 = vector.multi_reduction <maximumf>, %21, %cst_8 [2] : vector<8x8x8xf32> to vector<8x8xf32>
    %23 = vector.shape_cast %22 : vector<8x8xf32> to vector<8x8x1xf32>
    %24 = vector.broadcast %23 : vector<8x8x1xf32> to vector<8x8x8xf32>
    %25 = arith.subf %21, %24 : vector<8x8x8xf32>
    %26 = math.exp %25 : vector<8x8x8xf32>
    %cst_9 = arith.constant dense<0.000000e+00> : vector<8x8xf32>
    %27 = vector.multi_reduction <add>, %26, %cst_9 [2] : vector<8x8x8xf32> to vector<8x8xf32>
    %28 = vector.shape_cast %27 : vector<8x8xf32> to vector<8x8x1xf32>
    %29 = tpu.reciprocal %28 {approx = true} : vector<8x8x1xf32> -> vector<8x8x1xf32>
    %30 = vector.broadcast %29 : vector<8x8x1xf32> to vector<8x8x8xf32>
    %31 = arith.mulf %26, %30 : vector<8x8x8xf32>
    %32 = arith.truncf %31 : vector<8x8x8xf32> to vector<8x8x8xbf16>
    %cst_10 = arith.constant dense<0.000000e+00> : vector<8x8x64xf32>
    %33 = tpu.matmul %32, %20, %cst_10 {dimension_numbers = #tpu.dot_dimension_numbers<[2], [1], [1], [2], [0, 0, 0, 1, 1, 2], [0], [0]>} : vector<8x8x8xbf16>, vector<8x8x64xbf16>, vector<8x8x64xf32> -> vector<8x8x64xf32>
    %34 = vector.shape_cast %33 : vector<8x8x64xf32> to vector<64x64xf32>
    %35 = arith.truncf %34 : vector<64x64xf32> to vector<64x64xbf16>
    %c0_11 = arith.constant 0 : index
    %c0_12 = arith.constant 0 : index
    %c0_13 = arith.constant 0 : index
    %36 = vector.load %arg4[%c0_11, %c0_12, %c0_13] : memref<8x64x512xbf16, #tpu.memory_space<vmem>>, vector<1x64x512xbf16>
    %37 = vector.shape_cast %36 : vector<1x64x512xbf16> to vector<64x512xbf16>
    %cst_14 = arith.constant dense<0.000000e+00> : vector<64x512xf32>
    %38 = tpu.matmul %35, %37, %cst_14 {dimension_numbers = #tpu.dot_dimension_numbers<[1], [0], [0], [1], [0, 0, 1, 1], [], []>} : vector<64x64xbf16>, vector<64x512xbf16>, vector<64x512xf32> -> vector<64x512xf32>
    %39 = arith.addf %17, %38 : vector<64x512xf32>
    %40 = vector.extract_strided_slice %10 {offsets = [0, 0, 64], sizes = [8, 8, 64], strides = [1, 1, 1]} : vector<8x8x512xbf16> to vector<8x8x64xbf16>
    %41 = vector.extract_strided_slice %13 {offsets = [0, 0, 64], sizes = [8, 8, 64], strides = [1, 1, 1]} : vector<8x8x512xbf16> to vector<8x8x64xbf16>
    %42 = vector.extract_strided_slice %16 {offsets = [0, 0, 64], sizes = [8, 8, 64], strides = [1, 1, 1]} : vector<8x8x512xbf16> to vector<8x8x64xbf16>
    %cst_15 = arith.constant dense<0.000000e+00> : vector<8x8x8xf32>
    %43 = tpu.matmul %40, %41, %cst_15 {dimension_numbers = #tpu.dot_dimension_numbers<[2], [2], [1], [1], [0, 0, 0, 1, 1, 1], [0], [0]>} : vector<8x8x64xbf16>, vector<8x8x64xbf16>, vector<8x8x8xf32> -> vector<8x8x8xf32>
    %cst_16 = arith.constant dense<0xFF800000> : vector<8x8xf32>
    %44 = vector.multi_reduction <maximumf>, %43, %cst_16 [2] : vector<8x8x8xf32> to vector<8x8xf32>
    %45 = vector.shape_cast %44 : vector<8x8xf32> to vector<8x8x1xf32>
    %46 = vector.broadcast %45 : vector<8x8x1xf32> to vector<8x8x8xf32>
    %47 = arith.subf %43, %46 : vector<8x8x8xf32>
    %48 = math.exp %47 : vector<8x8x8xf32>
    %cst_17 = arith.constant dense<0.000000e+00> : vector<8x8xf32>
    %49 = vector.multi_reduction <add>, %48, %cst_17 [2] : vector<8x8x8xf32> to vector<8x8xf32>
    %50 = vector.shape_cast %49 : vector<8x8xf32> to vector<8x8x1xf32>
    %51 = tpu.reciprocal %50 {approx = true} : vector<8x8x1xf32> -> vector<8x8x1xf32>
    %52 = vector.broadcast %51 : vector<8x8x1xf32> to vector<8x8x8xf32>
    %53 = arith.mulf %48, %52 : vector<8x8x8xf32>
    %54 = arith.truncf %53 : vector<8x8x8xf32> to vector<8x8x8xbf16>
    %cst_18 = arith.constant dense<0.000000e+00> : vector<8x8x64xf32>
    %55 = tpu.matmul %54, %42, %cst_18 {dimension_numbers = #tpu.dot_dimension_numbers<[2], [1], [1], [2], [0, 0, 0, 1, 1, 2], [0], [0]>} : vector<8x8x8xbf16>, vector<8x8x64xbf16>, vector<8x8x64xf32> -> vector<8x8x64xf32>
    %56 = vector.shape_cast %55 : vector<8x8x64xf32> to vector<64x64xf32>
    %57 = arith.truncf %56 : vector<64x64xf32> to vector<64x64xbf16>
    %c1 = arith.constant 1 : index
    %c0_19 = arith.constant 0 : index
    %c0_20 = arith.constant 0 : index
    %58 = vector.load %arg4[%c1, %c0_19, %c0_20] : memref<8x64x512xbf16, #tpu.memory_space<vmem>>, vector<1x64x512xbf16>
    %59 = vector.shape_cast %58 : vector<1x64x512xbf16> to vector<64x512xbf16>
    %cst_21 = arith.constant dense<0.000000e+00> : vector<64x512xf32>
    %60 = tpu.matmul %57, %59, %cst_21 {dimension_numbers = #tpu.dot_dimension_numbers<[1], [0], [0], [1], [0, 0, 1, 1], [], []>} : vector<64x64xbf16>, vector<64x512xbf16>, vector<64x512xf32> -> vector<64x512xf32>
    %61 = arith.addf %39, %60 : vector<64x512xf32>
    %62 = vector.extract_strided_slice %10 {offsets = [0, 0, 128], sizes = [8, 8, 64], strides = [1, 1, 1]} : vector<8x8x512xbf16> to vector<8x8x64xbf16>
    %63 = vector.extract_strided_slice %13 {offsets = [0, 0, 128], sizes = [8, 8, 64], strides = [1, 1, 1]} : vector<8x8x512xbf16> to vector<8x8x64xbf16>
    %64 = vector.extract_strided_slice %16 {offsets = [0, 0, 128], sizes = [8, 8, 64], strides = [1, 1, 1]} : vector<8x8x512xbf16> to vector<8x8x64xbf16>
    %cst_22 = arith.constant dense<0.000000e+00> : vector<8x8x8xf32>
    %65 = tpu.matmul %62, %63, %cst_22 {dimension_numbers = #tpu.dot_dimension_numbers<[2], [2], [1], [1], [0, 0, 0, 1, 1, 1], [0], [0]>} : vector<8x8x64xbf16>, vector<8x8x64xbf16>, vector<8x8x8xf32> -> vector<8x8x8xf32>
    %cst_23 = arith.constant dense<0xFF800000> : vector<8x8xf32>
    %66 = vector.multi_reduction <maximumf>, %65, %cst_23 [2] : vector<8x8x8xf32> to vector<8x8xf32>
    %67 = vector.shape_cast %66 : vector<8x8xf32> to vector<8x8x1xf32>
    %68 = vector.broadcast %67 : vector<8x8x1xf32> to vector<8x8x8xf32>
    %69 = arith.subf %65, %68 : vector<8x8x8xf32>
    %70 = math.exp %69 : vector<8x8x8xf32>
    %cst_24 = arith.constant dense<0.000000e+00> : vector<8x8xf32>
    %71 = vector.multi_reduction <add>, %70, %cst_24 [2] : vector<8x8x8xf32> to vector<8x8xf32>
    %72 = vector.shape_cast %71 : vector<8x8xf32> to vector<8x8x1xf32>
    %73 = tpu.reciprocal %72 {approx = true} : vector<8x8x1xf32> -> vector<8x8x1xf32>
    %74 = vector.broadcast %73 : vector<8x8x1xf32> to vector<8x8x8xf32>
    %75 = arith.mulf %70, %74 : vector<8x8x8xf32>
    %76 = arith.truncf %75 : vector<8x8x8xf32> to vector<8x8x8xbf16>
    %cst_25 = arith.constant dense<0.000000e+00> : vector<8x8x64xf32>
    %77 = tpu.matmul %76, %64, %cst_25 {dimension_numbers = #tpu.dot_dimension_numbers<[2], [1], [1], [2], [0, 0, 0, 1, 1, 2], [0], [0]>} : vector<8x8x8xbf16>, vector<8x8x64xbf16>, vector<8x8x64xf32> -> vector<8x8x64xf32>
    %78 = vector.shape_cast %77 : vector<8x8x64xf32> to vector<64x64xf32>
    %79 = arith.truncf %78 : vector<64x64xf32> to vector<64x64xbf16>
    %c2 = arith.constant 2 : index
    %c0_26 = arith.constant 0 : index
    %c0_27 = arith.constant 0 : index
    %80 = vector.load %arg4[%c2, %c0_26, %c0_27] : memref<8x64x512xbf16, #tpu.memory_space<vmem>>, vector<1x64x512xbf16>
    %81 = vector.shape_cast %80 : vector<1x64x512xbf16> to vector<64x512xbf16>
    %cst_28 = arith.constant dense<0.000000e+00> : vector<64x512xf32>
    %82 = tpu.matmul %79, %81, %cst_28 {dimension_numbers = #tpu.dot_dimension_numbers<[1], [0], [0], [1], [0, 0, 1, 1], [], []>} : vector<64x64xbf16>, vector<64x512xbf16>, vector<64x512xf32> -> vector<64x512xf32>
    %83 = arith.addf %61, %82 : vector<64x512xf32>
    %84 = vector.extract_strided_slice %10 {offsets = [0, 0, 192], sizes = [8, 8, 64], strides = [1, 1, 1]} : vector<8x8x512xbf16> to vector<8x8x64xbf16>
    %85 = vector.extract_strided_slice %13 {offsets = [0, 0, 192], sizes = [8, 8, 64], strides = [1, 1, 1]} : vector<8x8x512xbf16> to vector<8x8x64xbf16>
    %86 = vector.extract_strided_slice %16 {offsets = [0, 0, 192], sizes = [8, 8, 64], strides = [1, 1, 1]} : vector<8x8x512xbf16> to vector<8x8x64xbf16>
    %cst_29 = arith.constant dense<0.000000e+00> : vector<8x8x8xf32>
    %87 = tpu.matmul %84, %85, %cst_29 {dimension_numbers = #tpu.dot_dimension_numbers<[2], [2], [1], [1], [0, 0, 0, 1, 1, 1], [0], [0]>} : vector<8x8x64xbf16>, vector<8x8x64xbf16>, vector<8x8x8xf32> -> vector<8x8x8xf32>
    %cst_30 = arith.constant dense<0xFF800000> : vector<8x8xf32>
    %88 = vector.multi_reduction <maximumf>, %87, %cst_30 [2] : vector<8x8x8xf32> to vector<8x8xf32>
    %89 = vector.shape_cast %88 : vector<8x8xf32> to vector<8x8x1xf32>
    %90 = vector.broadcast %89 : vector<8x8x1xf32> to vector<8x8x8xf32>
    %91 = arith.subf %87, %90 : vector<8x8x8xf32>
    %92 = math.exp %91 : vector<8x8x8xf32>
    %cst_31 = arith.constant dense<0.000000e+00> : vector<8x8xf32>
    %93 = vector.multi_reduction <add>, %92, %cst_31 [2] : vector<8x8x8xf32> to vector<8x8xf32>
    %94 = vector.shape_cast %93 : vector<8x8xf32> to vector<8x8x1xf32>
    %95 = tpu.reciprocal %94 {approx = true} : vector<8x8x1xf32> -> vector<8x8x1xf32>
    %96 = vector.broadcast %95 : vector<8x8x1xf32> to vector<8x8x8xf32>
    %97 = arith.mulf %92, %96 : vector<8x8x8xf32>
    %98 = arith.truncf %97 : vector<8x8x8xf32> to vector<8x8x8xbf16>
    %cst_32 = arith.constant dense<0.000000e+00> : vector<8x8x64xf32>
    %99 = tpu.matmul %98, %86, %cst_32 {dimension_numbers = #tpu.dot_dimension_numbers<[2], [1], [1], [2], [0, 0, 0, 1, 1, 2], [0], [0]>} : vector<8x8x8xbf16>, vector<8x8x64xbf16>, vector<8x8x64xf32> -> vector<8x8x64xf32>
    %100 = vector.shape_cast %99 : vector<8x8x64xf32> to vector<64x64xf32>
    %101 = arith.truncf %100 : vector<64x64xf32> to vector<64x64xbf16>
    %c3 = arith.constant 3 : index
    %c0_33 = arith.constant 0 : index
    %c0_34 = arith.constant 0 : index
    %102 = vector.load %arg4[%c3, %c0_33, %c0_34] : memref<8x64x512xbf16, #tpu.memory_space<vmem>>, vector<1x64x512xbf16>
    %103 = vector.shape_cast %102 : vector<1x64x512xbf16> to vector<64x512xbf16>
    %cst_35 = arith.constant dense<0.000000e+00> : vector<64x512xf32>
    %104 = tpu.matmul %101, %103, %cst_35 {dimension_numbers = #tpu.dot_dimension_numbers<[1], [0], [0], [1], [0, 0, 1, 1], [], []>} : vector<64x64xbf16>, vector<64x512xbf16>, vector<64x512xf32> -> vector<64x512xf32>
    %105 = arith.addf %83, %104 : vector<64x512xf32>
    %106 = vector.extract_strided_slice %10 {offsets = [0, 0, 256], sizes = [8, 8, 64], strides = [1, 1, 1]} : vector<8x8x512xbf16> to vector<8x8x64xbf16>
    %107 = vector.extract_strided_slice %13 {offsets = [0, 0, 256], sizes = [8, 8, 64], strides = [1, 1, 1]} : vector<8x8x512xbf16> to vector<8x8x64xbf16>
    %108 = vector.extract_strided_slice %16 {offsets = [0, 0, 256], sizes = [8, 8, 64], strides = [1, 1, 1]} : vector<8x8x512xbf16> to vector<8x8x64xbf16>
    %cst_36 = arith.constant dense<0.000000e+00> : vector<8x8x8xf32>
    %109 = tpu.matmul %106, %107, %cst_36 {dimension_numbers = #tpu.dot_dimension_numbers<[2], [2], [1], [1], [0, 0, 0, 1, 1, 1], [0], [0]>} : vector<8x8x64xbf16>, vector<8x8x64xbf16>, vector<8x8x8xf32> -> vector<8x8x8xf32>
    %cst_37 = arith.constant dense<0xFF800000> : vector<8x8xf32>
    %110 = vector.multi_reduction <maximumf>, %109, %cst_37 [2] : vector<8x8x8xf32> to vector<8x8xf32>
    %111 = vector.shape_cast %110 : vector<8x8xf32> to vector<8x8x1xf32>
    %112 = vector.broadcast %111 : vector<8x8x1xf32> to vector<8x8x8xf32>
    %113 = arith.subf %109, %112 : vector<8x8x8xf32>
    %114 = math.exp %113 : vector<8x8x8xf32>
    %cst_38 = arith.constant dense<0.000000e+00> : vector<8x8xf32>
    %115 = vector.multi_reduction <add>, %114, %cst_38 [2] : vector<8x8x8xf32> to vector<8x8xf32>
    %116 = vector.shape_cast %115 : vector<8x8xf32> to vector<8x8x1xf32>
    %117 = tpu.reciprocal %116 {approx = true} : vector<8x8x1xf32> -> vector<8x8x1xf32>
    %118 = vector.broadcast %117 : vector<8x8x1xf32> to vector<8x8x8xf32>
    %119 = arith.mulf %114, %118 : vector<8x8x8xf32>
    %120 = arith.truncf %119 : vector<8x8x8xf32> to vector<8x8x8xbf16>
    %cst_39 = arith.constant dense<0.000000e+00> : vector<8x8x64xf32>
    %121 = tpu.matmul %120, %108, %cst_39 {dimension_numbers = #tpu.dot_dimension_numbers<[2], [1], [1], [2], [0, 0, 0, 1, 1, 2], [0], [0]>} : vector<8x8x8xbf16>, vector<8x8x64xbf16>, vector<8x8x64xf32> -> vector<8x8x64xf32>
    %122 = vector.shape_cast %121 : vector<8x8x64xf32> to vector<64x64xf32>
    %123 = arith.truncf %122 : vector<64x64xf32> to vector<64x64xbf16>
    %c4 = arith.constant 4 : index
    %c0_40 = arith.constant 0 : index
    %c0_41 = arith.constant 0 : index
    %124 = vector.load %arg4[%c4, %c0_40, %c0_41] : memref<8x64x512xbf16, #tpu.memory_space<vmem>>, vector<1x64x512xbf16>
    %125 = vector.shape_cast %124 : vector<1x64x512xbf16> to vector<64x512xbf16>
    %cst_42 = arith.constant dense<0.000000e+00> : vector<64x512xf32>
    %126 = tpu.matmul %123, %125, %cst_42 {dimension_numbers = #tpu.dot_dimension_numbers<[1], [0], [0], [1], [0, 0, 1, 1], [], []>} : vector<64x64xbf16>, vector<64x512xbf16>, vector<64x512xf32> -> vector<64x512xf32>
    %127 = arith.addf %105, %126 : vector<64x512xf32>
    %128 = vector.extract_strided_slice %10 {offsets = [0, 0, 320], sizes = [8, 8, 64], strides = [1, 1, 1]} : vector<8x8x512xbf16> to vector<8x8x64xbf16>
    %129 = vector.extract_strided_slice %13 {offsets = [0, 0, 320], sizes = [8, 8, 64], strides = [1, 1, 1]} : vector<8x8x512xbf16> to vector<8x8x64xbf16>
    %130 = vector.extract_strided_slice %16 {offsets = [0, 0, 320], sizes = [8, 8, 64], strides = [1, 1, 1]} : vector<8x8x512xbf16> to vector<8x8x64xbf16>
    %cst_43 = arith.constant dense<0.000000e+00> : vector<8x8x8xf32>
    %131 = tpu.matmul %128, %129, %cst_43 {dimension_numbers = #tpu.dot_dimension_numbers<[2], [2], [1], [1], [0, 0, 0, 1, 1, 1], [0], [0]>} : vector<8x8x64xbf16>, vector<8x8x64xbf16>, vector<8x8x8xf32> -> vector<8x8x8xf32>
    %cst_44 = arith.constant dense<0xFF800000> : vector<8x8xf32>
    %132 = vector.multi_reduction <maximumf>, %131, %cst_44 [2] : vector<8x8x8xf32> to vector<8x8xf32>
    %133 = vector.shape_cast %132 : vector<8x8xf32> to vector<8x8x1xf32>
    %134 = vector.broadcast %133 : vector<8x8x1xf32> to vector<8x8x8xf32>
    %135 = arith.subf %131, %134 : vector<8x8x8xf32>
    %136 = math.exp %135 : vector<8x8x8xf32>
    %cst_45 = arith.constant dense<0.000000e+00> : vector<8x8xf32>
    %137 = vector.multi_reduction <add>, %136, %cst_45 [2] : vector<8x8x8xf32> to vector<8x8xf32>
    %138 = vector.shape_cast %137 : vector<8x8xf32> to vector<8x8x1xf32>
    %139 = tpu.reciprocal %138 {approx = true} : vector<8x8x1xf32> -> vector<8x8x1xf32>
    %140 = vector.broadcast %139 : vector<8x8x1xf32> to vector<8x8x8xf32>
    %141 = arith.mulf %136, %140 : vector<8x8x8xf32>
    %142 = arith.truncf %141 : vector<8x8x8xf32> to vector<8x8x8xbf16>
    %cst_46 = arith.constant dense<0.000000e+00> : vector<8x8x64xf32>
    %143 = tpu.matmul %142, %130, %cst_46 {dimension_numbers = #tpu.dot_dimension_numbers<[2], [1], [1], [2], [0, 0, 0, 1, 1, 2], [0], [0]>} : vector<8x8x8xbf16>, vector<8x8x64xbf16>, vector<8x8x64xf32> -> vector<8x8x64xf32>
    %144 = vector.shape_cast %143 : vector<8x8x64xf32> to vector<64x64xf32>
    %145 = arith.truncf %144 : vector<64x64xf32> to vector<64x64xbf16>
    %c5 = arith.constant 5 : index
    %c0_47 = arith.constant 0 : index
    %c0_48 = arith.constant 0 : index
    %146 = vector.load %arg4[%c5, %c0_47, %c0_48] : memref<8x64x512xbf16, #tpu.memory_space<vmem>>, vector<1x64x512xbf16>
    %147 = vector.shape_cast %146 : vector<1x64x512xbf16> to vector<64x512xbf16>
    %cst_49 = arith.constant dense<0.000000e+00> : vector<64x512xf32>
    %148 = tpu.matmul %145, %147, %cst_49 {dimension_numbers = #tpu.dot_dimension_numbers<[1], [0], [0], [1], [0, 0, 1, 1], [], []>} : vector<64x64xbf16>, vector<64x512xbf16>, vector<64x512xf32> -> vector<64x512xf32>
    %149 = arith.addf %127, %148 : vector<64x512xf32>
    %150 = vector.extract_strided_slice %10 {offsets = [0, 0, 384], sizes = [8, 8, 64], strides = [1, 1, 1]} : vector<8x8x512xbf16> to vector<8x8x64xbf16>
    %151 = vector.extract_strided_slice %13 {offsets = [0, 0, 384], sizes = [8, 8, 64], strides = [1, 1, 1]} : vector<8x8x512xbf16> to vector<8x8x64xbf16>
    %152 = vector.extract_strided_slice %16 {offsets = [0, 0, 384], sizes = [8, 8, 64], strides = [1, 1, 1]} : vector<8x8x512xbf16> to vector<8x8x64xbf16>
    %cst_50 = arith.constant dense<0.000000e+00> : vector<8x8x8xf32>
    %153 = tpu.matmul %150, %151, %cst_50 {dimension_numbers = #tpu.dot_dimension_numbers<[2], [2], [1], [1], [0, 0, 0, 1, 1, 1], [0], [0]>} : vector<8x8x64xbf16>, vector<8x8x64xbf16>, vector<8x8x8xf32> -> vector<8x8x8xf32>
    %cst_51 = arith.constant dense<0xFF800000> : vector<8x8xf32>
    %154 = vector.multi_reduction <maximumf>, %153, %cst_51 [2] : vector<8x8x8xf32> to vector<8x8xf32>
    %155 = vector.shape_cast %154 : vector<8x8xf32> to vector<8x8x1xf32>
    %156 = vector.broadcast %155 : vector<8x8x1xf32> to vector<8x8x8xf32>
    %157 = arith.subf %153, %156 : vector<8x8x8xf32>
    %158 = math.exp %157 : vector<8x8x8xf32>
    %cst_52 = arith.constant dense<0.000000e+00> : vector<8x8xf32>
    %159 = vector.multi_reduction <add>, %158, %cst_52 [2] : vector<8x8x8xf32> to vector<8x8xf32>
    %160 = vector.shape_cast %159 : vector<8x8xf32> to vector<8x8x1xf32>
    %161 = tpu.reciprocal %160 {approx = true} : vector<8x8x1xf32> -> vector<8x8x1xf32>
    %162 = vector.broadcast %161 : vector<8x8x1xf32> to vector<8x8x8xf32>
    %163 = arith.mulf %158, %162 : vector<8x8x8xf32>
    %164 = arith.truncf %163 : vector<8x8x8xf32> to vector<8x8x8xbf16>
    %cst_53 = arith.constant dense<0.000000e+00> : vector<8x8x64xf32>
    %165 = tpu.matmul %164, %152, %cst_53 {dimension_numbers = #tpu.dot_dimension_numbers<[2], [1], [1], [2], [0, 0, 0, 1, 1, 2], [0], [0]>} : vector<8x8x8xbf16>, vector<8x8x64xbf16>, vector<8x8x64xf32> -> vector<8x8x64xf32>
    %166 = vector.shape_cast %165 : vector<8x8x64xf32> to vector<64x64xf32>
    %167 = arith.truncf %166 : vector<64x64xf32> to vector<64x64xbf16>
    %c6 = arith.constant 6 : index
    %c0_54 = arith.constant 0 : index
    %c0_55 = arith.constant 0 : index
    %168 = vector.load %arg4[%c6, %c0_54, %c0_55] : memref<8x64x512xbf16, #tpu.memory_space<vmem>>, vector<1x64x512xbf16>
    %169 = vector.shape_cast %168 : vector<1x64x512xbf16> to vector<64x512xbf16>
    %cst_56 = arith.constant dense<0.000000e+00> : vector<64x512xf32>
    %170 = tpu.matmul %167, %169, %cst_56 {dimension_numbers = #tpu.dot_dimension_numbers<[1], [0], [0], [1], [0, 0, 1, 1], [], []>} : vector<64x64xbf16>, vector<64x512xbf16>, vector<64x512xf32> -> vector<64x512xf32>
    %171 = arith.addf %149, %170 : vector<64x512xf32>
    %172 = vector.extract_strided_slice %10 {offsets = [0, 0, 448], sizes = [8, 8, 64], strides = [1, 1, 1]} : vector<8x8x512xbf16> to vector<8x8x64xbf16>
    %173 = vector.extract_strided_slice %13 {offsets = [0, 0, 448], sizes = [8, 8, 64], strides = [1, 1, 1]} : vector<8x8x512xbf16> to vector<8x8x64xbf16>
    %174 = vector.extract_strided_slice %16 {offsets = [0, 0, 448], sizes = [8, 8, 64], strides = [1, 1, 1]} : vector<8x8x512xbf16> to vector<8x8x64xbf16>
    %cst_57 = arith.constant dense<0.000000e+00> : vector<8x8x8xf32>
    %175 = tpu.matmul %172, %173, %cst_57 {dimension_numbers = #tpu.dot_dimension_numbers<[2], [2], [1], [1], [0, 0, 0, 1, 1, 1], [0], [0]>} : vector<8x8x64xbf16>, vector<8x8x64xbf16>, vector<8x8x8xf32> -> vector<8x8x8xf32>
    %cst_58 = arith.constant dense<0xFF800000> : vector<8x8xf32>
    %176 = vector.multi_reduction <maximumf>, %175, %cst_58 [2] : vector<8x8x8xf32> to vector<8x8xf32>
    %177 = vector.shape_cast %176 : vector<8x8xf32> to vector<8x8x1xf32>
    %178 = vector.broadcast %177 : vector<8x8x1xf32> to vector<8x8x8xf32>
    %179 = arith.subf %175, %178 : vector<8x8x8xf32>
    %180 = math.exp %179 : vector<8x8x8xf32>
    %cst_59 = arith.constant dense<0.000000e+00> : vector<8x8xf32>
    %181 = vector.multi_reduction <add>, %180, %cst_59 [2] : vector<8x8x8xf32> to vector<8x8xf32>
    %182 = vector.shape_cast %181 : vector<8x8xf32> to vector<8x8x1xf32>
    %183 = tpu.reciprocal %182 {approx = true} : vector<8x8x1xf32> -> vector<8x8x1xf32>
    %184 = vector.broadcast %183 : vector<8x8x1xf32> to vector<8x8x8xf32>
    %185 = arith.mulf %180, %184 : vector<8x8x8xf32>
    %186 = arith.truncf %185 : vector<8x8x8xf32> to vector<8x8x8xbf16>
    %cst_60 = arith.constant dense<0.000000e+00> : vector<8x8x64xf32>
    %187 = tpu.matmul %186, %174, %cst_60 {dimension_numbers = #tpu.dot_dimension_numbers<[2], [1], [1], [2], [0, 0, 0, 1, 1, 2], [0], [0]>} : vector<8x8x8xbf16>, vector<8x8x64xbf16>, vector<8x8x64xf32> -> vector<8x8x64xf32>
    %188 = vector.shape_cast %187 : vector<8x8x64xf32> to vector<64x64xf32>
    %189 = arith.truncf %188 : vector<64x64xf32> to vector<64x64xbf16>
    %c7 = arith.constant 7 : index
    %c0_61 = arith.constant 0 : index
    %c0_62 = arith.constant 0 : index
    %190 = vector.load %arg4[%c7, %c0_61, %c0_62] : memref<8x64x512xbf16, #tpu.memory_space<vmem>>, vector<1x64x512xbf16>
    %191 = vector.shape_cast %190 : vector<1x64x512xbf16> to vector<64x512xbf16>
    %cst_63 = arith.constant dense<0.000000e+00> : vector<64x512xf32>
    %192 = tpu.matmul %189, %191, %cst_63 {dimension_numbers = #tpu.dot_dimension_numbers<[1], [0], [0], [1], [0, 0, 1, 1], [], []>} : vector<64x64xbf16>, vector<64x512xbf16>, vector<64x512xf32> -> vector<64x512xf32>
    %193 = arith.addf %171, %192 : vector<64x512xf32>
    %c0_64 = arith.constant 0 : index
    %c0_65 = arith.constant 0 : index
    %194 = vector.load %arg5[%c0_64, %c0_65] : memref<1x512xf32, #tpu.memory_space<vmem>>, vector<1x512xf32>
    %195 = vector.broadcast %194 : vector<1x512xf32> to vector<64x512xf32>
    %196 = arith.addf %193, %195 : vector<64x512xf32>
    %197 = vector.shape_cast %196 : vector<64x512xf32> to vector<8x8x512xf32>
    %c0_66 = arith.constant 0 : index
    %c0_67 = arith.constant 0 : index
    %c0_68 = arith.constant 0 : index
    %198 = vector.load %arg6[%c0_66, %c0_67, %c0_68] : memref<8x8x512xf32, #tpu.memory_space<vmem>>, vector<8x8x512xf32>
    tpu.vector_store %arg6[%c0_66, %c0_67, %c0_68], %197 {strides = array<i32>} : memref<8x8x512xf32, #tpu.memory_space<vmem>>, vector<8x8x512xf32>,
    return
  }
  func.func @transform_0(%arg0: i32) -> (i32, i32, i32) {
    %c0_i32 = arith.constant 0 : i32
    %c0_i32_0 = arith.constant 0 : i32
    %c0_i32_1 = arith.constant 0 : i32
    return %arg0, %c0_i32, %c0_i32_0 : i32, i32, i32
  }
  func.func @transform_1(%arg0: i32) -> (i32, i32) {
    %c0_i32 = arith.constant 0 : i32
    %c0_i32_0 = arith.constant 0 : i32
    %c0_i32_1 = arith.constant 0 : i32
    return %c0_i32, %c0_i32_0 : i32, i32
  }
  func.func @transform_2(%arg0: i32) -> (i32, i32) {
    %c0_i32 = arith.constant 0 : i32
    %c0_i32_0 = arith.constant 0 : i32
    %c0_i32_1 = arith.constant 0 : i32
    return %c0_i32, %c0_i32_0 : i32, i32
  }
  func.func @transform_3(%arg0: i32) -> (i32, i32, i32) {
    %c0_i32 = arith.constant 0 : i32
    %c0_i32_0 = arith.constant 0 : i32
    %c0_i32_1 = arith.constant 0 : i32
    %c0_i32_2 = arith.constant 0 : i32
    return %c0_i32, %c0_i32_0, %c0_i32_1 : i32, i32, i32
  }
  func.func @transform_4(%arg0: i32) -> (i32, i32) {
    %c0_i32 = arith.constant 0 : i32
    %c0_i32_0 = arith.constant 0 : i32
    %c0_i32_1 = arith.constant 0 : i32
    return %c0_i32, %c0_i32_0 : i32, i32
  }
  func.func @transform_5(%arg0: i32) -> (i32, i32, i32) {
    %c0_i32 = arith.constant 0 : i32
    %c0_i32_0 = arith.constant 0 : i32
    %c0_i32_1 = arith.constant 0 : i32
    return %arg0, %c0_i32, %c0_i32_0 : i32, i32, i32
  }
}

</mosaic_0001>

<bundles_post_ra>
// kernel: tpu_custom_call.1
= control target key start
LH: loop header
LB: loop body
LE: loop exit
PB: predicated region body
PF: predicated region fallthrough
CT: control target
= control target key end

     0   :  { %10 = vsyncpa [#allocation3], 0  ;;  %s18542_s0 = inlined_call_operand.hbm [shape: f32[8,8,512], index: 0, kind: input, shape index: {}]   ;;  %s18543_s1 = inlined_call_operand.hbm [shape: bf16[512,1536], index: 1, kind: input, shape index: {}]   ;;  %s18544_s2 = inlined_call_operand.hbm [shape: f32[1,1536], index: 2, kind: input, shape index: {}]   ;;  %s18545_s3 = inlined_call_operand.hbm [shape: bf16[8,64,512], index: 3, kind: input, shape index: {}]   ;;  %s18546_s4 = inlined_call_operand.hbm [shape: f32[1,512], index: 4, kind: input, shape index: {}]   ;;  %s18547_s5 = inlined_call_operand.hbm [shape: f32[8,8,512], index: 5, kind: output, shape index: {}]  }
   0x1   :  { %11 = vsyncpa [#allocation6], 0 }
   0x2   :  { %12 = vsyncpa [#allocation9], 0 }
   0x3   :  { %13 = vsyncpa [#allocation4], 0  ;;  %s16116_s18 = smov [#allocation5]   ;;  %s15976_s22 = scalar_lea.hbm %s18543_s1, 49152 }
   0x4   :  { %s31_s19 = sshll.u32 %s16116_s18, 4  ;;  %p15977_p0 = scmp.ne.s32.totalorder %s18543_s1, %s15976_s22  ;;  %s32_s19 = int_to_ptr.vmem [resolvable:$true] %s31_s19 }
   0x5   :  { %p15980_p1 = scmp.lt.u32.totalorder %s15976_s22, %s18543_s1 }
   0x7   :  { %p15982_p2 = pnand %p15980_p1, %p15977_p0 }
   0x9   :  { %15985 = shalt.err (!%p15982_p2)
}
   0xa   :  { %s15986_s27 = scalar_lea.vmem %s32_s19, 49152  ;;  %p15991_p4 = scmp.lt.s32.totalorder %s32_s19, %s32_s19 }
   0xb   :  { %p15987_p3 = scmp.ne.s32.totalorder %s32_s19, %s15986_s27  ;;  %p15992_p5 = scmp.lt.s32.totalorder %s15986_s27, %s15986_s27 }
   0xd   :  { %p15993_p6 = por %p15992_p5, %p15991_p4 }
   0xf   :  { %p15994_p7 = pnand %p15993_p6, %p15987_p3 }
  0x11   :  { %15997 = shalt.err (!%p15994_p7)
}
  0x12   :  { %s16117_s28 = smov 768   ;;  %s16118_s29 = smov 48  }
  0x13   :  { %37 = dma.hbm_to_vmem [thread:$0]  %s18543_s1, 49152, %s32_s19, [#allocation6], %s16117_s28, %s16117_s28, %s16118_s29  }
  0x14   :  { %s16119_s7 = smov [#allocation8]   ;;  %s15998_s11 = scalar_lea.hbm %s18545_s3, 16384 }
  0x15   :  { %s53_s8 = sshll.u32 %s16119_s7, 4  ;;  %p15999_p8 = scmp.ne.s32.totalorder %s18545_s3, %s15998_s11  ;;  %s54_s8 = int_to_ptr.vmem [resolvable:$true] %s53_s8 }
  0x16   :  { %p16002_p9 = scmp.lt.u32.totalorder %s15998_s11, %s18545_s3 }
  0x18   :  { %p16004_p10 = pnand %p16002_p9, %p15999_p8 }
  0x1a   :  { %16007 = shalt.err (!%p16004_p10)
}
  0x1b   :  { %s16008_s16 = scalar_lea.vmem %s54_s8, 16384  ;;  %p16013_p12 = scmp.lt.s32.totalorder %s54_s8, %s54_s8 }
  0x1c   :  { %p16009_p11 = scmp.ne.s32.totalorder %s54_s8, %s16008_s16  ;;  %p16014_p13 = scmp.lt.s32.totalorder %s16008_s16, %s16008_s16 }
  0x1e   :  { %p16015_p0 = por %p16014_p13, %p16013_p12 }
  0x20   :  { %p16016_p1 = pnand %p16015_p0, %p16009_p11 }
  0x22   :  { %16019 = shalt.err (!%p16016_p1)
}
  0x23   :  { %s16120_s1 = smov 256   ;;  %s16121_s17 = smov 16  }
  0x24   :  { %59 = dma.hbm_to_vmem [thread:$0]  %s18545_s3, 16384, %s54_s8, [#allocation9], %s16120_s1, %s16120_s1, %s16121_s17  }
  0x25   :  { %s16122_s20 = smov [#allocation2]   ;;  %s16020_s24 = scalar_lea.hbm %s18542_s0, 4096 }
  0x26   :  { %s19_s21 = sshll.u32 %s16122_s20, 4  ;;  %p16021_p2 = scmp.ne.s32.totalorder %s18542_s0, %s16020_s24  ;;  %s20_s21 = int_to_ptr.vmem [resolvable:$true] %s19_s21 }
  0x27   :  { %p16024_p3 = scmp.lt.u32.totalorder %s16020_s24, %s18542_s0 }
  0x29   :  { %p16026_p4 = pnand %p16024_p3, %p16021_p2 }
  0x2b   :  { %16029 = shalt.err (!%p16026_p4)
}
  0x2c   :  { %s16030_s29 = scalar_lea.vmem %s20_s21, 4096  ;;  %p16035_p6 = scmp.lt.s32.totalorder %s20_s21, %s20_s21 }
  0x2d   :  { %p16031_p5 = scmp.ne.s32.totalorder %s20_s21, %s16030_s29  ;;  %p16036_p7 = scmp.lt.s32.totalorder %s16030_s29, %s16030_s29 }
  0x2f   :  { %p16037_p8 = por %p16036_p7, %p16035_p6 }
  0x31   :  { %p16038_p9 = pnand %p16037_p8, %p16031_p5 }
  0x33   :  { %16041 = shalt.err (!%p16038_p9)
}
  0x34   :  { %s16123_s3 = smov 512   ;;  %s16124_s30 = smov 32  }
  0x35   :  { %25 = dma.hbm_to_vmem [thread:$0]  %s18542_s0, 4096, %s20_s21, [#allocation3], %s16123_s3, %s16123_s3, %s16124_s30  }
  0x36   :  { %s16125_s8 = smov [#allocation7]   ;;  %s16126_s10 = smov [#allocation10]  }
  0x37   :  { %s44_s9 = sshll.u32 %s16125_s8, 4  ;;  %s66_s11 = sshll.u32 %s16126_s10, 4  ;;  %s45_s9 = int_to_ptr.vmem [resolvable:$true] %s44_s9  ;;  %s67_s11 = int_to_ptr.vmem [resolvable:$true] %s66_s11 }
  0x38   :  { %s16042_s14 = scalar_lea.hbm %s18544_s2, 192 }
  0x39   :  { %p16043_p10 = scmp.ne.s32.totalorder %s18544_s2, %s16042_s14  ;;  %p16046_p11 = scmp.lt.u32.totalorder %s16042_s14, %s18544_s2 }
  0x3b   :  { %p16048_p12 = pnand %p16046_p11, %p16043_p10 }
  0x3d   :  { %16051 = shalt.err (!%p16048_p12)
}
  0x3e   :  { %s16052_s0 = scalar_lea.vmem %s45_s9, 192  ;;  %p16057_p0 = scmp.lt.s32.totalorder %s45_s9, %s45_s9 }
  0x3f   :  { %p16053_p13 = scmp.ne.s32.totalorder %s45_s9, %s16052_s0  ;;  %p16058_p1 = scmp.lt.s32.totalorder %s16052_s0, %s16052_s0 }
  0x41   :  { %p16059_p2 = por %p16058_p1, %p16057_p0 }
  0x43   :  { %p16060_p3 = pnand %p16059_p2, %p16053_p13 }
  0x45   :  { %16063 = shalt.err (!%p16060_p3)
}
  0x46   :  { %47 = dma.hbm_to_vmem [thread:$0]  %s18544_s2, 192, %s45_s9, [#allocation6]  }
  0x47   :  { %s16064_s22 = scalar_lea.hbm %s18546_s4, 64 }
  0x48   :  { %p16065_p4 = scmp.ne.s32.totalorder %s18546_s4, %s16064_s22  ;;  %p16068_p5 = scmp.lt.u32.totalorder %s16064_s22, %s18546_s4 }
  0x4a   :  { %p16070_p6 = pnand %p16068_p5, %p16065_p4 }
  0x4c   :  { %16073 = shalt.err (!%p16070_p6)
}
  0x4d   :  { %s16074_s27 = scalar_lea.vmem %s67_s11, 64  ;;  %p16079_p8 = scmp.lt.s32.totalorder %s67_s11, %s67_s11 }
  0x4e   :  { %p16075_p7 = scmp.ne.s32.totalorder %s67_s11, %s16074_s27  ;;  %p16080_p9 = scmp.lt.s32.totalorder %s16074_s27, %s16074_s27 }
  0x50   :  { %p16081_p10 = por %p16080_p9, %p16079_p8 }
  0x52   :  { %p16082_p11 = pnand %p16081_p10, %p16075_p7 }
  0x54   :  { %16085 = shalt.err (!%p16082_p11)
}
  0x55   :  { %69 = dma.hbm_to_vmem [thread:$0]  %s18546_s4, 64, %s67_s11, [#allocation9]  }
  0x56   :  { %16108 = dma.done.wait [#allocation3], 4096  }
  0x57   :  { %16109 = vsyncadd [#allocation3], 4294963200 }
  0x58   :  { %16110 = dma.done.wait [#allocation6], 49344  }
  0x59   :  { %16111 = vsyncadd [#allocation6], 4294917952 }
  0x5a   :  { %16112 = dma.done.wait [#allocation9], 16448  }
  0x5b   :  { %16113 = vsyncadd [#allocation9], 4294950848  ;;  %v14949_v0 = vld [vmem:[#allocation5 + $0x4] ss:$48 sps:$4 sm:$0xff]   ;;  %v14951_v1 = vld [vmem:[#allocation5] ss:$48 sps:$4 sm:$0xff]  }
  0x5c   :  { %2502 = vmatprep.subr.bf16.mxu0 %v14949_v0  ;;  %v14952_v2 = vld [vmem:[#allocation5 + $0x64] ss:$48 sps:$4 sm:$0xff]   ;;  %v14954_v3 = vld [vmem:[#allocation5 + $0x60] ss:$48 sps:$4 sm:$0xff]   ;;  %v14964_v6 = vld [vmem:[#allocation5 + $0xc] ss:$48 sps:$4 sm:$0xff]  }
  0x5d   :  { %2503 = vmatpush1.bf16.msra.mxu0 %v14951_v1  ;;  %v14955_v4 = vld [vmem:[#allocation5 + $0xc4] ss:$48 sps:$4 sm:$0xff]   ;;  %v14957_v5 = vld [vmem:[#allocation5 + $0xc0] ss:$48 sps:$4 sm:$0xff]   ;;  %v14968_v8 = vld [vmem:[#allocation5 + $0x8] ss:$48 sps:$4 sm:$0xff]   ;;  %2648 = vmatprep.subr.bf16.mxu1 %v14964_v6 }
  0x5e   :  { %2504 = vmatprep.subr.bf16.mxu0 %v14952_v2  ;;  %v14958_v7 = vld [vmem:[#allocation5 + $0x124] ss:$48 sps:$4 sm:$0xff]   ;;  %2649 = vmatpush1.bf16.msra.mxu1 %v14968_v8  ;;  %v14970_v9 = vld [vmem:[#allocation5 + $0x6c] ss:$48 sps:$4 sm:$0xff]   ;;  %v14960_v10 = vld [vmem:[#allocation5 + $0x120] ss:$48 sps:$4 sm:$0xff]  }
  0x5f   :  { %v14961_v11 = vld [vmem:[#allocation5 + $0x184] ss:$48 sps:$4 sm:$0xff]   ;;  %v14974_v12 = vld [vmem:[#allocation5 + $0x68] ss:$48 sps:$4 sm:$0xff]   ;;  %2650 = vmatprep.subr.bf16.mxu1 %v14970_v9  ;;  %v14976_v13 = vld [vmem:[#allocation5 + $0xcc] ss:$48 sps:$4 sm:$0xff]  }
  0x60   :  { %v14963_v14 = vld [vmem:[#allocation5 + $0x180] ss:$48 sps:$4 sm:$0xff]   ;;  %v14980_v15 = vld [vmem:[#allocation5 + $0xc8] ss:$48 sps:$4 sm:$0xff]   ;;  %v14982_v16 = vld [vmem:[#allocation5 + $0x12c] ss:$48 sps:$4 sm:$0xff]  }
  0x61   :  { %2505 = vmatpush1.bf16.msra.mxu0 %v14954_v3  ;;  %v14966_v17 = vld [vmem:[#allocation5 + $0x1e4] ss:$48 sps:$4 sm:$0xff]   ;;  %v14986_v18 = vld [vmem:[#allocation5 + $0x128] ss:$48 sps:$4 sm:$0xff]   ;;  %v14969_v19 = vld [vmem:[#allocation5 + $0x1e0] ss:$48 sps:$4 sm:$0xff]  }
  0x62   :  { %2506 = vmatprep.subr.bf16.mxu0 %v14955_v4  ;;  %2651 = vmatpush1.bf16.msra.mxu1 %v14974_v12  ;;  %v14988_v20 = vld [vmem:[#allocation5 + $0x18c] ss:$48 sps:$4 sm:$0xff]   ;;  %v14972_v21 = vld [vmem:[#allocation5 + $0x244] ss:$48 sps:$4 sm:$0xff]   ;;  %v14975_v22 = vld [vmem:[#allocation5 + $0x240] ss:$48 sps:$4 sm:$0xff]  }
  0x63   :  { %2652 = vmatprep.subr.bf16.mxu1 %v14976_v13  ;;  %v14992_v23 = vld [vmem:[#allocation5 + $0x188] ss:$48 sps:$4 sm:$0xff]   ;;  %v14994_v24 = vld [vmem:[#allocation5 + $0x1ec] ss:$48 sps:$4 sm:$0xff]   ;;  %v14978_v25 = vld [vmem:[#allocation5 + $0x2a4] ss:$48 sps:$4 sm:$0xff]  }
  0x64   :  { %v14998_v26 = vld [vmem:[#allocation5 + $0x1e8] ss:$48 sps:$4 sm:$0xff]   ;;  %v14981_v27 = vld [vmem:[#allocation5 + $0x2a0] ss:$48 sps:$4 sm:$0xff]   ;;  %v15000_v28 = vld [vmem:[#allocation5 + $0x24c] ss:$48 sps:$4 sm:$0xff]  }
  0x65   :  { %2507 = vmatpush1.bf16.msra.mxu0 %v14957_v5  ;;  %v14984_v29 = vld [vmem:[#allocation5 + $0x304] ss:$48 sps:$4 sm:$0xff]   ;;  %v14987_v30 = vld [vmem:[#allocation5 + $0x300] ss:$48 sps:$4 sm:$0xff]   ;;  %v15004_v31 = vld [vmem:[#allocation5 + $0x248] ss:$48 sps:$4 sm:$0xff]  }
  0x66   :  { %2508 = vmatprep.subr.bf16.mxu0 %v14958_v7  ;;  %2653 = vmatpush1.bf16.msra.mxu1 %v14980_v15  ;;  %v15006_v32 = vld [vmem:[#allocation5 + $0x2ac] ss:$48 sps:$4 sm:$0xff]   ;;  %v14990_v33 = vld [vmem:[#allocation5 + $0x364] ss:$48 sps:$4 sm:$0xff]   ;;  %v15010_v34 = vld [vmem:[#allocation5 + $0x2a8] ss:$48 sps:$4 sm:$0xff]  }
  0x67   :  { %2654 = vmatprep.subr.bf16.mxu1 %v14982_v16  ;;  %v14993_v35 = vld [vmem:[#allocation5 + $0x360] ss:$48 sps:$4 sm:$0xff]   ;;  %v15012_v36 = vld [vmem:[#allocation5 + $0x30c] ss:$48 sps:$4 sm:$0xff]   ;;  %v14996_v37 = vld [vmem:[#allocation5 + $0x3c4] ss:$48 sps:$4 sm:$0xff]  }
  0x68   :  { %v87_v38 = vld [vmem:[#allocation2 + $0x8] sm:$0xff]  ;;  %v14999_v42 = vld [vmem:[#allocation5 + $0x3c0] ss:$48 sps:$4 sm:$0xff]   ;;  %v15002_v44 = vld [vmem:[#allocation5 + $0x424] ss:$48 sps:$4 sm:$0xff]   ;;  %vm16128_vm0 = vmmov 0  }
  0x69   :  { %2509 = vmatpush1.bf16.msra.mxu0 %v14960_v10  ;;  %v91_v39 = vld [vmem:[#allocation2 + $0x28] sm:$0xff]  ;;  %v15005_v45 = vld [vmem:[#allocation5 + $0x420] ss:$48 sps:$4 sm:$0xff]   ;;  %v15008_v48 = vld [vmem:[#allocation5 + $0x484] ss:$48 sps:$4 sm:$0xff]   ;;  %vm3474_vm1 = vcmask 523264  }
  0x6a   :  { %2510 = vmatprep.subr.bf16.mxu0 %v14961_v11  ;;  %2655 = vmatpush1.bf16.msra.mxu1 %v14986_v18  ;;  %v15016_v40 = vld [vmem:[#allocation5 + $0x308] ss:$48 sps:$4 sm:$0xff]   ;;  %v16225_v41 = vpack.c.bf16 %v91_v39, %v87_v38  ;;  %v15018_v43 = vld [vmem:[#allocation5 + $0x36c] ss:$48 sps:$4 sm:$0xff]   ;;  %v15011_v50 = vld [vmem:[#allocation5 + $0x480] ss:$48 sps:$4 sm:$0xff]  }
  0x6b   :  { %2656 = vmatprep.subr.bf16.mxu1 %v14988_v20  ;;  %v15022_v46 = vld [vmem:[#allocation5 + $0x368] ss:$48 sps:$4 sm:$0xff]   ;;  %v15024_v47 = vld [vmem:[#allocation5 + $0x3cc] ss:$48 sps:$4 sm:$0xff]   ;;  %v15014_v52 = vld [vmem:[#allocation5 + $0x4e4] ss:$48 sps:$4 sm:$0xff]  }
  0x6c   :  { %2534 = vmatprep.mubr.bf16.mxu0 %v16225_v41  ;;  %2680 = vmatprep.mubr.bf16.mxu1 %v16225_v41  ;;  %v15028_v49 = vld [vmem:[#allocation5 + $0x3c8] ss:$48 sps:$4 sm:$0xff]   ;;  %v15030_v51 = vld [vmem:[#allocation5 + $0x42c] ss:$48 sps:$4 sm:$0xff]   ;;  %v15017_v54 = vld [vmem:[#allocation5 + $0x4e0] ss:$48 sps:$4 sm:$0xff]  }
  0x6d   :  { %2511 = vmatpush1.bf16.msra.mxu0 %v14963_v14  ;;  %v15035_v53 = vld [vmem:[#allocation5 + $0x428] ss:$48 sps:$4 sm:$0xff]   ;;  %v15036_v55 = vld [vmem:[#allocation5 + $0x48c] ss:$48 sps:$4 sm:$0xff]   ;;  %v15020_v56 = vld [vmem:[#allocation5 + $0x544] ss:$48 sps:$4 sm:$0xff]  }
  0x6e   :  { %2512 = vmatprep.subr.bf16.mxu0 %v14966_v17  ;;  %2657 = vmatpush1.bf16.msra.mxu1 %v14992_v23  ;;  %v15041_v57 = vld [vmem:[#allocation5 + $0x488] ss:$48 sps:$4 sm:$0xff]   ;;  %v15023_v58 = vld [vmem:[#allocation5 + $0x540] ss:$48 sps:$4 sm:$0xff]   ;;  %v15042_v59 = vld [vmem:[#allocation5 + $0x4ec] ss:$48 sps:$4 sm:$0xff]  }
  0x6f   :  { %2658 = vmatprep.subr.bf16.mxu1 %v14994_v24  ;;  %v15026_v60 = vld [vmem:[#allocation5 + $0x5a4] ss:$48 sps:$4 sm:$0xff]   ;;  %v15029_v61 = vld [vmem:[#allocation5 + $0x5a0] ss:$48 sps:$4 sm:$0xff]   ;;  %v15047_v63 = vld [vmem:[#allocation5 + $0x4e8] ss:$48 sps:$4 sm:$0xff]  }
  0x70   :  { %v86_v62 = vld [vmem:[#allocation2] sm:$0xff]  ;;  %v15048_v1 = vld [vmem:[#allocation5 + $0x54c] ss:$48 sps:$4 sm:$0xff]   ;;  %v15053_v5 = vld [vmem:[#allocation5 + $0x548] ss:$48 sps:$4 sm:$0xff]   ;;  %vm3943_vm2 = vcmask 1043456  }
  0x71   :  { %2513 = vmatpush1.bf16.msra.mxu0 %v14969_v19  ;;  %v90_v0 = vld [vmem:[#allocation2 + $0x20] sm:$0xff]  ;;  %v15054_v7 = vld [vmem:[#allocation5 + $0x5ac] ss:$48 sps:$4 sm:$0xff]   ;;  %v15059_v12 = vld [vmem:[#allocation5 + $0x5a8] ss:$48 sps:$4 sm:$0xff]   ;;  %vm3843_vm3 = vcmask 64512  }
  0x72   :  { %2514 = vmatprep.subr.bf16.mxu0 %v14972_v21  ;;  %2659 = vmatpush1.bf16.msra.mxu1 %v14998_v26  ;;  %v15034_v2 = vld [vmem:[#allocation5 + $0x604] ss:$48 sps:$4 sm:$0xff]   ;;  %v15032_v3 = vld [vmem:[#allocation5 + $0x600] ss:$48 sps:$4 sm:$0xff]   ;;  %v16229_v4 = vpack.c.bf16 %v90_v0, %v86_v62  ;;  %v95_v8 = vld [vmem:[#allocation2 + $0x48] sm:$0xff]  ;;  %s16129_s4 = smov 64  }
  0x73   :  { %2660 = vmatprep.subr.bf16.mxu1 %v15000_v28  ;;  %v15040_v6 = vld [vmem:[#allocation5 + $0x664] ss:$48 sps:$4 sm:$0xff]   ;;  %v99_v9 = vld [vmem:[#allocation2 + $0x68] sm:$0xff]  ;;  %v15038_v10 = vld [vmem:[#allocation5 + $0x660] ss:$48 sps:$4 sm:$0xff]   ;;  %s16131_s29 = smov [#allocation11]  }
  0x74   :  { %v16231_v11 = vpack.c.bf16 %v99_v9, %v95_v8  ;;  %v15062_v13 = vld [vmem:[#allocation5 + $0x60c] ss:$48 sps:$4 sm:$0xff]   ;;  %v94_v14 = vld [vmem:[#allocation2 + $0x40] sm:$0xff]  ;;  %v15060_v18 = vld [vmem:[#allocation5 + $0x608] ss:$48 sps:$4 sm:$0xff]   ;;  %s12775_s6 = sshll.u32 %s16131_s29, 4  ;;  %s12776_s6 = int_to_ptr.vmem [resolvable:$true] %s12775_s6 }
  0x75   :  { %2515 = vmatpush1.bf16.msra.mxu0 %v14975_v22  ;;  %v98_v15 = vld [vmem:[#allocation2 + $0x60] sm:$0xff]  ;;  %v15068_v19 = vld [vmem:[#allocation5 + $0x66c] ss:$48 sps:$4 sm:$0xff]   ;;  %v15066_v26 = vld [vmem:[#allocation5 + $0x668] ss:$48 sps:$4 sm:$0xff]   ;;  %s16086_s7 = scalar_lea.vmem %s12776_s6, 4096  ;;  %p16091_p13 = scmp.lt.s32.totalorder %s12776_s6, %s12776_s6 }
  0x76   :  { %2516 = vmatprep.subr.bf16.mxu0 %v14978_v25  ;;  %2661 = vmatpush1.bf16.msra.mxu1 %v15004_v31  ;;  %v15046_v16 = vld [vmem:[#allocation5 + $0x6c4] ss:$48 sps:$4 sm:$0xff]   ;;  %v15044_v17 = vld [vmem:[#allocation5 + $0x6c0] ss:$48 sps:$4 sm:$0xff]   ;;  %v16235_v20 = vpack.c.bf16 %v98_v15, %v94_v14  ;;  %v103_v21 = vld [vmem:[#allocation2 + $0x88] sm:$0xff]  ;;  %p16087_p12 = scmp.ne.s32.totalorder %s12776_s6, %s16086_s7  ;;  %p16092_p0 = scmp.lt.s32.totalorder %s16086_s7, %s16086_s7 }
  0x77   :  { %2662 = vmatprep.subr.bf16.mxu1 %v15006_v32  ;;  %v107_v22 = vld [vmem:[#allocation2 + $0xa8] sm:$0xff]  ;;  %v15052_v23 = vld [vmem:[#allocation5 + $0x724] ss:$48 sps:$4 sm:$0xff]   ;;  %v15050_v25 = vld [vmem:[#allocation5 + $0x720] ss:$48 sps:$4 sm:$0xff]  }
  0x78   :  { %v16237_v24 = vpack.c.bf16 %v107_v22, %v103_v21  ;;  %v102_v28 = vld [vmem:[#allocation2 + $0x80] sm:$0xff]  ;;  %v111_v31 = vld [vmem:[#allocation2 + $0xc8] sm:$0xff]  ;;  %p16093_p1 = por %p16092_p0, %p16091_p13 }
  0x79   :  { %2517 = vmatpush1.bf16.msra.mxu0 %v14981_v27  ;;  %v15074_v27 = vld [vmem:[#allocation5 + $0x6cc] ss:$48 sps:$4 sm:$0xff]   ;;  %v15063_v39 = vld [vmem:[#allocation5 + $0x7e0] ss:$48 sps:$4 sm:$0xff]   ;;  %v15102_v62 = vld [vmem:[#allocation5 + $0x8a8] ss:$48 sps:$4 sm:$0xff]  }
  0x7a   :  { %2518 = vmatprep.subr.bf16.mxu0 %v14984_v29  ;;  %2663 = vmatpush1.bf16.msra.mxu1 %v15010_v34  ;;  %v106_v29 = vld [vmem:[#allocation2 + $0xa0] sm:$0xff]  ;;  %v115_v32 = vld [vmem:[#allocation2 + $0xe8] sm:$0xff]  ;;  %p16094_p2 = pnand %p16093_p1, %p16087_p12 }
  0x7b   :  { %2664 = vmatprep.subr.bf16.mxu1 %v15012_v36  ;;  %v16243_v34 = vpack.c.bf16 %v106_v29, %v102_v28  ;;  %v15080_v36 = vld [vmem:[#allocation5 + $0x72c] ss:$48 sps:$4 sm:$0xff]   ;;  %v16245_v38 = vpack.c.bf16 %v115_v32, %v111_v31  ;;  %v15099_v8 = vld [vmem:[#allocation5 + $0xa20] ss:$48 sps:$4 sm:$0xff]   ;;  %v15113_v15 = vld [vmem:[#allocation5 + $0xae4] ss:$48 sps:$4 sm:$0xff]  }
  0x7c   :  { %v15110_v0 = vld [vmem:[#allocation5 + $0x90c] ss:$48 sps:$4 sm:$0xff]   ;;  %v15132_v21 = vld [vmem:[#allocation5 + $0xa88] ss:$48 sps:$4 sm:$0xff]   ;;  %v15117_v22 = vld [vmem:[#allocation5 + $0xb40] ss:$48 sps:$4 sm:$0xff]  }
  0x7d   :  { %2519 = vmatpush1.bf16.msra.mxu0 %v14987_v30  ;;  %v15058_v30 = vld [vmem:[#allocation5 + $0x784] ss:$48 sps:$4 sm:$0xff]   ;;  %v15122_v9 = vld [vmem:[#allocation5 + $0x9cc] ss:$48 sps:$4 sm:$0xff]  }
  0x7e   :  { %2520 = vmatprep.subr.bf16.mxu0 %v14990_v33  ;;  %2665 = vmatpush1.bf16.msra.mxu1 %v15016_v40  ;;  %v15072_v33 = vld [vmem:[#allocation5 + $0x6c8] ss:$48 sps:$4 sm:$0xff]   ;;  %v15128_v14 = vld [vmem:[#allocation5 + $0xa2c] ss:$48 sps:$4 sm:$0xff]   ;;  %v92_v28 = vld [vmem:[#allocation2 + $0x30] sm:$0xff] }
  0x7f   :  { %2666 = vmatprep.subr.bf16.mxu1 %v15018_v43  ;;  %v15078_v40 = vld [vmem:[#allocation5 + $0x728] ss:$48 sps:$4 sm:$0xff]   ;;  %v110_v43 = vld [vmem:[#allocation2 + $0xc0] sm:$0xff]  ;;  %v15146_v32 = vld [vmem:[#allocation5 + $0xb4c] ss:$48 sps:$4 sm:$0xff]  }
  0x80   :  { %v15131_v29 = vld [vmem:[#allocation5 + $0x14] ss:$48 sps:$4 sm:$0xff]   ;;  %v97_v31 = vld [vmem:[#allocation2 + $0x58] sm:$0xff] }
  0x81   :  { %2521 = vmatpush1.bf16.msra.mxu0 %v14993_v35  ;;  %v15056_v35 = vld [vmem:[#allocation5 + $0x780] ss:$48 sps:$4 sm:$0xff]  }
  0x82   :  { %2522 = vmatprep.subr.bf16.mxu0 %v14996_v37  ;;  %2667 = vmatpush1.bf16.msra.mxu1 %v15022_v46  ;;  %v15065_v37 = vld [vmem:[#allocation5 + $0x7e4] ss:$48 sps:$4 sm:$0xff]   ;;  %v89_v46 = vld [vmem:[#allocation2 + $0x18] sm:$0xff] }
  0x83   :  { %2668 = vmatprep.subr.bf16.mxu1 %v15024_v47  ;;  %v93_v47 = vld [vmem:[#allocation2 + $0x38] sm:$0xff] }
  0x85   :  { %2523 = vmatpush1.bf16.msra.mxu0 %v14999_v42  ;;  %v15086_v42 = vld [vmem:[#allocation5 + $0x78c] ss:$48 sps:$4 sm:$0xff]  }
  0x86   :  { %2524 = vmatprep.subr.bf16.mxu0 %v15002_v44  ;;  %2669 = vmatpush1.bf16.msra.mxu1 %v15028_v49  ;;  %v114_v44 = vld [vmem:[#allocation2 + $0xe0] sm:$0xff] }
  0x87   :  { %2670 = vmatprep.subr.bf16.mxu1 %v15030_v51  ;;  %v16251_v49 = vpack.c.bf16 %v114_v44, %v110_v43  ;;  %v15092_v51 = vld [vmem:[#allocation5 + $0x7ec] ss:$48 sps:$4 sm:$0xff]   ;;  %v15135_v43 = vld [vmem:[#allocation5 + $0x70] ss:$48 sps:$4 sm:$0xff]  }
  0x88   :  { %v96_v44 = vld [vmem:[#allocation2 + $0x50] sm:$0xff] }
  0x89   :  { %2525 = vmatpush1.bf16.msra.mxu0 %v15005_v45  ;;  %v15071_v45 = vld [vmem:[#allocation5 + $0x844] ss:$48 sps:$4 sm:$0xff]  }
  0x8a   :  { %2526 = vmatprep.subr.bf16.mxu0 %v15008_v48  ;;  %2671 = vmatpush1.bf16.msra.mxu1 %v15035_v53  ;;  %v15084_v48 = vld [vmem:[#allocation5 + $0x788] ss:$48 sps:$4 sm:$0xff]   ;;  %v16253_v53 = vpack.c.bf16 %v93_v47, %v89_v46  ;;  %v15143_v46 = vld [vmem:[#allocation5 + $0xd4] ss:$48 sps:$4 sm:$0xff]  }
  0x8b   :  { %2672 = vmatprep.subr.bf16.mxu1 %v15036_v55  ;;  %v15090_v55 = vld [vmem:[#allocation5 + $0x7e8] ss:$48 sps:$4 sm:$0xff]  }
  0x8c   :  { %v15150_v47 = vld [vmem:[#allocation5 + $0xba8] ss:$48 sps:$4 sm:$0xff]  }
  0x8d   :  { %2527 = vmatpush1.bf16.msra.mxu0 %v15011_v50  ;;  %v15069_v50 = vld [vmem:[#allocation5 + $0x840] ss:$48 sps:$4 sm:$0xff]  }
  0x8e   :  { %2528 = vmatprep.subr.bf16.mxu0 %v15014_v52  ;;  %2673 = vmatpush1.bf16.msra.mxu1 %v15041_v57  ;;  %v15077_v52 = vld [vmem:[#allocation5 + $0x8a4] ss:$48 sps:$4 sm:$0xff]  }
  0x8f   :  { %2674 = vmatprep.subr.bf16.mxu1 %v15042_v59  ;;  %v15083_v57 = vld [vmem:[#allocation5 + $0x904] ss:$48 sps:$4 sm:$0xff]   ;;  %v15081_v59 = vld [vmem:[#allocation5 + $0x900] ss:$48 sps:$4 sm:$0xff]  }
  0x91   :  { %2529 = vmatpush1.bf16.msra.mxu0 %v15017_v54  ;;  %v15075_v54 = vld [vmem:[#allocation5 + $0x8a0] ss:$48 sps:$4 sm:$0xff]  }
  0x92   :  { %2530 = vmatprep.subr.bf16.mxu0 %v15020_v56  ;;  %2675 = vmatpush1.bf16.msra.mxu1 %v15047_v63  ;;  %v15098_v56 = vld [vmem:[#allocation5 + $0x84c] ss:$48 sps:$4 sm:$0xff]   ;;  %v15087_v63 = vld [vmem:[#allocation5 + $0x960] ss:$48 sps:$4 sm:$0xff]  }
  0x93   :  { %2676 = vmatprep.subr.bf16.mxu1 %v15048_v1  ;;  %v15095_v1 = vld [vmem:[#allocation5 + $0x9c4] ss:$48 sps:$4 sm:$0xff]  }
  0x95   :  { %2531 = vmatpush1.bf16.msra.mxu0 %v15023_v58  ;;  %v15096_v58 = vld [vmem:[#allocation5 + $0x848] ss:$48 sps:$4 sm:$0xff]  }
  0x96   :  { %2532 = vmatprep.subr.bf16.mxu0 %v15026_v60  ;;  %2677 = vmatpush1.bf16.msra.mxu1 %v15053_v5  ;;  %v15104_v60 = vld [vmem:[#allocation5 + $0x8ac] ss:$48 sps:$4 sm:$0xff]  }
  0x97   :  { %2678 = vmatprep.subr.bf16.mxu1 %v15054_v7  ;;  %v15116_v5 = vld [vmem:[#allocation5 + $0x96c] ss:$48 sps:$4 sm:$0xff]   ;;  %v15114_v7 = vld [vmem:[#allocation5 + $0x968] ss:$48 sps:$4 sm:$0xff]  }
  0x99   :  { %2533 = vmatpush1.bf16.msra.mxu0 %v15029_v61  ;;  %v15089_v61 = vld [vmem:[#allocation5 + $0x964] ss:$48 sps:$4 sm:$0xff]  }
  0x9a   :  { %2575 = vmatprep.subr.bf16.mxu0 %v15034_v2  ;;  %2679 = vmatpush1.bf16.msra.mxu1 %v15059_v12  ;;  %v15108_v2 = vld [vmem:[#allocation5 + $0x908] ss:$48 sps:$4 sm:$0xff]  }
  0x9b   :  { %2721 = vmatprep.subr.bf16.mxu1 %v15062_v13  ;;  %v15120_v12 = vld [vmem:[#allocation5 + $0x9c8] ss:$48 sps:$4 sm:$0xff]   ;;  %v15105_v13 = vld [vmem:[#allocation5 + $0xa80] ss:$48 sps:$4 sm:$0xff]  }
  0x9c   :  { %2535 = vmatmul.mubr.bf16.vlgmr.msra.gmra.mrb[0].mxu0 %v16229_v4 }
  0x9d   :  { %2576 = vmatpush1.bf16.msra.mxu0 %v15032_v3  ;;  %2544 = vmatprep.mubr.bf16.mxu0 %v16231_v11  ;;  %v15093_v3 = vld [vmem:[#allocation5 + $0x9c0] ss:$48 sps:$4 sm:$0xff]  }
  0x9e   :  { %2577 = vmatprep.subr.bf16.mxu0 %v15040_v6  ;;  %2681 = vmatmul.mubr.bf16.vlgmr.msra.gmra.mrb[0].mxu1 %v16229_v4  ;;  %v15101_v6 = vld [vmem:[#allocation5 + $0xa24] ss:$48 sps:$4 sm:$0xff]  }
  0x9f   :  { %2722 = vmatpush1.bf16.msra.mxu1 %v15060_v18  ;;  %2690 = vmatprep.mubr.bf16.mxu1 %v16231_v11  ;;  %v15134_v18 = vld [vmem:[#allocation5 + $0xa8c] ss:$48 sps:$4 sm:$0xff]  }
  0xa0   :  { %2723 = vmatprep.subr.bf16.mxu1 %v15068_v19  ;;  %v15119_v19 = vld [vmem:[#allocation5 + $0xb44] ss:$48 sps:$4 sm:$0xff]  }
  0xa1   :  { %2578 = vmatpush1.bf16.msra.mxu0 %v15038_v10  ;;  %v15107_v10 = vld [vmem:[#allocation5 + $0xa84] ss:$48 sps:$4 sm:$0xff]  }
  0xa2   :  { %2579 = vmatprep.subr.bf16.mxu0 %v15046_v16  ;;  %v15126_v16 = vld [vmem:[#allocation5 + $0xa28] ss:$48 sps:$4 sm:$0xff]  }
  0xa3   :  { %2724 = vmatpush1.bf16.msra.mxu1 %v15066_v26  ;;  %v15123_v26 = vld [vmem:[#allocation5 + $0xba0] ss:$48 sps:$4 sm:$0xff]  }
  0xa4   :  { %2545 = vmatmul.mubr.bf16.gmra.mrb[4].mxu0 %v16235_v20  ;;  %2725 = vmatprep.subr.bf16.mxu1 %v15074_v27  ;;  %v88_v27 = vld [vmem:[#allocation2 + $0x10] sm:$0xff] }
  0xa5   :  { %2580 = vmatpush1.bf16.msra.mxu0 %v15044_v17  ;;  %2554 = vmatprep.mubr.bf16.mxu0 %v16237_v24  ;;  %v15111_v17 = vld [vmem:[#allocation5 + $0xae0] ss:$48 sps:$4 sm:$0xff]  }
  0xa6   :  { %2581 = vmatprep.subr.bf16.mxu0 %v15052_v23  ;;  %2691 = vmatmul.mubr.bf16.gmra.mrb[4].mxu1 %v16235_v20  ;;  %v15140_v23 = vld [vmem:[#allocation5 + $0xaec] ss:$48 sps:$4 sm:$0xff]  }
  0xa7   :  { %2726 = vmatpush1.bf16.msra.mxu1 %v15072_v33  ;;  %2700 = vmatprep.mubr.bf16.mxu1 %v16237_v24  ;;  %v101_v33 = vld [vmem:[#allocation2 + $0x78] sm:$0xff] }
  0xa8   :  { %2727 = vmatprep.subr.bf16.mxu1 %v15080_v36  ;;  %v15144_v36 = vld [vmem:[#allocation5 + $0xb48] ss:$48 sps:$4 sm:$0xff]  }
  0xa9   :  { %2582 = vmatpush1.bf16.msra.mxu0 %v15050_v25  ;;  %v15125_v25 = vld [vmem:[#allocation5 + $0xba4] ss:$48 sps:$4 sm:$0xff]  }
  0xaa   :  { %2583 = vmatprep.subr.bf16.mxu0 %v15058_v30  ;;  %v15138_v30 = vld [vmem:[#allocation5 + $0xae8] ss:$48 sps:$4 sm:$0xff]  }
  0xab   :  { %2728 = vmatpush1.bf16.msra.mxu1 %v15078_v40  ;;  %v16263_v40 = vpack.c.bf16 %v101_v33, %v97_v31  ;;  %v15185_v31 = vld [vmem:[#allocation5 + $0x374] ss:$48 sps:$4 sm:$0xff]   ;;  %v15183_v33 = vld [vmem:[#allocation5 + $0x370] ss:$48 sps:$4 sm:$0xff]  }
  0xac   :  { %2555 = vmatmul.mubr.bf16.gmra.mrb[8].mxu0 %v16243_v34  ;;  %2729 = vmatprep.subr.bf16.mxu1 %v15086_v42  ;;  %v15152_v42 = vld [vmem:[#allocation5 + $0xbac] ss:$48 sps:$4 sm:$0xff]  }
  0xad   :  { %2584 = vmatpush1.bf16.msra.mxu0 %v15056_v35  ;;  %2564 = vmatprep.mubr.bf16.mxu0 %v16245_v38  ;;  %v16261_v35 = vpack.c.bf16 %v92_v28, %v88_v27  ;;  %v15179_v27 = vld [vmem:[#allocation5 + $0x314] ss:$48 sps:$4 sm:$0xff]   ;;  %v15192_v28 = vld [vmem:[#allocation5 + $0x258] ss:$48 sps:$4 sm:$0xff]  }
  0xae   :  { %2585 = vmatprep.subr.bf16.mxu0 %v15065_v37  ;;  %2701 = vmatmul.mubr.bf16.gmra.mrb[8].mxu1 %v16243_v34  ;;  %v15129_v37 = vld [vmem:[#allocation5 + $0x10] ss:$48 sps:$4 sm:$0xff]  }
  0xaf   :  { %2730 = vmatpush1.bf16.msra.mxu1 %v15084_v48  ;;  %2710 = vmatprep.mubr.bf16.mxu1 %v16245_v38  ;;  %v105_v48 = vld [vmem:[#allocation2 + $0x98] sm:$0xff] }
  0xb0   :  { %2731 = vmatprep.subr.bf16.mxu1 %v15092_v51  ;;  %v109_v51 = vld [vmem:[#allocation2 + $0xb8] sm:$0xff] }
  0xb1   :  { %2586 = vmatpush1.bf16.msra.mxu0 %v15063_v39  ;;  %v15137_v39 = vld [vmem:[#allocation5 + $0x74] ss:$48 sps:$4 sm:$0xff]  }
  0xb2   :  { %2587 = vmatprep.subr.bf16.mxu0 %v15071_v45  ;;  %v100_v45 = vld [vmem:[#allocation2 + $0x70] sm:$0xff] }
  0xb3   :  { %2732 = vmatpush1.bf16.msra.mxu1 %v15090_v55  ;;  %v15141_v55 = vld [vmem:[#allocation5 + $0xd0] ss:$48 sps:$4 sm:$0xff]  }
  0xb4   :  { %2565 = vmatmul.mubr.bf16.gmra.mrb[12].mxu0 %v16251_v49  ;;  %2733 = vmatprep.subr.bf16.mxu1 %v15098_v56  ;;  %v15149_v56 = vld [vmem:[#allocation5 + $0x134] ss:$48 sps:$4 sm:$0xff]  }
  0xb5   :  { %2588 = vmatpush1.bf16.msra.mxu0 %v15069_v50  ;;  %2607 = vmatprep.mubr.bf16.mxu0 %v16253_v53  ;;  %v15158_v50 = vld [vmem:[#allocation5 + $0x1c] ss:$48 sps:$4 sm:$0xff]  }
  0xb6   :  { %2589 = vmatprep.subr.bf16.mxu0 %v15077_v52  ;;  %2711 = vmatmul.mubr.bf16.gmra.mrb[12].mxu1 %v16251_v49  ;;  %v16267_v52 = vpack.c.bf16 %v100_v45, %v96_v44  ;;  %v15197_v44 = vld [vmem:[#allocation5 + $0x434] ss:$48 sps:$4 sm:$0xff]   ;;  %v15210_v45 = vld [vmem:[#allocation5 + $0x378] ss:$48 sps:$4 sm:$0xff]  }
  0xb7   :  { %2734 = vmatpush1.bf16.msra.mxu1 %v15096_v58  ;;  %2753 = vmatprep.mubr.bf16.mxu1 %v16253_v53  ;;  %v15164_v58 = vld [vmem:[#allocation5 + $0x7c] ss:$48 sps:$4 sm:$0xff]  }
  0xb8   :  { %2735 = vmatprep.subr.bf16.mxu1 %v15104_v60  ;;  %v104_v60 = vld [vmem:[#allocation2 + $0x90] sm:$0xff] }
  0xb9   :  { %2590 = vmatpush1.bf16.msra.mxu0 %v15075_v54  ;;  %v15156_v54 = vld [vmem:[#allocation5 + $0x18] ss:$48 sps:$4 sm:$0xff]  }
  0xba   :  { %2591 = vmatprep.subr.bf16.mxu0 %v15083_v57  ;;  %v16269_v57 = vpack.c.bf16 %v109_v51, %v105_v48  ;;  %v15203_v48 = vld [vmem:[#allocation5 + $0x494] ss:$48 sps:$4 sm:$0xff]   ;;  %v15201_v51 = vld [vmem:[#allocation5 + $0x490] ss:$48 sps:$4 sm:$0xff]  }
  0xbb   :  { %2736 = vmatpush1.bf16.msra.mxu1 %v15102_v62  ;;  %v15155_v62 = vld [vmem:[#allocation5 + $0x194] ss:$48 sps:$4 sm:$0xff]  }
  0xbc   :  { %2737 = vmatprep.subr.bf16.mxu1 %v15110_v0  ;;  %v113_v0 = vld [vmem:[#allocation2 + $0xd8] sm:$0xff] }
  0xbd   :  { %2592 = vmatpush1.bf16.msra.mxu0 %v15081_v59  ;;  %v15147_v59 = vld [vmem:[#allocation5 + $0x130] ss:$48 sps:$4 sm:$0xff]  }
  0xbe   :  { %2593 = vmatprep.subr.bf16.mxu0 %v15089_v61  ;;  %v108_v61 = vld [vmem:[#allocation2 + $0xb0] sm:$0xff] }
  0xbf   :  { %2738 = vmatpush1.bf16.msra.mxu1 %v15108_v2  ;;  %v117_v2 = vld [vmem:[#allocation2 + $0xf8] sm:$0xff] }
  0xc0   :  { %2739 = vmatprep.subr.bf16.mxu1 %v15116_v5  ;;  %v15168_v5 = vld [vmem:[#allocation5 + $0xd8] ss:$48 sps:$4 sm:$0xff]  }
  0xc1   :  { %2594 = vmatpush1.bf16.msra.mxu0 %v15087_v63  ;;  %v15162_v63 = vld [vmem:[#allocation5 + $0x78] ss:$48 sps:$4 sm:$0xff]  }
  0xc2   :  { %2595 = vmatprep.subr.bf16.mxu0 %v15095_v1  ;;  %v15170_v1 = vld [vmem:[#allocation5 + $0xdc] ss:$48 sps:$4 sm:$0xff]  }
  0xc3   :  { %2740 = vmatpush1.bf16.msra.mxu1 %v15114_v7  ;;  %v15161_v7 = vld [vmem:[#allocation5 + $0x1f4] ss:$48 sps:$4 sm:$0xff]  }
  0xc4   :  { %2741 = vmatprep.subr.bf16.mxu1 %v15122_v9  ;;  %v15176_v9 = vld [vmem:[#allocation5 + $0x13c] ss:$48 sps:$4 sm:$0xff]  }
  0xc5   :  { %2596 = vmatpush1.bf16.msra.mxu0 %v15093_v3  ;;  %v16275_v3 = vpack.c.bf16 %v108_v61, %v104_v60  ;;  %v15215_v60 = vld [vmem:[#allocation5 + $0x554] ss:$48 sps:$4 sm:$0xff]   ;;  %v15228_v61 = vld [vmem:[#allocation5 + $0x498] ss:$48 sps:$4 sm:$0xff]  }
  0xc6   :  { %2597 = vmatprep.subr.bf16.mxu0 %v15101_v6  ;;  %v15153_v6 = vld [vmem:[#allocation5 + $0x190] ss:$48 sps:$4 sm:$0xff]  }
  0xc7   :  { %2742 = vmatpush1.bf16.msra.mxu1 %v15120_v12  ;;  %v112_v12 = vld [vmem:[#allocation2 + $0xd0] sm:$0xff] }
  0xc8   :  { %2743 = vmatprep.subr.bf16.mxu1 %v15128_v14  ;;  %v116_v14 = vld [vmem:[#allocation2 + $0xf0] sm:$0xff] }
  0xc9   :  { %2598 = vmatpush1.bf16.msra.mxu0 %v15099_v8  ;;  %v16277_v8 = vpack.c.bf16 %v117_v2, %v113_v0  ;;  %v15221_v0 = vld [vmem:[#allocation5 + $0x5b4] ss:$48 sps:$4 sm:$0xff]   ;;  %v15219_v2 = vld [vmem:[#allocation5 + $0x5b0] ss:$48 sps:$4 sm:$0xff]  }
  0xca   :  { %2599 = vmatprep.subr.bf16.mxu0 %v15107_v10  ;;  %v15159_v10 = vld [vmem:[#allocation5 + $0x1f0] ss:$48 sps:$4 sm:$0xff]  }
  0xcb   :  { %2744 = vmatpush1.bf16.msra.mxu1 %v15126_v16  ;;  %v15167_v16 = vld [vmem:[#allocation5 + $0x254] ss:$48 sps:$4 sm:$0xff]  }
  0xcc   :  { %2745 = vmatprep.subr.bf16.mxu1 %v15134_v18  ;;  %v15180_v18 = vld [vmem:[#allocation5 + $0x198] ss:$48 sps:$4 sm:$0xff]  }
  0xcd   :  { %2600 = vmatpush1.bf16.msra.mxu0 %v15105_v13  ;;  %v15174_v13 = vld [vmem:[#allocation5 + $0x138] ss:$48 sps:$4 sm:$0xff]  }
  0xce   :  { %2601 = vmatprep.subr.bf16.mxu0 %v15113_v15  ;;  %v15182_v15 = vld [vmem:[#allocation5 + $0x19c] ss:$48 sps:$4 sm:$0xff]  }
  0xcf   :  { %2746 = vmatpush1.bf16.msra.mxu1 %v15132_v21  ;;  %v15188_v21 = vld [vmem:[#allocation5 + $0x1fc] ss:$48 sps:$4 sm:$0xff]  }
  0xd0   :  { %2747 = vmatprep.subr.bf16.mxu1 %v15140_v23  ;;  %v15186_v23 = vld [vmem:[#allocation5 + $0x1f8] ss:$48 sps:$4 sm:$0xff]  }
  0xd1   :  { %2602 = vmatpush1.bf16.msra.mxu0 %v15111_v17  ;;  %v16283_v17 = vpack.c.bf16 %v116_v14, %v112_v12  ;;  %v15233_v12 = vld [vmem:[#allocation5 + $0x674] ss:$48 sps:$4 sm:$0xff]   ;;  %v15231_v14 = vld [vmem:[#allocation5 + $0x670] ss:$48 sps:$4 sm:$0xff]  }
  0xd2   :  { %2603 = vmatprep.subr.bf16.mxu0 %v15119_v19  ;;  %v15165_v19 = vld [vmem:[#allocation5 + $0x250] ss:$48 sps:$4 sm:$0xff]  }
  0xd3   :  { %2748 = vmatpush1.bf16.msra.mxu1 %v15138_v30  ;;  %v15200_v30 = vld [vmem:[#allocation5 + $0x2bc] ss:$48 sps:$4 sm:$0xff]  }
  0xd4   :  { %2749 = vmatprep.subr.bf16.mxu1 %v15146_v32  ;;  %v15198_v32 = vld [vmem:[#allocation5 + $0x2b8] ss:$48 sps:$4 sm:$0xff]  }
  0xd5   :  { %2604 = vmatpush1.bf16.msra.mxu0 %v15117_v22  ;;  %v15173_v22 = vld [vmem:[#allocation5 + $0x2b4] ss:$48 sps:$4 sm:$0xff]  }
  0xd6   :  { %2605 = vmatprep.subr.bf16.mxu0 %v15125_v25  ;;  %v15171_v25 = vld [vmem:[#allocation5 + $0x2b0] ss:$48 sps:$4 sm:$0xff]  }
  0xd7   :  { %2750 = vmatpush1.bf16.msra.mxu1 %v15144_v36  ;;  %v15206_v36 = vld [vmem:[#allocation5 + $0x31c] ss:$48 sps:$4 sm:$0xff]  }
  0xd8   :  { %2751 = vmatprep.subr.bf16.mxu1 %v15152_v42  ;;  %v15189_v42 = vld [vmem:[#allocation5 + $0x3d0] ss:$48 sps:$4 sm:$0xff]  }
  0xd9   :  { %2606 = vmatpush1.bf16.msra.mxu0 %v15123_v26  ;;  %v15194_v26 = vld [vmem:[#allocation5 + $0x25c] ss:$48 sps:$4 sm:$0xff]  }
  0xda   :  { %2794 = vmatprep.subr.bf16.mxu0 %v15131_v29  ;;  %v15177_v29 = vld [vmem:[#allocation5 + $0x310] ss:$48 sps:$4 sm:$0xff]  }
  0xdb   :  { %2752 = vmatpush1.bf16.msra.mxu1 %v15150_v47  ;;  %v15218_v47 = vld [vmem:[#allocation5 + $0x3dc] ss:$48 sps:$4 sm:$0xff]  }
  0xdc   :  { %2608 = vmatmul.mubr.bf16.vlgmr.msra.gmra.mrb[0].mxu0 %v16261_v35  ;;  %2940 = vmatprep.subr.bf16.mxu1 %v15158_v50  ;;  %v15216_v50 = vld [vmem:[#allocation5 + $0x3d8] ss:$48 sps:$4 sm:$0xff]  }
  0xdd   :  { %2795 = vmatpush1.bf16.msra.mxu0 %v15129_v37  ;;  %2617 = vmatprep.mubr.bf16.mxu0 %v16263_v40  ;;  %v15191_v37 = vld [vmem:[#allocation5 + $0x3d4] ss:$48 sps:$4 sm:$0xff]  }
  0xde   :  { %2796 = vmatprep.subr.bf16.mxu0 %v15137_v39  ;;  %2754 = vmatmul.mubr.bf16.vlgmr.msra.gmra.mrb[0].mxu1 %v16261_v35  ;;  %v15204_v39 = vld [vmem:[#allocation5 + $0x318] ss:$48 sps:$4 sm:$0xff]  }
  0xdf   :  { %2941 = vmatpush1.bf16.msra.mxu1 %v15156_v54  ;;  %2763 = vmatprep.mubr.bf16.mxu1 %v16263_v40  ;;  %v15224_v54 = vld [vmem:[#allocation5 + $0x43c] ss:$48 sps:$4 sm:$0xff]  }
  0xe0   :  { %2942 = vmatprep.subr.bf16.mxu1 %v15164_v58  ;;  %v15207_v58 = vld [vmem:[#allocation5 + $0x4f0] ss:$48 sps:$4 sm:$0xff]  }
  0xe1   :  { %2797 = vmatpush1.bf16.msra.mxu0 %v15135_v43  ;;  %v15212_v43 = vld [vmem:[#allocation5 + $0x37c] ss:$48 sps:$4 sm:$0xff]  }
  0xe2   :  { %2798 = vmatprep.subr.bf16.mxu0 %v15143_v46  ;;  %v15195_v46 = vld [vmem:[#allocation5 + $0x430] ss:$48 sps:$4 sm:$0xff]  }
  0xe3   :  { %2943 = vmatpush1.bf16.msra.mxu1 %v15162_v63  ;;  %v15236_v63 = vld [vmem:[#allocation5 + $0x4fc] ss:$48 sps:$4 sm:$0xff]  }
  0xe4   :  { %2618 = vmatmul.mubr.bf16.gmra.mrb[4].mxu0 %v16267_v52  ;;  %2944 = vmatprep.subr.bf16.mxu1 %v15170_v1  ;;  %v15234_v1 = vld [vmem:[#allocation5 + $0x4f8] ss:$48 sps:$4 sm:$0xff]  }
  0xe5   :  { %2799 = vmatpush1.bf16.msra.mxu0 %v15141_v55  ;;  %2627 = vmatprep.mubr.bf16.mxu0 %v16269_v57  ;;  %v15209_v55 = vld [vmem:[#allocation5 + $0x4f4] ss:$48 sps:$4 sm:$0xff]  }
  0xe6   :  { %2800 = vmatprep.subr.bf16.mxu0 %v15149_v56  ;;  %2764 = vmatmul.mubr.bf16.gmra.mrb[4].mxu1 %v16267_v52  ;;  %v15222_v56 = vld [vmem:[#allocation5 + $0x438] ss:$48 sps:$4 sm:$0xff]  }
  0xe7   :  { %2945 = vmatpush1.bf16.msra.mxu1 %v15168_v5  ;;  %2773 = vmatprep.mubr.bf16.mxu1 %v16269_v57  ;;  %v15242_v5 = vld [vmem:[#allocation5 + $0x55c] ss:$48 sps:$4 sm:$0xff]  }
  0xe8   :  { %2946 = vmatprep.subr.bf16.mxu1 %v15176_v9  ;;  %v15225_v9 = vld [vmem:[#allocation5 + $0x610] ss:$48 sps:$4 sm:$0xff]  }
  0xe9   :  { %2801 = vmatpush1.bf16.msra.mxu0 %v15147_v59  ;;  %v15230_v59 = vld [vmem:[#allocation5 + $0x49c] ss:$48 sps:$4 sm:$0xff]  }
  0xea   :  { %2802 = vmatprep.subr.bf16.mxu0 %v15155_v62  ;;  %v15213_v62 = vld [vmem:[#allocation5 + $0x550] ss:$48 sps:$4 sm:$0xff]  }
  0xeb   :  { %2947 = vmatpush1.bf16.msra.mxu1 %v15174_v13  ;;  %v15246_v13 = vld [vmem:[#allocation5 + $0x5b8] ss:$48 sps:$4 sm:$0xff]  }
  0xec   :  { %2628 = vmatmul.mubr.bf16.gmra.mrb[8].mxu0 %v16275_v3  ;;  %2948 = vmatprep.subr.bf16.mxu1 %v15182_v15  ;;  %v15254_v15 = vld [vmem:[#allocation5 + $0x61c] ss:$48 sps:$4 sm:$0xff]  }
  0xed   :  { %2803 = vmatpush1.bf16.msra.mxu0 %v15153_v6  ;;  %2637 = vmatprep.mubr.bf16.mxu0 %v16277_v8  ;;  %v15227_v6 = vld [vmem:[#allocation5 + $0x614] ss:$48 sps:$4 sm:$0xff]  }
  0xee   :  { %2804 = vmatprep.subr.bf16.mxu0 %v15161_v7  ;;  %2774 = vmatmul.mubr.bf16.gmra.mrb[8].mxu1 %v16275_v3  ;;  %v15240_v7 = vld [vmem:[#allocation5 + $0x558] ss:$48 sps:$4 sm:$0xff]  }
  0xef   :  { %2949 = vmatpush1.bf16.msra.mxu1 %v15180_v18  ;;  %2783 = vmatprep.mubr.bf16.mxu1 %v16277_v8  ;;  %v15252_v18 = vld [vmem:[#allocation5 + $0x618] ss:$48 sps:$4 sm:$0xff]  }
  0xf0   :  { %2950 = vmatprep.subr.bf16.mxu1 %v15188_v21  ;;  %v15260_v21 = vld [vmem:[#allocation5 + $0x67c] ss:$48 sps:$4 sm:$0xff]  }
  0xf1   :  { %2805 = vmatpush1.bf16.msra.mxu0 %v15159_v10  ;;  %v15248_v10 = vld [vmem:[#allocation5 + $0x5bc] ss:$48 sps:$4 sm:$0xff]  }
  0xf2   :  { %2806 = vmatprep.subr.bf16.mxu0 %v15167_v16  ;;  %v15239_v16 = vld [vmem:[#allocation5 + $0x6d4] ss:$48 sps:$4 sm:$0xff]  }
  0xf3   :  { %2951 = vmatpush1.bf16.msra.mxu1 %v15186_v23  ;;  %v15258_v23 = vld [vmem:[#allocation5 + $0x678] ss:$48 sps:$4 sm:$0xff]  }
  0xf4   :  { %2638 = vmatmul.mubr.bf16.gmra.mrb[12].mxu0 %v16283_v17  ;;  %2952 = vmatprep.subr.bf16.mxu1 %v15194_v26  ;;  %v15266_v26 = vld [vmem:[#allocation5 + $0x6dc] ss:$48 sps:$4 sm:$0xff]  }
  0xf5   :  { %2807 = vmatpush1.bf16.msra.mxu0 %v15165_v19  ;;  %2826 = vmatprep.mubr.bf16.mxu0 %v16225_v41  ;;  %v15237_v19 = vld [vmem:[#allocation5 + $0x6d0] ss:$48 sps:$4 sm:$0xff]  }
  0xf6   :  { %2808 = vmatprep.subr.bf16.mxu0 %v15173_v22  ;;  %2784 = vmatmul.mubr.bf16.gmra.mrb[12].mxu1 %v16283_v17  ;;  %v15245_v22 = vld [vmem:[#allocation5 + $0x734] ss:$48 sps:$4 sm:$0xff]  }
  0xf7   :  { %2953 = vmatpush1.bf16.msra.mxu1 %v15192_v28  ;;  %2972 = vmatprep.mubr.bf16.mxu1 %v16225_v41  ;;  %v15264_v28 = vld [vmem:[#allocation5 + $0x6d8] ss:$48 sps:$4 sm:$0xff]  }
  0xf8   :  { %2954 = vmatprep.subr.bf16.mxu1 %v15200_v30  ;;  %v15272_v30 = vld [vmem:[#allocation5 + $0x73c] ss:$48 sps:$4 sm:$0xff]  }
  0xf9   :  { %2809 = vmatpush1.bf16.msra.mxu0 %v15171_v25  ;;  %v15243_v25 = vld [vmem:[#allocation5 + $0x730] ss:$48 sps:$4 sm:$0xff]  }
  0xfa   :  { %2810 = vmatprep.subr.bf16.mxu0 %v15179_v27  ;;  %v15251_v27 = vld [vmem:[#allocation5 + $0x794] ss:$48 sps:$4 sm:$0xff]  }
  0xfb   :  { %2955 = vmatpush1.bf16.msra.mxu1 %v15198_v32  ;;  %v15270_v32 = vld [vmem:[#allocation5 + $0x738] ss:$48 sps:$4 sm:$0xff]  }
  0xfc   :  { %2956 = vmatprep.subr.bf16.mxu1 %v15206_v36  ;;  %v15278_v36 = vld [vmem:[#allocation5 + $0x79c] ss:$48 sps:$4 sm:$0xff]  }
  0xfd   :  { %2811 = vmatpush1.bf16.msra.mxu0 %v15177_v29  ;;  %v15249_v29 = vld [vmem:[#allocation5 + $0x790] ss:$48 sps:$4 sm:$0xff]  }
  0xfe   :  { %2812 = vmatprep.subr.bf16.mxu0 %v15185_v31  ;;  %v15257_v31 = vld [vmem:[#allocation5 + $0x7f4] ss:$48 sps:$4 sm:$0xff]  }
  0xff   :  { %2957 = vmatpush1.bf16.msra.mxu1 %v15204_v39  ;;  %v15276_v39 = vld [vmem:[#allocation5 + $0x798] ss:$48 sps:$4 sm:$0xff]  }
 0x100   :  { %2958 = vmatprep.subr.bf16.mxu1 %v15212_v43  ;;  %v15284_v43 = vld [vmem:[#allocation5 + $0x7fc] ss:$48 sps:$4 sm:$0xff]  }
 0x101   :  { %2813 = vmatpush1.bf16.msra.mxu0 %v15183_v33  ;;  %v15255_v33 = vld [vmem:[#allocation5 + $0x7f0] ss:$48 sps:$4 sm:$0xff]  }
 0x102   :  { %2814 = vmatprep.subr.bf16.mxu0 %v15191_v37  ;;  %v15263_v37 = vld [vmem:[#allocation5 + $0x854] ss:$48 sps:$4 sm:$0xff]  }
 0x103   :  { %2959 = vmatpush1.bf16.msra.mxu1 %v15210_v45  ;;  %v15282_v45 = vld [vmem:[#allocation5 + $0x7f8] ss:$48 sps:$4 sm:$0xff]  }
 0x104   :  { %2960 = vmatprep.subr.bf16.mxu1 %v15218_v47  ;;  %v15290_v47 = vld [vmem:[#allocation5 + $0x85c] ss:$48 sps:$4 sm:$0xff]  }
 0x105   :  { %2815 = vmatpush1.bf16.msra.mxu0 %v15189_v42  ;;  %v15261_v42 = vld [vmem:[#allocation5 + $0x850] ss:$48 sps:$4 sm:$0xff]  }
 0x106   :  { %2816 = vmatprep.subr.bf16.mxu0 %v15197_v44  ;;  %v15269_v44 = vld [vmem:[#allocation5 + $0x8b4] ss:$48 sps:$4 sm:$0xff]  }
 0x107   :  { %2961 = vmatpush1.bf16.msra.mxu1 %v15216_v50  ;;  %v15288_v50 = vld [vmem:[#allocation5 + $0x858] ss:$48 sps:$4 sm:$0xff]  }
 0x108   :  { %2962 = vmatprep.subr.bf16.mxu1 %v15224_v54  ;;  %v15296_v54 = vld [vmem:[#allocation5 + $0x8bc] ss:$48 sps:$4 sm:$0xff]  }
 0x109   :  { %2817 = vmatpush1.bf16.msra.mxu0 %v15195_v46  ;;  %v15267_v46 = vld [vmem:[#allocation5 + $0x8b0] ss:$48 sps:$4 sm:$0xff]  }
 0x10a   :  { %2818 = vmatprep.subr.bf16.mxu0 %v15203_v48  ;;  %v15275_v48 = vld [vmem:[#allocation5 + $0x914] ss:$48 sps:$4 sm:$0xff]  }
 0x10b   :  { %2963 = vmatpush1.bf16.msra.mxu1 %v15222_v56  ;;  %v15279_v56 = vld [vmem:[#allocation5 + $0x970] ss:$48 sps:$4 sm:$0xff]  }
 0x10c   :  { %2964 = vmatprep.subr.bf16.mxu1 %v15230_v59  ;;  %v15302_v59 = vld [vmem:[#allocation5 + $0x91c] ss:$48 sps:$4 sm:$0xff]  }
 0x10d   :  { %2819 = vmatpush1.bf16.msra.mxu0 %v15201_v51  ;;  %v15273_v51 = vld [vmem:[#allocation5 + $0x910] ss:$48 sps:$4 sm:$0xff]  }
 0x10e   :  { %2820 = vmatprep.subr.bf16.mxu0 %v15209_v55  ;;  %v15281_v55 = vld [vmem:[#allocation5 + $0x974] ss:$48 sps:$4 sm:$0xff]  }
 0x10f   :  { %2965 = vmatpush1.bf16.msra.mxu1 %v15228_v61  ;;  %v15285_v61 = vld [vmem:[#allocation5 + $0x9d0] ss:$48 sps:$4 sm:$0xff]  }
 0x110   :  { %2966 = vmatprep.subr.bf16.mxu1 %v15236_v63  ;;  %v15308_v63 = vld [vmem:[#allocation5 + $0x97c] ss:$48 sps:$4 sm:$0xff]  }
 0x111   :  { %2821 = vmatpush1.bf16.msra.mxu0 %v15207_v58  ;;  %v15294_v58 = vld [vmem:[#allocation5 + $0x8b8] ss:$48 sps:$4 sm:$0xff]  }
 0x112   :  { %2822 = vmatprep.subr.bf16.mxu0 %v15215_v60  ;;  %v15287_v60 = vld [vmem:[#allocation5 + $0x9d4] ss:$48 sps:$4 sm:$0xff]  }
 0x113   :  { %2967 = vmatpush1.bf16.msra.mxu1 %v15234_v1  ;;  %v15291_v1 = vld [vmem:[#allocation5 + $0xa30] ss:$48 sps:$4 sm:$0xff]  }
 0x114   :  { %2968 = vmatprep.subr.bf16.mxu1 %v15242_v5  ;;  %v15314_v5 = vld [vmem:[#allocation5 + $0x9dc] ss:$48 sps:$4 sm:$0xff]  }
 0x115   :  { %2823 = vmatpush1.bf16.msra.mxu0 %v15213_v62  ;;  %v15300_v62 = vld [vmem:[#allocation5 + $0x918] ss:$48 sps:$4 sm:$0xff]  }
 0x116   :  { %2824 = vmatprep.subr.bf16.mxu0 %v15221_v0  ;;  %v15293_v0 = vld [vmem:[#allocation5 + $0xa34] ss:$48 sps:$4 sm:$0xff]  }
 0x117   :  { %2969 = vmatpush1.bf16.msra.mxu1 %v15240_v7  ;;  %v15297_v7 = vld [vmem:[#allocation5 + $0xa90] ss:$48 sps:$4 sm:$0xff]  }
 0x118   :  { %2970 = vmatprep.subr.bf16.mxu1 %v15248_v10  ;;  %v15320_v10 = vld [vmem:[#allocation5 + $0xa3c] ss:$48 sps:$4 sm:$0xff]  }
 0x119   :  { %2825 = vmatpush1.bf16.msra.mxu0 %v15219_v2  ;;  %v15306_v2 = vld [vmem:[#allocation5 + $0x978] ss:$48 sps:$4 sm:$0xff]  }
 0x11a   :  { %2867 = vmatprep.subr.bf16.mxu0 %v15227_v6  ;;  %v15299_v6 = vld [vmem:[#allocation5 + $0xa94] ss:$48 sps:$4 sm:$0xff]  }
 0x11b   :  { %2971 = vmatpush1.bf16.msra.mxu1 %v15246_v13  ;;  %v15303_v13 = vld [vmem:[#allocation5 + $0xaf0] ss:$48 sps:$4 sm:$0xff]  }
 0x11c   :  { %2827 = vmatmul.mubr.bf16.vlgmr.msra.gmra.mrb[16].mxu0 %v16229_v4  ;;  %3013 = vmatprep.subr.bf16.mxu1 %v15254_v15  ;;  %v15323_v15 = vld [vmem:[#allocation5 + $0xa9c] ss:$48 sps:$4 sm:$0xff]  }
 0x11d   :  { %2868 = vmatpush1.bf16.msra.mxu0 %v15225_v9  ;;  %2836 = vmatprep.mubr.bf16.mxu0 %v16231_v11  ;;  %v15312_v9 = vld [vmem:[#allocation5 + $0x9d8] ss:$48 sps:$4 sm:$0xff]  }
 0x11e   :  { %2869 = vmatprep.subr.bf16.mxu0 %v15233_v12  ;;  %2973 = vmatmul.mubr.bf16.vlgmr.msra.gmra.mrb[16].mxu1 %v16229_v4  ;;  %v15305_v12 = vld [vmem:[#allocation5 + $0xaf4] ss:$48 sps:$4 sm:$0xff]  }
 0x11f   :  { %3014 = vmatpush1.bf16.msra.mxu1 %v15252_v18  ;;  %2982 = vmatprep.mubr.bf16.mxu1 %v16231_v11  ;;  %v15309_v18 = vld [vmem:[#allocation5 + $0xb50] ss:$48 sps:$4 sm:$0xff]  }
 0x120   :  { %3015 = vmatprep.subr.bf16.mxu1 %v15260_v21  ;;  %v15326_v21 = vld [vmem:[#allocation5 + $0xafc] ss:$48 sps:$4 sm:$0xff]  }
 0x121   :  { %2870 = vmatpush1.bf16.msra.mxu0 %v15231_v14  ;;  %v15318_v14 = vld [vmem:[#allocation5 + $0xa38] ss:$48 sps:$4 sm:$0xff]  }
 0x122   :  { %2871 = vmatprep.subr.bf16.mxu0 %v15239_v16  ;;  %v15311_v16 = vld [vmem:[#allocation5 + $0xb54] ss:$48 sps:$4 sm:$0xff]  }
 0x123   :  { %3016 = vmatpush1.bf16.msra.mxu1 %v15258_v23  ;;  %v15315_v23 = vld [vmem:[#allocation5 + $0xbb0] ss:$48 sps:$4 sm:$0xff]  }
 0x124   :  { %2837 = vmatmul.mubr.bf16.gmra.mrb[20].mxu0 %v16235_v20  ;;  %3017 = vmatprep.subr.bf16.mxu1 %v15266_v26  ;;  %v15329_v26 = vld [vmem:[#allocation5 + $0xb5c] ss:$48 sps:$4 sm:$0xff]  }
 0x125   :  { %2872 = vmatpush1.bf16.msra.mxu0 %v15237_v19  ;;  %2846 = vmatprep.mubr.bf16.mxu0 %v16237_v24  ;;  %v15321_v19 = vld [vmem:[#allocation5 + $0xa98] ss:$48 sps:$4 sm:$0xff]  }
 0x126   :  { %2873 = vmatprep.subr.bf16.mxu0 %v15245_v22  ;;  %2983 = vmatmul.mubr.bf16.gmra.mrb[20].mxu1 %v16235_v20  ;;  %v15317_v22 = vld [vmem:[#allocation5 + $0xbb4] ss:$48 sps:$4 sm:$0xff]  }
 0x127   :  { %3018 = vmatpush1.bf16.msra.mxu1 %v15264_v28  ;;  %2992 = vmatprep.mubr.bf16.mxu1 %v16237_v24  ;;  %v15327_v28 = vld [vmem:[#allocation5 + $0xb58] ss:$48 sps:$4 sm:$0xff]  }
 0x128   :  { %3019 = vmatprep.subr.bf16.mxu1 %v15272_v30  ;;  %v15333_v30 = vld [vmem:[#allocation5 + $0x20] ss:$48 sps:$4 sm:$0xff]  }
 0x129   :  { %2874 = vmatpush1.bf16.msra.mxu0 %v15243_v25  ;;  %v15324_v25 = vld [vmem:[#allocation5 + $0xaf8] ss:$48 sps:$4 sm:$0xff]  }
 0x12a   :  { %2875 = vmatprep.subr.bf16.mxu0 %v15251_v27  ;;  %v15335_v27 = vld [vmem:[#allocation5 + $0x24] ss:$48 sps:$4 sm:$0xff]  }
 0x12b   :  { %3020 = vmatpush1.bf16.msra.mxu1 %v15270_v32  ;;  %v15330_v32 = vld [vmem:[#allocation5 + $0xbb8] ss:$48 sps:$4 sm:$0xff]  }
 0x12c   :  { %2847 = vmatmul.mubr.bf16.gmra.mrb[24].mxu0 %v16243_v34  ;;  %3021 = vmatprep.subr.bf16.mxu1 %v15278_v36  ;;  %v15339_v36 = vld [vmem:[#allocation5 + $0x80] ss:$48 sps:$4 sm:$0xff]  }
 0x12d   :  { %2876 = vmatpush1.bf16.msra.mxu0 %v15249_v29  ;;  %2856 = vmatprep.mubr.bf16.mxu0 %v16245_v38  ;;  %v15332_v29 = vld [vmem:[#allocation5 + $0xbbc] ss:$48 sps:$4 sm:$0xff]  }
 0x12e   :  { %2877 = vmatprep.subr.bf16.mxu0 %v15257_v31  ;;  %2993 = vmatmul.mubr.bf16.gmra.mrb[24].mxu1 %v16243_v34  ;;  %v15341_v31 = vld [vmem:[#allocation5 + $0x84] ss:$48 sps:$4 sm:$0xff]  }
 0x12f   :  { %3022 = vmatpush1.bf16.msra.mxu1 %v15276_v39  ;;  %3002 = vmatprep.mubr.bf16.mxu1 %v16245_v38  ;;  %v15336_v39 = vld [vmem:[#allocation5 + $0x28] ss:$48 sps:$4 sm:$0xff]  }
 0x130   :  { %3023 = vmatprep.subr.bf16.mxu1 %v15284_v43  ;;  %v15345_v43 = vld [vmem:[#allocation5 + $0xe0] ss:$48 sps:$4 sm:$0xff]  }
 0x131   :  { %2878 = vmatpush1.bf16.msra.mxu0 %v15255_v33  ;;  %v15338_v33 = vld [vmem:[#allocation5 + $0x2c] ss:$48 sps:$4 sm:$0xff]  }
 0x132   :  { %2879 = vmatprep.subr.bf16.mxu0 %v15263_v37  ;;  %v15347_v37 = vld [vmem:[#allocation5 + $0xe4] ss:$48 sps:$4 sm:$0xff]  }
 0x133   :  { %3024 = vmatpush1.bf16.msra.mxu1 %v15282_v45  ;;  %v15353_v45 = vld [vmem:[#allocation5 + $0x144] ss:$48 sps:$4 sm:$0xff]  }
 0x134   :  { %2857 = vmatmul.mubr.bf16.gmra.mrb[28].mxu0 %v16251_v49  ;;  %3025 = vmatprep.subr.bf16.mxu1 %v15290_v47  ;;  %v15351_v47 = vld [vmem:[#allocation5 + $0x140] ss:$48 sps:$4 sm:$0xff]  }
 0x135   :  { %2880 = vmatpush1.bf16.msra.mxu0 %v15261_v42  ;;  %2899 = vmatprep.mubr.bf16.mxu0 %v16253_v53  ;;  %v15344_v42 = vld [vmem:[#allocation5 + $0x8c] ss:$48 sps:$4 sm:$0xff]  }
 0x136   :  { %2881 = vmatprep.subr.bf16.mxu0 %v15269_v44  ;;  %3003 = vmatmul.mubr.bf16.gmra.mrb[28].mxu1 %v16251_v49  ;;  %v15342_v44 = vld [vmem:[#allocation5 + $0x88] ss:$48 sps:$4 sm:$0xff]  }
 0x137   :  { %3026 = vmatpush1.bf16.msra.mxu1 %v15288_v50  ;;  %3045 = vmatprep.mubr.bf16.mxu1 %v16253_v53  ;;  %v15348_v50 = vld [vmem:[#allocation5 + $0xe8] ss:$48 sps:$4 sm:$0xff]  }
 0x138   :  { %3027 = vmatprep.subr.bf16.mxu1 %v15296_v54  ;;  %v15357_v54 = vld [vmem:[#allocation5 + $0x1a0] ss:$48 sps:$4 sm:$0xff]  }
 0x139   :  { %2882 = vmatpush1.bf16.msra.mxu0 %v15267_v46  ;;  %v15350_v46 = vld [vmem:[#allocation5 + $0xec] ss:$48 sps:$4 sm:$0xff]  }
 0x13a   :  { %2883 = vmatprep.subr.bf16.mxu0 %v15275_v48  ;;  %v15359_v48 = vld [vmem:[#allocation5 + $0x1a4] ss:$48 sps:$4 sm:$0xff]  }
 0x13b   :  { %3028 = vmatpush1.bf16.msra.mxu1 %v15294_v58  ;;  %v15362_v58 = vld [vmem:[#allocation5 + $0x1ac] ss:$48 sps:$4 sm:$0xff]  }
 0x13c   :  { %3029 = vmatprep.subr.bf16.mxu1 %v15302_v59  ;;  %v15363_v59 = vld [vmem:[#allocation5 + $0x200] ss:$48 sps:$4 sm:$0xff]  }
 0x13d   :  { %2884 = vmatpush1.bf16.msra.mxu0 %v15273_v51  ;;  %v15356_v51 = vld [vmem:[#allocation5 + $0x14c] ss:$48 sps:$4 sm:$0xff]  }
 0x13e   :  { %2885 = vmatprep.subr.bf16.mxu0 %v15281_v55  ;;  %v15365_v55 = vld [vmem:[#allocation5 + $0x204] ss:$48 sps:$4 sm:$0xff]  }
 0x13f   :  { %3030 = vmatpush1.bf16.msra.mxu1 %v15300_v62  ;;  %v15368_v62 = vld [vmem:[#allocation5 + $0x20c] ss:$48 sps:$4 sm:$0xff]  }
 0x140   :  { %3031 = vmatprep.subr.bf16.mxu1 %v15308_v63  ;;  %v15369_v63 = vld [vmem:[#allocation5 + $0x260] ss:$48 sps:$4 sm:$0xff]  }
 0x141   :  { %2886 = vmatpush1.bf16.msra.mxu0 %v15279_v56  ;;  %v15354_v56 = vld [vmem:[#allocation5 + $0x148] ss:$48 sps:$4 sm:$0xff]  }
 0x142   :  { %2887 = vmatprep.subr.bf16.mxu0 %v15287_v60  ;;  %v15371_v60 = vld [vmem:[#allocation5 + $0x264] ss:$48 sps:$4 sm:$0xff]  }
 0x143   :  { %3032 = vmatpush1.bf16.msra.mxu1 %v15306_v2  ;;  %v15374_v2 = vld [vmem:[#allocation5 + $0x26c] ss:$48 sps:$4 sm:$0xff]  }
 0x144   :  { %3033 = vmatprep.subr.bf16.mxu1 %v15314_v5  ;;  %v15375_v5 = vld [vmem:[#allocation5 + $0x2c0] ss:$48 sps:$4 sm:$0xff]  }
 0x145   :  { %2888 = vmatpush1.bf16.msra.mxu0 %v15285_v61  ;;  %v15360_v61 = vld [vmem:[#allocation5 + $0x1a8] ss:$48 sps:$4 sm:$0xff]  }
 0x146   :  { %2889 = vmatprep.subr.bf16.mxu0 %v15293_v0  ;;  %v15377_v0 = vld [vmem:[#allocation5 + $0x2c4] ss:$48 sps:$4 sm:$0xff]  }
 0x147   :  { %3034 = vmatpush1.bf16.msra.mxu1 %v15312_v9  ;;  %v15380_v9 = vld [vmem:[#allocation5 + $0x2cc] ss:$48 sps:$4 sm:$0xff]  }
 0x148   :  { %3035 = vmatprep.subr.bf16.mxu1 %v15320_v10  ;;  %v15381_v10 = vld [vmem:[#allocation5 + $0x320] ss:$48 sps:$4 sm:$0xff]  }
 0x149   :  { %2890 = vmatpush1.bf16.msra.mxu0 %v15291_v1  ;;  %v15366_v1 = vld [vmem:[#allocation5 + $0x208] ss:$48 sps:$4 sm:$0xff]  }
 0x14a   :  { %2891 = vmatprep.subr.bf16.mxu0 %v15299_v6  ;;  %v15383_v6 = vld [vmem:[#allocation5 + $0x324] ss:$48 sps:$4 sm:$0xff]  }
 0x14b   :  { %3036 = vmatpush1.bf16.msra.mxu1 %v15318_v14  ;;  %v15386_v14 = vld [vmem:[#allocation5 + $0x32c] ss:$48 sps:$4 sm:$0xff]  }
 0x14c   :  { %3037 = vmatprep.subr.bf16.mxu1 %v15323_v15  ;;  %v15387_v15 = vld [vmem:[#allocation5 + $0x380] ss:$48 sps:$4 sm:$0xff]  }
 0x14d   :  { %2892 = vmatpush1.bf16.msra.mxu0 %v15297_v7  ;;  %v15372_v7 = vld [vmem:[#allocation5 + $0x268] ss:$48 sps:$4 sm:$0xff]  }
 0x14e   :  { %2893 = vmatprep.subr.bf16.mxu0 %v15305_v12  ;;  %v15389_v12 = vld [vmem:[#allocation5 + $0x384] ss:$48 sps:$4 sm:$0xff]  }
 0x14f   :  { %3038 = vmatpush1.bf16.msra.mxu1 %v15321_v19  ;;  %v15392_v19 = vld [vmem:[#allocation5 + $0x38c] ss:$48 sps:$4 sm:$0xff]  }
 0x150   :  { %3039 = vmatprep.subr.bf16.mxu1 %v15326_v21  ;;  %v15393_v21 = vld [vmem:[#allocation5 + $0x3e0] ss:$48 sps:$4 sm:$0xff]  }
 0x151   :  { %2894 = vmatpush1.bf16.msra.mxu0 %v15303_v13  ;;  %v15378_v13 = vld [vmem:[#allocation5 + $0x2c8] ss:$48 sps:$4 sm:$0xff]  }
 0x152   :  { %2895 = vmatprep.subr.bf16.mxu0 %v15311_v16  ;;  %v15395_v16 = vld [vmem:[#allocation5 + $0x3e4] ss:$48 sps:$4 sm:$0xff]  }
 0x153   :  { %3040 = vmatpush1.bf16.msra.mxu1 %v15324_v25  ;;  %v15398_v25 = vld [vmem:[#allocation5 + $0x3ec] ss:$48 sps:$4 sm:$0xff]  }
 0x154   :  { %3041 = vmatprep.subr.bf16.mxu1 %v15329_v26  ;;  %v15399_v26 = vld [vmem:[#allocation5 + $0x440] ss:$48 sps:$4 sm:$0xff]  }
 0x155   :  { %2896 = vmatpush1.bf16.msra.mxu0 %v15309_v18  ;;  %v15384_v18 = vld [vmem:[#allocation5 + $0x328] ss:$48 sps:$4 sm:$0xff]  }
 0x156   :  { %2897 = vmatprep.subr.bf16.mxu0 %v15317_v22  ;;  %v15401_v22 = vld [vmem:[#allocation5 + $0x444] ss:$48 sps:$4 sm:$0xff]  }
 0x157   :  { %3042 = vmatpush1.bf16.msra.mxu1 %v15327_v28  ;;  %v15396_v28 = vld [vmem:[#allocation5 + $0x3e8] ss:$48 sps:$4 sm:$0xff]  }
 0x158   :  { %3043 = vmatprep.subr.bf16.mxu1 %v15332_v29  ;;  %v15405_v29 = vld [vmem:[#allocation5 + $0x4a0] ss:$48 sps:$4 sm:$0xff]  }
 0x159   :  { %2898 = vmatpush1.bf16.msra.mxu0 %v15315_v23  ;;  %v15390_v23 = vld [vmem:[#allocation5 + $0x388] ss:$48 sps:$4 sm:$0xff]  }
 0x15a   :  { %3086 = vmatprep.subr.bf16.mxu0 %v15335_v27  ;;  %v15407_v27 = vld [vmem:[#allocation5 + $0x4a4] ss:$48 sps:$4 sm:$0xff]  }
 0x15b   :  { %3044 = vmatpush1.bf16.msra.mxu1 %v15330_v32  ;;  %v15410_v32 = vld [vmem:[#allocation5 + $0x4ac] ss:$48 sps:$4 sm:$0xff]  }
 0x15c   :  { %2900 = vmatmul.mubr.bf16.vlgmr.msra.gmra.mrb[16].mxu0 %v16261_v35  ;;  %3232 = vmatprep.subr.bf16.mxu1 %v15338_v33  ;;  %v15411_v33 = vld [vmem:[#allocation5 + $0x500] ss:$48 sps:$4 sm:$0xff]  }
 0x15d   :  { %2909 = vmatprep.mubr.bf16.mxu0 %v16263_v40  ;;  %3087 = vmatpush1.bf16.msra.mxu0 %v15333_v30  ;;  %v15413_v30 = vld [vmem:[#allocation5 + $0x504] ss:$48 sps:$4 sm:$0xff]  }
 0x15e   :  { %3088 = vmatprep.subr.bf16.mxu0 %v15341_v31  ;;  %3046 = vmatmul.mubr.bf16.vlgmr.msra.gmra.mrb[16].mxu1 %v16261_v35  ;;  %v15402_v31 = vld [vmem:[#allocation5 + $0x448] ss:$48 sps:$4 sm:$0xff]  }
 0x15f   :  { %3233 = vmatpush1.bf16.msra.mxu1 %v15336_v39  ;;  %3055 = vmatprep.mubr.bf16.mxu1 %v16263_v40  ;;  %v15416_v39 = vld [vmem:[#allocation5 + $0x50c] ss:$48 sps:$4 sm:$0xff]  }
 0x160   :  { %3234 = vmatprep.subr.bf16.mxu1 %v15344_v42  ;;  %v15417_v42 = vld [vmem:[#allocation5 + $0x560] ss:$48 sps:$4 sm:$0xff]  }
 0x161   :  { %3089 = vmatpush1.bf16.msra.mxu0 %v15339_v36  ;;  %v15419_v36 = vld [vmem:[#allocation5 + $0x564] ss:$48 sps:$4 sm:$0xff]  }
 0x162   :  { %3090 = vmatprep.subr.bf16.mxu0 %v15347_v37  ;;  %v15408_v37 = vld [vmem:[#allocation5 + $0x4a8] ss:$48 sps:$4 sm:$0xff]  }
 0x163   :  { %3235 = vmatpush1.bf16.msra.mxu1 %v15342_v44  ;;  %v15414_v44 = vld [vmem:[#allocation5 + $0x508] ss:$48 sps:$4 sm:$0xff]  }
 0x164   :  { %2910 = vmatmul.mubr.bf16.gmra.mrb[20].mxu0 %v16267_v52  ;;  %3236 = vmatprep.subr.bf16.mxu1 %v15350_v46  ;;  %v15423_v46 = vld [vmem:[#allocation5 + $0x5c0] ss:$48 sps:$4 sm:$0xff]  }
 0x165   :  { %2919 = vmatprep.mubr.bf16.mxu0 %v16269_v57  ;;  %3091 = vmatpush1.bf16.msra.mxu0 %v15345_v43  ;;  %v15425_v43 = vld [vmem:[#allocation5 + $0x5c4] ss:$48 sps:$4 sm:$0xff]  }
 0x166   :  { %3092 = vmatprep.subr.bf16.mxu0 %v15353_v45  ;;  %3056 = vmatmul.mubr.bf16.gmra.mrb[20].mxu1 %v16267_v52  ;;  %v15422_v45 = vld [vmem:[#allocation5 + $0x56c] ss:$48 sps:$4 sm:$0xff]  }
 0x167   :  { %3237 = vmatpush1.bf16.msra.mxu1 %v15348_v50  ;;  %3065 = vmatprep.mubr.bf16.mxu1 %v16269_v57  ;;  %v15428_v50 = vld [vmem:[#allocation5 + $0x5cc] ss:$48 sps:$4 sm:$0xff]  }
 0x168   :  { %3238 = vmatprep.subr.bf16.mxu1 %v15356_v51  ;;  %v15429_v51 = vld [vmem:[#allocation5 + $0x620] ss:$48 sps:$4 sm:$0xff]  }
 0x169   :  { %3093 = vmatpush1.bf16.msra.mxu0 %v15351_v47  ;;  %v15431_v47 = vld [vmem:[#allocation5 + $0x624] ss:$48 sps:$4 sm:$0xff]  }
 0x16a   :  { %3094 = vmatprep.subr.bf16.mxu0 %v15359_v48  ;;  %v15420_v48 = vld [vmem:[#allocation5 + $0x568] ss:$48 sps:$4 sm:$0xff]  }
 0x16b   :  { %3239 = vmatpush1.bf16.msra.mxu1 %v15354_v56  ;;  %v15434_v56 = vld [vmem:[#allocation5 + $0x62c] ss:$48 sps:$4 sm:$0xff]  }
 0x16c   :  { %2920 = vmatmul.mubr.bf16.gmra.mrb[24].mxu0 %v16275_v3  ;;  %3240 = vmatprep.subr.bf16.mxu1 %v15362_v58  ;;  %v15435_v58 = vld [vmem:[#allocation5 + $0x680] ss:$48 sps:$4 sm:$0xff]  }
 0x16d   :  { %2929 = vmatprep.mubr.bf16.mxu0 %v16277_v8  ;;  %3095 = vmatpush1.bf16.msra.mxu0 %v15357_v54  ;;  %v15437_v54 = vld [vmem:[#allocation5 + $0x684] ss:$48 sps:$4 sm:$0xff]  }
 0x16e   :  { %3096 = vmatprep.subr.bf16.mxu0 %v15365_v55  ;;  %3066 = vmatmul.mubr.bf16.gmra.mrb[24].mxu1 %v16275_v3  ;;  %v15426_v55 = vld [vmem:[#allocation5 + $0x5c8] ss:$48 sps:$4 sm:$0xff]  }
 0x16f   :  { %3241 = vmatpush1.bf16.msra.mxu1 %v15360_v61  ;;  %3075 = vmatprep.mubr.bf16.mxu1 %v16277_v8  ;;  %v15440_v61 = vld [vmem:[#allocation5 + $0x68c] ss:$48 sps:$4 sm:$0xff]  }
 0x170   :  { %3242 = vmatprep.subr.bf16.mxu1 %v15368_v62  ;;  %v15441_v62 = vld [vmem:[#allocation5 + $0x6e0] ss:$48 sps:$4 sm:$0xff]  }
 0x171   :  { %3097 = vmatpush1.bf16.msra.mxu0 %v15363_v59  ;;  %v15443_v59 = vld [vmem:[#allocation5 + $0x6e4] ss:$48 sps:$4 sm:$0xff]  }
 0x172   :  { %3098 = vmatprep.subr.bf16.mxu0 %v15371_v60  ;;  %v15432_v60 = vld [vmem:[#allocation5 + $0x628] ss:$48 sps:$4 sm:$0xff]  }
 0x173   :  { %3243 = vmatpush1.bf16.msra.mxu1 %v15366_v1  ;;  %v15446_v1 = vld [vmem:[#allocation5 + $0x6ec] ss:$48 sps:$4 sm:$0xff]  }
 0x174   :  { %2930 = vmatmul.mubr.bf16.gmra.mrb[28].mxu0 %v16283_v17  ;;  %3244 = vmatprep.subr.bf16.mxu1 %v15374_v2  ;;  %v15447_v2 = vld [vmem:[#allocation5 + $0x740] ss:$48 sps:$4 sm:$0xff]  }
 0x175   :  { %3099 = vmatpush1.bf16.msra.mxu0 %v15369_v63  ;;  %3118 = vmatprep.mubr.bf16.mxu0 %v16225_v41  ;;  %v15449_v63 = vld [vmem:[#allocation5 + $0x744] ss:$48 sps:$4 sm:$0xff]  }
 0x176   :  { %3100 = vmatprep.subr.bf16.mxu0 %v15377_v0  ;;  %3076 = vmatmul.mubr.bf16.gmra.mrb[28].mxu1 %v16283_v17  ;;  %v15438_v0 = vld [vmem:[#allocation5 + $0x688] ss:$48 sps:$4 sm:$0xff]  }
 0x177   :  { %3245 = vmatpush1.bf16.msra.mxu1 %v15372_v7  ;;  %3264 = vmatprep.mubr.bf16.mxu1 %v16225_v41  ;;  %v15404_v41 = vld [vmem:[#allocation5 + $0x44c] ss:$48 sps:$4 sm:$0xff]   ;;  %v15453_v7 = vld [vmem:[#allocation5 + $0x7a0] ss:$48 sps:$4 sm:$0xff]  }
 0x178   :  { %3246 = vmatprep.subr.bf16.mxu1 %v15380_v9  ;;  %v15461_v9 = vld [vmem:[#allocation5 + $0x804] ss:$48 sps:$4 sm:$0xff]  }
 0x179   :  { %3101 = vmatpush1.bf16.msra.mxu0 %v15375_v5  ;;  %v15455_v5 = vld [vmem:[#allocation5 + $0x7a4] ss:$48 sps:$4 sm:$0xff]  }
 0x17a   :  { %3102 = vmatprep.subr.bf16.mxu0 %v15383_v6  ;;  %v15444_v6 = vld [vmem:[#allocation5 + $0x6e8] ss:$48 sps:$4 sm:$0xff]  }
 0x17b   :  { %3247 = vmatpush1.bf16.msra.mxu1 %v15378_v13 }
 0x17c   :  { %3248 = vmatprep.subr.bf16.mxu1 %v15386_v14  ;;  %v15467_v14 = vld [vmem:[#allocation5 + $0x864] ss:$48 sps:$4 sm:$0xff]  }
 0x17d   :  { %3103 = vmatpush1.bf16.msra.mxu0 %v15381_v10  ;;  %v15458_v10 = vld [vmem:[#allocation5 + $0x7ac] ss:$48 sps:$4 sm:$0xff]  }
 0x17e   :  { %3104 = vmatprep.subr.bf16.mxu0 %v15389_v12  ;;  %v15459_v12 = vld [vmem:[#allocation5 + $0x800] ss:$48 sps:$4 sm:$0xff]  }
 0x17f   :  { %3249 = vmatpush1.bf16.msra.mxu1 %v15384_v18 }
 0x180   :  { %3250 = vmatprep.subr.bf16.mxu1 %v15392_v19  ;;  %v15465_v19 = vld [vmem:[#allocation5 + $0x860] ss:$48 sps:$4 sm:$0xff]  }
 0x181   :  { %3105 = vmatpush1.bf16.msra.mxu0 %v15387_v15 }
 0x182   :  { %3106 = vmatprep.subr.bf16.mxu0 %v15395_v16 }
 0x183   :  { %3251 = vmatpush1.bf16.msra.mxu1 %v15390_v23  ;;  %v15470_v23 = vld [vmem:[#allocation5 + $0x86c] ss:$48 sps:$4 sm:$0xff]  }
 0x184   :  { %3252 = vmatprep.subr.bf16.mxu1 %v15398_v25 }
 0x185   :  { %3107 = vmatpush1.bf16.msra.mxu0 %v15393_v21  ;;  %v15473_v21 = vld [vmem:[#allocation5 + $0x8c4] ss:$48 sps:$4 sm:$0xff]  }
 0x186   :  { %3108 = vmatprep.subr.bf16.mxu0 %v15401_v22  ;;  %v15462_v22 = vld [vmem:[#allocation5 + $0x808] ss:$48 sps:$4 sm:$0xff]  }
 0x187   :  { %3253 = vmatpush1.bf16.msra.mxu1 %v15396_v28 }
 0x188   :  { %3254 = vmatprep.subr.bf16.mxu1 %v15404_v41 }
 0x189   :  { %3109 = vmatpush1.bf16.msra.mxu0 %v15399_v26  ;;  %v15471_v26 = vld [vmem:[#allocation5 + $0x8c0] ss:$48 sps:$4 sm:$0xff]  }
 0x18a   :  { %3110 = vmatprep.subr.bf16.mxu0 %v15407_v27 }
 0x18b   :  { %3255 = vmatpush1.bf16.msra.mxu1 %v15402_v31 }
 0x18c   :  { %3256 = vmatprep.subr.bf16.mxu1 %v15410_v32  ;;  %v15476_v32 = vld [vmem:[#allocation5 + $0x8cc] ss:$48 sps:$4 sm:$0xff]  }
 0x18d   :  { %3111 = vmatpush1.bf16.msra.mxu0 %v15405_v29 }
 0x18e   :  { %3112 = vmatprep.subr.bf16.mxu0 %v15413_v30 }
 0x18f   :  { %3257 = vmatpush1.bf16.msra.mxu1 %v15408_v37  ;;  %v15485_v37 = vld [vmem:[#allocation5 + $0x984] ss:$48 sps:$4 sm:$0xff]  }
 0x190   :  { %3258 = vmatprep.subr.bf16.mxu1 %v15416_v39  ;;  %v15474_v39 = vld [vmem:[#allocation5 + $0x8c8] ss:$48 sps:$4 sm:$0xff]  }
 0x191   :  { %3113 = vmatpush1.bf16.msra.mxu0 %v15411_v33 }
 0x192   :  { %3114 = vmatprep.subr.bf16.mxu0 %v15419_v36  ;;  %v15477_v36 = vld [vmem:[#allocation5 + $0x920] ss:$48 sps:$4 sm:$0xff]  }
 0x193   :  { %3259 = vmatpush1.bf16.msra.mxu1 %v15414_v44 }
 0x194   :  { %3260 = vmatprep.subr.bf16.mxu1 %v15422_v45 }
 0x195   :  { %3115 = vmatpush1.bf16.msra.mxu0 %v15417_v42  ;;  %v15482_v42 = vld [vmem:[#allocation5 + $0x92c] ss:$48 sps:$4 sm:$0xff]  }
 0x196   :  { %3116 = vmatprep.subr.bf16.mxu0 %v15425_v43  ;;  %v15483_v43 = vld [vmem:[#allocation5 + $0x980] ss:$48 sps:$4 sm:$0xff]  }
 0x197   :  { %3261 = vmatpush1.bf16.msra.mxu1 %v15420_v48 }
 0x198   :  { %3262 = vmatprep.subr.bf16.mxu1 %v15428_v50 }
 0x199   :  { %3117 = vmatpush1.bf16.msra.mxu0 %v15423_v46  ;;  %v15491_v46 = vld [vmem:[#allocation5 + $0x9e4] ss:$48 sps:$4 sm:$0xff]  }
 0x19a   :  { %3159 = vmatprep.subr.bf16.mxu0 %v15431_v47 }
 0x19b   :  { %3263 = vmatpush1.bf16.msra.mxu1 %v15426_v55 }
 0x19c   :  { %3119 = vmatmul.mubr.bf16.vlgmr.msra.gmra.mrb[32].mxu0 %v16229_v4  ;;  %3305 = vmatprep.subr.bf16.mxu1 %v15434_v56  ;;  %v15489_v56 = vld [vmem:[#allocation5 + $0x9e0] ss:$48 sps:$4 sm:$0xff]  }
 0x19d   :  { %3160 = vmatpush1.bf16.msra.mxu0 %v15429_v51  ;;  %3128 = vmatprep.mubr.bf16.mxu0 %v16231_v11 }
 0x19e   :  { %3161 = vmatprep.subr.bf16.mxu0 %v15437_v54  ;;  %3265 = vmatmul.mubr.bf16.vlgmr.msra.gmra.mrb[32].mxu1 %v16229_v4  ;;  %v15452_v4 = vld [vmem:[#allocation5 + $0x74c] ss:$48 sps:$4 sm:$0xff]  }
 0x19f   :  { %3306 = vmatpush1.bf16.msra.mxu1 %v15432_v60  ;;  %3274 = vmatprep.mubr.bf16.mxu1 %v16231_v11  ;;  %v15450_v11 = vld [vmem:[#allocation5 + $0x748] ss:$48 sps:$4 sm:$0xff]   ;;  %v15494_v60 = vld [vmem:[#allocation5 + $0x9ec] ss:$48 sps:$4 sm:$0xff]  }
 0x1a0   :  { %3307 = vmatprep.subr.bf16.mxu1 %v15440_v61  ;;  %v15495_v61 = vld [vmem:[#allocation5 + $0xa40] ss:$48 sps:$4 sm:$0xff]  }
 0x1a1   :  { %3162 = vmatpush1.bf16.msra.mxu0 %v15435_v58  ;;  %v15497_v58 = vld [vmem:[#allocation5 + $0xa44] ss:$48 sps:$4 sm:$0xff]  }
 0x1a2   :  { %3163 = vmatprep.subr.bf16.mxu0 %v15443_v59  ;;  %v15486_v59 = vld [vmem:[#allocation5 + $0x988] ss:$48 sps:$4 sm:$0xff]  }
 0x1a3   :  { %3308 = vmatpush1.bf16.msra.mxu1 %v15438_v0  ;;  %v15503_v0 = vld [vmem:[#allocation5 + $0xaa4] ss:$48 sps:$4 sm:$0xff]  }
 0x1a4   :  { %3129 = vmatmul.mubr.bf16.gmra.mrb[36].mxu0 %v16235_v20  ;;  %3309 = vmatprep.subr.bf16.mxu1 %v15446_v1 }
 0x1a5   :  { %3164 = vmatpush1.bf16.msra.mxu0 %v15441_v62  ;;  %3138 = vmatprep.mubr.bf16.mxu0 %v16237_v24 }
 0x1a6   :  { %3165 = vmatprep.subr.bf16.mxu0 %v15449_v63  ;;  %3275 = vmatmul.mubr.bf16.gmra.mrb[36].mxu1 %v16235_v20  ;;  %v15456_v20 = vld [vmem:[#allocation5 + $0x7a8] ss:$48 sps:$4 sm:$0xff]  }
 0x1a7   :  { %3310 = vmatpush1.bf16.msra.mxu1 %v15444_v6  ;;  %3284 = vmatprep.mubr.bf16.mxu1 %v16237_v24  ;;  %v15464_v24 = vld [vmem:[#allocation5 + $0x80c] ss:$48 sps:$4 sm:$0xff]  }
 0x1a8   :  { %3311 = vmatprep.subr.bf16.mxu1 %v15452_v4 }
 0x1a9   :  { %3166 = vmatpush1.bf16.msra.mxu0 %v15447_v2 }
 0x1aa   :  { %3167 = vmatprep.subr.bf16.mxu0 %v15455_v5  ;;  %v15492_v5 = vld [vmem:[#allocation5 + $0x9e8] ss:$48 sps:$4 sm:$0xff]  }
 0x1ab   :  { %3312 = vmatpush1.bf16.msra.mxu1 %v15450_v11 }
 0x1ac   :  { %3139 = vmatmul.mubr.bf16.gmra.mrb[40].mxu0 %v16243_v34  ;;  %3313 = vmatprep.subr.bf16.mxu1 %v15458_v10  ;;  %v15501_v10 = vld [vmem:[#allocation5 + $0xaa0] ss:$48 sps:$4 sm:$0xff]  }
 0x1ad   :  { %3168 = vmatpush1.bf16.msra.mxu0 %v15453_v7  ;;  %3148 = vmatprep.mubr.bf16.mxu0 %v16245_v38  ;;  %v15500_v7 = vld [vmem:[#allocation5 + $0xa4c] ss:$48 sps:$4 sm:$0xff]  }
 0x1ae   :  { %3169 = vmatprep.subr.bf16.mxu0 %v15461_v9  ;;  %3285 = vmatmul.mubr.bf16.gmra.mrb[40].mxu1 %v16243_v34  ;;  %v15479_v34 = vld [vmem:[#allocation5 + $0x924] ss:$48 sps:$4 sm:$0xff]  }
 0x1af   :  { %v16333_v13 = vpop.f32.mrb[0].mxu0  ;;  %3314 = vmatpush1.bf16.msra.mxu1 %v15456_v20  ;;  %3294 = vmatprep.mubr.bf16.mxu1 %v16245_v38  ;;  %v15468_v38 = vld [vmem:[#allocation5 + $0x868] ss:$48 sps:$4 sm:$0xff]   ;;  %v15506_v20 = vld [vmem:[#allocation5 + $0xaac] ss:$48 sps:$4 sm:$0xff]  }
 0x1b0   :  { %v16335_v15 = vpop.f32.mrb[1].mxu0  ;;  %3315 = vmatprep.subr.bf16.mxu1 %v15464_v24  ;;  %v15507_v24 = vld [vmem:[#allocation5 + $0xb00] ss:$48 sps:$4 sm:$0xff]  }
 0x1b1   :  { %v16337_v16 = vpop.f32.mrb[2].mxu0  ;;  %3170 = vmatpush1.bf16.msra.mxu0 %v15459_v12  ;;  %v16344_v25 = vpop.f32.mrb[0].mxu1  ;;  %v15509_v12 = vld [vmem:[#allocation5 + $0xb04] ss:$48 sps:$4 sm:$0xff]  }
 0x1b2   :  { %v16339_v18 = vpop.f32.mrb[3].mxu0  ;;  %3171 = vmatprep.subr.bf16.mxu0 %v15467_v14  ;;  %18565 = vst [vmem:[#allocation16_spill] sm:$0xff] %v16344_v25  ;;  %v16349_v28 = vpop.f32.mrb[1].mxu1  ;;  %v15498_v14 = vld [vmem:[#allocation5 + $0xa48] ss:$48 sps:$4 sm:$0xff]  }
 0x1b3   :  { %18566 = vst [vmem:[#allocation17_spill] sm:$0xff] %v16349_v28  ;;  %v16353_v29 = vpop.f32.mrb[2].mxu1  ;;  %3316 = vmatpush1.bf16.msra.mxu1 %v15462_v22 }
 0x1b4   :  { %3149 = vmatmul.mubr.bf16.gmra.mrb[44].mxu0 %v16251_v49  ;;  %18567 = vst [vmem:[#allocation18_spill] sm:$0xff] %v16353_v29  ;;  %v16357_v31 = vpop.f32.mrb[3].mxu1  ;;  %3317 = vmatprep.subr.bf16.mxu1 %v15470_v23  ;;  %v15504_v23 = vld [vmem:[#allocation5 + $0xaa8] ss:$48 sps:$4 sm:$0xff]  }
 0x1b5   :  { %3172 = vmatpush1.bf16.msra.mxu0 %v15465_v19  ;;  %3191 = vmatprep.mubr.bf16.mxu0 %v16253_v53  ;;  %18568 = vst [vmem:[#allocation19_spill] sm:$0xff] %v16357_v31 }
 0x1b6   :  { %3173 = vmatprep.subr.bf16.mxu0 %v15473_v21  ;;  %3295 = vmatmul.mubr.bf16.gmra.mrb[44].mxu1 %v16251_v49  ;;  %v15480_v49 = vld [vmem:[#allocation5 + $0x928] ss:$48 sps:$4 sm:$0xff]   ;;  %v15515_v21 = vld [vmem:[#allocation5 + $0xb64] ss:$48 sps:$4 sm:$0xff]  }
 0x1b7   :  { %v16347_v27 = vpop.f32.mrb[4].mxu0  ;;  %3318 = vmatpush1.bf16.msra.mxu1 %v15468_v38  ;;  %3337 = vmatprep.mubr.bf16.mxu1 %v16253_v53  ;;  %v15488_v53 = vld [vmem:[#allocation5 + $0x98c] ss:$48 sps:$4 sm:$0xff]  }
 0x1b8   :  { %v16351_v41 = vpop.f32.mrb[5].mxu0  ;;  %3319 = vmatprep.subr.bf16.mxu1 %v15476_v32  ;;  %v15513_v32 = vld [vmem:[#allocation5 + $0xb60] ss:$48 sps:$4 sm:$0xff]  }
 0x1b9   :  { %v16355_v30 = vpop.f32.mrb[6].mxu0  ;;  %3174 = vmatpush1.bf16.msra.mxu0 %v15471_v26  ;;  %v16363_v44 = vpop.f32.mrb[4].mxu1 }
 0x1ba   :  { %v16359_v33 = vpop.f32.mrb[7].mxu0  ;;  %3175 = vmatprep.subr.bf16.mxu0 %v15479_v34  ;;  %18569 = vst [vmem:[#allocation20_spill] sm:$0xff] %v16363_v44  ;;  %v16367_v47 = vpop.f32.mrb[5].mxu1  ;;  %v15512_v34 = vld [vmem:[#allocation5 + $0xb0c] ss:$48 sps:$4 sm:$0xff]  }
 0x1bb   :  { %18570 = vst [vmem:[#allocation21_spill] sm:$0xff] %v16367_v47  ;;  %3320 = vmatpush1.bf16.msra.mxu1 %v15474_v39  ;;  %v16371_v50 = vpop.f32.mrb[6].mxu1  ;;  %v15518_v39 = vld [vmem:[#allocation5 + $0xb6c] ss:$48 sps:$4 sm:$0xff]  }
 0x1bc   :  { %18571 = vst [vmem:[#allocation22_spill] sm:$0xff] %v16371_v50  ;;  %3321 = vmatprep.subr.bf16.mxu1 %v15482_v42  ;;  %v16375_v54 = vpop.f32.mrb[7].mxu1  ;;  %v15519_v42 = vld [vmem:[#allocation5 + $0xbc0] ss:$48 sps:$4 sm:$0xff]  }
 0x1bd   :  { %3176 = vmatpush1.bf16.msra.mxu0 %v15477_v36  ;;  %18572 = vst [vmem:[#allocation23_spill] sm:$0xff] %v16375_v54  ;;  %v15521_v36 = vld [vmem:[#allocation5 + $0xbc4] ss:$48 sps:$4 sm:$0xff]  }
 0x1be   :  { %3177 = vmatprep.subr.bf16.mxu0 %v15485_v37  ;;  %v15510_v37 = vld [vmem:[#allocation5 + $0xb08] ss:$48 sps:$4 sm:$0xff]  }
 0x1bf   :  { %v16365_v45 = vpop.f32.mrb[8].mxu0  ;;  %3322 = vmatpush1.bf16.msra.mxu1 %v15480_v49  ;;  %v18548_v49 = vmov 0.0  }
 0x1c0   :  { %v16369_v48 = vpop.f32.mrb[9].mxu0  ;;  %3323 = vmatprep.subr.bf16.mxu1 %v15488_v53  ;;  %v15522_v53 = vld [vmem:[#allocation5 + $0xbc8] ss:$48 sps:$4 sm:$0xff]  }
 0x1c1   :  { %v16373_v51 = vpop.f32.mrb[10].mxu0  ;;  %3178 = vmatpush1.bf16.msra.mxu0 %v15483_v43  ;;  %v16379_v62 = vpop.f32.mrb[8].mxu1  ;;  %v15516_v43 = vld [vmem:[#allocation5 + $0xb68] ss:$48 sps:$4 sm:$0xff]  }
 0x1c2   :  { %v16377_v55 = vpop.f32.mrb[11].mxu0  ;;  %3179 = vmatprep.subr.bf16.mxu0 %v15491_v46  ;;  %18574 = vst [vmem:[#allocation25_spill] sm:$0xff] %v16379_v62  ;;  %v16383_v1 = vpop.f32.mrb[9].mxu1  ;;  %v15524_v46 = vld [vmem:[#allocation5 + $0xbcc] ss:$48 sps:$4 sm:$0xff]  }
 0x1c3   :  { %18573 = vst [vmem:[#allocation24_spill] sm:$0xff] %v16377_v55  ;;  %18575 = vst [vmem:[#allocation26_spill] sm:$0xff] %v16383_v1  ;;  %3324 = vmatpush1.bf16.msra.mxu1 %v15486_v59  ;;  %v16387_v6 = vpop.f32.mrb[10].mxu1 }
 0x1c4   :  { %18577 = vst [vmem:[#allocation28_spill] sm:$0xff] %v16387_v6  ;;  %3325 = vmatprep.subr.bf16.mxu1 %v15494_v60  ;;  %v16391_v9 = vpop.f32.mrb[11].mxu1 }
 0x1c5   :  { %3180 = vmatpush1.bf16.msra.mxu0 %v15489_v56  ;;  %18578 = vst [vmem:[#allocation29_spill] sm:$0xff] %v16391_v9 }
 0x1c6   :  { %3181 = vmatprep.subr.bf16.mxu0 %v15497_v58 }
 0x1c7   :  { %v16381_v63 = vpop.f32.mrb[12].mxu0  ;;  %3326 = vmatpush1.bf16.msra.mxu1 %v15492_v5 }
 0x1c8   :  { %v16385_v2 = vpop.f32.mrb[13].mxu0  ;;  %3327 = vmatprep.subr.bf16.mxu1 %v15500_v7 }
 0x1c9   :  { %18576 = vst [vmem:[#allocation27_spill] sm:$0xff] %v16385_v2  ;;  %v16389_v4 = vpop.f32.mrb[14].mxu0  ;;  %3182 = vmatpush1.bf16.msra.mxu0 %v15495_v61  ;;  %v16395_v19 = vpop.f32.mrb[12].mxu1 }
 0x1ca   :  { %v16393_v11 = vpop.f32.mrb[15].mxu0  ;;  %3183 = vmatprep.subr.bf16.mxu0 %v15503_v0  ;;  %18580 = vst [vmem:[#allocation31_spill] sm:$0xff] %v16395_v19  ;;  %v16397_v22 = vpop.f32.mrb[13].mxu1 }
 0x1cb   :  { %18579 = vst [vmem:[#allocation30_spill] sm:$0xff] %v16393_v11  ;;  %18581 = vst [vmem:[#allocation32_spill] sm:$0xff] %v16397_v22  ;;  %3328 = vmatpush1.bf16.msra.mxu1 %v15498_v14  ;;  %v16399_v26 = vpop.f32.mrb[14].mxu1 }
 0x1cc   :  { %18582 = vst [vmem:[#allocation33_spill] sm:$0xff] %v16399_v26  ;;  %3329 = vmatprep.subr.bf16.mxu1 %v15506_v20  ;;  %v16401_v38 = vpop.f32.mrb[15].mxu1 }
 0x1cd   :  { %3184 = vmatpush1.bf16.msra.mxu0 %v15501_v10  ;;  %18583 = vst [vmem:[#allocation34_spill] sm:$0xff] %v16401_v38 }
 0x1ce   :  { %3185 = vmatprep.subr.bf16.mxu0 %v15509_v12 }
 0x1cf   :  { %3330 = vmatpush1.bf16.msra.mxu1 %v15504_v23 }
 0x1d0   :  { %3331 = vmatprep.subr.bf16.mxu1 %v15512_v34 }
 0x1d1   :  { %3186 = vmatpush1.bf16.msra.mxu0 %v15507_v24 }
 0x1d2   :  { %3187 = vmatprep.subr.bf16.mxu0 %v15515_v21 }
 0x1d3   :  { %3332 = vmatpush1.bf16.msra.mxu1 %v15510_v37 }
 0x1d4   :  { %3333 = vmatprep.subr.bf16.mxu1 %v15518_v39 }
 0x1d5   :  { %3188 = vmatpush1.bf16.msra.mxu0 %v15513_v32 }
 0x1d6   :  { %3189 = vmatprep.subr.bf16.mxu0 %v15521_v36 }
 0x1d7   :  { %3334 = vmatpush1.bf16.msra.mxu1 %v15516_v43 }
 0x1d8   :  { %3335 = vmatprep.subr.bf16.mxu1 %v15524_v46 }
 0x1d9   :  { %3190 = vmatpush1.bf16.msra.mxu0 %v15519_v42 }
 0x1da   :  { %13749 = vmatprep.subr.bf16.mxu0 %v18548_v49 }
 0x1db   :  { %3336 = vmatpush1.bf16.msra.mxu1 %v15522_v53 }
 0x1dc   :  { %3192 = vmatmul.mubr.bf16.vlgmr.msra.gmra.mrb[32].mxu0 %v16261_v35  ;;  %13755 = vmatprep.subr.bf16.mxu1 %v18548_v49 }
 0x1dd   :  { %3201 = vmatprep.mubr.bf16.mxu0 %v16263_v40 }
 0x1de   :  { %3338 = vmatmul.mubr.bf16.vlgmr.msra.gmra.mrb[32].mxu1 %v16261_v35  ;;  %v522_v35 = vlaneseq }
 0x1df   :  { %3347 = vmatprep.mubr.bf16.mxu1 %v16263_v40 }
 0x1e0   :  { %v16423_v40 = vshrl.u32 %v522_v35, 7 }
 0x1e2   :  { %v548_v37 = vsub.s32 6, %v16423_v40  ;;  %v552_v53 = vsub.s32 7, %v16423_v40 }
 0x1e4   :  { %3202 = vmatmul.mubr.bf16.gmra.mrb[36].mxu0 %v16267_v52 }
 0x1e5   :  { %3211 = vmatprep.mubr.bf16.mxu0 %v16269_v57 }
 0x1e6   :  { %3348 = vmatmul.mubr.bf16.gmra.mrb[36].mxu1 %v16267_v52  ;;  %v540_v52 = vsub.s32 4, %v16423_v40 }
 0x1e7   :  { %3357 = vmatprep.mubr.bf16.mxu1 %v16269_v57  ;;  %v518_v57 = vld [vmem:[#allocation7] sm:$0xff] }
 0x1ec   :  { %3212 = vmatmul.mubr.bf16.gmra.mrb[40].mxu0 %v16275_v3 }
 0x1ed   :  { %3221 = vmatprep.mubr.bf16.mxu0 %v16277_v8 }
 0x1ee   :  { %3358 = vmatmul.mubr.bf16.gmra.mrb[40].mxu1 %v16275_v3  ;;  %v16426_v3 = vrot.slane %v518_v57, %v540_v52 }
 0x1ef   :  { %3367 = vmatprep.mubr.bf16.mxu1 %v16277_v8  ;;  %v16429_v8 = vsub.s32 0, %v16423_v40 }
 0x1f1   :  { %18584 = vst [vmem:[#allocation35_spill] sm:$0xff] %v16429_v8  ;;  %v16435_v60 = vrot.slane %v518_v57, %v16429_v8 }
 0x1f3   :  { %v14517_v12 = vadd.f32 %v16333_v13, %v16435_v60  ;;  %v14519_v23 = vadd.f32 %v16337_v16, %v16435_v60 }
 0x1f4   :  { %3222 = vmatmul.mubr.bf16.gmra.mrb[44].mxu0 %v16283_v17 }
 0x1f5   :  { %13751 = vmatprep.mubr.msk.bf16.mxu0 %vm16128_vm0, %v18548_v49  ;;  %v16466_v42 = vpack.c.bf16 %v14517_v12, %v14517_v12  ;;  %v16474_v35 = vpack.c.bf16 %v14519_v23, %v14519_v23  ;;  %v14523_v23 = vadd.f32 %v16355_v30, %v16435_v60 }
 0x1f6   :  { %3368 = vmatmul.mubr.bf16.gmra.mrb[44].mxu1 %v16283_v17 }
 0x1f7   :  { %13757 = vmatprep.mubr.msk.bf16.mxu1 %vm16128_vm0, %v18548_v49 }
 0x22f   :  { %v2901_v56 = vpop.f32.mrb[16].mxu0 }
 0x230   :  { %v14549_v58 = vadd.f32 %v2901_v56, %v16426_v3  ;;  %v16432_v59 = vpop.f32.mrb[17].mxu0 }
 0x231   :  { %v2905_v17 = vpop.f32.mrb[18].mxu0  ;;  %v16451_v20 = vpop.f32.mrb[16].mxu1 }
 0x232   :  { %v16437_v61 = vpack.c.bf16 %v14549_v58, %v14549_v58  ;;  %v14551_v0 = vadd.f32 %v2905_v17, %v16426_v3  ;;  %v16440_v5 = vpop.f32.mrb[19].mxu0  ;;  %18585 = vst [vmem:[#allocation36_spill] sm:$0xff] %v16451_v20  ;;  %v16453_v21 = vpop.f32.mrb[17].mxu1  ;;  %v16482_v58 = vrot.slane %v518_v57, %v548_v37  ;;  %v14521_v17 = vadd.f32 %v16347_v27, %v16435_v60 }
 0x233   :  { %18586 = vst [vmem:[#allocation37_spill] sm:$0xff] %v16453_v21  ;;  %v16461_v13 = vpop.f32.mrb[18].mxu1 }
 0x234   :  { %v16442_v7 = vpack.c.bf16 %v14551_v0, %v14551_v0  ;;  %v3479_v10 = vsel %vm3474_vm1, %v16437_v61, 0  ;;  %18587 = vst [vmem:[#allocation38_spill] sm:$0xff] %v16461_v13  ;;  %v16464_v39 = vpop.f32.mrb[19].mxu1  ;;  %18589 = vst [vmem:[#allocation40_spill] sm:$0xff] %v16482_v58 }
 0x235   :  { %13750 = vmatpush3.bf16.xpose.msra.mxu0 %v3479_v10  ;;  %18588 = vst [vmem:[#allocation39_spill] sm:$0xff] %v16464_v39  ;;  %v16492_v10 = vrot.slane %v518_v57, %v552_v53 }
 0x236   :  { %v3525_v14 = vsel %vm3474_vm1, %v16442_v7, 0  ;;  %13761 = vmatprep.subr.bf16.mxu0 %v18548_v49 }
 0x237   :  { %v2911_v24 = vpop.f32.mrb[20].mxu0  ;;  %13756 = vmatpush3.bf16.xpose.msra.mxu1 %v3525_v14  ;;  %18590 = vst [vmem:[#allocation41_spill] sm:$0xff] %v16492_v10 }
 0x238   :  { %v14553_v34 = vadd.f32 %v2911_v24, %v16426_v3  ;;  %v16458_v32 = vpop.f32.mrb[21].mxu0  ;;  %13767 = vmatprep.subr.bf16.mxu1 %v18548_v49 }
 0x239   :  { %v2915_v36 = vpop.f32.mrb[22].mxu0  ;;  %v3057_v12 = vpop.f32.mrb[20].mxu1 }
 0x23a   :  { %v16468_v43 = vpack.c.bf16 %v14553_v34, %v14553_v34  ;;  %v14555_v46 = vadd.f32 %v2915_v36, %v16426_v3  ;;  %v16471_v16 = vpop.f32.mrb[23].mxu0  ;;  %v16498_v24 = vadd.f32 %v3057_v12, %v16482_v58  ;;  %v3059_v27 = vpop.f32.mrb[21].mxu1 }
 0x23b   :  { %v16507_v57 = vadd.f32 %v3059_v27, %v16492_v10  ;;  %v3061_v37 = vpop.f32.mrb[22].mxu1 }
 0x23c   :  { %v16476_v52 = vpack.c.bf16 %v14555_v46, %v14555_v46  ;;  %13752 = vmatmul.mubr.msk.bf16.vlgmr.msra.gmra.mrb[48].mxu0 %vm3474_vm1, %v16466_v42  ;;  %v3571_v56 = vsel %vm3474_vm1, %v16468_v43, 0  ;;  %18591 = vst [vmem:[#allocation42_spill] sm:$0xff] %v16498_v24  ;;  %v16510_v53 = vadd.f32 %v3061_v37, %v16482_v58  ;;  %v14525_v37 = vadd.f32 %v16365_v45, %v16435_v60 }
 0x23d   :  { %13762 = vmatpush3.bf16.xpose.msra.mxu0 %v3571_v56  ;;  %13763 = vmatprep.mubr.msk.bf16.mxu0 %vm16128_vm0, %v18548_v49  ;;  %18592 = vst [vmem:[#allocation43_spill] sm:$0xff] %v16507_v57  ;;  %v3063_v56 = vpop.f32.mrb[23].mxu1  ;;  %v14527_v45 = vadd.f32 %v16373_v51, %v16435_v60 }
 0x23e   :  { %13758 = vmatmul.mubr.msk.bf16.vlgmr.msra.gmra.mrb[48].mxu1 %vm3474_vm1, %v16474_v35  ;;  %v3617_v0 = vsel %vm3474_vm1, %v16476_v52, 0  ;;  %13773 = vmatprep.subr.bf16.mxu0 %v18548_v49  ;;  %18593 = vst [vmem:[#allocation44_spill] sm:$0xff] %v16510_v53  ;;  %v16520_v38 = vadd.f32 %v3063_v56, %v16492_v10 }
 0x23f   :  { %v2921_v14 = vpop.f32.mrb[24].mxu0  ;;  %13768 = vmatpush3.bf16.xpose.msra.mxu1 %v3617_v0  ;;  %13769 = vmatprep.mubr.msk.bf16.mxu1 %vm16128_vm0, %v18548_v49  ;;  %v16512_v0 = vpack.c.bf16 %v14521_v17, %v14521_v17  ;;  %v16566_v28 = vpack.c.bf16 %v14527_v45, %v14527_v45 }
 0x240   :  { %v14557_v34 = vadd.f32 %v2921_v14, %v16426_v3  ;;  %v16503_v36 = vpop.f32.mrb[25].mxu0  ;;  %13779 = vmatprep.subr.bf16.mxu1 %v18548_v49  ;;  %18594 = vst [vmem:[#allocation45_spill] sm:$0xff] %v16520_v38  ;;  %v16522_v49 = vpack.c.bf16 %v14523_v23, %v14523_v23  ;;  %v16556_v38 = vpack.c.bf16 %v14525_v37, %v14525_v37 }
 0x241   :  { %v2925_v46 = vpop.f32.mrb[26].mxu0 }
 0x242   :  { %v16514_v12 = vpack.c.bf16 %v14557_v34, %v14557_v34  ;;  %v14559_v30 = vadd.f32 %v2925_v46, %v16426_v3  ;;  %v16517_v14 = vpop.f32.mrb[27].mxu0  ;;  %v18595_v34 = vmov 0.0   ;;  %v3067_v46 = vpop.f32.mrb[24].mxu1 }
 0x244   :  { %v16524_v27 = vpack.c.bf16 %v14559_v30, %v14559_v30  ;;  %13764 = vmatmul.mubr.msk.bf16.vlgmr.msra.gmra.mrb[52].mxu0 %vm3474_vm1, %v16512_v0  ;;  %v3663_v17 = vsel %vm3474_vm1, %v16514_v12, 0  ;;  %v16542_v30 = vadd.f32 %v3067_v46, %v16482_v58 }
 0x245   :  { %13774 = vmatpush3.bf16.xpose.msra.mxu0 %v3663_v17  ;;  %13775 = vmatprep.mubr.msk.bf16.mxu0 %vm16128_vm0, %v18595_v34  ;;  %v3069_v17 = vpop.f32.mrb[25].mxu1 }
 0x246   :  { %13770 = vmatmul.mubr.msk.bf16.vlgmr.msra.gmra.mrb[52].mxu1 %vm3474_vm1, %v16522_v49  ;;  %v3709_v23 = vsel %vm3474_vm1, %v16524_v27, 0  ;;  %13785 = vmatprep.subr.bf16.mxu0 %v18595_v34  ;;  %18596 = vst [vmem:[#allocation46_spill] sm:$0xff] %v16542_v30  ;;  %v16551_v1 = vadd.f32 %v3069_v17, %v16492_v10 }
 0x247   :  { %v2931_v56 = vpop.f32.mrb[28].mxu0  ;;  %13780 = vmatpush3.bf16.xpose.msra.mxu1 %v3709_v23  ;;  %13781 = vmatprep.mubr.msk.bf16.mxu1 %vm16128_vm0, %v18595_v34  ;;  %v3071_v23 = vpop.f32.mrb[26].mxu1 }
 0x248   :  { %v14561_v22 = vadd.f32 %v2931_v56, %v16426_v3  ;;  %v16547_v9 = vpop.f32.mrb[29].mxu0  ;;  %13791 = vmatprep.subr.bf16.mxu1 %v18595_v34  ;;  %18597 = vst [vmem:[#allocation47_spill] sm:$0xff] %v16551_v1  ;;  %v16554_v47 = vadd.f32 %v3071_v23, %v16482_v58  ;;  %v3073_v46 = vpop.f32.mrb[27].mxu1 }
 0x249   :  { %v2935_v54 = vpop.f32.mrb[30].mxu0  ;;  %v16564_v31 = vadd.f32 %v3073_v46, %v16492_v10 }
 0x24a   :  { %18598 = vst [vmem:[#allocation48_spill] sm:$0xff] %v16554_v47  ;;  %v16558_v57 = vpack.c.bf16 %v14561_v22, %v14561_v22  ;;  %v14563_v51 = vadd.f32 %v2935_v54, %v16426_v3  ;;  %v16561_v56 = vpop.f32.mrb[31].mxu0  ;;  %v14529_v54 = vadd.f32 %v16381_v63, %v16435_v60  ;;  %v3077_v3 = vpop.f32.mrb[28].mxu1  ;;  %v14531_v63 = vadd.f32 %v16389_v4, %v16435_v60  ;;  %v519_v4 = vld [vmem:[#allocation7 + $0x8] sm:$0xf] }
 0x24b   :  { %18599 = vst [vmem:[#allocation49_spill] sm:$0xff] %v16564_v31  ;;  %v16586_v45 = vadd.f32 %v3077_v3, %v16482_v58  ;;  %v3079_v23 = vpop.f32.mrb[29].mxu1  ;;  %v16613_v60 = vrot.slane %v519_v4, %v16429_v8  ;;  %v16628_v8 = vsub.s32 1, %v16423_v40 }
 0x24c   :  { %v16568_v17 = vpack.c.bf16 %v14563_v51, %v14563_v51  ;;  %13776 = vmatmul.mubr.msk.bf16.vlgmr.msra.gmra.mrb[56].mxu0 %vm3474_vm1, %v16556_v38  ;;  %v3755_v37 = vsel %vm3474_vm1, %v16558_v57, 0  ;;  %v16591_v46 = vadd.f32 %v3079_v23, %v16492_v10  ;;  %v3081_v51 = vpop.f32.mrb[30].mxu1  ;;  %v16597_v31 = vpack.c.bf16 %v14529_v54, %v14529_v54 }
 0x24d   :  { %13786 = vmatpush3.bf16.xpose.msra.mxu0 %v3755_v37  ;;  %13787 = vmatprep.mubr.msk.bf16.mxu0 %vm16128_vm0, %v18595_v34  ;;  %18600 = vst [vmem:[#allocation50_spill] sm:$0xff] %v16586_v45  ;;  %v16595_v37 = vadd.f32 %v3081_v51, %v16482_v58  ;;  %v16602_v3 = vpack.c.bf16 %v14531_v63, %v14531_v63  ;;  %v16652_v45 = vsub.s32 2, %v16423_v40 }
 0x24e   :  { %13782 = vmatmul.mubr.msk.bf16.vlgmr.msra.gmra.mrb[56].mxu1 %vm3474_vm1, %v16566_v28  ;;  %v3801_v22 = vsel %vm3474_vm1, %v16568_v17, 0  ;;  %13797 = vmatprep.subr.bf16.mxu0 %v18595_v34  ;;  %18601 = vst [vmem:[#allocation51_spill] sm:$0xff] %v16591_v46 }
 0x24f   :  { %13792 = vmatpush3.bf16.xpose.msra.mxu1 %v3801_v22  ;;  %13793 = vmatprep.mubr.msk.bf16.mxu1 %vm16128_vm0, %v18595_v34  ;;  %18602 = vst [vmem:[#allocation52_spill] sm:$0xff] %v16595_v37  ;;  %v3083_v22 = vpop.f32.mrb[31].mxu1  ;;  %18612 = vst [vmem:[#allocation62_spill] sm:$0xff] %v16652_v45 }
 0x250   :  { %13803 = vmatprep.subr.bf16.mxu1 %v18595_v34  ;;  %v16600_v1 = vadd.f32 %v3083_v22, %v16492_v10 }
 0x252   :  { %18603 = vst [vmem:[#allocation53_spill] sm:$0xff] %v16600_v1 }
 0x254   :  { %13788 = vmatmul.mubr.msk.bf16.vlgmr.msra.gmra.mrb[60].mxu0 %vm3474_vm1, %v16597_v31 }
 0x255   :  { %13799 = vmatprep.mubr.msk.bf16.mxu0 %vm16128_vm0, %v18595_v34 }
 0x256   :  { %13794 = vmatmul.mubr.msk.bf16.vlgmr.msra.gmra.mrb[60].mxu1 %vm3474_vm1, %v16602_v3 }
 0x257   :  { %13805 = vmatprep.mubr.msk.bf16.mxu1 %vm16128_vm0, %v18595_v34 }
 0x2af   :  { %v3193_v54 = vpop.f32.mrb[32].mxu0 }
 0x2b0   :  { %v14581_v23 = vadd.f32 %v3193_v54, %v16613_v60  ;;  %v16616_v63 = vpop.f32.mrb[33].mxu0 }
 0x2b1   :  { %18604 = vst [vmem:[#allocation54_spill] sm:$0xff] %v16616_v63  ;;  %v3197_v51 = vpop.f32.mrb[34].mxu0  ;;  %v16630_v10 = vpop.f32.mrb[32].mxu1 }
 0x2b2   :  { %v16618_v22 = vpack.c.bf16 %v14581_v23, %v14581_v23  ;;  %v14583_v1 = vadd.f32 %v3197_v51, %v16613_v60  ;;  %v16621_v46 = vpop.f32.mrb[35].mxu0  ;;  %18606 = vst [vmem:[#allocation56_spill] sm:$0xff] %v16630_v10  ;;  %v16632_v54 = vpop.f32.mrb[33].mxu1  ;;  %v16638_v51 = vrot.slane %v519_v4, %v16628_v8 }
 0x2b3   :  { %18605 = vst [vmem:[#allocation55_spill] sm:$0xff] %v16621_v46  ;;  %18607 = vst [vmem:[#allocation57_spill] sm:$0xff] %v16632_v54 }
 0x2b4   :  { %v16623_v39 = vpack.c.bf16 %v14583_v1, %v14583_v1  ;;  %v3945_v21 = vsel %vm3943_vm2, %v16618_v22, 0  ;;  %18608 = vst [vmem:[#allocation58_spill] sm:$0xff] %v16638_v51  ;;  %v16640_v1 = vpop.f32.mrb[34].mxu1 }
 0x2b5   :  { %13798 = vmatpush3.bf16.msra.mxu0 %v3945_v21  ;;  %18609 = vst [vmem:[#allocation59_spill] sm:$0xff] %v16640_v1  ;;  %v16642_v19 = vpop.f32.mrb[35].mxu1  ;;  %v16658_v1 = vsub.s32 3, %v16423_v40 }
 0x2b6   :  { %v3991_v23 = vsel %vm3943_vm2, %v16623_v39, 0  ;;  %13809 = vmatprep.subr.bf16.mxu0 %v18595_v34  ;;  %18610 = vst [vmem:[#allocation60_spill] sm:$0xff] %v16642_v19  ;;  %v16664_v19 = vrot.slane %v519_v4, %v16652_v45 }
 0x2b7   :  { %13804 = vmatpush3.bf16.msra.mxu1 %v3991_v23  ;;  %v3203_v26 = vpop.f32.mrb[36].mxu0  ;;  %18613 = vst [vmem:[#allocation63_spill] sm:$0xff] %v16658_v1 }
 0x2b8   :  { %v16645_v37 = vadd.f32 %v3203_v26, %v16613_v60  ;;  %v3205_v21 = vpop.f32.mrb[37].mxu0  ;;  %13815 = vmatprep.subr.bf16.mxu1 %v18595_v34  ;;  %18615 = vst [vmem:[#allocation65_spill] sm:$0xff] %v16664_v19 }
 0x2b9   :  { %v16649_v54 = vadd.f32 %v3205_v21, %v16638_v51  ;;  %v3207_v10 = vpop.f32.mrb[38].mxu0  ;;  %v16667_v21 = vrot.slane %v519_v4, %v16658_v1  ;;  %v3349_v62 = vpop.f32.mrb[36].mxu1 }
 0x2ba   :  { %v16655_v6 = vadd.f32 %v3207_v10, %v16613_v60  ;;  %v3209_v23 = vpop.f32.mrb[39].mxu0  ;;  %v16670_v47 = vadd.f32 %v3349_v62, %v16664_v19  ;;  %v3351_v30 = vpop.f32.mrb[37].mxu1 }
 0x2bb   :  { %18611 = vst [vmem:[#allocation61_spill] sm:$0xff] %v16649_v54  ;;  %v16661_v26 = vadd.f32 %v3209_v23, %v16638_v51  ;;  %18616 = vst [vmem:[#allocation66_spill] sm:$0xff] %v16667_v21  ;;  %v16673_v10 = vadd.f32 %v3351_v30, %v16667_v21  ;;  %v3353_v50 = vpop.f32.mrb[38].mxu1 }
 0x2bc   :  { %18617 = vst [vmem:[#allocation67_spill] sm:$0xff] %v16670_v47  ;;  %v16676_v53 = vadd.f32 %v3353_v50, %v16664_v19  ;;  %v3355_v23 = vpop.f32.mrb[39].mxu1 }
 0x2bd   :  { %18614 = vst [vmem:[#allocation64_spill] sm:$0xff] %v16661_v26  ;;  %18618 = vst [vmem:[#allocation68_spill] sm:$0xff] %v16673_v10  ;;  %v16682_v4 = vadd.f32 %v3355_v23, %v16667_v21 }
 0x2be   :  { %18619 = vst [vmem:[#allocation69_spill] sm:$0xff] %v16676_v53 }
 0x2bf   :  { %v3213_v44 = vpop.f32.mrb[40].mxu0  ;;  %18620 = vst [vmem:[#allocation70_spill] sm:$0xff] %v16682_v4 }
 0x2c0   :  { %v16679_v24 = vadd.f32 %v3213_v44, %v16613_v60  ;;  %v3215_v29 = vpop.f32.mrb[41].mxu0 }
 0x2c1   :  { %v16685_v62 = vadd.f32 %v3215_v29, %v16638_v51  ;;  %v3217_v1 = vpop.f32.mrb[42].mxu0  ;;  %v3359_v50 = vpop.f32.mrb[40].mxu1 }
 0x2c2   :  { %v16688_v30 = vadd.f32 %v3217_v1, %v16613_v60  ;;  %v3219_v10 = vpop.f32.mrb[43].mxu0  ;;  %v16694_v53 = vadd.f32 %v3359_v50, %v16664_v19  ;;  %v3361_v44 = vpop.f32.mrb[41].mxu1 }
 0x2c3   :  { %18621 = vst [vmem:[#allocation71_spill] sm:$0xff] %v16685_v62  ;;  %v16691_v47 = vadd.f32 %v3219_v10, %v16638_v51  ;;  %v16697_v25 = vadd.f32 %v3361_v44, %v16667_v21  ;;  %v3363_v23 = vpop.f32.mrb[42].mxu1 }
 0x2c4   :  { %18623 = vst [vmem:[#allocation73_spill] sm:$0xff] %v16694_v53  ;;  %v16700_v29 = vadd.f32 %v3363_v23, %v16664_v19  ;;  %v3365_v45 = vpop.f32.mrb[43].mxu1 }
 0x2c5   :  { %18622 = vst [vmem:[#allocation72_spill] sm:$0xff] %v16691_v47  ;;  %18624 = vst [vmem:[#allocation74_spill] sm:$0xff] %v16697_v25  ;;  %v16706_v10 = vadd.f32 %v3365_v45, %v16667_v21 }
 0x2c6   :  { %18625 = vst [vmem:[#allocation75_spill] sm:$0xff] %v16700_v29 }
 0x2c7   :  { %v3223_v4 = vpop.f32.mrb[44].mxu0  ;;  %18626 = vst [vmem:[#allocation76_spill] sm:$0xff] %v16706_v10 }
 0x2c8   :  { %v16703_v1 = vadd.f32 %v3223_v4, %v16613_v60  ;;  %v3225_v13 = vpop.f32.mrb[45].mxu0 }
 0x2c9   :  { %v16709_v50 = vadd.f32 %v3225_v13, %v16638_v51  ;;  %v3227_v53 = vpop.f32.mrb[46].mxu0  ;;  %v3369_v23 = vpop.f32.mrb[44].mxu1 }
 0x2ca   :  { %v16712_v44 = vadd.f32 %v3227_v53, %v16613_v60  ;;  %v3229_v25 = vpop.f32.mrb[47].mxu0  ;;  %v16718_v29 = vadd.f32 %v3369_v23, %v16664_v19  ;;  %v3371_v4 = vpop.f32.mrb[45].mxu1 }
 0x2cb   :  { %18627 = vst [vmem:[#allocation77_spill] sm:$0xff] %v16709_v50  ;;  %v16715_v20 = vadd.f32 %v3229_v25, %v16638_v51  ;;  %v16721_v58 = vadd.f32 %v3371_v4, %v16667_v21  ;;  %v3373_v45 = vpop.f32.mrb[46].mxu1 }
 0x2cc   :  { %18629 = vst [vmem:[#allocation79_spill] sm:$0xff] %v16718_v29  ;;  %v16724_v13 = vadd.f32 %v3373_v45, %v16664_v19  ;;  %v3375_v10 = vpop.f32.mrb[47].mxu1 }
 0x2cd   :  { %18628 = vst [vmem:[#allocation78_spill] sm:$0xff] %v16715_v20  ;;  %18630 = vst [vmem:[#allocation80_spill] sm:$0xff] %v16721_v58  ;;  %v16727_v53 = vadd.f32 %v3375_v10, %v16667_v21 }
 0x2ce   :  { %18631 = vst [vmem:[#allocation81_spill] sm:$0xff] %v16724_v13 }
 0x2cf   :  { %18632 = vst [vmem:[#allocation82_spill] sm:$0xff] %v16727_v53 }
 0x30f   :  { %v3515_v60 = vpop.f32.mrb[48].mxu0 }
 0x310   :  { %v13753_v25 = vpop.f32.mrb[49].mxu0  ;;  %v3844_v20 = vsel %vm3843_vm3, %v3515_v60, -inf }
 0x311   :  { %v3561_v50 = vpop.f32.mrb[48].mxu1  ;;  %3845 = vmax.xlane.f32.xlu0 %v3844_v20  ;;  %v3518_v23 = vpop.f32.mrb[50].mxu0 }
 0x312   :  { %v13754_v29 = vpop.f32.mrb[51].mxu0  ;;  %v13759_v47 = vpop.f32.mrb[49].mxu1  ;;  %v3847_v62 = vsel %vm3843_vm3, %v3561_v50, -inf }
 0x313   :  { %v3564_v4 = vpop.f32.mrb[50].mxu1 }
 0x314   :  { %v13760_v58 = vpop.f32.mrb[51].mxu1 }
 0x315   :  { %3848 = vmax.xlane.f32.xlu0 %v3847_v62 }
 0x317   :  { %v3607_v45 = vpop.f32.mrb[52].mxu0 }
 0x318   :  { %v13765_v13 = vpop.f32.mrb[53].mxu0  ;;  %v3850_v10 = vsel %vm3843_vm3, %v3607_v45, -inf }
 0x319   :  { %v3653_v53 = vpop.f32.mrb[52].mxu1  ;;  %3851 = vmax.xlane.f32.xlu1 %v3850_v10  ;;  %v3610_v21 = vpop.f32.mrb[54].mxu0 }
 0x31a   :  { %v13766_v25 = vpop.f32.mrb[55].mxu0  ;;  %v13771_v19 = vpop.f32.mrb[53].mxu1  ;;  %v3853_v20 = vsel %vm3843_vm3, %v3653_v53, -inf }
 0x31b   :  { %v3656_v54 = vpop.f32.mrb[54].mxu1 }
 0x31c   :  { %v13772_v26 = vpop.f32.mrb[55].mxu1 }
 0x31d   :  { %3854 = vmax.xlane.f32.xlu1 %v3853_v20 }
 0x31f   :  { %v3699_v47 = vpop.f32.mrb[56].mxu0 }
 0x320   :  { %v13777_v29 = vpop.f32.mrb[57].mxu0  ;;  %v3856_v58 = vsel %vm3843_vm3, %v3699_v47, -inf }
 0x321   :  { %v3745_v23 = vpop.f32.mrb[56].mxu1  ;;  %3857 = vmax.xlane.f32.xlu0 %v3856_v58  ;;  %v3702_v62 = vpop.f32.mrb[58].mxu0 }
 0x322   :  { %v13778_v13 = vpop.f32.mrb[59].mxu0  ;;  %v13783_v4 = vpop.f32.mrb[57].mxu1  ;;  %v3859_v11 = vsel %vm3843_vm3, %v3745_v23, -inf }
 0x323   :  { %v3748_v10 = vpop.f32.mrb[58].mxu1  ;;  %3860 = vmax.xlane.f32.xlu1 %v3859_v11 }
 0x324   :  { %v13784_v21 = vpop.f32.mrb[59].mxu1 }
 0x327   :  { %v3791_v19 = vpop.f32.mrb[60].mxu0 }
 0x328   :  { %v13789_v54 = vpop.f32.mrb[61].mxu0  ;;  %v3862_v26 = vsel %vm3843_vm3, %v3791_v19, -inf }
 0x329   :  { %v16736_v25 = vpop.f32.mrb[60].mxu1  ;;  %3863 = vmax.xlane.f32.xlu0 %v3862_v26  ;;  %v3794_v20 = vpop.f32.mrb[62].mxu0 }
 0x32a   :  { %v13790_v29 = vpop.f32.mrb[63].mxu0  ;;  %v13795_v2 = vpop.f32.mrb[61].mxu1  ;;  %v3865_v58 = vsel %vm3843_vm3, %v16736_v25, -inf }
 0x32b   :  { %v3840_v62 = vpop.f32.mrb[62].mxu1  ;;  %3866 = vmax.xlane.f32.xlu1 %v3865_v58 }
 0x32c   :  { %v13796_v13 = vpop.f32.mrb[63].mxu1 }
 0x39e   :  { %v3846_v4 = vpop.xlane.xlu0 %3845 }
 0x39f   :  { %v3868_v10 = vsub.f32 %v3515_v60, %v3846_v4 }
 0x3a1   :  { %v3876_v11 = vmul.f32 1.442695, %v3868_v10 }
 0x3a2   :  { %v3849_v21 = vpop.xlane.xlu0 %3848 }
 0x3a3   :  { %15717 = vpow2.f32 %v3876_v11  ;;  %v3869_v54 = vsub.f32 %v3561_v50, %v3849_v21 }
 0x3a5   :  { %v3878_v46 = vmul.f32 1.442695, %v3869_v54 }
 0x3a6   :  { %v3852_v63 = vpop.xlane.xlu1 %3851 }
 0x3a7   :  { %15719 = vpow2.f32 %v3878_v46  ;;  %v3870_v51 = vsub.f32 %v3607_v45, %v3852_v63 }
 0x3a9   :  { %v3880_v26 = vmul.f32 1.442695, %v3870_v51 }
 0x3aa   :  { %v3855_v20 = vpop.xlane.xlu1 %3854 }
 0x3ab   :  { %15721 = vpow2.f32 %v3880_v26  ;;  %v3871_v2 = vsub.f32 %v3653_v53, %v3855_v20 }
 0x3ad   :  { %v16740_v29 = vpop.eup %15717  ;;  %v3882_v55 = vmul.f32 1.442695, %v3871_v2 }
 0x3ae   :  { %v3858_v62 = vpop.xlane.xlu0 %3857  ;;  %v3892_v58 = vsel %vm3843_vm3, %v16740_v29, 0.0 }
 0x3af   :  { %15723 = vpow2.f32 %v3882_v55  ;;  %v3872_v60 = vsub.f32 %v3699_v47, %v3858_v62  ;;  %3893 = vadd.xlane.f32.xlu0 %v3892_v58 }
 0x3b0   :  { %v3861_v13 = vpop.xlane.xlu1 %3860 }
 0x3b1   :  { %v16744_v50 = vpop.eup %15719  ;;  %v3884_v4 = vmul.f32 1.442695, %v3872_v60  ;;  %v3873_v46 = vsub.f32 %v3745_v23, %v3861_v13 }
 0x3b2   :  { %v3895_v63 = vsel %vm3843_vm3, %v16744_v50, 0.0 }
 0x3b3   :  { %15725 = vpow2.f32 %v3884_v4  ;;  %v3886_v51 = vmul.f32 1.442695, %v3873_v46  ;;  %3896 = vadd.xlane.f32.xlu1 %v3895_v63  ;;  %v16834_v46 = vpack.c.bf16 %v16688_v30, %v16688_v30  ;;  %v16845_v30 = vpack.c.bf16 %v16703_v1, %v16703_v1 }
 0x3b4   :  { %v16857_v1 = vpack.c.bf16 %v16712_v44, %v16712_v44 }
 0x3b5   :  { %v16748_v53 = vpop.eup %15721  ;;  %15727 = vpow2.f32 %v3886_v51 }
 0x3b6   :  { %v3864_v45 = vpop.xlane.xlu0 %3863  ;;  %v3898_v55 = vsel %vm3843_vm3, %v16748_v53, 0.0  ;;  %v4267_v44 = vsel %vm3943_vm2, %v16857_v1, 0 }
 0x3b7   :  { %v3874_v47 = vsub.f32 %v3791_v19, %v3864_v45  ;;  %3899 = vadd.xlane.f32.xlu0 %v3898_v55  ;;  %v4175_v55 = vsel %vm3943_vm2, %v16834_v46, 0 }
 0x3b8   :  { %v3867_v62 = vpop.xlane.xlu1 %3866 }
 0x3b9   :  { %v16752_v10 = vpop.eup %15723  ;;  %v3888_v11 = vmul.f32 1.442695, %v3874_v47  ;;  %v3875_v58 = vsub.f32 %v16736_v25, %v3867_v62 }
 0x3ba   :  { %v3901_v23 = vsel %vm3843_vm3, %v16752_v10, 0.0 }
 0x3bb   :  { %15729 = vpow2.f32 %v3888_v11  ;;  %3902 = vadd.xlane.f32.xlu1 %v3901_v23  ;;  %v3890_v60 = vmul.f32 1.442695, %v3875_v58 }
 0x3bd   :  { %v16756_v21 = vpop.eup %15725  ;;  %15731 = vpow2.f32 %v3890_v60 }
 0x3be   :  { %v3904_v54 = vsel %vm3843_vm3, %v16756_v21, 0.0 }
 0x3bf   :  { %v16760_v26 = vpop.eup %15727  ;;  %3905 = vadd.xlane.f32.xlu0 %v3904_v54 }
 0x3c0   :  { %v3907_v19 = vsel %vm3843_vm3, %v16760_v26, 0.0 }
 0x3c1   :  { %3908 = vadd.xlane.f32.xlu1 %v3907_v19 }
 0x3c5   :  { %v16764_v20 = vpop.eup %15729 }
 0x3c6   :  { %v3910_v2 = vsel %vm3843_vm3, %v16764_v20, 0.0 }
 0x3c7   :  { %3911 = vadd.xlane.f32.xlu0 %v3910_v2 }
 0x3d2   :  { %4385 = vrot.lane.b32.xlu1 %v16442_v7, %s16129_s4 }
 0x3d6   :  { %4330 = vrot.lane.b32.xlu1 %v16466_v42, %s16129_s4 }
 0x3dd   :  { %4333 = vrot.lane.b32.xlu0 %v16437_v61, %s16129_s4  ;;  %v16787_v61 = vpop.eup %15731 }
 0x3de   :  { %v3913_v7 = vsel %vm3843_vm3, %v16787_v61, 0.0 }
 0x3e1   :  { %4437 = vrot.lane.b32.xlu0 %v16468_v43, %s16129_s4 }
 0x3e5   :  { %4434 = vrot.lane.b32.xlu0 %v16512_v0, %s16129_s4  ;;  %v16812_v0 = vpack.c.bf16 %v16655_v6, %v16655_v6  ;;  %v16823_v6 = vpack.c.bf16 %v16679_v24, %v16679_v24 }
 0x3e7   :  { %v4129_v24 = vsel %vm3943_vm2, %v16823_v6, 0 }
 0x3e9   :  { %4541 = vrot.lane.b32.xlu0 %v16514_v12, %s16129_s4 }
 0x3ed   :  { %4538 = vrot.lane.b32.xlu0 %v16556_v38, %s16129_s4 }
 0x3f1   :  { %4645 = vrot.lane.b32.xlu0 %v16558_v57, %s16129_s4 }
 0x3f5   :  { %4642 = vrot.lane.b32.xlu0 %v16597_v31, %s16129_s4 }
 0x3fa   :  { %3914 = vadd.xlane.f32.xlu1 %v3913_v7 }
 0x40b   :  { %4382 = vrot.lane.b32.xlu1 %v16474_v35, %s16129_s4 }
 0x40f   :  { %4489 = vrot.lane.b32.xlu1 %v16476_v52, %s16129_s4 }
 0x413   :  { %4486 = vrot.lane.b32.xlu1 %v16522_v49, %s16129_s4  ;;  %v16807_v49 = vpack.c.bf16 %v16645_v37, %v16645_v37 }
 0x415   :  { %v4037_v12 = vsel %vm3943_vm2, %v16807_v49, 0 }
 0x417   :  { %4593 = vrot.lane.b32.xlu1 %v16524_v27, %s16129_s4 }
 0x41b   :  { %4590 = vrot.lane.b32.xlu1 %v16566_v28, %s16129_s4 }
 0x41f   :  { %4697 = vrot.lane.b32.xlu1 %v16568_v17, %s16129_s4 }
 0x423   :  { %4694 = vrot.lane.b32.xlu1 %v16602_v3, %s16129_s4 }
 0x43c   :  { %v3894_v31 = vpop.xlane.xlu0 %3893 }
 0x43d   :  { %15733 = vrcp.f32 %v3894_v31 }
 0x440   :  { %v3897_v38 = vpop.xlane.xlu1 %3896 }
 0x441   :  { %15735 = vrcp.f32 %v3897_v38 }
 0x444   :  { %v3900_v42 = vpop.xlane.xlu0 %3899 }
 0x445   :  { %15737 = vrcp.f32 %v3900_v42 }
 0x447   :  { %v15734_v43 = vpop.eup %15733 }
 0x448   :  { %v3903_v35 = vpop.xlane.xlu1 %3902  ;;  %v3924_v28 = vmul.f32 %v15734_v43, %v16740_v29  ;;  %v4083_v29 = vsel %vm3943_vm2, %v16812_v0, 0 }
 0x449   :  { %15739 = vrcp.f32 %v3903_v35 }
 0x44a   :  { %v3932_v52 = vpack.c.bf16 %v3924_v28, %v3924_v28 }
 0x44b   :  { %v15736_v57 = vpop.eup %15735 }
 0x44c   :  { %13800 = vmatmul.mubr.msk.bf16.vlgmr.msra.gmra.mrb[64].mxu0 %vm3843_vm3, %v3932_v52  ;;  %v3906_v27 = vpop.xlane.xlu0 %3905  ;;  %v3925_v17 = vmul.f32 %v15736_v57, %v16744_v50 }
 0x44d   :  { %13810 = vmatpush3.bf16.msra.mxu0 %v4037_v12  ;;  %15741 = vrcp.f32 %v3906_v27  ;;  %13811 = vmatprep.mubr.msk.bf16.mxu0 %vm16128_vm0, %v18595_v34 }
 0x44e   :  { %v3909_v37 = vpop.xlane.xlu1 %3908  ;;  %v3933_v3 = vpack.c.bf16 %v3925_v17, %v3925_v17  ;;  %13821 = vmatprep.subr.bf16.mxu0 %v18595_v34 }
 0x44f   :  { %v15738_v25 = vpop.eup %15737  ;;  %15743 = vrcp.f32 %v3909_v37 }
 0x450   :  { %13806 = vmatmul.mubr.msk.bf16.vlgmr.msra.gmra.mrb[64].mxu1 %vm3843_vm3, %v3933_v3  ;;  %v3926_v13 = vmul.f32 %v15738_v25, %v16748_v53 }
 0x451   :  { %13816 = vmatpush3.bf16.msra.mxu1 %v4083_v29  ;;  %13817 = vmatprep.mubr.msk.bf16.mxu1 %vm16128_vm0, %v18595_v34 }
 0x452   :  { %v3934_v50 = vpack.c.bf16 %v3926_v13, %v3926_v13  ;;  %13827 = vmatprep.subr.bf16.mxu1 %v18595_v34  ;;  %v4386_v7 = vpop.permute.xlu1 %4385 }
 0x453   :  { %v15740_v4 = vpop.eup %15739  ;;  %v4391_v29 = vsel %vm3474_vm1, %v4386_v7, 0 }
 0x454   :  { %13812 = vmatmul.mubr.msk.bf16.vlgmr.msra.gmra.mrb[68].mxu0 %vm3843_vm3, %v3934_v50  ;;  %v3912_v63 = vpop.xlane.xlu0 %3911  ;;  %v3927_v51 = vmul.f32 %v15740_v4, %v16752_v10 }
 0x455   :  { %13822 = vmatpush3.bf16.msra.mxu0 %v4129_v24  ;;  %15745 = vrcp.f32 %v3912_v63  ;;  %13823 = vmatprep.mubr.msk.bf16.mxu0 %vm16128_vm0, %v18595_v34 }
 0x456   :  { %v3935_v53 = vpack.c.bf16 %v3927_v51, %v3927_v51  ;;  %13833 = vmatprep.subr.bf16.mxu0 %v18595_v34  ;;  %v4331_v31 = vpop.permute.xlu1 %4330 }
 0x457   :  { %v15742_v45 = vpop.eup %15741 }
 0x458   :  { %13818 = vmatmul.mubr.msk.bf16.vlgmr.msra.gmra.mrb[68].mxu1 %vm3843_vm3, %v3935_v53  ;;  %v3928_v47 = vmul.f32 %v15742_v45, %v16756_v21  ;;  %v4334_v54 = vpop.permute.xlu0 %4333  ;;  %v4221_v21 = vsel %vm3943_vm2, %v16845_v30, 0 }
 0x459   :  { %v15744_v10 = vpop.eup %15743  ;;  %13828 = vmatpush3.bf16.msra.mxu1 %v4175_v55  ;;  %13829 = vmatprep.mubr.msk.bf16.mxu1 %vm16128_vm0, %v18595_v34  ;;  %v4339_v60 = vsel %vm3474_vm1, %v4334_v54, 0 }
 0x45a   :  { %v3936_v11 = vpack.c.bf16 %v3928_v47, %v3928_v47  ;;  %13839 = vmatprep.subr.bf16.mxu1 %v18595_v34  ;;  %v3929_v23 = vmul.f32 %v15744_v10, %v16760_v26 }
 0x45c   :  { %13824 = vmatmul.mubr.msk.bf16.vlgmr.msra.gmra.mrb[72].mxu0 %vm3843_vm3, %v3936_v11  ;;  %v3937_v19 = vpack.c.bf16 %v3929_v23, %v3929_v23  ;;  %v4438_v62 = vpop.permute.xlu0 %4437 }
 0x45d   :  { %13834 = vmatpush3.bf16.msra.mxu0 %v4221_v21  ;;  %13835 = vmatprep.mubr.msk.bf16.mxu0 %vm16128_vm0, %v18595_v34  ;;  %v4443_v38 = vsel %vm3474_vm1, %v4438_v62, 0 }
 0x45e   :  { %13845 = vmatprep.subr.bf16.mxu0 %v18595_v34 }
 0x45f   :  { %v15746_v2 = vpop.eup %15745 }
 0x460   :  { %13830 = vmatmul.mubr.msk.bf16.vlgmr.msra.gmra.mrb[72].mxu1 %vm3843_vm3, %v3937_v19  ;;  %v3930_v26 = vmul.f32 %v15746_v2, %v16764_v20  ;;  %v4435_v20 = vpop.permute.xlu0 %4434 }
 0x461   :  { %13840 = vmatpush3.bf16.msra.mxu1 %v4267_v44  ;;  %13841 = vmatprep.mubr.msk.bf16.mxu1 %vm16128_vm0, %v18595_v34 }
 0x462   :  { %v3938_v58 = vpack.c.bf16 %v3930_v26, %v3930_v26  ;;  %13851 = vmatprep.subr.bf16.mxu1 %v18595_v34 }
 0x464   :  { %13836 = vmatmul.mubr.msk.bf16.vlgmr.msra.gmra.mrb[76].mxu0 %vm3843_vm3, %v3938_v58  ;;  %v4542_v42 = vpop.permute.xlu0 %4541 }
 0x465   :  { %13847 = vmatprep.mubr.msk.bf16.mxu0 %vm16128_vm0, %v18595_v34  ;;  %v4547_v35 = vsel %vm3474_vm1, %v4542_v42, 0 }
 0x466   :  { %13846 = vmatpush3.bf16.xpose.msra.mxu0 %v4339_v60 }
 0x467   :  { %13857 = vmatprep.subr.bf16.mxu0 %v18595_v34 }
 0x468   :  { %v4539_v43 = vpop.permute.xlu0 %4538 }
 0x46c   :  { %v4646_v28 = vpop.permute.xlu0 %4645 }
 0x46d   :  { %13848 = vmatmul.mubr.msk.bf16.vlgmr.msra.gmra.mrb[80].mxu0 %vm3474_vm1, %v4331_v31  ;;  %v4651_v52 = vsel %vm3474_vm1, %v4646_v28, 0 }
 0x46e   :  { %13858 = vmatpush3.bf16.xpose.msra.mxu0 %v4443_v38  ;;  %13859 = vmatprep.mubr.msk.bf16.mxu0 %vm16128_vm0, %v18595_v34 }
 0x46f   :  { %13869 = vmatprep.subr.bf16.mxu0 %v18595_v34 }
 0x470   :  { %v4643_v57 = vpop.permute.xlu0 %4642 }
 0x475   :  { %13860 = vmatmul.mubr.msk.bf16.vlgmr.msra.gmra.mrb[84].mxu0 %vm3474_vm1, %v4435_v20 }
 0x476   :  { %13870 = vmatpush3.bf16.xpose.msra.mxu0 %v4547_v35  ;;  %13871 = vmatprep.mubr.msk.bf16.mxu0 %vm16128_vm0, %v18595_v34 }
 0x477   :  { %13881 = vmatprep.subr.bf16.mxu0 %v18595_v34 }
 0x47d   :  { %13872 = vmatmul.mubr.msk.bf16.vlgmr.msra.gmra.mrb[88].mxu0 %vm3474_vm1, %v4539_v43 }
 0x47e   :  { %13882 = vmatpush3.bf16.xpose.msra.mxu0 %v4651_v52  ;;  %13883 = vmatprep.mubr.msk.bf16.mxu0 %vm16128_vm0, %v18595_v34 }
 0x47f   :  { %13893 = vmatprep.subr.bf16.mxu0 %v18595_v34 }
 0x485   :  { %13884 = vmatmul.mubr.msk.bf16.vlgmr.msra.gmra.mrb[92].mxu0 %vm3474_vm1, %v4643_v57 }
 0x486   :  { %13895 = vmatprep.mubr.msk.bf16.mxu0 %vm16128_vm0, %v18595_v34 }
 0x487   :  { %v3915_v12 = vpop.xlane.xlu1 %3914 }
 0x488   :  { %15747 = vrcp.f32 %v3915_v12 }
 0x48b   :  { %v4383_v27 = vpop.permute.xlu1 %4382 }
 0x48f   :  { %v4490_v3 = vpop.permute.xlu1 %4489 }
 0x490   :  { %v4495_v50 = vsel %vm3474_vm1, %v4490_v3, 0 }
 0x492   :  { %v15748_v17 = vpop.eup %15747 }
 0x493   :  { %v3931_v37 = vmul.f32 %v15748_v17, %v16787_v61  ;;  %v4487_v13 = vpop.permute.xlu1 %4486 }
 0x495   :  { %v3939_v25 = vpack.c.bf16 %v3931_v37, %v3931_v37 }
 0x497   :  { %13842 = vmatmul.mubr.msk.bf16.vlgmr.msra.gmra.mrb[76].mxu1 %vm3843_vm3, %v3939_v25  ;;  %v4594_v4 = vpop.permute.xlu1 %4593 }
 0x498   :  { %13852 = vmatpush3.bf16.xpose.msra.mxu1 %v4391_v29  ;;  %13853 = vmatprep.mubr.msk.bf16.mxu1 %vm16128_vm0, %v18595_v34  ;;  %v4599_v24 = vsel %vm3474_vm1, %v4594_v4, 0 }
 0x499   :  { %13863 = vmatprep.subr.bf16.mxu1 %v18595_v34 }
 0x49b   :  { %v4591_v61 = vpop.permute.xlu1 %4590 }
 0x49f   :  { %13854 = vmatmul.mubr.msk.bf16.vlgmr.msra.gmra.mrb[80].mxu1 %vm3474_vm1, %v4383_v27  ;;  %v4698_v63 = vpop.permute.xlu1 %4697 }
 0x4a0   :  { %13864 = vmatpush3.bf16.xpose.msra.mxu1 %v4495_v50  ;;  %13865 = vmatprep.mubr.msk.bf16.mxu1 %vm16128_vm0, %v18595_v34  ;;  %v4703_v51 = vsel %vm3474_vm1, %v4698_v63, 0 }
 0x4a1   :  { %13875 = vmatprep.subr.bf16.mxu1 %v18595_v34 }
 0x4a3   :  { %v4695_v53 = vpop.permute.xlu1 %4694 }
 0x4a7   :  { %13866 = vmatmul.mubr.msk.bf16.vlgmr.msra.gmra.mrb[84].mxu1 %vm3474_vm1, %v4487_v13 }
 0x4a8   :  { %13876 = vmatpush3.bf16.xpose.msra.mxu1 %v4599_v24  ;;  %13877 = vmatprep.mubr.msk.bf16.mxu1 %vm16128_vm0, %v18595_v34 }
 0x4a9   :  { %13887 = vmatprep.subr.bf16.mxu1 %v18595_v34 }
 0x4af   :  { %13878 = vmatmul.mubr.msk.bf16.vlgmr.msra.gmra.mrb[88].mxu1 %vm3474_vm1, %v4591_v61 }
 0x4b0   :  { %13888 = vmatpush3.bf16.xpose.msra.mxu1 %v4703_v51  ;;  %13889 = vmatprep.mubr.msk.bf16.mxu1 %vm16128_vm0, %v18595_v34 }
 0x4b1   :  { %13899 = vmatprep.subr.bf16.mxu1 %v18595_v34 }
 0x4b7   :  { %13890 = vmatmul.mubr.msk.bf16.vlgmr.msra.gmra.mrb[92].mxu1 %vm3474_vm1, %v4695_v53 }
 0x4b8   :  { %13901 = vmatprep.mubr.msk.bf16.mxu1 %vm16128_vm0, %v18595_v34 }
 0x51f   :  { %v3981_v45 = vpop.f32.mrb[64].mxu0 }
 0x520   :  { %v13801_v55 = vpop.f32.mrb[65].mxu0 }
 0x521   :  { %v3984_v47 = vpop.f32.mrb[66].mxu0 }
 0x522   :  { %v13802_v10 = vpop.f32.mrb[67].mxu0 }
 0x523   :  { %v4027_v11 = vpop.f32.mrb[64].mxu1 }
 0x524   :  { %v16919_v23 = vpack.c.bf16 %v4027_v11, %v3981_v45  ;;  %v13807_v54 = vpop.f32.mrb[65].mxu1 }
 0x525   :  { %v4030_v21 = vpop.f32.mrb[66].mxu1 }
 0x526   :  { %v13808_v19 = vpop.f32.mrb[67].mxu1 }
 0x527   :  { %v4073_v2 = vpop.f32.mrb[68].mxu0 }
 0x528   :  { %v13813_v44 = vpop.f32.mrb[69].mxu0 }
 0x529   :  { %v4076_v26 = vpop.f32.mrb[70].mxu0 }
 0x52a   :  { %v13814_v62 = vpop.f32.mrb[71].mxu0 }
 0x52b   :  { %v4119_v58 = vpop.f32.mrb[68].mxu1 }
 0x52c   :  { %v16921_v60 = vpack.c.bf16 %v4119_v58, %v4073_v2  ;;  %v13819_v7 = vpop.f32.mrb[69].mxu1 }
 0x52d   :  { %v4122_v20 = vpop.f32.mrb[70].mxu1 }
 0x52e   :  { %v13820_v31 = vpop.f32.mrb[71].mxu1 }
 0x52f   :  { %v4165_v38 = vpop.f32.mrb[72].mxu0 }
 0x530   :  { %v13825_v42 = vpop.f32.mrb[73].mxu0 }
 0x531   :  { %v4168_v43 = vpop.f32.mrb[74].mxu0 }
 0x532   :  { %v13826_v35 = vpop.f32.mrb[75].mxu0 }
 0x533   :  { %v4211_v28 = vpop.f32.mrb[72].mxu1 }
 0x534   :  { %v16923_v52 = vpack.c.bf16 %v4211_v28, %v4165_v38  ;;  %v13831_v57 = vpop.f32.mrb[73].mxu1 }
 0x535   :  { %v4214_v12 = vpop.f32.mrb[74].mxu1 }
 0x536   :  { %v13832_v27 = vpop.f32.mrb[75].mxu1 }
 0x537   :  { %v4257_v17 = vpop.f32.mrb[76].mxu0 }
 0x538   :  { %v13837_v37 = vpop.f32.mrb[77].mxu0 }
 0x539   :  { %v4260_v3 = vpop.f32.mrb[78].mxu0 }
 0x53a   :  { %v13838_v25 = vpop.f32.mrb[79].mxu0 }
 0x540   :  { %v4375_v29 = vpop.f32.mrb[80].mxu0 }
 0x541   :  { %v13849_v13 = vpop.f32.mrb[81].mxu0  ;;  %v4745_v50 = vsel %vm3843_vm3, %v4375_v29, -inf }
 0x542   :  { %4746 = vmax.xlane.f32.xlu0 %v4745_v50  ;;  %v4378_v4 = vpop.f32.mrb[82].mxu0 }
 0x543   :  { %v13850_v61 = vpop.f32.mrb[83].mxu0 }
 0x548   :  { %v4479_v24 = vpop.f32.mrb[84].mxu0 }
 0x549   :  { %v13861_v63 = vpop.f32.mrb[85].mxu0  ;;  %v4751_v51 = vsel %vm3843_vm3, %v4479_v24, -inf }
 0x54a   :  { %4752 = vmax.xlane.f32.xlu0 %v4751_v51  ;;  %v4482_v53 = vpop.f32.mrb[86].mxu0 }
 0x54b   :  { %v13862_v45 = vpop.f32.mrb[87].mxu0 }
 0x550   :  { %v16927_v55 = vpop.f32.mrb[88].mxu0 }
 0x551   :  { %v13873_v47 = vpop.f32.mrb[89].mxu0 }
 0x552   :  { %v4586_v10 = vpop.f32.mrb[90].mxu0 }
 0x553   :  { %v13874_v11 = vpop.f32.mrb[91].mxu0 }
 0x558   :  { %v16929_v54 = vpop.f32.mrb[92].mxu0 }
 0x559   :  { %v13885_v21 = vpop.f32.mrb[93].mxu0  ;;  %v4763_v13 = vsel %vm3843_vm3, %v16929_v54, -inf }
 0x55a   :  { %v4690_v19 = vpop.f32.mrb[94].mxu0 }
 0x55b   :  { %v13886_v2 = vpop.f32.mrb[95].mxu0 }
 0x56a   :  { %v4303_v44 = vpop.f32.mrb[76].mxu1 }
 0x56b   :  { %v16931_v26 = vpack.c.bf16 %v4303_v44, %v4257_v17  ;;  %v13843_v62 = vpop.f32.mrb[77].mxu1  ;;  %v4757_v17 = vsel %vm3843_vm3, %v16927_v55, -inf }
 0x56c   :  { %v4306_v58 = vpop.f32.mrb[78].mxu1 }
 0x56d   :  { %v13844_v7 = vpop.f32.mrb[79].mxu1 }
 0x572   :  { %v4427_v20 = vpop.f32.mrb[80].mxu1 }
 0x573   :  { %v13855_v31 = vpop.f32.mrb[81].mxu1  ;;  %v4748_v38 = vsel %vm3843_vm3, %v4427_v20, -inf }
 0x574   :  { %4749 = vmax.xlane.f32.xlu1 %v4748_v38  ;;  %v4430_v42 = vpop.f32.mrb[82].mxu1 }
 0x575   :  { %v13856_v43 = vpop.f32.mrb[83].mxu1 }
 0x57a   :  { %v16934_v35 = vpop.f32.mrb[84].mxu1 }
 0x57b   :  { %v13867_v28 = vpop.f32.mrb[85].mxu1  ;;  %v4754_v57 = vsel %vm3843_vm3, %v16934_v35, -inf }
 0x57c   :  { %v4534_v12 = vpop.f32.mrb[86].mxu1  ;;  %4755 = vmax.xlane.f32.xlu0 %v4754_v57 }
 0x57d   :  { %v13868_v27 = vpop.f32.mrb[87].mxu1 }
 0x580   :  { %4758 = vmax.xlane.f32.xlu0 %v4757_v17 }
 0x582   :  { %v16940_v37 = vpop.f32.mrb[88].mxu1 }
 0x583   :  { %v13879_v3 = vpop.f32.mrb[89].mxu1  ;;  %v4760_v25 = vsel %vm3843_vm3, %v16940_v37, -inf }
 0x584   :  { %4761 = vmax.xlane.f32.xlu1 %v4760_v25  ;;  %v4638_v50 = vpop.f32.mrb[90].mxu1  ;;  %4764 = vmax.xlane.f32.xlu0 %v4763_v13 }
 0x585   :  { %v13880_v4 = vpop.f32.mrb[91].mxu1 }
 0x58a   :  { %v16946_v61 = vpop.f32.mrb[92].mxu1 }
 0x58b   :  { %v13891_v63 = vpop.f32.mrb[93].mxu1  ;;  %v4766_v45 = vsel %vm3843_vm3, %v16946_v61, -inf }
 0x58c   :  { %v4742_v51 = vpop.f32.mrb[94].mxu1 }
 0x58d   :  { %v13892_v53 = vpop.f32.mrb[95].mxu1 }
 0x595   :  { %4891 = vrot.lane.b32.xlu1 %v16623_v39, %s16129_s4 }
 0x599   :  { %4940 = vrot.lane.b32.xlu1 %v16807_v49, %s16129_s4 }
 0x59a   :  { %4842 = vrot.lane.b32.xlu0 %v16618_v22, %s16129_s4 }
 0x5bd   :  { %4767 = vmax.xlane.f32.xlu1 %v4766_v45 }
 0x5ce   :  { %4989 = vrot.lane.b32.xlu1 %v16812_v0, %s16129_s4 }
 0x5cf   :  { %v4747_v47 = vpop.xlane.xlu0 %4746 }
 0x5d0   :  { %v4769_v10 = vsub.f32 %v4375_v29, %v4747_v47 }
 0x5d2   :  { %v4777_v11 = vmul.f32 1.442695, %v4769_v10 }
 0x5d4   :  { %15749 = vpow2.f32 %v4777_v11 }
 0x5d7   :  { %v4753_v21 = vpop.xlane.xlu0 %4752 }
 0x5d8   :  { %v4771_v19 = vsub.f32 %v4479_v24, %v4753_v21 }
 0x5da   :  { %v4781_v39 = vmul.f32 1.442695, %v4771_v19 }
 0x5dc   :  { %15751 = vpow2.f32 %v4781_v39 }
 0x5de   :  { %v16958_v2 = vpop.eup %15749 }
 0x5df   :  { %v4793_v22 = vsel %vm3843_vm3, %v16958_v2, 0.0 }
 0x5e0   :  { %4794 = vadd.xlane.f32.xlu0 %v4793_v22 }
 0x5e6   :  { %v16962_v49 = vpop.eup %15751 }
 0x5e7   :  { %v4799_v44 = vsel %vm3843_vm3, %v16962_v49, 0.0 }
 0x5e8   :  { %4800 = vadd.xlane.f32.xlu0 %v4799_v44 }
 0x5fe   :  { %5038 = vrot.lane.b32.xlu0 %v16823_v6, %s16129_s4 }
 0x601   :  { %v4750_v0 = vpop.xlane.xlu1 %4749 }
 0x602   :  { %v4770_v29 = vsub.f32 %v4427_v20, %v4750_v0 }
 0x604   :  { %v4779_v24 = vmul.f32 1.442695, %v4770_v29 }
 0x606   :  { %15753 = vpow2.f32 %v4779_v24 }
 0x609   :  { %v4756_v62 = vpop.xlane.xlu0 %4755 }
 0x60a   :  { %v4772_v13 = vsub.f32 %v16934_v35, %v4756_v62 }
 0x60c   :  { %v4783_v50 = vmul.f32 1.442695, %v4772_v13 }
 0x60d   :  { %v4759_v58 = vpop.xlane.xlu0 %4758 }
 0x60e   :  { %v4773_v7 = vsub.f32 %v16927_v55, %v4759_v58 }
 0x610   :  { %v16969_v31 = vpop.eup %15753  ;;  %v4785_v38 = vmul.f32 1.442695, %v4773_v7 }
 0x611   :  { %v4762_v42 = vpop.xlane.xlu1 %4761  ;;  %v4765_v43 = vpop.xlane.xlu0 %4764  ;;  %v4796_v28 = vsel %vm3843_vm3, %v16969_v31, 0.0 }
 0x612   :  { %15755 = vpow2.f32 %v4785_v38  ;;  %v4775_v57 = vsub.f32 %v16929_v54, %v4765_v43  ;;  %4797 = vadd.xlane.f32.xlu1 %v4796_v28  ;;  %v4774_v4 = vsub.f32 %v16940_v37, %v4762_v42 }
 0x614   :  { %v4789_v6 = vmul.f32 1.442695, %v4775_v57  ;;  %v4787_v63 = vmul.f32 1.442695, %v4774_v4  ;;  %v15527_v4 = vld [vmem:[#allocation8 + $0x84] ss:$16 sps:$4 sm:$0xff]  }
 0x615   :  { %v4892_v20 = vpop.permute.xlu1 %4891  ;;  %v4843_v12 = vpop.permute.xlu0 %4842 }
 0x616   :  { %v4897_v27 = vsel %vm3943_vm2, %v4892_v20, 0  ;;  %v4848_v17 = vsel %vm3943_vm2, %v4843_v12, 0  ;;  %15757 = vpow2.f32 %v4789_v6 }
 0x617   :  { %13894 = vmatpush3.bf16.msra.mxu0 %v4848_v17  ;;  %13900 = vmatpush3.bf16.msra.mxu1 %v4897_v27  ;;  %15759 = vpow2.f32 %v4783_v50  ;;  %v15525_v50 = vld [vmem:[#allocation8 + $0x80] ss:$16 sps:$4 sm:$0xff]  }
 0x618   :  { %13905 = vmatprep.subr.bf16.mxu0 %v18595_v34  ;;  %13911 = vmatprep.subr.bf16.mxu1 %v18595_v34  ;;  %15761 = vpow2.f32 %v4787_v63  ;;  %v15533_v63 = vld [vmem:[#allocation8 + $0xa4] ss:$16 sps:$4 sm:$0xff]  }
 0x619   :  { %v4941_v53 = vpop.permute.xlu1 %4940 }
 0x61a   :  { %v4946_v44 = vsel %vm3943_vm2, %v4941_v53, 0  ;;  %v15531_v53 = vld [vmem:[#allocation8 + $0xa0] ss:$16 sps:$4 sm:$0xff]  }
 0x61c   :  { %v16978_v55 = vpop.eup %15755 }
 0x61d   :  { %v4805_v54 = vsel %vm3843_vm3, %v16978_v55, 0.0 }
 0x61e   :  { %4806 = vadd.xlane.f32.xlu0 %v4805_v54 }
 0x620   :  { %v16982_v3 = vpop.eup %15757 }
 0x621   :  { %v4811_v25 = vsel %vm3843_vm3, %v16982_v3, 0.0  ;;  %v16992_v51 = vpop.eup %15759 }
 0x622   :  { %4812 = vadd.xlane.f32.xlu0 %v4811_v25  ;;  %v4802_v45 = vsel %vm3843_vm3, %v16992_v51, 0.0  ;;  %v16996_v47 = vpop.eup %15761 }
 0x623   :  { %5087 = vrot.lane.b32.xlu1 %v16834_v46, %s16129_s4  ;;  %v4808_v35 = vsel %vm3843_vm3, %v16996_v47, 0.0 }
 0x638   :  { %5136 = vrot.lane.b32.xlu0 %v16845_v30, %s16129_s4 }
 0x647   :  { %4803 = vadd.xlane.f32.xlu1 %v4802_v45 }
 0x64a   :  { %v4768_v46 = vpop.xlane.xlu1 %4767 }
 0x64b   :  { %v4776_v37 = vsub.f32 %v16946_v61, %v4768_v46  ;;  %4809 = vadd.xlane.f32.xlu1 %v4808_v35  ;;  %v15539_v46 = vld [vmem:[#allocation8 + $0xc4] ss:$16 sps:$4 sm:$0xff]  }
 0x64d   :  { %v4791_v10 = vmul.f32 1.442695, %v4776_v37  ;;  %v15537_v37 = vld [vmem:[#allocation8 + $0xc0] ss:$16 sps:$4 sm:$0xff]  }
 0x64f   :  { %15763 = vpow2.f32 %v4791_v10 }
 0x659   :  { %v17001_v30 = vpop.eup %15763 }
 0x65a   :  { %v4814_v11 = vsel %vm3843_vm3, %v17001_v30, 0.0 }
 0x65b   :  { %4815 = vadd.xlane.f32.xlu1 %v4814_v11  ;;  %v15545_v11 = vld [vmem:[#allocation8 + $0xe4] ss:$16 sps:$4 sm:$0xff]  }
 0x66c   :  { %5185 = vrot.lane.b32.xlu1 %v16857_v1, %s16129_s4 }
 0x66d   :  { %v4795_v21 = vpop.xlane.xlu0 %4794 }
 0x66e   :  { %15765 = vrcp.f32 %v4795_v21 }
 0x675   :  { %v4801_v19 = vpop.xlane.xlu0 %4800 }
 0x676   :  { %15767 = vrcp.f32 %v4801_v19 }
 0x678   :  { %v15766_v39 = vpop.eup %15765 }
 0x679   :  { %v4825_v22 = vmul.f32 %v15766_v39, %v16958_v2  ;;  %v5039_v29 = vpop.permute.xlu0 %5038  ;;  %v4990_v2 = vpop.permute.xlu1 %4989 }
 0x67a   :  { %v5044_v62 = vsel %vm3943_vm2, %v5039_v29, 0  ;;  %v4995_v43 = vsel %vm3943_vm2, %v4990_v2, 0  ;;  %v15528_v29 = vld [vmem:[#allocation8 + $0x88] ss:$16 sps:$4 sm:$0xff]  }
 0x67b   :  { %v4833_v61 = vpack.c.bf16 %v4825_v22, %v4825_v22  ;;  %v15534_v2 = vld [vmem:[#allocation8 + $0xa8] ss:$16 sps:$4 sm:$0xff]  }
 0x67d   :  { %13896 = vmatmul.mubr.msk.bf16.vlgmr.msra.gmra.mrb[96].mxu0 %vm3843_vm3, %v4833_v61  ;;  %v15530_v61 = vld [vmem:[#allocation8 + $0x8c] ss:$16 sps:$4 sm:$0xff]  }
 0x67e   :  { %13906 = vmatpush3.bf16.msra.mxu0 %v4946_v44  ;;  %13907 = vmatprep.mubr.msk.bf16.mxu0 %vm16128_vm0, %v18595_v34 }
 0x67f   :  { %13917 = vmatprep.subr.bf16.mxu0 %v18595_v34 }
 0x680   :  { %v15768_v0 = vpop.eup %15767 }
 0x681   :  { %v4827_v1 = vmul.f32 %v15768_v0, %v16962_v49 }
 0x683   :  { %v4835_v24 = vpack.c.bf16 %v4827_v1, %v4827_v1 }
 0x685   :  { %13908 = vmatmul.mubr.msk.bf16.vlgmr.msra.gmra.mrb[100].mxu0 %vm3843_vm3, %v4835_v24 }
 0x686   :  { %13918 = vmatpush3.bf16.msra.mxu0 %v5044_v62  ;;  %13919 = vmatprep.mubr.msk.bf16.mxu0 %vm16128_vm0, %v18595_v34  ;;  %v15536_v62 = vld [vmem:[#allocation8 + $0xac] ss:$16 sps:$4 sm:$0xff]  }
 0x687   :  { %13929 = vmatprep.subr.bf16.mxu0 %v18595_v34 }
 0x69f   :  { %v4798_v58 = vpop.xlane.xlu1 %4797 }
 0x6a0   :  { %15769 = vrcp.f32 %v4798_v58  ;;  %v15542_v58 = vld [vmem:[#allocation8 + $0xcc] ss:$16 sps:$4 sm:$0xff]  }
 0x6a3   :  { %v5088_v25 = vpop.permute.xlu1 %5087 }
 0x6a4   :  { %v5093_v21 = vsel %vm3943_vm2, %v5088_v25, 0 }
 0x6aa   :  { %v15770_v7 = vpop.eup %15769 }
 0x6ab   :  { %v4807_v38 = vpop.xlane.xlu0 %4806  ;;  %v4826_v42 = vmul.f32 %v15770_v7, %v16969_v31  ;;  %v15540_v7 = vld [vmem:[#allocation8 + $0xc8] ss:$16 sps:$4 sm:$0xff]  }
 0x6ac   :  { %15771 = vrcp.f32 %v4807_v38  ;;  %v15548_v38 = vld [vmem:[#allocation8 + $0xec] ss:$16 sps:$4 sm:$0xff]  }
 0x6ad   :  { %v4834_v49 = vpack.c.bf16 %v4826_v42, %v4826_v42  ;;  %v15546_v42 = vld [vmem:[#allocation8 + $0xe8] ss:$16 sps:$4 sm:$0xff]  }
 0x6af   :  { %13902 = vmatmul.mubr.msk.bf16.vlgmr.msra.gmra.mrb[96].mxu1 %vm3843_vm3, %v4834_v49  ;;  %v4813_v28 = vpop.xlane.xlu0 %4812  ;;  %v16130_v49 = vmov 0  }
 0x6b0   :  { %13912 = vmatpush3.bf16.msra.mxu1 %v4995_v43  ;;  %13913 = vmatprep.mubr.msk.bf16.mxu1 %vm16128_vm0, %v18595_v34  ;;  %15773 = vrcp.f32 %v4813_v28  ;;  %v15554_v43 = vld [vmem:[#allocation8 + $0xc] ss:$16 sps:$4 sm:$0xff]  }
 0x6b1   :  { %13923 = vmatprep.subr.bf16.mxu1 %v18595_v34 }
 0x6b3   :  { %v5137_v20 = vpop.permute.xlu0 %5136 }
 0x6b4   :  { %v5142_v27 = vsel %vm3943_vm2, %v5137_v20, 0 }
 0x6b6   :  { %v15772_v57 = vpop.eup %15771 }
 0x6b7   :  { %v4829_v6 = vmul.f32 %v15772_v57, %v16978_v55 }
 0x6b9   :  { %v4837_v12 = vpack.c.bf16 %v4829_v6, %v4829_v6 }
 0x6ba   :  { %v15774_v31 = vpop.eup %15773 }
 0x6bb   :  { %13920 = vmatmul.mubr.msk.bf16.vlgmr.msra.gmra.mrb[104].mxu0 %vm3843_vm3, %v4837_v12  ;;  %v4831_v17 = vmul.f32 %v15774_v31, %v16982_v3 }
 0x6bc   :  { %13930 = vmatpush3.bf16.msra.mxu0 %v5142_v27  ;;  %13931 = vmatprep.mubr.msk.bf16.mxu0 %vm16128_vm0, %v18595_v34 }
 0x6bd   :  { %v4839_v54 = vpack.c.bf16 %v4831_v17, %v4831_v17  ;;  %5346 = vmatprep.subr.bf16.mxu0 %v15527_v4 }
 0x6c3   :  { %13932 = vmatmul.mubr.msk.bf16.vlgmr.msra.gmra.mrb[108].mxu0 %vm3843_vm3, %v4839_v54 }
 0x6c4   :  { %5347 = vmatpush1.bf16.msra.mxu0 %v15525_v50  ;;  %5378 = vmatprep.mubr.bf16.mxu0 %v16130_v49  ;;  %v15552_v50 = vld [vmem:[#allocation8 + $0x8] ss:$16 sps:$4 sm:$0xff]  }
 0x6c5   :  { %5348 = vmatprep.subr.bf16.mxu0 %v15533_v63  ;;  %v15557_v63 = vld [vmem:[#allocation8 + $0x24] ss:$16 sps:$4 sm:$0xff]  }
 0x6c8   :  { %5349 = vmatpush1.bf16.msra.mxu0 %v15531_v53  ;;  %v15560_v53 = vld [vmem:[#allocation8 + $0x2c] ss:$16 sps:$4 sm:$0xff]  }
 0x6c9   :  { %5350 = vmatprep.subr.bf16.mxu0 %v15539_v46  ;;  %v15555_v46 = vld [vmem:[#allocation8 + $0x20] ss:$16 sps:$4 sm:$0xff]  }
 0x6cc   :  { %5351 = vmatpush1.bf16.msra.mxu0 %v15537_v37  ;;  %v15566_v37 = vld [vmem:[#allocation8 + $0x4c] ss:$16 sps:$4 sm:$0xff]  }
 0x6cd   :  { %5352 = vmatprep.subr.bf16.mxu0 %v15545_v11  ;;  %v15564_v11 = vld [vmem:[#allocation8 + $0x48] ss:$16 sps:$4 sm:$0xff]  }
 0x6d4   :  { %v4804_v13 = vpop.xlane.xlu1 %4803 }
 0x6d5   :  { %15775 = vrcp.f32 %v4804_v13 }
 0x6d8   :  { %v4810_v55 = vpop.xlane.xlu1 %4809 }
 0x6d9   :  { %15777 = vrcp.f32 %v4810_v55  ;;  %v15549_v55 = vld [vmem:[#allocation8] ss:$16 sps:$4 sm:$0xff]  }
 0x6df   :  { %v15776_v45 = vpop.eup %15775 }
 0x6e0   :  { %v4828_v35 = vmul.f32 %v15776_v45, %v16992_v51  ;;  %v15543_v51 = vld [vmem:[#allocation8 + $0xe0] ss:$16 sps:$4 sm:$0xff]  }
 0x6e1   :  { %5353 = vmatpush1.bf16.msra.mxu0 %v15543_v51 }
 0x6e2   :  { %v4836_v3 = vpack.c.bf16 %v4828_v35, %v4828_v35  ;;  %v15558_v35 = vld [vmem:[#allocation8 + $0x28] ss:$16 sps:$4 sm:$0xff]  }
 0x6e3   :  { %v15778_v10 = vpop.eup %15777 }
 0x6e4   :  { %13914 = vmatmul.mubr.msk.bf16.vlgmr.msra.gmra.mrb[100].mxu1 %vm3843_vm3, %v4836_v3  ;;  %v4830_v19 = vmul.f32 %v15778_v10, %v16996_v47  ;;  %v15563_v3 = vld [vmem:[#allocation8 + $0x44] ss:$16 sps:$4 sm:$0xff]   ;;  %v15561_v10 = vld [vmem:[#allocation8 + $0x40] ss:$16 sps:$4 sm:$0xff]  }
 0x6e5   :  { %13924 = vmatpush3.bf16.msra.mxu1 %v5093_v21  ;;  %13925 = vmatprep.mubr.msk.bf16.mxu1 %vm16128_vm0, %v18595_v34  ;;  %v15569_v21 = vld [vmem:[#allocation8 + $0x64] ss:$16 sps:$4 sm:$0xff]  }
 0x6e6   :  { %13935 = vmatprep.subr.bf16.mxu1 %v18595_v34  ;;  %v4838_v22 = vpack.c.bf16 %v4830_v19, %v4830_v19  ;;  %v15572_v19 = vld [vmem:[#allocation8 + $0x6c] ss:$16 sps:$4 sm:$0xff]  }
 0x6e8   :  { %v4816_v39 = vpop.xlane.xlu1 %4815 }
 0x6e9   :  { %15779 = vrcp.f32 %v4816_v39 }
 0x6ec   :  { %13926 = vmatmul.mubr.msk.bf16.vlgmr.msra.gmra.mrb[104].mxu1 %vm3843_vm3, %v4838_v22  ;;  %v5186_v44 = vpop.permute.xlu1 %5185  ;;  %v15567_v22 = vld [vmem:[#allocation8 + $0x60] ss:$16 sps:$4 sm:$0xff]  }
 0x6ed   :  { %v5191_v0 = vsel %vm3943_vm2, %v5186_v44, 0  ;;  %13937 = vmatprep.mubr.msk.bf16.mxu1 %vm16128_vm0, %v18595_v34 }
 0x6ee   :  { %13936 = vmatpush3.bf16.msra.mxu1 %v5191_v0 }
 0x6ef   :  { %5419 = vmatprep.subr.bf16.mxu1 %v15530_v61  ;;  %v15570_v61 = vld [vmem:[#allocation8 + $0x68] ss:$16 sps:$4 sm:$0xff]  }
 0x6f3   :  { %v15780_v47 = vpop.eup %15779 }
 0x6f4   :  { %v4832_v1 = vmul.f32 %v15780_v47, %v17001_v30  ;;  %v15551_v30 = vld [vmem:[#allocation8 + $0x4] ss:$16 sps:$4 sm:$0xff]  }
 0x6f5   :  { %5584 = vmatprep.subr.bf16.mxu0 %v15551_v30 }
 0x6f6   :  { %v4840_v24 = vpack.c.bf16 %v4832_v1, %v4832_v1 }
 0x6f8   :  { %13938 = vmatmul.mubr.msk.bf16.vlgmr.msra.gmra.mrb[108].mxu1 %vm3843_vm3, %v4840_v24 }
 0x6f9   :  { %5420 = vmatpush1.bf16.msra.mxu1 %v15528_v29  ;;  %5451 = vmatprep.mubr.bf16.mxu1 %v16130_v49 }
 0x6fa   :  { %5421 = vmatprep.subr.bf16.mxu1 %v15536_v62 }
 0x6fd   :  { %5422 = vmatpush1.bf16.msra.mxu1 %v15534_v2 }
 0x6fe   :  { %5423 = vmatprep.subr.bf16.mxu1 %v15542_v58 }
 0x701   :  { %5424 = vmatpush1.bf16.msra.mxu1 %v15540_v7 }
 0x702   :  { %5425 = vmatprep.subr.bf16.mxu1 %v15548_v38 }
 0x705   :  { %5426 = vmatpush1.bf16.msra.mxu1 %v15546_v42 }
 0x706   :  { %5657 = vmatprep.subr.bf16.mxu1 %v15554_v43 }
 0x750   :  { %v4884_v28 = vpop.f32.mrb[96].mxu0 }
 0x751   :  { %v13897_v57 = vpop.f32.mrb[97].mxu0 }
 0x752   :  { %v4887_v6 = vpop.f32.mrb[98].mxu0 }
 0x753   :  { %v13898_v20 = vpop.f32.mrb[99].mxu0  ;;  %v544_v6 = vsub.s32 5, %v16423_v40 }
 0x754   :  { %v15973_v20 = vld [vmem:[#allocation7] sm:$0xff] }
 0x758   :  { %v4982_v12 = vpop.f32.mrb[100].mxu0 }
 0x759   :  { %v13909_v31 = vpop.f32.mrb[101].mxu0 }
 0x75a   :  { %v4985_v27 = vpop.f32.mrb[102].mxu0 }
 0x75b   :  { %v13910_v17 = vpop.f32.mrb[103].mxu0 }
 0x782   :  { %v4933_v54 = vpop.f32.mrb[96].mxu1 }
 0x783   :  { %v5233_v25 = vpack.c.bf16 %v4933_v54, %v4884_v28  ;;  %v13903_v13 = vpop.f32.mrb[97].mxu1 }
 0x784   :  { %v4936_v4 = vpop.f32.mrb[98].mxu1 }
 0x785   :  { %v13904_v45 = vpop.f32.mrb[99].mxu1  ;;  %13221 = vmatmul.mubr.msk.bf16.vlgmr.msra.gmra.mrb[112].mxu0 %vm3474_vm1, %v5233_v25  ;;  %13225 = vmatmul.mubr.msk.bf16.vlgmr.msra.gmra.mrb[112].mxu1 %vm3474_vm1, %v5233_v25 }
 0x786   :  { %5388 = vmatprep.mubr.bf16.mxu0 %v16130_v49  ;;  %5461 = vmatprep.mubr.bf16.mxu1 %v16130_v49 }
 0x787   :  { %5585 = vmatpush1.bf16.msra.mxu0 %v15549_v55  ;;  %5658 = vmatpush1.bf16.msra.mxu1 %v15552_v50 }
 0x788   :  { %5586 = vmatprep.subr.bf16.mxu0 %v15557_v63  ;;  %5659 = vmatprep.subr.bf16.mxu1 %v15560_v53 }
 0x78b   :  { %5587 = vmatpush1.bf16.msra.mxu0 %v15555_v46  ;;  %5660 = vmatpush1.bf16.msra.mxu1 %v15558_v35 }
 0x78c   :  { %5588 = vmatprep.subr.bf16.mxu0 %v15563_v3  ;;  %5661 = vmatprep.subr.bf16.mxu1 %v15566_v37 }
 0x78e   :  { %v5080_v51 = vpop.f32.mrb[104].mxu0 }
 0x78f   :  { %v13921_v39 = vpop.f32.mrb[105].mxu0  ;;  %5589 = vmatpush1.bf16.msra.mxu0 %v15561_v10  ;;  %5662 = vmatpush1.bf16.msra.mxu1 %v15564_v11 }
 0x790   :  { %v5083_v44 = vpop.f32.mrb[106].mxu0  ;;  %5590 = vmatprep.subr.bf16.mxu0 %v15569_v21  ;;  %5663 = vmatprep.subr.bf16.mxu1 %v15572_v19 }
 0x791   :  { %v13922_v0 = vpop.f32.mrb[107].mxu0  ;;  %v18635_v44 = vld [vmem:[#allocation54_spill] sm:$0xff] }
 0x793   :  { %5591 = vmatpush1.bf16.msra.mxu0 %v15567_v22  ;;  %5664 = vmatpush1.bf16.msra.mxu1 %v15570_v61 }
 0x794   :  { %13941 = vmatprep.subr.bf16.mxu0 %v18595_v34  ;;  %13947 = vmatprep.subr.bf16.mxu1 %v18595_v34 }
 0x796   :  { %v5178_v47 = vpop.f32.mrb[108].mxu0 }
 0x797   :  { %v13933_v1 = vpop.f32.mrb[109].mxu0 }
 0x798   :  { %v5181_v29 = vpop.f32.mrb[110].mxu0 }
 0x799   :  { %v13934_v24 = vpop.f32.mrb[111].mxu0 }
 0x7b7   :  { %v5031_v62 = vpop.f32.mrb[100].mxu1 }
 0x7b8   :  { %v5234_v2 = vpack.c.bf16 %v5031_v62, %v4982_v12  ;;  %v13915_v58 = vpop.f32.mrb[101].mxu1  ;;  %v17062_v12 = vrot.slane %v15973_v20, %v544_v6  ;;  %v18637_v62 = vld [vmem:[#allocation27_spill] sm:$0xff] }
 0x7b9   :  { %v5034_v7 = vpop.f32.mrb[102].mxu1  ;;  %v18638_v58 = vld [vmem:[#allocation30_spill] sm:$0xff] }
 0x7ba   :  { %v13916_v38 = vpop.f32.mrb[103].mxu1  ;;  %13222 = vmatmul.mubr.msk.bf16.gmra.mrb[116].mxu0 %vm3474_vm1, %v5234_v2  ;;  %13226 = vmatmul.mubr.msk.bf16.gmra.mrb[116].mxu1 %vm3474_vm1, %v5234_v2  ;;  %v14550_v25 = vadd.f32 %v16432_v59, %v17062_v12  ;;  %v14552_v13 = vadd.f32 %v16440_v5, %v17062_v12  ;;  %v14554_v4 = vadd.f32 %v16458_v32, %v17062_v12 }
 0x7bb   :  { %5398 = vmatprep.mubr.bf16.mxu0 %v16130_v49  ;;  %5471 = vmatprep.mubr.bf16.mxu1 %v16130_v49  ;;  %v14560_v46 = vadd.f32 %v16517_v14, %v17062_v12 }
 0x7bc   :  { %v17072_v40 = vpack.c.bf16 %v14550_v25, %v14550_v25  ;;  %v17074_v50 = vpack.c.bf16 %v14552_v13, %v14552_v13  ;;  %v17115_v32 = vpack.c.bf16 %v14554_v4, %v14554_v4 }
 0x7bd   :  { %v17145_v3 = vpack.c.bf16 %v14560_v46, %v14560_v46 }
 0x7be   :  { %v5734_v59 = vsel %vm3474_vm1, %v17072_v40, 0  ;;  %v5780_v5 = vsel %vm3474_vm1, %v17074_v50, 0 }
 0x7bf   :  { %v5129_v42 = vpop.f32.mrb[104].mxu1  ;;  %v5964_v21 = vsel %vm3474_vm1, %v17145_v3, 0 }
 0x7c0   :  { %v5235_v30 = vpack.c.bf16 %v5129_v42, %v5080_v51  ;;  %v13927_v43 = vpop.f32.mrb[105].mxu1 }
 0x7c1   :  { %v5132_v28 = vpop.f32.mrb[106].mxu1 }
 0x7c2   :  { %v13928_v57 = vpop.f32.mrb[107].mxu1  ;;  %13223 = vmatmul.mubr.msk.bf16.gmra.mrb[120].mxu0 %vm3474_vm1, %v5235_v30  ;;  %13227 = vmatmul.mubr.msk.bf16.gmra.mrb[120].mxu1 %vm3474_vm1, %v5235_v30 }
 0x7c3   :  { %5408 = vmatprep.mubr.bf16.mxu0 %v16130_v49  ;;  %5481 = vmatprep.mubr.bf16.mxu1 %v16130_v49 }
 0x7cb   :  { %v5227_v31 = vpop.f32.mrb[108].mxu1 }
 0x7cc   :  { %v5236_v27 = vpack.c.bf16 %v5227_v31, %v5178_v47  ;;  %v13939_v17 = vpop.f32.mrb[109].mxu1  ;;  %v18636_v47 = vld [vmem:[#allocation55_spill] sm:$0xff] }
 0x7cd   :  { %v5230_v54 = vpop.f32.mrb[110].mxu1 }
 0x7ce   :  { %v13940_v55 = vpop.f32.mrb[111].mxu1  ;;  %13224 = vmatmul.mubr.msk.bf16.gmra.mrb[124].mxu0 %vm3474_vm1, %v5236_v27  ;;  %13228 = vmatmul.mubr.msk.bf16.gmra.mrb[124].mxu1 %vm3474_vm1, %v5236_v27 }
 0x7cf   :  { %5616 = vmatprep.mubr.bf16.mxu0 %v16130_v49  ;;  %5689 = vmatprep.mubr.bf16.mxu1 %v16130_v49 }
 0x7d6   :  { %13245 = vmatmul.mubr.msk.bf16.vlgmr.msra.gmra.mrb[112].mxu0 %vm3474_vm1, %v16919_v23  ;;  %13249 = vmatmul.mubr.msk.bf16.vlgmr.msra.gmra.mrb[112].mxu1 %vm3474_vm1, %v16919_v23  ;;  %v529_v23 = vrot.slane %v15973_v20, %v16628_v8 }
 0x7d7   :  { %13942 = vmatpush3.bf16.xpose.msra.mxu0 %v5734_v59  ;;  %13948 = vmatpush3.bf16.xpose.msra.mxu1 %v5780_v5 }
 0x7d8   :  { %5626 = vmatprep.mubr.bf16.mxu0 %v16130_v49  ;;  %5699 = vmatprep.mubr.bf16.mxu1 %v16130_v49  ;;  %v14520_v63 = vadd.f32 %v16339_v18, %v529_v23  ;;  %v14522_v35 = vadd.f32 %v16351_v41, %v529_v23  ;;  %v14562_v41 = vadd.f32 %v16547_v9, %v17062_v12  ;;  %v18633_v9 = vld [vmem:[#allocation24_spill] sm:$0xff] }
 0x7d9   :  { %13953 = vmatprep.subr.bf16.mxu0 %v18595_v34  ;;  %13959 = vmatprep.subr.bf16.mxu1 %v18595_v34  ;;  %v14526_v19 = vadd.f32 %v16369_v48, %v529_v23  ;;  %v14528_v51 = vadd.f32 %v18633_v9, %v529_v23  ;;  %v18634_v48 = vld [vmem:[#allocation58_spill] sm:$0xff]  ;;  %v14530_v2 = vadd.f32 %v18637_v62, %v529_v23 }
 0x7da   :  { %v17121_v45 = vpack.c.bf16 %v14520_v63, %v14520_v63  ;;  %v17147_v37 = vpack.c.bf16 %v14522_v35, %v14522_v35  ;;  %v14582_v0 = vadd.f32 %v18635_v44, %v18634_v48  ;;  %v14584_v1 = vadd.f32 %v18636_v47, %v18634_v48 }
 0x7db   :  { %v17175_v22 = vpack.c.bf16 %v14526_v19, %v14526_v19  ;;  %v17177_v61 = vpack.c.bf16 %v14528_v51, %v14528_v51  ;;  %v14532_v7 = vadd.f32 %v18638_v58, %v529_v23  ;;  %v17203_v30 = vpack.c.bf16 %v14530_v2, %v14530_v2 }
 0x7dc   :  { %v17199_v38 = vpack.c.bf16 %v14582_v0, %v14582_v0  ;;  %v17201_v42 = vpack.c.bf16 %v14584_v1, %v14584_v1 }
 0x7dd   :  { %v17205_v43 = vpack.c.bf16 %v14532_v7, %v14532_v7 }
 0x7de   :  { %13246 = vmatmul.mubr.msk.bf16.gmra.mrb[116].mxu0 %vm3474_vm1, %v16921_v60  ;;  %13250 = vmatmul.mubr.msk.bf16.gmra.mrb[116].mxu1 %vm3474_vm1, %v16921_v60  ;;  %v14556_v60 = vadd.f32 %v16471_v16, %v17062_v12  ;;  %v6198_v28 = vsel %vm3943_vm2, %v17199_v38, 0  ;;  %v6244_v57 = vsel %vm3943_vm2, %v17201_v42, 0 }
 0x7df   :  { %5636 = vmatprep.mubr.bf16.mxu0 %v16130_v49  ;;  %5709 = vmatprep.mubr.bf16.mxu1 %v16130_v49 }
 0x7e0   :  { %v17117_v53 = vpack.c.bf16 %v14556_v60, %v14556_v60 }
 0x7e2   :  { %v5872_v18 = vsel %vm3474_vm1, %v17117_v53, 0 }
 0x7e6   :  { %13247 = vmatmul.mubr.msk.bf16.gmra.mrb[120].mxu0 %vm3474_vm1, %v16923_v52  ;;  %13251 = vmatmul.mubr.msk.bf16.gmra.mrb[120].mxu1 %vm3474_vm1, %v16923_v52  ;;  %v14518_v52 = vadd.f32 %v16335_v15, %v529_v23  ;;  %v5826_v15 = vsel %vm3474_vm1, %v17115_v32, 0 }
 0x7e7   :  { %5646 = vmatprep.mubr.bf16.mxu0 %v16130_v49  ;;  %5719 = vmatprep.mubr.bf16.mxu1 %v16130_v49 }
 0x7e8   :  { %v17119_v16 = vpack.c.bf16 %v14518_v52, %v14518_v52 }
 0x7ee   :  { %13248 = vmatmul.mubr.msk.bf16.gmra.mrb[124].mxu0 %vm3474_vm1, %v16931_v26  ;;  %13252 = vmatmul.mubr.msk.bf16.gmra.mrb[124].mxu1 %vm3474_vm1, %v16931_v26  ;;  %v14558_v26 = vadd.f32 %v16503_v36, %v17062_v12  ;;  %v14524_v36 = vadd.f32 %v16359_v33, %v529_v23  ;;  %v14564_v33 = vadd.f32 %v16561_v56, %v17062_v12 }
 0x7ef   :  { %13943 = vmatprep.mubr.msk.bf16.mxu0 %vm16128_vm0, %v18595_v34  ;;  %13949 = vmatprep.mubr.msk.bf16.mxu1 %vm16128_vm0, %v18595_v34  ;;  %v17171_v56 = vpack.c.bf16 %v14562_v41, %v14562_v41 }
 0x7f0   :  { %v17143_v14 = vpack.c.bf16 %v14558_v26, %v14558_v26  ;;  %v17149_v10 = vpack.c.bf16 %v14524_v36, %v14524_v36  ;;  %v17173_v39 = vpack.c.bf16 %v14564_v33, %v14564_v33 }
 0x7f1   :  { %v6010_v29 = vsel %vm3474_vm1, %v17171_v56, 0 }
 0x7f2   :  { %v5918_v11 = vsel %vm3474_vm1, %v17143_v14, 0  ;;  %v6056_v24 = vsel %vm3474_vm1, %v17173_v39, 0 }
 0x7f6   :  { %13944 = vmatmul.mubr.msk.bf16.vlgmr.msra.gmra.mrb[128].mxu0 %vm3474_vm1, %v17119_v16  ;;  %13950 = vmatmul.mubr.msk.bf16.vlgmr.msra.gmra.mrb[128].mxu1 %vm3474_vm1, %v17121_v45 }
 0x7f7   :  { %13954 = vmatpush3.bf16.xpose.msra.mxu0 %v5826_v15  ;;  %13960 = vmatpush3.bf16.xpose.msra.mxu1 %v5872_v18 }
 0x7f8   :  { %13955 = vmatprep.mubr.msk.bf16.mxu0 %vm16128_vm0, %v18595_v34  ;;  %13961 = vmatprep.mubr.msk.bf16.mxu1 %vm16128_vm0, %v18595_v34 }
 0x7f9   :  { %13965 = vmatprep.subr.bf16.mxu0 %v18595_v34  ;;  %13971 = vmatprep.subr.bf16.mxu1 %v18595_v34 }
 0x7fe   :  { %13956 = vmatmul.mubr.msk.bf16.vlgmr.msra.gmra.mrb[132].mxu0 %vm3474_vm1, %v17147_v37  ;;  %13962 = vmatmul.mubr.msk.bf16.vlgmr.msra.gmra.mrb[132].mxu1 %vm3474_vm1, %v17149_v10 }
 0x7ff   :  { %13966 = vmatpush3.bf16.xpose.msra.mxu0 %v5918_v11  ;;  %13972 = vmatpush3.bf16.xpose.msra.mxu1 %v5964_v21 }
 0x800   :  { %13967 = vmatprep.mubr.msk.bf16.mxu0 %vm16128_vm0, %v18595_v34  ;;  %13973 = vmatprep.mubr.msk.bf16.mxu1 %vm16128_vm0, %v18595_v34 }
 0x801   :  { %13977 = vmatprep.subr.bf16.mxu0 %v18595_v34  ;;  %13983 = vmatprep.subr.bf16.mxu1 %v18595_v34 }
 0x806   :  { %13968 = vmatmul.mubr.msk.bf16.vlgmr.msra.gmra.mrb[136].mxu0 %vm3474_vm1, %v17175_v22  ;;  %13974 = vmatmul.mubr.msk.bf16.vlgmr.msra.gmra.mrb[136].mxu1 %vm3474_vm1, %v17177_v61 }
 0x807   :  { %13978 = vmatpush3.bf16.xpose.msra.mxu0 %v6010_v29  ;;  %13984 = vmatpush3.bf16.xpose.msra.mxu1 %v6056_v24 }
 0x808   :  { %13979 = vmatprep.mubr.msk.bf16.mxu0 %vm16128_vm0, %v18595_v34  ;;  %13985 = vmatprep.mubr.msk.bf16.mxu1 %vm16128_vm0, %v18595_v34 }
 0x809   :  { %13989 = vmatprep.subr.bf16.mxu0 %v18595_v34  ;;  %13995 = vmatprep.subr.bf16.mxu1 %v18595_v34 }
 0x80e   :  { %13980 = vmatmul.mubr.msk.bf16.vlgmr.msra.gmra.mrb[140].mxu0 %vm3474_vm1, %v17203_v30  ;;  %13986 = vmatmul.mubr.msk.bf16.vlgmr.msra.gmra.mrb[140].mxu1 %vm3474_vm1, %v17205_v43 }
 0x80f   :  { %13990 = vmatpush3.bf16.msra.mxu0 %v6198_v28  ;;  %13996 = vmatpush3.bf16.msra.mxu1 %v6244_v57 }
 0x810   :  { %13991 = vmatprep.mubr.msk.bf16.mxu0 %vm16128_vm0, %v18595_v34  ;;  %13997 = vmatprep.mubr.msk.bf16.mxu1 %vm16128_vm0, %v18595_v34 }
 0x811   :  { %14001 = vmatprep.subr.bf16.mxu0 %v18595_v34  ;;  %14007 = vmatprep.subr.bf16.mxu1 %v18595_v34 }
 0x8c9   :  { %v5770_v6 = vpop.f32.mrb[128].mxu0  ;;  %v5816_v20 = vpop.f32.mrb[128].mxu1 }
 0x8ca   :  { %v13945_v12 = vpop.f32.mrb[129].mxu0  ;;  %v13951_v31 = vpop.f32.mrb[129].mxu1  ;;  %v6101_v27 = vsel %vm3843_vm3, %v5816_v20, -inf  ;;  %v6098_v17 = vsel %vm3843_vm3, %v5770_v6, -inf }
 0x8cb   :  { %6102 = vmax.xlane.f32.xlu1 %v6101_v27  ;;  %v5819_v54 = vpop.f32.mrb[130].mxu1  ;;  %6099 = vmax.xlane.f32.xlu0 %v6098_v17  ;;  %v5773_v25 = vpop.f32.mrb[130].mxu0 }
 0x8cc   :  { %v13946_v13 = vpop.f32.mrb[131].mxu0  ;;  %v13952_v55 = vpop.f32.mrb[131].mxu1 }
 0x8d1   :  { %v5862_v59 = vpop.f32.mrb[132].mxu0  ;;  %v5908_v5 = vpop.f32.mrb[132].mxu1 }
 0x8d2   :  { %v13957_v23 = vpop.f32.mrb[133].mxu0  ;;  %v13963_v4 = vpop.f32.mrb[133].mxu1  ;;  %v6104_v60 = vsel %vm3843_vm3, %v5862_v59, -inf  ;;  %v6107_v15 = vsel %vm3843_vm3, %v5908_v5, -inf }
 0x8d3   :  { %v5911_v52 = vpop.f32.mrb[134].mxu1  ;;  %6105 = vmax.xlane.f32.xlu0 %v6104_v60  ;;  %v5865_v63 = vpop.f32.mrb[134].mxu0 }
 0x8d4   :  { %v13958_v26 = vpop.f32.mrb[135].mxu0  ;;  %v13964_v46 = vpop.f32.mrb[135].mxu1 }
 0x8d7   :  { %6108 = vmax.xlane.f32.xlu0 %v6107_v15 }
 0x8d9   :  { %v5954_v18 = vpop.f32.mrb[136].mxu0  ;;  %v6000_v35 = vpop.f32.mrb[136].mxu1 }
 0x8da   :  { %v13969_v36 = vpop.f32.mrb[137].mxu0  ;;  %v13975_v41 = vpop.f32.mrb[137].mxu1  ;;  %v6113_v33 = vsel %vm3843_vm3, %v6000_v35, -inf  ;;  %v6110_v11 = vsel %vm3843_vm3, %v5954_v18, -inf }
 0x8db   :  { %6114 = vmax.xlane.f32.xlu1 %v6113_v33  ;;  %v6003_v21 = vpop.f32.mrb[138].mxu1  ;;  %6111 = vmax.xlane.f32.xlu0 %v6110_v11  ;;  %v5957_v19 = vpop.f32.mrb[138].mxu0 }
 0x8dc   :  { %v13970_v9 = vpop.f32.mrb[139].mxu0  ;;  %v13976_v51 = vpop.f32.mrb[139].mxu1 }
 0x8e1   :  { %v6046_v48 = vpop.f32.mrb[140].mxu0  ;;  %v6092_v44 = vpop.f32.mrb[140].mxu1 }
 0x8e2   :  { %v13981_v0 = vpop.f32.mrb[141].mxu0  ;;  %v13987_v47 = vpop.f32.mrb[141].mxu1  ;;  %v6119_v1 = vsel %vm3843_vm3, %v6092_v44, -inf  ;;  %v6116_v29 = vsel %vm3843_vm3, %v6046_v48, -inf }
 0x8e3   :  { %6120 = vmax.xlane.f32.xlu1 %v6119_v1  ;;  %v6095_v24 = vpop.f32.mrb[142].mxu1  ;;  %6117 = vmax.xlane.f32.xlu0 %v6116_v29  ;;  %v6049_v62 = vpop.f32.mrb[142].mxu0 }
 0x8e4   :  { %v13982_v2 = vpop.f32.mrb[143].mxu0  ;;  %v13988_v58 = vpop.f32.mrb[143].mxu1 }
 0x958   :  { %v6103_v7 = vpop.xlane.xlu1 %6102  ;;  %v6100_v28 = vpop.xlane.xlu0 %6099 }
 0x959   :  { %v6123_v57 = vsub.f32 %v5816_v20, %v6103_v7  ;;  %v6122_v12 = vsub.f32 %v5770_v6, %v6100_v28  ;;  %v18641_v28 = vld [vmem:[#allocation71_spill] sm:$0xff] }
 0x95b   :  { %v6132_v31 = vmul.f32 1.442695, %v6123_v57  ;;  %v6130_v27 = vmul.f32 1.442695, %v6122_v12  ;;  %v17318_v57 = vpack.c.bf16 %v18641_v28, %v18641_v28 }
 0x95d   :  { %15781 = vpow2.f32 %v6132_v31 }
 0x95e   :  { %15783 = vpow2.f32 %v6130_v27  ;;  %v18642_v27 = vld [vmem:[#allocation72_spill] sm:$0xff] }
 0x960   :  { %v6106_v17 = vpop.xlane.xlu0 %6105 }
 0x961   :  { %v6124_v54 = vsub.f32 %v5862_v59, %v6106_v17  ;;  %v17322_v17 = vpack.c.bf16 %v18642_v27, %v18642_v27 }
 0x963   :  { %v6134_v25 = vmul.f32 1.442695, %v6124_v54 }
 0x964   :  { %v6109_v13 = vpop.xlane.xlu0 %6108 }
 0x965   :  { %15785 = vpow2.f32 %v6134_v25  ;;  %v6125_v55 = vsub.f32 %v5908_v5, %v6109_v13  ;;  %v6382_v13 = vsel %vm3943_vm2, %v17318_v57, 0 }
 0x967   :  { %v17229_v23 = vpop.eup %15781  ;;  %v6136_v4 = vmul.f32 1.442695, %v6125_v55 }
 0x968   :  { %v17231_v60 = vpop.eup %15783  ;;  %v6115_v52 = vpop.xlane.xlu1 %6114  ;;  %v6149_v6 = vsel %vm3843_vm3, %v17229_v23, 0.0 }
 0x969   :  { %v6112_v63 = vpop.xlane.xlu0 %6111  ;;  %15787 = vpow2.f32 %v6136_v4  ;;  %v6127_v20 = vsub.f32 %v6000_v35, %v6115_v52  ;;  %6150 = vadd.xlane.f32.xlu1 %v6149_v6  ;;  %v6146_v59 = vsel %vm3843_vm3, %v17231_v60, 0.0  ;;  %v6428_v52 = vsel %vm3943_vm2, %v17322_v17, 0 }
 0x96a   :  { %v6126_v26 = vsub.f32 %v5954_v18, %v6112_v63  ;;  %6147 = vadd.xlane.f32.xlu0 %v6146_v59  ;;  %v18643_v63 = vld [vmem:[#allocation77_spill] sm:$0xff] }
 0x96b   :  { %v6140_v46 = vmul.f32 1.442695, %v6127_v20  ;;  %v17336_v6 = vpack.c.bf16 %v18643_v63, %v18643_v63 }
 0x96c   :  { %v6138_v5 = vmul.f32 1.442695, %v6126_v26 }
 0x96d   :  { %15789 = vpow2.f32 %v6140_v46  ;;  %v15575_v46 = vld [vmem:[#allocation8 + $0x104] ss:$16 sps:$4 sm:$0xff]  }
 0x96e   :  { %15791 = vpow2.f32 %v6138_v5  ;;  %v18644_v5 = vld [vmem:[#allocation78_spill] sm:$0xff] }
 0x96f   :  { %v17237_v15 = vpop.eup %15785 }
 0x970   :  { %v6121_v36 = vpop.xlane.xlu1 %6120  ;;  %v6118_v41 = vpop.xlane.xlu0 %6117  ;;  %v6152_v33 = vsel %vm3843_vm3, %v17237_v15, 0.0 }
 0x971   :  { %v6129_v11 = vsub.f32 %v6092_v44, %v6121_v36  ;;  %v6128_v21 = vsub.f32 %v6046_v48, %v6118_v41  ;;  %6153 = vadd.xlane.f32.xlu0 %v6152_v33  ;;  %v6474_v36 = vsel %vm3943_vm2, %v17336_v6, 0  ;;  %v15578_v33 = vld [vmem:[#allocation8 + $0x10c] ss:$16 sps:$4 sm:$0xff]  }
 0x973   :  { %v17241_v18 = vpop.eup %15787  ;;  %v6144_v35 = vmul.f32 1.442695, %v6129_v11  ;;  %v6142_v19 = vmul.f32 1.442695, %v6128_v21 }
 0x974   :  { %v6155_v9 = vsel %vm3843_vm3, %v17241_v18, 0.0 }
 0x975   :  { %15793 = vpow2.f32 %v6144_v35  ;;  %6156 = vadd.xlane.f32.xlu1 %v6155_v9  ;;  %v15573_v9 = vld [vmem:[#allocation8 + $0x100] ss:$16 sps:$4 sm:$0xff]  }
 0x976   :  { %15795 = vpow2.f32 %v6142_v19 }
 0x977   :  { %v17245_v51 = vpop.eup %15789 }
 0x978   :  { %v17247_v0 = vpop.eup %15791  ;;  %v6161_v47 = vsel %vm3843_vm3, %v17245_v51, 0.0 }
 0x979   :  { %6162 = vadd.xlane.f32.xlu1 %v6161_v47  ;;  %v6158_v48 = vsel %vm3843_vm3, %v17247_v0, 0.0  ;;  %v15576_v47 = vld [vmem:[#allocation8 + $0x108] ss:$16 sps:$4 sm:$0xff]  }
 0x97a   :  { %6159 = vadd.xlane.f32.xlu0 %v6158_v48 }
 0x97f   :  { %v17253_v44 = vpop.eup %15793 }
 0x980   :  { %v17255_v1 = vpop.eup %15795  ;;  %v6167_v29 = vsel %vm3843_vm3, %v17253_v44, 0.0 }
 0x981   :  { %6168 = vadd.xlane.f32.xlu1 %v6167_v29  ;;  %v6164_v24 = vsel %vm3843_vm3, %v17255_v1, 0.0  ;;  %v15579_v29 = vld [vmem:[#allocation8 + $0x120] ss:$16 sps:$4 sm:$0xff]  }
 0x982   :  { %6165 = vadd.xlane.f32.xlu0 %v6164_v24  ;;  %v15584_v24 = vld [vmem:[#allocation8 + $0x12c] ss:$16 sps:$4 sm:$0xff]  }
 0x992   :  { %6909 = vrot.lane.b32.xlu1 %v17074_v50, %s16129_s4 }
 0x996   :  { %6854 = vrot.lane.b32.xlu1 %v17119_v16, %s16129_s4 }
 0x998   :  { %6857 = vrot.lane.b32.xlu0 %v17072_v40, %s16129_s4 }
 0x99a   :  { %6906 = vrot.lane.b32.xlu1 %v17121_v45, %s16129_s4  ;;  %v18639_v45 = vld [vmem:[#allocation64_spill] sm:$0xff] }
 0x99c   :  { %6961 = vrot.lane.b32.xlu0 %v17115_v32, %s16129_s4 }
 0x99e   :  { %7013 = vrot.lane.b32.xlu1 %v17117_v53, %s16129_s4 }
 0x9a0   :  { %6958 = vrot.lane.b32.xlu0 %v17147_v37, %s16129_s4 }
 0x9a2   :  { %7010 = vrot.lane.b32.xlu1 %v17149_v10, %s16129_s4  ;;  %v18640_v10 = vld [vmem:[#allocation61_spill] sm:$0xff] }
 0x9a4   :  { %7065 = vrot.lane.b32.xlu0 %v17143_v14, %s16129_s4  ;;  %v17295_v14 = vpack.c.bf16 %v18639_v45, %v18639_v45  ;;  %v15596_v45 = vld [vmem:[#allocation8 + $0x16c] ss:$16 sps:$4 sm:$0xff]  }
 0x9a6   :  { %7117 = vrot.lane.b32.xlu1 %v17145_v3, %s16129_s4 }
 0x9a8   :  { %7062 = vrot.lane.b32.xlu0 %v17175_v22, %s16129_s4 }
 0x9aa   :  { %7114 = vrot.lane.b32.xlu1 %v17177_v61, %s16129_s4 }
 0x9ac   :  { %7169 = vrot.lane.b32.xlu0 %v17171_v56, %s16129_s4  ;;  %v17300_v56 = vpack.c.bf16 %v18640_v10, %v18640_v10 }
 0x9ae   :  { %7221 = vrot.lane.b32.xlu1 %v17173_v39, %s16129_s4  ;;  %v6290_v62 = vsel %vm3943_vm2, %v17300_v56, 0 }
 0x9b0   :  { %7166 = vrot.lane.b32.xlu0 %v17203_v30, %s16129_s4  ;;  %v6336_v30 = vsel %vm3943_vm2, %v17295_v14, 0 }
 0x9b2   :  { %7218 = vrot.lane.b32.xlu1 %v17205_v43, %s16129_s4 }
 0x9f6   :  { %v6151_v40 = vpop.xlane.xlu1 %6150 }
 0x9f7   :  { %15797 = vrcp.f32 %v6151_v40  ;;  %v6148_v50 = vpop.xlane.xlu0 %6147  ;;  %v15582_v40 = vld [vmem:[#allocation8 + $0x128] ss:$16 sps:$4 sm:$0xff]  }
 0x9f8   :  { %15799 = vrcp.f32 %v6148_v50  ;;  %v15590_v50 = vld [vmem:[#allocation8 + $0x14c] ss:$16 sps:$4 sm:$0xff]  }
 0x9fe   :  { %v6154_v32 = vpop.xlane.xlu0 %6153 }
 0x9ff   :  { %15801 = vrcp.f32 %v6154_v32  ;;  %v15593_v32 = vld [vmem:[#allocation8 + $0x164] ss:$16 sps:$4 sm:$0xff]  }
 0xa01   :  { %v15798_v53 = vpop.eup %15797 }
 0xa02   :  { %v15800_v16 = vpop.eup %15799  ;;  %v6157_v3 = vpop.xlane.xlu1 %6156  ;;  %v6179_v37 = vmul.f32 %v15798_v53, %v17229_v23  ;;  %v15588_v53 = vld [vmem:[#allocation8 + $0x148] ss:$16 sps:$4 sm:$0xff]  }
 0xa03   :  { %15803 = vrcp.f32 %v6157_v3  ;;  %v6178_v39 = vmul.f32 %v15800_v16, %v17231_v60  ;;  %v15591_v16 = vld [vmem:[#allocation8 + $0x160] ss:$16 sps:$4 sm:$0xff]   ;;  %v15594_v3 = vld [vmem:[#allocation8 + $0x168] ss:$16 sps:$4 sm:$0xff]  }
 0xa04   :  { %v6187_v22 = vpack.c.bf16 %v6179_v37, %v6179_v37 }
 0xa05   :  { %v6186_v61 = vpack.c.bf16 %v6178_v39, %v6178_v39 }
 0xa06   :  { %13998 = vmatmul.mubr.msk.bf16.vlgmr.msra.gmra.mrb[144].mxu1 %vm3843_vm3, %v6187_v22  ;;  %v6163_v43 = vpop.xlane.xlu1 %6162 }
 0xa07   :  { %14008 = vmatpush3.bf16.msra.mxu1 %v6336_v30  ;;  %15805 = vrcp.f32 %v6163_v43  ;;  %13992 = vmatmul.mubr.msk.bf16.vlgmr.msra.gmra.mrb[144].mxu0 %vm3843_vm3, %v6186_v61  ;;  %v6160_v2 = vpop.xlane.xlu0 %6159 }
 0xa08   :  { %14002 = vmatpush3.bf16.msra.mxu0 %v6290_v62  ;;  %15807 = vrcp.f32 %v6160_v2  ;;  %14003 = vmatprep.mubr.msk.bf16.mxu0 %vm16128_vm0, %v18595_v34 }
 0xa09   :  { %v15802_v58 = vpop.eup %15801  ;;  %14013 = vmatprep.subr.bf16.mxu0 %v18595_v34  ;;  %14009 = vmatprep.mubr.msk.bf16.mxu1 %vm16128_vm0, %v18595_v34 }
 0xa0a   :  { %v6180_v7 = vmul.f32 %v15802_v58, %v17237_v15  ;;  %14019 = vmatprep.subr.bf16.mxu1 %v18595_v34  ;;  %v17345_v15 = vpack.c.bf16 %v18644_v5, %v18644_v5 }
 0xa0c   :  { %v6188_v12 = vpack.c.bf16 %v6180_v7, %v6180_v7 }
 0xa0d   :  { %v15804_v31 = vpop.eup %15803 }
 0xa0e   :  { %v6169_v54 = vpop.xlane.xlu1 %6168  ;;  %v6181_v25 = vmul.f32 %v15804_v31, %v17241_v18  ;;  %v6520_v18 = vsel %vm3943_vm2, %v17345_v15, 0 }
 0xa0f   :  { %15809 = vrcp.f32 %v6169_v54  ;;  %14004 = vmatmul.mubr.msk.bf16.vlgmr.msra.gmra.mrb[148].mxu0 %vm3843_vm3, %v6188_v12  ;;  %v6166_v55 = vpop.xlane.xlu0 %6165 }
 0xa10   :  { %14014 = vmatpush3.bf16.msra.mxu0 %v6382_v13  ;;  %15811 = vrcp.f32 %v6166_v55  ;;  %v6189_v23 = vpack.c.bf16 %v6181_v25, %v6181_v25  ;;  %14015 = vmatprep.mubr.msk.bf16.mxu0 %vm16128_vm0, %v18595_v34 }
 0xa11   :  { %v15806_v4 = vpop.eup %15805  ;;  %14025 = vmatprep.subr.bf16.mxu0 %v18595_v34 }
 0xa12   :  { %v15808_v60 = vpop.eup %15807  ;;  %14010 = vmatmul.mubr.msk.bf16.vlgmr.msra.gmra.mrb[148].mxu1 %vm3843_vm3, %v6189_v23  ;;  %v6183_v26 = vmul.f32 %v15806_v4, %v17245_v51  ;;  %v6910_v37 = vpop.permute.xlu1 %6909 }
 0xa13   :  { %14020 = vmatpush3.bf16.msra.mxu1 %v6428_v52  ;;  %v6182_v20 = vmul.f32 %v15808_v60, %v17247_v0  ;;  %14021 = vmatprep.mubr.msk.bf16.mxu1 %vm16128_vm0, %v18595_v34  ;;  %v15581_v0 = vld [vmem:[#allocation8 + $0x124] ss:$16 sps:$4 sm:$0xff]   ;;  %v6858_v10 = vpop.permute.xlu0 %6857  ;;  %v6915_v7 = vsel %vm3474_vm1, %v6910_v37, 0 }
 0xa14   :  { %14031 = vmatprep.subr.bf16.mxu1 %v18595_v34  ;;  %v6191_v41 = vpack.c.bf16 %v6183_v26, %v6183_v26  ;;  %v6863_v28 = vsel %vm3474_vm1, %v6858_v10, 0 }
 0xa15   :  { %v6190_v59 = vpack.c.bf16 %v6182_v20, %v6182_v20 }
 0xa16   :  { %v6855_v60 = vpop.permute.xlu1 %6854 }
 0xa17   :  { %14016 = vmatmul.mubr.msk.bf16.vlgmr.msra.gmra.mrb[152].mxu0 %vm3843_vm3, %v6190_v59 }
 0xa18   :  { %14026 = vmatpush3.bf16.msra.mxu0 %v6474_v36  ;;  %14027 = vmatprep.mubr.msk.bf16.mxu0 %vm16128_vm0, %v18595_v34 }
 0xa19   :  { %v15810_v11 = vpop.eup %15809  ;;  %6675 = vmatprep.subr.bf16.mxu0 %v15575_v46 }
 0xa1a   :  { %v15812_v21 = vpop.eup %15811  ;;  %14022 = vmatmul.mubr.msk.bf16.vlgmr.msra.gmra.mrb[152].mxu1 %vm3843_vm3, %v6191_v41  ;;  %v6185_v19 = vmul.f32 %v15810_v11, %v17253_v44  ;;  %v15585_v44 = vld [vmem:[#allocation8 + $0x140] ss:$16 sps:$4 sm:$0xff]   ;;  %v6907_v5 = vpop.permute.xlu1 %6906 }
 0xa1b   :  { %14032 = vmatpush3.bf16.msra.mxu1 %v6520_v18  ;;  %v6184_v35 = vmul.f32 %v15812_v21, %v17255_v1  ;;  %14033 = vmatprep.mubr.msk.bf16.mxu1 %vm16128_vm0, %v18595_v34  ;;  %v15587_v1 = vld [vmem:[#allocation8 + $0x144] ss:$16 sps:$4 sm:$0xff]   ;;  %v6962_v18 = vpop.permute.xlu0 %6961 }
 0xa1c   :  { %6748 = vmatprep.subr.bf16.mxu1 %v15578_v33  ;;  %v6193_v48 = vpack.c.bf16 %v6185_v19, %v6185_v19 }
 0xa1d   :  { %v6192_v51 = vpack.c.bf16 %v6184_v35, %v6184_v35 }
 0xa1e   :  { %v7014_v19 = vpop.permute.xlu1 %7013 }
 0xa1f   :  { %14028 = vmatmul.mubr.msk.bf16.vlgmr.msra.gmra.mrb[156].mxu0 %vm3843_vm3, %v6192_v51 }
 0xa20   :  { %6676 = vmatpush1.bf16.msra.mxu0 %v15573_v9  ;;  %6707 = vmatprep.mubr.bf16.mxu0 %v16130_v49 }
 0xa21   :  { %6677 = vmatprep.subr.bf16.mxu0 %v15581_v0 }
 0xa22   :  { %14034 = vmatmul.mubr.msk.bf16.vlgmr.msra.gmra.mrb[156].mxu1 %vm3843_vm3, %v6193_v48 }
 0xa23   :  { %6749 = vmatpush1.bf16.msra.mxu1 %v15576_v47  ;;  %6780 = vmatprep.mubr.bf16.mxu1 %v16130_v49 }
 0xa24   :  { %6750 = vmatprep.subr.bf16.mxu1 %v15584_v24  ;;  %6678 = vmatpush1.bf16.msra.mxu0 %v15579_v29 }
 0xa25   :  { %6679 = vmatprep.subr.bf16.mxu0 %v15587_v1  ;;  %v6959_v1 = vpop.permute.xlu0 %6958 }
 0xa27   :  { %6751 = vmatpush1.bf16.msra.mxu1 %v15582_v40  ;;  %v7011_v40 = vpop.permute.xlu1 %7010 }
 0xa28   :  { %6752 = vmatprep.subr.bf16.mxu1 %v15590_v50  ;;  %6680 = vmatpush1.bf16.msra.mxu0 %v15585_v44  ;;  %v6967_v44 = vsel %vm3474_vm1, %v6962_v18, 0  ;;  %v7019_v50 = vsel %vm3474_vm1, %v7014_v19, 0 }
 0xa29   :  { %6681 = vmatprep.subr.bf16.mxu0 %v15593_v32  ;;  %v7066_v32 = vpop.permute.xlu0 %7065 }
 0xa2b   :  { %6753 = vmatpush1.bf16.msra.mxu1 %v15588_v53  ;;  %v7118_v53 = vpop.permute.xlu1 %7117 }
 0xa2c   :  { %6754 = vmatprep.subr.bf16.mxu1 %v15596_v45  ;;  %6682 = vmatpush1.bf16.msra.mxu0 %v15591_v16  ;;  %v7123_v37 = vsel %vm3474_vm1, %v7118_v53, 0 }
 0xa2d   :  { %14037 = vmatprep.subr.bf16.mxu0 %v18595_v34  ;;  %v7063_v16 = vpop.permute.xlu0 %7062 }
 0xa2f   :  { %6755 = vmatpush1.bf16.msra.mxu1 %v15594_v3  ;;  %v7115_v45 = vpop.permute.xlu1 %7114  ;;  %v7071_v3 = vsel %vm3474_vm1, %v7066_v32, 0 }
 0xa30   :  { %14043 = vmatprep.subr.bf16.mxu1 %v18595_v34 }
 0xa31   :  { %v7170_v10 = vpop.permute.xlu0 %7169 }
 0xad9   :  { %v6280_v39 = vpop.f32.mrb[144].mxu1 }
 0xada   :  { %v6234_v22 = vpop.f32.mrb[144].mxu0  ;;  %v13999_v61 = vpop.f32.mrb[145].mxu1 }
 0xadb   :  { %v6562_v30 = vpack.c.bf16 %v6280_v39, %v6234_v22  ;;  %v13993_v43 = vpop.f32.mrb[145].mxu0  ;;  %v6283_v62 = vpop.f32.mrb[146].mxu1  ;;  %v7175_v22 = vsel %vm3474_vm1, %v7170_v10, 0 }
 0xadc   :  { %v6237_v2 = vpop.f32.mrb[146].mxu0  ;;  %v14000_v58 = vpop.f32.mrb[147].mxu1 }
 0xadd   :  { %v13994_v12 = vpop.f32.mrb[147].mxu0  ;;  %13285 = vmatmul.mubr.msk.bf16.vlgmr.msra.gmra.mrb[112].mxu0 %vm3474_vm1, %v6562_v30  ;;  %13289 = vmatmul.mubr.msk.bf16.vlgmr.msra.gmra.mrb[112].mxu1 %vm3474_vm1, %v6562_v30  ;;  %v7222_v39 = vpop.permute.xlu1 %7221 }
 0xade   :  { %14038 = vmatpush3.bf16.xpose.msra.mxu0 %v6863_v28  ;;  %14044 = vmatpush3.bf16.xpose.msra.mxu1 %v6915_v7  ;;  %v7227_v61 = vsel %vm3474_vm1, %v7222_v39, 0  ;;  %v7167_v30 = vpop.permute.xlu0 %7166 }
 0xadf   :  { %6717 = vmatprep.mubr.bf16.mxu0 %v16130_v49  ;;  %6790 = vmatprep.mubr.bf16.mxu1 %v16130_v49 }
 0xae0   :  { %14049 = vmatprep.subr.bf16.mxu0 %v18595_v34  ;;  %14055 = vmatprep.subr.bf16.mxu1 %v18595_v34 }
 0xae1   :  { %v7219_v43 = vpop.permute.xlu1 %7218 }
 0xae2   :  { %v6326_v31 = vpop.f32.mrb[148].mxu0 }
 0xae3   :  { %v14005_v27 = vpop.f32.mrb[149].mxu0 }
 0xae4   :  { %v6329_v54 = vpop.f32.mrb[150].mxu0 }
 0xae5   :  { %v14006_v25 = vpop.f32.mrb[151].mxu0  ;;  %v6372_v13 = vpop.f32.mrb[148].mxu1 }
 0xae6   :  { %v6563_v55 = vpack.c.bf16 %v6372_v13, %v6326_v31  ;;  %v14011_v23 = vpop.f32.mrb[149].mxu1 }
 0xae7   :  { %v6375_v4 = vpop.f32.mrb[150].mxu1 }
 0xae8   :  { %v14012_v52 = vpop.f32.mrb[151].mxu1  ;;  %13286 = vmatmul.mubr.msk.bf16.gmra.mrb[116].mxu0 %vm3474_vm1, %v6563_v55  ;;  %13290 = vmatmul.mubr.msk.bf16.gmra.mrb[116].mxu1 %vm3474_vm1, %v6563_v55 }
 0xae9   :  { %6727 = vmatprep.mubr.bf16.mxu0 %v16130_v49  ;;  %6800 = vmatprep.mubr.bf16.mxu1 %v16130_v49 }
 0xaea   :  { %v6418_v63 = vpop.f32.mrb[152].mxu0 }
 0xaeb   :  { %v14017_v20 = vpop.f32.mrb[153].mxu0 }
 0xaec   :  { %v6421_v26 = vpop.f32.mrb[154].mxu0 }
 0xaed   :  { %v14018_v59 = vpop.f32.mrb[155].mxu0  ;;  %v6464_v46 = vpop.f32.mrb[152].mxu1 }
 0xaee   :  { %v6564_v36 = vpack.c.bf16 %v6464_v46, %v6418_v63  ;;  %v14023_v41 = vpop.f32.mrb[153].mxu1 }
 0xaef   :  { %v6467_v33 = vpop.f32.mrb[154].mxu1 }
 0xaf0   :  { %v14024_v11 = vpop.f32.mrb[155].mxu1  ;;  %13287 = vmatmul.mubr.msk.bf16.gmra.mrb[120].mxu0 %vm3474_vm1, %v6564_v36  ;;  %13291 = vmatmul.mubr.msk.bf16.gmra.mrb[120].mxu1 %vm3474_vm1, %v6564_v36 }
 0xaf1   :  { %6737 = vmatprep.mubr.bf16.mxu0 %v16130_v49  ;;  %6810 = vmatprep.mubr.bf16.mxu1 %v16130_v49 }
 0xaf2   :  { %v6510_v21 = vpop.f32.mrb[156].mxu0 }
 0xaf3   :  { %v14029_v35 = vpop.f32.mrb[157].mxu0 }
 0xaf4   :  { %v6513_v9 = vpop.f32.mrb[158].mxu0 }
 0xaf5   :  { %v14030_v51 = vpop.f32.mrb[159].mxu0  ;;  %v6556_v0 = vpop.f32.mrb[156].mxu1 }
 0xaf6   :  { %v6565_v47 = vpack.c.bf16 %v6556_v0, %v6510_v21  ;;  %v14035_v48 = vpop.f32.mrb[157].mxu1 }
 0xaf7   :  { %v6559_v29 = vpop.f32.mrb[158].mxu1 }
 0xaf8   :  { %v14036_v24 = vpop.f32.mrb[159].mxu1  ;;  %13288 = vmatmul.mubr.msk.bf16.gmra.mrb[124].mxu0 %vm3474_vm1, %v6565_v47  ;;  %13292 = vmatmul.mubr.msk.bf16.gmra.mrb[124].mxu1 %vm3474_vm1, %v6565_v47 }
 0xaf9   :  { %14039 = vmatprep.mubr.msk.bf16.mxu0 %vm16128_vm0, %v18595_v34  ;;  %14045 = vmatprep.mubr.msk.bf16.mxu1 %vm16128_vm0, %v18595_v34 }
 0xb00   :  { %14040 = vmatmul.mubr.msk.bf16.vlgmr.msra.gmra.mrb[160].mxu0 %vm3474_vm1, %v6855_v60  ;;  %14046 = vmatmul.mubr.msk.bf16.vlgmr.msra.gmra.mrb[160].mxu1 %vm3474_vm1, %v6907_v5 }
 0xb01   :  { %14050 = vmatpush3.bf16.xpose.msra.mxu0 %v6967_v44  ;;  %14056 = vmatpush3.bf16.xpose.msra.mxu1 %v7019_v50 }
 0xb02   :  { %14051 = vmatprep.mubr.msk.bf16.mxu0 %vm16128_vm0, %v18595_v34  ;;  %14057 = vmatprep.mubr.msk.bf16.mxu1 %vm16128_vm0, %v18595_v34 }
 0xb03   :  { %14061 = vmatprep.subr.bf16.mxu0 %v18595_v34  ;;  %14067 = vmatprep.subr.bf16.mxu1 %v18595_v34 }
 0xb08   :  { %14052 = vmatmul.mubr.msk.bf16.vlgmr.msra.gmra.mrb[164].mxu0 %vm3474_vm1, %v6959_v1  ;;  %14058 = vmatmul.mubr.msk.bf16.vlgmr.msra.gmra.mrb[164].mxu1 %vm3474_vm1, %v7011_v40 }
 0xb09   :  { %14062 = vmatpush3.bf16.xpose.msra.mxu0 %v7071_v3  ;;  %14068 = vmatpush3.bf16.xpose.msra.mxu1 %v7123_v37 }
 0xb0a   :  { %14063 = vmatprep.mubr.msk.bf16.mxu0 %vm16128_vm0, %v18595_v34  ;;  %14069 = vmatprep.mubr.msk.bf16.mxu1 %vm16128_vm0, %v18595_v34 }
 0xb0b   :  { %14073 = vmatprep.subr.bf16.mxu0 %v18595_v34  ;;  %14079 = vmatprep.subr.bf16.mxu1 %v18595_v34 }
 0xb10   :  { %14064 = vmatmul.mubr.msk.bf16.vlgmr.msra.gmra.mrb[168].mxu0 %vm3474_vm1, %v7063_v16  ;;  %14070 = vmatmul.mubr.msk.bf16.vlgmr.msra.gmra.mrb[168].mxu1 %vm3474_vm1, %v7115_v45 }
 0xb11   :  { %14074 = vmatpush3.bf16.xpose.msra.mxu0 %v7175_v22  ;;  %14080 = vmatpush3.bf16.xpose.msra.mxu1 %v7227_v61 }
 0xb12   :  { %14075 = vmatprep.mubr.msk.bf16.mxu0 %vm16128_vm0, %v18595_v34  ;;  %14081 = vmatprep.mubr.msk.bf16.mxu1 %vm16128_vm0, %v18595_v34 }
 0xb13   :  { %14091 = vmatprep.subr.bf16.mxu1 %v18595_v34  ;;  %14085 = vmatprep.subr.bf16.mxu0 %v18595_v34 }
 0xb18   :  { %14076 = vmatmul.mubr.msk.bf16.vlgmr.msra.gmra.mrb[172].mxu0 %vm3474_vm1, %v7167_v30  ;;  %14082 = vmatmul.mubr.msk.bf16.vlgmr.msra.gmra.mrb[172].mxu1 %vm3474_vm1, %v7219_v43 }
 0xb19   :  { %14087 = vmatprep.mubr.msk.bf16.mxu0 %vm16128_vm0, %v18595_v34  ;;  %14093 = vmatprep.mubr.msk.bf16.mxu1 %vm16128_vm0, %v18595_v34 }
 0xbd3   :  { %v6899_v62 = vpop.f32.mrb[160].mxu0  ;;  %v6951_v2 = vpop.f32.mrb[160].mxu1 }
 0xbd4   :  { %v14041_v58 = vpop.f32.mrb[161].mxu0  ;;  %v14047_v7 = vpop.f32.mrb[161].mxu1  ;;  %v7272_v28 = vsel %vm3843_vm3, %v6951_v2, -inf  ;;  %v7269_v12 = vsel %vm3843_vm3, %v6899_v62, -inf }
 0xbd5   :  { %7273 = vmax.xlane.f32.xlu1 %v7272_v28  ;;  %v6954_v31 = vpop.f32.mrb[162].mxu1  ;;  %7270 = vmax.xlane.f32.xlu0 %v7269_v12  ;;  %v6902_v27 = vpop.f32.mrb[162].mxu0 }
 0xbd6   :  { %v14042_v54 = vpop.f32.mrb[163].mxu0  ;;  %v14048_v25 = vpop.f32.mrb[163].mxu1 }
 0xbdb   :  { %v7003_v13 = vpop.f32.mrb[164].mxu0  ;;  %v17425_v55 = vpop.f32.mrb[164].mxu1 }
 0xbdc   :  { %v14053_v23 = vpop.f32.mrb[165].mxu0  ;;  %v14059_v4 = vpop.f32.mrb[165].mxu1  ;;  %v7275_v60 = vsel %vm3843_vm3, %v7003_v13, -inf  ;;  %v7278_v59 = vsel %vm3843_vm3, %v17425_v55, -inf }
 0xbdd   :  { %v7058_v52 = vpop.f32.mrb[166].mxu1  ;;  %7276 = vmax.xlane.f32.xlu0 %v7275_v60  ;;  %v7006_v63 = vpop.f32.mrb[166].mxu0 }
 0xbde   :  { %v14054_v20 = vpop.f32.mrb[167].mxu0  ;;  %v14060_v26 = vpop.f32.mrb[167].mxu1 }
 0xbe1   :  { %7279 = vmax.xlane.f32.xlu0 %v7278_v59 }
 0xbe3   :  { %v17430_v46 = vpop.f32.mrb[168].mxu0  ;;  %v17432_v5 = vpop.f32.mrb[168].mxu1 }
 0xbe4   :  { %v14065_v36 = vpop.f32.mrb[169].mxu0  ;;  %v14071_v41 = vpop.f32.mrb[169].mxu1  ;;  %v7284_v33 = vsel %vm3843_vm3, %v17432_v5, -inf  ;;  %v7281_v11 = vsel %vm3843_vm3, %v17430_v46, -inf }
 0xbe5   :  { %7285 = vmax.xlane.f32.xlu1 %v7284_v33  ;;  %v7162_v21 = vpop.f32.mrb[170].mxu1  ;;  %7282 = vmax.xlane.f32.xlu0 %v7281_v11  ;;  %v7110_v18 = vpop.f32.mrb[170].mxu0 }
 0xbe6   :  { %v14066_v35 = vpop.f32.mrb[171].mxu0  ;;  %v14072_v19 = vpop.f32.mrb[171].mxu1 }
 0xbeb   :  { %v7211_v9 = vpop.f32.mrb[172].mxu0  ;;  %v17438_v51 = vpop.f32.mrb[172].mxu1 }
 0xbec   :  { %v14077_v0 = vpop.f32.mrb[173].mxu0  ;;  %v14083_v47 = vpop.f32.mrb[173].mxu1  ;;  %v7287_v48 = vsel %vm3843_vm3, %v7211_v9, -inf  ;;  %v7290_v44 = vsel %vm3843_vm3, %v17438_v51, -inf }
 0xbed   :  { %v7266_v29 = vpop.f32.mrb[174].mxu1  ;;  %7288 = vmax.xlane.f32.xlu0 %v7287_v48  ;;  %v7214_v24 = vpop.f32.mrb[174].mxu0 }
 0xbee   :  { %v14078_v1 = vpop.f32.mrb[175].mxu0  ;;  %v14084_v40 = vpop.f32.mrb[175].mxu1 }
 0xbf6   :  { %7415 = vrot.lane.b32.xlu1 %v17201_v42, %s16129_s4 }
 0xbfa   :  { %7464 = vrot.lane.b32.xlu1 %v17300_v56, %s16129_s4 }
 0xc03   :  { %7366 = vrot.lane.b32.xlu0 %v17199_v38, %s16129_s4 }
 0xc1e   :  { %7291 = vmax.xlane.f32.xlu1 %v7290_v44 }
 0xc2f   :  { %7513 = vrot.lane.b32.xlu1 %v17295_v14, %s16129_s4 }
 0xc62   :  { %v7274_v50 = vpop.xlane.xlu1 %7273  ;;  %v7271_v32 = vpop.xlane.xlu0 %7270 }
 0xc63   :  { %v7294_v53 = vsub.f32 %v6951_v2, %v7274_v50  ;;  %v7293_v16 = vsub.f32 %v6899_v62, %v7271_v32 }
 0xc65   :  { %v7303_v45 = vmul.f32 1.442695, %v7294_v53  ;;  %v7301_v3 = vmul.f32 1.442695, %v7293_v16 }
 0xc67   :  { %15813 = vpow2.f32 %v7303_v45 }
 0xc68   :  { %15815 = vpow2.f32 %v7301_v3 }
 0xc6a   :  { %v7277_v42 = vpop.xlane.xlu0 %7276 }
 0xc6b   :  { %v7295_v56 = vsub.f32 %v7003_v13, %v7277_v42 }
 0xc6d   :  { %v7305_v37 = vmul.f32 1.442695, %v7295_v56 }
 0xc6e   :  { %v7280_v38 = vpop.xlane.xlu0 %7279 }
 0xc6f   :  { %15817 = vpow2.f32 %v7305_v37  ;;  %v7296_v31 = vsub.f32 %v17425_v55, %v7280_v38 }
 0xc71   :  { %v17451_v10 = vpop.eup %15813  ;;  %v7307_v27 = vmul.f32 1.442695, %v7296_v31 }
 0xc72   :  { %v17453_v39 = vpop.eup %15815  ;;  %v7286_v22 = vpop.xlane.xlu1 %7285  ;;  %v7320_v14 = vsel %vm3843_vm3, %v17451_v10, 0.0 }
 0xc73   :  { %7321 = vadd.xlane.f32.xlu1 %v7320_v14  ;;  %v7317_v61 = vsel %vm3843_vm3, %v17453_v39, 0.0  ;;  %v7283_v30 = vpop.xlane.xlu0 %7282  ;;  %v7298_v54 = vsub.f32 %v17432_v5, %v7286_v22  ;;  %15819 = vpow2.f32 %v7307_v27 }
 0xc74   :  { %7318 = vadd.xlane.f32.xlu0 %v7317_v61  ;;  %v7297_v13 = vsub.f32 %v17430_v46, %v7283_v30 }
 0xc75   :  { %v7311_v25 = vmul.f32 1.442695, %v7298_v54  ;;  %v15597_v54 = vld [vmem:[#allocation8 + $0x180] ss:$16 sps:$4 sm:$0xff]  }
 0xc76   :  { %v7416_v43 = vpop.permute.xlu1 %7415  ;;  %v7309_v23 = vmul.f32 1.442695, %v7297_v13  ;;  %v15605_v13 = vld [vmem:[#allocation8 + $0x1a4] ss:$16 sps:$4 sm:$0xff]  }
 0xc77   :  { %v7421_v62 = vsel %vm3943_vm2, %v7416_v43, 0  ;;  %15821 = vpow2.f32 %v7311_v25 }
 0xc78   :  { %14092 = vmatpush3.bf16.msra.mxu1 %v7421_v62  ;;  %15823 = vpow2.f32 %v7309_v23 }
 0xc79   :  { %v17460_v2 = vpop.eup %15817  ;;  %14103 = vmatprep.subr.bf16.mxu1 %v18595_v34 }
 0xc7a   :  { %v7289_v58 = vpop.xlane.xlu0 %7288  ;;  %v7323_v7 = vsel %vm3843_vm3, %v17460_v2, 0.0 }
 0xc7b   :  { %7324 = vadd.xlane.f32.xlu0 %v7323_v7  ;;  %v7299_v4 = vsub.f32 %v7211_v9, %v7289_v58  ;;  %v15599_v58 = vld [vmem:[#allocation8 + $0x184] ss:$16 sps:$4 sm:$0xff]   ;;  %v15602_v7 = vld [vmem:[#allocation8 + $0x18c] ss:$16 sps:$4 sm:$0xff]  }
 0xc7d   :  { %v7313_v60 = vmul.f32 1.442695, %v7299_v4  ;;  %v17474_v52 = vpop.eup %15819 }
 0xc7e   :  { %v7367_v28 = vpop.permute.xlu0 %7366 }
 0xc7f   :  { %v7372_v12 = vsel %vm3943_vm2, %v7367_v28, 0  ;;  %15825 = vpow2.f32 %v7313_v60  ;;  %v15600_v60 = vld [vmem:[#allocation8 + $0x188] ss:$16 sps:$4 sm:$0xff]  }
 0xc80   :  { %14086 = vmatpush3.bf16.msra.mxu0 %v7372_v12 }
 0xc81   :  { %14097 = vmatprep.subr.bf16.mxu0 %v18595_v34  ;;  %v17478_v55 = vpop.eup %15821 }
 0xc82   :  { %v7332_v20 = vsel %vm3843_vm3, %v17478_v55, 0.0  ;;  %v17482_v26 = vpop.eup %15823 }
 0xc83   :  { %v7329_v5 = vsel %vm3843_vm3, %v17482_v26, 0.0 }
 0xc84   :  { %7611 = vrot.lane.b32.xlu1 %v17322_v17, %s16129_s4  ;;  %v7465_v17 = vpop.permute.xlu1 %7464 }
 0xc89   :  { %v17487_v36 = vpop.eup %15825 }
 0xc8a   :  { %v7335_v41 = vsel %vm3843_vm3, %v17487_v36, 0.0 }
 0xc91   :  { %7562 = vrot.lane.b32.xlu0 %v17318_v57, %s16129_s4  ;;  %v7326_v57 = vsel %vm3843_vm3, %v17474_v52, 0.0 }
 0xca8   :  { %7327 = vadd.xlane.f32.xlu1 %v7326_v57  ;;  %v15608_v57 = vld [vmem:[#allocation8 + $0x1ac] ss:$16 sps:$4 sm:$0xff]  }
 0xcab   :  { %v7292_v63 = vpop.xlane.xlu1 %7291 }
 0xcac   :  { %v7300_v59 = vsub.f32 %v17438_v51, %v7292_v63  ;;  %7333 = vadd.xlane.f32.xlu1 %v7332_v20  ;;  %v15606_v63 = vld [vmem:[#allocation8 + $0x1a8] ss:$16 sps:$4 sm:$0xff]   ;;  %v15609_v20 = vld [vmem:[#allocation8 + $0x1c0] ss:$16 sps:$4 sm:$0xff]  }
 0xcae   :  { %v7315_v46 = vmul.f32 1.442695, %v7300_v59  ;;  %v15617_v59 = vld [vmem:[#allocation8 + $0x1e4] ss:$16 sps:$4 sm:$0xff]  }
 0xcaf   :  { %v7514_v21 = vpop.permute.xlu1 %7513 }
 0xcb0   :  { %15827 = vpow2.f32 %v7315_v46  ;;  %7330 = vadd.xlane.f32.xlu0 %v7329_v5  ;;  %v15612_v46 = vld [vmem:[#allocation8 + $0x1c8] ss:$16 sps:$4 sm:$0xff]   ;;  %v15615_v5 = vld [vmem:[#allocation8 + $0x1e0] ss:$16 sps:$4 sm:$0xff]  }
 0xcb4   :  { %7336 = vadd.xlane.f32.xlu0 %v7335_v41  ;;  %v15618_v41 = vld [vmem:[#allocation8 + $0x1e8] ss:$16 sps:$4 sm:$0xff]  }
 0xcba   :  { %v17491_v33 = vpop.eup %15827 }
 0xcbb   :  { %v7338_v11 = vsel %vm3843_vm3, %v17491_v33, 0.0 }
 0xcbc   :  { %7339 = vadd.xlane.f32.xlu1 %v7338_v11  ;;  %v18646_v11 = vld [vmem:[#allocation36_spill] sm:$0xff] }
 0xcca   :  { %7660 = vrot.lane.b32.xlu0 %v17336_v6, %s16129_s4  ;;  %v7519_v6 = vsel %vm3943_vm2, %v7514_v21, 0 }
 0xccd   :  { %7709 = vrot.lane.b32.xlu1 %v17345_v15, %s16129_s4  ;;  %v7470_v15 = vsel %vm3943_vm2, %v7465_v17, 0 }
 0xd00   :  { %v7322_v18 = vpop.xlane.xlu1 %7321 }
 0xd01   :  { %15829 = vrcp.f32 %v7322_v18  ;;  %v7319_v35 = vpop.xlane.xlu0 %7318  ;;  %v18647_v18 = vld [vmem:[#allocation38_spill] sm:$0xff] }
 0xd02   :  { %15831 = vrcp.f32 %v7319_v35 }
 0xd04   :  { %v7612_v32 = vpop.permute.xlu1 %7611 }
 0xd08   :  { %v7325_v19 = vpop.xlane.xlu0 %7324 }
 0xd09   :  { %15833 = vrcp.f32 %v7325_v19 }
 0xd0b   :  { %v15830_v9 = vpop.eup %15829 }
 0xd0c   :  { %v15832_v51 = vpop.eup %15831  ;;  %v7350_v0 = vmul.f32 %v15830_v9, %v17451_v10  ;;  %v7563_v40 = vpop.permute.xlu0 %7562  ;;  %v7617_v10 = vsel %vm3943_vm2, %v7612_v32, 0 }
 0xd0d   :  { %v7349_v47 = vmul.f32 %v15832_v51, %v17453_v39  ;;  %v7568_v50 = vsel %vm3943_vm2, %v7563_v40, 0 }
 0xd0e   :  { %v7358_v48 = vpack.c.bf16 %v7350_v0, %v7350_v0 }
 0xd0f   :  { %v7357_v29 = vpack.c.bf16 %v7349_v47, %v7349_v47 }
 0xd10   :  { %14094 = vmatmul.mubr.msk.bf16.vlgmr.msra.gmra.mrb[176].mxu1 %vm3843_vm3, %v7358_v48 }
 0xd11   :  { %14088 = vmatmul.mubr.msk.bf16.vlgmr.msra.gmra.mrb[176].mxu0 %vm3843_vm3, %v7357_v29  ;;  %14104 = vmatpush3.bf16.msra.mxu1 %v7519_v6 }
 0xd12   :  { %14098 = vmatpush3.bf16.msra.mxu0 %v7470_v15  ;;  %14099 = vmatprep.mubr.msk.bf16.mxu0 %vm16128_vm0, %v18595_v34 }
 0xd13   :  { %v15834_v24 = vpop.eup %15833  ;;  %14109 = vmatprep.subr.bf16.mxu0 %v18595_v34  ;;  %14105 = vmatprep.mubr.msk.bf16.mxu1 %vm16128_vm0, %v18595_v34 }
 0xd14   :  { %v7351_v1 = vmul.f32 %v15834_v24, %v17460_v2  ;;  %14115 = vmatprep.subr.bf16.mxu1 %v18595_v34 }
 0xd16   :  { %v7359_v44 = vpack.c.bf16 %v7351_v1, %v7351_v1 }
 0xd19   :  { %14100 = vmatmul.mubr.msk.bf16.vlgmr.msra.gmra.mrb[180].mxu0 %vm3843_vm3, %v7359_v44 }
 0xd1a   :  { %14110 = vmatpush3.bf16.msra.mxu0 %v7568_v50  ;;  %14111 = vmatprep.mubr.msk.bf16.mxu0 %vm16128_vm0, %v18595_v34 }
 0xd1b   :  { %14121 = vmatprep.subr.bf16.mxu0 %v18595_v34 }
 0xd35   :  { %v7328_v53 = vpop.xlane.xlu1 %7327 }
 0xd36   :  { %15835 = vrcp.f32 %v7328_v53 }
 0xd39   :  { %v7334_v16 = vpop.xlane.xlu1 %7333 }
 0xd3a   :  { %15837 = vrcp.f32 %v7334_v16 }
 0xd3d   :  { %v7331_v45 = vpop.xlane.xlu0 %7330 }
 0xd3e   :  { %15839 = vrcp.f32 %v7331_v45 }
 0xd40   :  { %v15836_v3 = vpop.eup %15835 }
 0xd41   :  { %v7337_v42 = vpop.xlane.xlu0 %7336  ;;  %v7352_v56 = vmul.f32 %v15836_v3, %v17474_v52  ;;  %v15603_v52 = vld [vmem:[#allocation8 + $0x1a0] ss:$16 sps:$4 sm:$0xff]  }
 0xd42   :  { %15841 = vrcp.f32 %v7337_v42 }
 0xd43   :  { %v7360_v37 = vpack.c.bf16 %v7352_v56, %v7352_v56 }
 0xd44   :  { %v15838_v38 = vpop.eup %15837 }
 0xd45   :  { %14106 = vmatmul.mubr.msk.bf16.vlgmr.msra.gmra.mrb[180].mxu1 %vm3843_vm3, %v7360_v37  ;;  %v7354_v39 = vmul.f32 %v15838_v38, %v17478_v55  ;;  %v7661_v30 = vpop.permute.xlu0 %7660  ;;  %v15611_v55 = vld [vmem:[#allocation8 + $0x1c4] ss:$16 sps:$4 sm:$0xff]  }
 0xd46   :  { %14116 = vmatpush3.bf16.msra.mxu1 %v7617_v10  ;;  %14117 = vmatprep.mubr.msk.bf16.mxu1 %vm16128_vm0, %v18595_v34  ;;  %v7666_v28 = vsel %vm3943_vm2, %v7661_v30, 0 }
 0xd47   :  { %14127 = vmatprep.subr.bf16.mxu1 %v18595_v34  ;;  %v7362_v43 = vpack.c.bf16 %v7354_v39, %v7354_v39 }
 0xd48   :  { %v15840_v22 = vpop.eup %15839 }
 0xd49   :  { %v7340_v14 = vpop.xlane.xlu1 %7339  ;;  %v7353_v61 = vmul.f32 %v15840_v22, %v17482_v26  ;;  %v15614_v26 = vld [vmem:[#allocation8 + $0x1cc] ss:$16 sps:$4 sm:$0xff]  }
 0xd4a   :  { %15843 = vrcp.f32 %v7340_v14 }
 0xd4b   :  { %v7361_v62 = vpack.c.bf16 %v7353_v61, %v7353_v61 }
 0xd4c   :  { %v15842_v2 = vpop.eup %15841 }
 0xd4d   :  { %14118 = vmatmul.mubr.msk.bf16.vlgmr.msra.gmra.mrb[184].mxu1 %vm3843_vm3, %v7362_v43  ;;  %v7710_v12 = vpop.permute.xlu1 %7709  ;;  %14112 = vmatmul.mubr.msk.bf16.vlgmr.msra.gmra.mrb[184].mxu0 %vm3843_vm3, %v7361_v62  ;;  %v7355_v27 = vmul.f32 %v15842_v2, %v17487_v36  ;;  %v15620_v36 = vld [vmem:[#allocation8 + $0x1ec] ss:$16 sps:$4 sm:$0xff]  }
 0xd4e   :  { %v7715_v31 = vsel %vm3943_vm2, %v7710_v12, 0  ;;  %14122 = vmatpush3.bf16.msra.mxu0 %v7666_v28  ;;  %14123 = vmatprep.mubr.msk.bf16.mxu0 %vm16128_vm0, %v18595_v34 }
 0xd4f   :  { %14128 = vmatpush3.bf16.msra.mxu1 %v7715_v31  ;;  %14129 = vmatprep.mubr.msk.bf16.mxu1 %vm16128_vm0, %v18595_v34  ;;  %v7363_v25 = vpack.c.bf16 %v7355_v27, %v7355_v27  ;;  %v15974_v31 = vld [vmem:[#allocation7] sm:$0xff] }
 0xd50   :  { %7870 = vmatprep.subr.bf16.mxu0 %v15599_v58  ;;  %7943 = vmatprep.subr.bf16.mxu1 %v15602_v7  ;;  %v18648_v27 = vld [vmem:[#allocation62_spill] sm:$0xff] }
 0xd54   :  { %v15844_v23 = vpop.eup %15843 }
 0xd55   :  { %14124 = vmatmul.mubr.msk.bf16.vlgmr.msra.gmra.mrb[188].mxu0 %vm3843_vm3, %v7363_v25  ;;  %v7356_v4 = vmul.f32 %v15844_v23, %v17491_v33  ;;  %v18645_v33 = vld [vmem:[#allocation40_spill] sm:$0xff] }
 0xd56   :  { %7871 = vmatpush1.bf16.msra.mxu0 %v15597_v54  ;;  %7902 = vmatprep.mubr.bf16.mxu0 %v16130_v49  ;;  %v14565_v21 = vadd.f32 %v18646_v11, %v18645_v33  ;;  %v14567_v35 = vadd.f32 %v18647_v18, %v18645_v33  ;;  %v533_v54 = vrot.slane %v15974_v31, %v18648_v27  ;;  %v18654_v11 = vld [vmem:[#allocation22_spill] sm:$0xff] }
 0xd57   :  { %v7364_v17 = vpack.c.bf16 %v7356_v4, %v7356_v4  ;;  %7872 = vmatprep.subr.bf16.mxu0 %v15605_v13  ;;  %v18655_v18 = vld [vmem:[#allocation46_spill] sm:$0xff] }
 0xd58   :  { %v17545_v19 = vpack.c.bf16 %v14565_v21, %v14565_v21  ;;  %v17547_v9 = vpack.c.bf16 %v14567_v35, %v14567_v35  ;;  %v14539_v21 = vadd.f32 %v18654_v11, %v533_v54  ;;  %v17606_v35 = vpack.c.bf16 %v18655_v18, %v18655_v18 }
 0xd59   :  { %14130 = vmatmul.mubr.msk.bf16.vlgmr.msra.gmra.mrb[188].mxu1 %vm3843_vm3, %v7364_v17  ;;  %v18650_v17 = vld [vmem:[#allocation18_spill] sm:$0xff] }
 0xd5a   :  { %7944 = vmatpush1.bf16.msra.mxu1 %v15600_v60  ;;  %7873 = vmatpush1.bf16.msra.mxu0 %v15603_v52  ;;  %v8052_v40 = vsel %vm3474_vm1, %v17545_v19, 0  ;;  %v8098_v44 = vsel %vm3474_vm1, %v17547_v9, 0  ;;  %v18649_v60 = vld [vmem:[#allocation16_spill] sm:$0xff] }
 0xd5b   :  { %7945 = vmatprep.subr.bf16.mxu1 %v15608_v57  ;;  %7874 = vmatprep.subr.bf16.mxu0 %v15611_v55  ;;  %v14533_v52 = vadd.f32 %v18649_v60, %v533_v54  ;;  %v14535_v57 = vadd.f32 %v18650_v17, %v533_v54  ;;  %v18651_v55 = vld [vmem:[#allocation42_spill] sm:$0xff] }
 0xd5c   :  { %7975 = vmatprep.mubr.bf16.mxu1 %v16130_v49 }
 0xd5e   :  { %7946 = vmatpush1.bf16.msra.mxu1 %v15606_v63  ;;  %7875 = vmatpush1.bf16.msra.mxu0 %v15609_v20  ;;  %v17578_v63 = vpack.c.bf16 %v18651_v55, %v18651_v55  ;;  %v18652_v20 = vld [vmem:[#allocation44_spill] sm:$0xff] }
 0xd5f   :  { %7947 = vmatprep.subr.bf16.mxu1 %v15614_v26  ;;  %7876 = vmatprep.subr.bf16.mxu0 %v15617_v59  ;;  %v17582_v26 = vpack.c.bf16 %v18652_v20, %v18652_v20  ;;  %v17584_v59 = vpack.c.bf16 %v14533_v52, %v14533_v52 }
 0xd62   :  { %7948 = vmatpush1.bf16.msra.mxu1 %v15612_v46  ;;  %7877 = vmatpush1.bf16.msra.mxu0 %v15615_v5  ;;  %v17586_v46 = vpack.c.bf16 %v14535_v57, %v14535_v57  ;;  %v8144_v5 = vsel %vm3474_vm1, %v17578_v63, 0 }
 0xd63   :  { %7949 = vmatprep.subr.bf16.mxu1 %v15620_v36  ;;  %14133 = vmatprep.subr.bf16.mxu0 %v18595_v34  ;;  %v8190_v36 = vsel %vm3474_vm1, %v17582_v26, 0 }
 0xd66   :  { %7950 = vmatpush1.bf16.msra.mxu1 %v15618_v41  ;;  %v18653_v41 = vld [vmem:[#allocation20_spill] sm:$0xff] }
 0xd67   :  { %14139 = vmatprep.subr.bf16.mxu1 %v18595_v34  ;;  %v14537_v33 = vadd.f32 %v18653_v41, %v533_v54 }
 0xde3   :  { %v7457_v51 = vpop.f32.mrb[176].mxu1 }
 0xde4   :  { %v7408_v0 = vpop.f32.mrb[176].mxu0  ;;  %v14095_v47 = vpop.f32.mrb[177].mxu1 }
 0xde5   :  { %v7757_v48 = vpack.c.bf16 %v7457_v51, %v7408_v0  ;;  %v14089_v29 = vpop.f32.mrb[177].mxu0  ;;  %v7460_v6 = vpop.f32.mrb[178].mxu1  ;;  %v18656_v51 = vld [vmem:[#allocation48_spill] sm:$0xff]  ;;  %v17612_v47 = vpack.c.bf16 %v14537_v33, %v14537_v33 }
 0xde6   :  { %v7411_v15 = vpop.f32.mrb[178].mxu0  ;;  %v14096_v24 = vpop.f32.mrb[179].mxu1  ;;  %v17610_v0 = vpack.c.bf16 %v18656_v51, %v18656_v51  ;;  %v8236_v29 = vsel %vm3474_vm1, %v17606_v35, 0 }
 0xde7   :  { %v14090_v1 = vpop.f32.mrb[179].mxu0  ;;  %13325 = vmatmul.mubr.msk.bf16.vlgmr.msra.gmra.mrb[112].mxu0 %vm3474_vm1, %v7757_v48  ;;  %13329 = vmatmul.mubr.msk.bf16.vlgmr.msra.gmra.mrb[112].mxu1 %vm3474_vm1, %v7757_v48  ;;  %v17614_v48 = vpack.c.bf16 %v14539_v21, %v14539_v21  ;;  %v18657_v15 = vld [vmem:[#allocation25_spill] sm:$0xff] }
 0xde8   :  { %14134 = vmatpush3.bf16.xpose.msra.mxu0 %v8052_v40  ;;  %14140 = vmatpush3.bf16.xpose.msra.mxu1 %v8098_v44  ;;  %v8282_v6 = vsel %vm3474_vm1, %v17610_v0, 0  ;;  %v14541_v24 = vadd.f32 %v18657_v15, %v533_v54  ;;  %v18658_v1 = vld [vmem:[#allocation28_spill] sm:$0xff]  ;;  %v18659_v44 = vld [vmem:[#allocation50_spill] sm:$0xff] }
 0xde9   :  { %7912 = vmatprep.mubr.bf16.mxu0 %v16130_v49  ;;  %7985 = vmatprep.mubr.bf16.mxu1 %v16130_v49  ;;  %v14543_v40 = vadd.f32 %v18658_v1, %v533_v54 }
 0xdea   :  { %14145 = vmatprep.subr.bf16.mxu0 %v18595_v34  ;;  %14151 = vmatprep.subr.bf16.mxu1 %v18595_v34 }
 0xdec   :  { %v7506_v50 = vpop.f32.mrb[180].mxu0 }
 0xded   :  { %v14101_v32 = vpop.f32.mrb[181].mxu0 }
 0xdee   :  { %v7509_v53 = vpop.f32.mrb[182].mxu0  ;;  %v18660_v32 = vld [vmem:[#allocation52_spill] sm:$0xff] }
 0xdef   :  { %v14102_v16 = vpop.f32.mrb[183].mxu0  ;;  %v17638_v53 = vpack.c.bf16 %v18660_v32, %v18660_v32 }
 0xdf0   :  { %v17640_v16 = vpack.c.bf16 %v14541_v24, %v14541_v24 }
 0xe18   :  { %v7555_v45 = vpop.f32.mrb[180].mxu1 }
 0xe19   :  { %v7758_v3 = vpack.c.bf16 %v7555_v45, %v7506_v50  ;;  %v14107_v42 = vpop.f32.mrb[181].mxu1  ;;  %v17634_v50 = vpack.c.bf16 %v18659_v44, %v18659_v44  ;;  %v17642_v45 = vpack.c.bf16 %v14543_v40, %v14543_v40 }
 0xe1a   :  { %v7558_v56 = vpop.f32.mrb[182].mxu1  ;;  %v18662_v42 = vld [vmem:[#allocation56_spill] sm:$0xff] }
 0xe1b   :  { %v14108_v37 = vpop.f32.mrb[183].mxu1  ;;  %13326 = vmatmul.mubr.msk.bf16.gmra.mrb[116].mxu0 %vm3474_vm1, %v7758_v3  ;;  %13330 = vmatmul.mubr.msk.bf16.gmra.mrb[116].mxu1 %vm3474_vm1, %v7758_v3  ;;  %v18661_v3 = vld [vmem:[#allocation65_spill] sm:$0xff] }
 0xe1c   :  { %7922 = vmatprep.mubr.bf16.mxu0 %v16130_v49  ;;  %7995 = vmatprep.mubr.bf16.mxu1 %v16130_v49  ;;  %v14597_v56 = vadd.f32 %v18662_v42, %v18661_v3  ;;  %v18663_v37 = vld [vmem:[#allocation59_spill] sm:$0xff] }
 0xe20   :  { %v7604_v38 = vpop.f32.mrb[184].mxu0  ;;  %v7653_v10 = vpop.f32.mrb[184].mxu1 }
 0xe21   :  { %v7759_v39 = vpack.c.bf16 %v7653_v10, %v7604_v38  ;;  %v14113_v22 = vpop.f32.mrb[185].mxu0  ;;  %v14119_v14 = vpop.f32.mrb[185].mxu1  ;;  %v14599_v38 = vadd.f32 %v18663_v37, %v18661_v3  ;;  %v8328_v10 = vsel %vm3474_vm1, %v17634_v50, 0 }
 0xe22   :  { %v7607_v61 = vpop.f32.mrb[186].mxu0  ;;  %v7656_v30 = vpop.f32.mrb[186].mxu1  ;;  %v18664_v22 = vld [vmem:[#allocation31_spill] sm:$0xff] }
 0xe23   :  { %v14114_v43 = vpop.f32.mrb[187].mxu0  ;;  %v14120_v62 = vpop.f32.mrb[187].mxu1  ;;  %13327 = vmatmul.mubr.msk.bf16.gmra.mrb[120].mxu0 %vm3474_vm1, %v7759_v39  ;;  %13331 = vmatmul.mubr.msk.bf16.gmra.mrb[120].mxu1 %vm3474_vm1, %v7759_v39  ;;  %v8374_v39 = vsel %vm3474_vm1, %v17638_v53, 0  ;;  %v14545_v14 = vadd.f32 %v18664_v22, %v533_v54  ;;  %v18665_v61 = vld [vmem:[#allocation33_spill] sm:$0xff] }
 0xe24   :  { %7932 = vmatprep.mubr.bf16.mxu0 %v16130_v49  ;;  %8005 = vmatprep.mubr.bf16.mxu1 %v16130_v49  ;;  %v14547_v30 = vadd.f32 %v18665_v61, %v533_v54  ;;  %v17664_v43 = vpack.c.bf16 %v14597_v56, %v14597_v56  ;;  %v17666_v62 = vpack.c.bf16 %v14599_v38, %v14599_v38 }
 0xe28   :  { %v7702_v2 = vpop.f32.mrb[188].mxu0 }
 0xe29   :  { %v14125_v58 = vpop.f32.mrb[189].mxu0 }
 0xe2a   :  { %v7705_v7 = vpop.f32.mrb[190].mxu0  ;;  %v17670_v58 = vpack.c.bf16 %v14547_v30, %v14547_v30 }
 0xe2b   :  { %v14126_v28 = vpop.f32.mrb[191].mxu0  ;;  %v8516_v7 = vsel %vm3943_vm2, %v17664_v43, 0 }
 0xe2c   :  { %v7751_v12 = vpop.f32.mrb[188].mxu1  ;;  %v8562_v28 = vsel %vm3943_vm2, %v17666_v62, 0 }
 0xe2d   :  { %v7760_v25 = vpack.c.bf16 %v7751_v12, %v7702_v2  ;;  %v14131_v13 = vpop.f32.mrb[189].mxu1  ;;  %v17668_v2 = vpack.c.bf16 %v14545_v14, %v14545_v14 }
 0xe2e   :  { %v7754_v23 = vpop.f32.mrb[190].mxu1 }
 0xe2f   :  { %v14132_v4 = vpop.f32.mrb[191].mxu1  ;;  %13328 = vmatmul.mubr.msk.bf16.gmra.mrb[124].mxu0 %vm3474_vm1, %v7760_v25  ;;  %13332 = vmatmul.mubr.msk.bf16.gmra.mrb[124].mxu1 %vm3474_vm1, %v7760_v25 }
 0xe30   :  { %14135 = vmatprep.mubr.msk.bf16.mxu0 %vm16128_vm0, %v18595_v34  ;;  %14141 = vmatprep.mubr.msk.bf16.mxu1 %vm16128_vm0, %v18595_v34 }
 0xe37   :  { %14136 = vmatmul.mubr.msk.bf16.vlgmr.msra.gmra.mrb[192].mxu0 %vm3474_vm1, %v17584_v59  ;;  %14142 = vmatmul.mubr.msk.bf16.vlgmr.msra.gmra.mrb[192].mxu1 %vm3474_vm1, %v17586_v46 }
 0xe38   :  { %14146 = vmatpush3.bf16.xpose.msra.mxu0 %v8144_v5  ;;  %14152 = vmatpush3.bf16.xpose.msra.mxu1 %v8190_v36 }
 0xe39   :  { %14147 = vmatprep.mubr.msk.bf16.mxu0 %vm16128_vm0, %v18595_v34  ;;  %14153 = vmatprep.mubr.msk.bf16.mxu1 %vm16128_vm0, %v18595_v34 }
 0xe3a   :  { %14157 = vmatprep.subr.bf16.mxu0 %v18595_v34  ;;  %14163 = vmatprep.subr.bf16.mxu1 %v18595_v34 }
 0xe3f   :  { %14148 = vmatmul.mubr.msk.bf16.vlgmr.msra.gmra.mrb[196].mxu0 %vm3474_vm1, %v17612_v47  ;;  %14154 = vmatmul.mubr.msk.bf16.vlgmr.msra.gmra.mrb[196].mxu1 %vm3474_vm1, %v17614_v48 }
 0xe40   :  { %14158 = vmatpush3.bf16.xpose.msra.mxu0 %v8236_v29  ;;  %14164 = vmatpush3.bf16.xpose.msra.mxu1 %v8282_v6 }
 0xe41   :  { %14159 = vmatprep.mubr.msk.bf16.mxu0 %vm16128_vm0, %v18595_v34  ;;  %14165 = vmatprep.mubr.msk.bf16.mxu1 %vm16128_vm0, %v18595_v34 }
 0xe42   :  { %14169 = vmatprep.subr.bf16.mxu0 %v18595_v34  ;;  %14175 = vmatprep.subr.bf16.mxu1 %v18595_v34 }
 0xe47   :  { %14160 = vmatmul.mubr.msk.bf16.vlgmr.msra.gmra.mrb[200].mxu0 %vm3474_vm1, %v17640_v16  ;;  %14166 = vmatmul.mubr.msk.bf16.vlgmr.msra.gmra.mrb[200].mxu1 %vm3474_vm1, %v17642_v45 }
 0xe48   :  { %14170 = vmatpush3.bf16.xpose.msra.mxu0 %v8328_v10  ;;  %14176 = vmatpush3.bf16.xpose.msra.mxu1 %v8374_v39 }
 0xe49   :  { %14171 = vmatprep.mubr.msk.bf16.mxu0 %vm16128_vm0, %v18595_v34  ;;  %14177 = vmatprep.mubr.msk.bf16.mxu1 %vm16128_vm0, %v18595_v34 }
 0xe4a   :  { %14181 = vmatprep.subr.bf16.mxu0 %v18595_v34  ;;  %14187 = vmatprep.subr.bf16.mxu1 %v18595_v34 }
 0xe4f   :  { %14172 = vmatmul.mubr.msk.bf16.vlgmr.msra.gmra.mrb[204].mxu0 %vm3474_vm1, %v17668_v2  ;;  %14178 = vmatmul.mubr.msk.bf16.vlgmr.msra.gmra.mrb[204].mxu1 %vm3474_vm1, %v17670_v58 }
 0xe50   :  { %14182 = vmatpush3.bf16.msra.mxu0 %v8516_v7  ;;  %14188 = vmatpush3.bf16.msra.mxu1 %v8562_v28 }
 0xe51   :  { %14183 = vmatprep.mubr.msk.bf16.mxu0 %vm16128_vm0, %v18595_v34  ;;  %14189 = vmatprep.mubr.msk.bf16.mxu1 %vm16128_vm0, %v18595_v34 }
 0xe52   :  { %14193 = vmatprep.subr.bf16.mxu0 %v18595_v34  ;;  %14199 = vmatprep.subr.bf16.mxu1 %v18595_v34 }
 0xf0a   :  { %v8088_v12 = vpop.f32.mrb[192].mxu0  ;;  %v8134_v31 = vpop.f32.mrb[192].mxu1 }
 0xf0b   :  { %v14137_v54 = vpop.f32.mrb[193].mxu0  ;;  %v14143_v25 = vpop.f32.mrb[193].mxu1  ;;  %v8419_v13 = vsel %vm3843_vm3, %v8134_v31, -inf  ;;  %v8416_v23 = vsel %vm3843_vm3, %v8088_v12, -inf }
 0xf0c   :  { %8420 = vmax.xlane.f32.xlu1 %v8419_v13  ;;  %v8137_v4 = vpop.f32.mrb[194].mxu1  ;;  %8417 = vmax.xlane.f32.xlu0 %v8416_v23  ;;  %v8091_v60 = vpop.f32.mrb[194].mxu0 }
 0xf0d   :  { %v14138_v52 = vpop.f32.mrb[195].mxu0  ;;  %v14144_v17 = vpop.f32.mrb[195].mxu1 }
 0xf12   :  { %v8180_v57 = vpop.f32.mrb[196].mxu0  ;;  %v8226_v55 = vpop.f32.mrb[196].mxu1 }
 0xf13   :  { %v14149_v20 = vpop.f32.mrb[197].mxu0  ;;  %v14155_v5 = vpop.f32.mrb[197].mxu1  ;;  %v8422_v36 = vsel %vm3843_vm3, %v8180_v57, -inf  ;;  %v8425_v18 = vsel %vm3843_vm3, %v8226_v55, -inf }
 0xf14   :  { %v8229_v41 = vpop.f32.mrb[198].mxu1  ;;  %8423 = vmax.xlane.f32.xlu0 %v8422_v36  ;;  %v8183_v33 = vpop.f32.mrb[198].mxu0 }
 0xf15   :  { %v14150_v11 = vpop.f32.mrb[199].mxu0  ;;  %v14156_v21 = vpop.f32.mrb[199].mxu1 }
 0xf18   :  { %8426 = vmax.xlane.f32.xlu0 %v8425_v18 }
 0xf1a   :  { %v8272_v51 = vpop.f32.mrb[200].mxu0  ;;  %v8318_v29 = vpop.f32.mrb[200].mxu1 }
 0xf1b   :  { %v14161_v6 = vpop.f32.mrb[201].mxu0  ;;  %v14167_v15 = vpop.f32.mrb[201].mxu1  ;;  %v8431_v24 = vsel %vm3843_vm3, %v8318_v29, -inf  ;;  %v8428_v1 = vsel %vm3843_vm3, %v8272_v51, -inf }
 0xf1c   :  { %8432 = vmax.xlane.f32.xlu1 %v8431_v24  ;;  %v8321_v40 = vpop.f32.mrb[202].mxu1  ;;  %8429 = vmax.xlane.f32.xlu0 %v8428_v1  ;;  %v8275_v44 = vpop.f32.mrb[202].mxu0 }
 0xf1d   :  { %v14162_v32 = vpop.f32.mrb[203].mxu0  ;;  %v14168_v3 = vpop.f32.mrb[203].mxu1 }
 0xf22   :  { %v8364_v42 = vpop.f32.mrb[204].mxu0  ;;  %v8410_v56 = vpop.f32.mrb[204].mxu1 }
 0xf23   :  { %v14173_v37 = vpop.f32.mrb[205].mxu0  ;;  %v14179_v38 = vpop.f32.mrb[205].mxu1  ;;  %v8437_v10 = vsel %vm3843_vm3, %v8410_v56, -inf  ;;  %v8434_v39 = vsel %vm3843_vm3, %v8364_v42, -inf }
 0xf24   :  { %8438 = vmax.xlane.f32.xlu1 %v8437_v10  ;;  %v8413_v22 = vpop.f32.mrb[206].mxu1  ;;  %8435 = vmax.xlane.f32.xlu0 %v8434_v39  ;;  %v8367_v14 = vpop.f32.mrb[206].mxu0 }
 0xf25   :  { %v14174_v61 = vpop.f32.mrb[207].mxu0  ;;  %v14180_v30 = vpop.f32.mrb[207].mxu1 }
 0xf99   :  { %v8421_v7 = vpop.xlane.xlu1 %8420  ;;  %v8418_v28 = vpop.xlane.xlu0 %8417 }
 0xf9a   :  { %v8441_v54 = vsub.f32 %v8134_v31, %v8421_v7  ;;  %v8440_v25 = vsub.f32 %v8088_v12, %v8418_v28 }
 0xf9c   :  { %v8450_v13 = vmul.f32 1.442695, %v8441_v54  ;;  %v8448_v23 = vmul.f32 1.442695, %v8440_v25  ;;  %v18668_v54 = vld [vmem:[#allocation73_spill] sm:$0xff] }
 0xf9d   :  { %v17783_v25 = vpack.c.bf16 %v18668_v54, %v18668_v54 }
 0xf9e   :  { %15845 = vpow2.f32 %v8450_v13 }
 0xf9f   :  { %15847 = vpow2.f32 %v8448_v23 }
 0xfa1   :  { %v8424_v4 = vpop.xlane.xlu0 %8423 }
 0xfa2   :  { %v8442_v60 = vsub.f32 %v8180_v57, %v8424_v4  ;;  %v18669_v4 = vld [vmem:[#allocation75_spill] sm:$0xff] }
 0xfa4   :  { %v8452_v52 = vmul.f32 1.442695, %v8442_v60  ;;  %v17787_v60 = vpack.c.bf16 %v18669_v4, %v18669_v4 }
 0xfa5   :  { %v8427_v17 = vpop.xlane.xlu0 %8426 }
 0xfa6   :  { %15849 = vpow2.f32 %v8452_v52  ;;  %v8443_v20 = vsub.f32 %v8226_v55, %v8427_v17 }
 0xfa8   :  { %v17694_v5 = vpop.eup %15845  ;;  %v8454_v36 = vmul.f32 1.442695, %v8443_v20  ;;  %v8700_v20 = vsel %vm3943_vm2, %v17783_v25, 0 }
 0xfa9   :  { %v17696_v41 = vpop.eup %15847  ;;  %v8433_v33 = vpop.xlane.xlu1 %8432  ;;  %v8467_v12 = vsel %vm3843_vm3, %v17694_v5, 0.0 }
 0xfaa   :  { %v8430_v11 = vpop.xlane.xlu0 %8429  ;;  %15851 = vpow2.f32 %v8454_v36  ;;  %v8445_v31 = vsub.f32 %v8318_v29, %v8433_v33  ;;  %8468 = vadd.xlane.f32.xlu1 %v8467_v12  ;;  %v8464_v57 = vsel %vm3843_vm3, %v17696_v41, 0.0  ;;  %v18670_v12 = vld [vmem:[#allocation79_spill] sm:$0xff] }
 0xfab   :  { %v8444_v21 = vsub.f32 %v8272_v51, %v8430_v11  ;;  %8465 = vadd.xlane.f32.xlu0 %v8464_v57  ;;  %v8746_v11 = vsel %vm3943_vm2, %v17787_v60, 0 }
 0xfac   :  { %v8458_v18 = vmul.f32 1.442695, %v8445_v31  ;;  %v17801_v31 = vpack.c.bf16 %v18670_v12, %v18670_v12 }
 0xfad   :  { %v8456_v55 = vmul.f32 1.442695, %v8444_v21 }
 0xfae   :  { %15853 = vpow2.f32 %v8458_v18 }
 0xfaf   :  { %15855 = vpow2.f32 %v8456_v55  ;;  %v15623_v55 = vld [vmem:[#allocation8 + $0x204] ss:$16 sps:$4 sm:$0xff]  }
 0xfb0   :  { %v17702_v6 = vpop.eup %15849 }
 0xfb1   :  { %v8439_v15 = vpop.xlane.xlu1 %8438  ;;  %v8436_v24 = vpop.xlane.xlu0 %8435  ;;  %v8470_v1 = vsel %vm3843_vm3, %v17702_v6, 0.0 }
 0xfb2   :  { %v8447_v40 = vsub.f32 %v8410_v56, %v8439_v15  ;;  %v8446_v44 = vsub.f32 %v8364_v42, %v8436_v24  ;;  %8471 = vadd.xlane.f32.xlu0 %v8470_v1  ;;  %v8792_v24 = vsel %vm3943_vm2, %v17801_v31, 0 }
 0xfb4   :  { %v17706_v51 = vpop.eup %15851  ;;  %v8462_v29 = vmul.f32 1.442695, %v8447_v40  ;;  %v8460_v32 = vmul.f32 1.442695, %v8446_v44  ;;  %v15626_v40 = vld [vmem:[#allocation8 + $0x20c] ss:$16 sps:$4 sm:$0xff]  }
 0xfb5   :  { %v8473_v3 = vsel %vm3843_vm3, %v17706_v51, 0.0 }
 0xfb6   :  { %15857 = vpow2.f32 %v8462_v29  ;;  %8474 = vadd.xlane.f32.xlu1 %v8473_v3 }
 0xfb7   :  { %15859 = vpow2.f32 %v8460_v32 }
 0xfb8   :  { %v17710_v37 = vpop.eup %15853 }
 0xfb9   :  { %v17712_v38 = vpop.eup %15855  ;;  %v8479_v10 = vsel %vm3843_vm3, %v17710_v37, 0.0 }
 0xfba   :  { %8480 = vadd.xlane.f32.xlu1 %v8479_v10  ;;  %v8476_v42 = vsel %vm3843_vm3, %v17712_v38, 0.0  ;;  %v15629_v10 = vld [vmem:[#allocation8 + $0x224] ss:$16 sps:$4 sm:$0xff]  }
 0xfbb   :  { %8477 = vadd.xlane.f32.xlu0 %v8476_v42  ;;  %v15624_v42 = vld [vmem:[#allocation8 + $0x208] ss:$16 sps:$4 sm:$0xff]  }
 0xfc0   :  { %v17718_v56 = vpop.eup %15857 }
 0xfc1   :  { %v17720_v39 = vpop.eup %15859  ;;  %v8485_v22 = vsel %vm3843_vm3, %v17718_v56, 0.0 }
 0xfc2   :  { %8486 = vadd.xlane.f32.xlu1 %v8485_v22  ;;  %v8482_v14 = vsel %vm3843_vm3, %v17720_v39, 0.0 }
 0xfc3   :  { %8483 = vadd.xlane.f32.xlu0 %v8482_v14  ;;  %v15627_v14 = vld [vmem:[#allocation8 + $0x220] ss:$16 sps:$4 sm:$0xff]  }
 0xfd3   :  { %9227 = vrot.lane.b32.xlu1 %v17547_v9, %s16129_s4 }
 0xfd7   :  { %9172 = vrot.lane.b32.xlu1 %v17584_v59, %s16129_s4 }
 0xfd9   :  { %9175 = vrot.lane.b32.xlu0 %v17545_v19, %s16129_s4 }
 0xfdb   :  { %9224 = vrot.lane.b32.xlu1 %v17586_v46, %s16129_s4  ;;  %v18666_v46 = vld [vmem:[#allocation69_spill] sm:$0xff] }
 0xfdd   :  { %9279 = vrot.lane.b32.xlu0 %v17578_v63, %s16129_s4 }
 0xfdf   :  { %9331 = vrot.lane.b32.xlu1 %v17582_v26, %s16129_s4 }
 0xfe1   :  { %9276 = vrot.lane.b32.xlu0 %v17612_v47, %s16129_s4 }
 0xfe3   :  { %9328 = vrot.lane.b32.xlu1 %v17614_v48, %s16129_s4  ;;  %v18667_v48 = vld [vmem:[#allocation67_spill] sm:$0xff] }
 0xfe5   :  { %9383 = vrot.lane.b32.xlu0 %v17606_v35, %s16129_s4  ;;  %v17760_v35 = vpack.c.bf16 %v18666_v46, %v18666_v46  ;;  %v15639_v46 = vld [vmem:[#allocation8 + $0x260] ss:$16 sps:$4 sm:$0xff]  }
 0xfe7   :  { %9435 = vrot.lane.b32.xlu1 %v17610_v0, %s16129_s4 }
 0xfe9   :  { %9380 = vrot.lane.b32.xlu0 %v17640_v16, %s16129_s4 }
 0xfeb   :  { %9432 = vrot.lane.b32.xlu1 %v17642_v45, %s16129_s4 }
 0xfed   :  { %9487 = vrot.lane.b32.xlu0 %v17634_v50, %s16129_s4  ;;  %v17765_v50 = vpack.c.bf16 %v18667_v48, %v18667_v48 }
 0xfef   :  { %9539 = vrot.lane.b32.xlu1 %v17638_v53, %s16129_s4  ;;  %v8608_v61 = vsel %vm3943_vm2, %v17765_v50, 0 }
 0xff1   :  { %9484 = vrot.lane.b32.xlu0 %v17668_v2, %s16129_s4  ;;  %v8654_v2 = vsel %vm3943_vm2, %v17760_v35, 0 }
 0xff3   :  { %9536 = vrot.lane.b32.xlu1 %v17670_v58, %s16129_s4 }
0x1037   :  { %v8469_v19 = vpop.xlane.xlu1 %8468 }
0x1038   :  { %15861 = vrcp.f32 %v8469_v19  ;;  %v8466_v9 = vpop.xlane.xlu0 %8465  ;;  %v15632_v19 = vld [vmem:[#allocation8 + $0x22c] ss:$16 sps:$4 sm:$0xff]  }
0x1039   :  { %15863 = vrcp.f32 %v8466_v9  ;;  %v15630_v9 = vld [vmem:[#allocation8 + $0x228] ss:$16 sps:$4 sm:$0xff]  }
0x103f   :  { %v8472_v63 = vpop.xlane.xlu0 %8471 }
0x1040   :  { %15865 = vrcp.f32 %v8472_v63  ;;  %v15638_v63 = vld [vmem:[#allocation8 + $0x24c] ss:$16 sps:$4 sm:$0xff]  }
0x1042   :  { %v15862_v26 = vpop.eup %15861 }
0x1043   :  { %v15864_v59 = vpop.eup %15863  ;;  %v8475_v0 = vpop.xlane.xlu1 %8474  ;;  %v8497_v47 = vmul.f32 %v15862_v26, %v17694_v5  ;;  %v15641_v26 = vld [vmem:[#allocation8 + $0x264] ss:$16 sps:$4 sm:$0xff]  }
0x1044   :  { %15867 = vrcp.f32 %v8475_v0  ;;  %v8496_v53 = vmul.f32 %v15864_v59, %v17696_v41  ;;  %v15636_v59 = vld [vmem:[#allocation8 + $0x248] ss:$16 sps:$4 sm:$0xff]   ;;  %v15644_v0 = vld [vmem:[#allocation8 + $0x26c] ss:$16 sps:$4 sm:$0xff]  }
0x1045   :  { %v8505_v16 = vpack.c.bf16 %v8497_v47, %v8497_v47  ;;  %v15642_v47 = vld [vmem:[#allocation8 + $0x268] ss:$16 sps:$4 sm:$0xff]  }
0x1046   :  { %v8504_v45 = vpack.c.bf16 %v8496_v53, %v8496_v53 }
0x1047   :  { %14190 = vmatmul.mubr.msk.bf16.vlgmr.msra.gmra.mrb[208].mxu1 %vm3843_vm3, %v8505_v16  ;;  %v8481_v58 = vpop.xlane.xlu1 %8480 }
0x1048   :  { %14200 = vmatpush3.bf16.msra.mxu1 %v8654_v2  ;;  %15869 = vrcp.f32 %v8481_v58  ;;  %14184 = vmatmul.mubr.msk.bf16.vlgmr.msra.gmra.mrb[208].mxu0 %vm3843_vm3, %v8504_v45  ;;  %v8478_v30 = vpop.xlane.xlu0 %8477 }
0x1049   :  { %14194 = vmatpush3.bf16.msra.mxu0 %v8608_v61  ;;  %15871 = vrcp.f32 %v8478_v30  ;;  %14195 = vmatprep.mubr.msk.bf16.mxu0 %vm16128_vm0, %v18595_v34 }
0x104a   :  { %v15866_v7 = vpop.eup %15865  ;;  %14205 = vmatprep.subr.bf16.mxu0 %v18595_v34  ;;  %14201 = vmatprep.mubr.msk.bf16.mxu1 %vm16128_vm0, %v18595_v34 }
0x104b   :  { %v8498_v28 = vmul.f32 %v15866_v7, %v17702_v6  ;;  %14211 = vmatprep.subr.bf16.mxu1 %v18595_v34  ;;  %v18671_v6 = vld [vmem:[#allocation81_spill] sm:$0xff] }
0x104c   :  { %v17810_v15 = vpack.c.bf16 %v18671_v6, %v18671_v6 }
0x104d   :  { %v8506_v13 = vpack.c.bf16 %v8498_v28, %v8498_v28 }
0x104e   :  { %v15868_v23 = vpop.eup %15867  ;;  %v8838_v29 = vsel %vm3943_vm2, %v17810_v15, 0 }
0x104f   :  { %v8487_v52 = vpop.xlane.xlu1 %8486  ;;  %v8499_v17 = vmul.f32 %v15868_v23, %v17706_v51 }
0x1050   :  { %15873 = vrcp.f32 %v8487_v52  ;;  %14196 = vmatmul.mubr.msk.bf16.vlgmr.msra.gmra.mrb[212].mxu0 %vm3843_vm3, %v8506_v13  ;;  %v8484_v5 = vpop.xlane.xlu0 %8483 }
0x1051   :  { %14206 = vmatpush3.bf16.msra.mxu0 %v8700_v20  ;;  %15875 = vrcp.f32 %v8484_v5  ;;  %v8507_v36 = vpack.c.bf16 %v8499_v17, %v8499_v17  ;;  %14207 = vmatprep.mubr.msk.bf16.mxu0 %vm16128_vm0, %v18595_v34 }
0x1052   :  { %v15870_v41 = vpop.eup %15869  ;;  %14217 = vmatprep.subr.bf16.mxu0 %v18595_v34 }
0x1053   :  { %v15872_v33 = vpop.eup %15871  ;;  %14202 = vmatmul.mubr.msk.bf16.vlgmr.msra.gmra.mrb[212].mxu1 %vm3843_vm3, %v8507_v36  ;;  %v8501_v57 = vmul.f32 %v15870_v41, %v17710_v37  ;;  %v15621_v37 = vld [vmem:[#allocation8 + $0x200] ss:$16 sps:$4 sm:$0xff]   ;;  %v9228_v48 = vpop.permute.xlu1 %9227 }
0x1054   :  { %v8500_v21 = vmul.f32 %v15872_v33, %v17712_v38  ;;  %14212 = vmatpush3.bf16.msra.mxu1 %v8746_v11  ;;  %14213 = vmatprep.mubr.msk.bf16.mxu1 %vm16128_vm0, %v18595_v34  ;;  %v9176_v53 = vpop.permute.xlu0 %9175  ;;  %v9233_v54 = vsel %vm3474_vm1, %v9228_v48, 0 }
0x1055   :  { %14223 = vmatprep.subr.bf16.mxu1 %v18595_v34  ;;  %v8509_v1 = vpack.c.bf16 %v8501_v57, %v8501_v57  ;;  %v9181_v13 = vsel %vm3474_vm1, %v9176_v53, 0 }
0x1056   :  { %v8508_v18 = vpack.c.bf16 %v8500_v21, %v8500_v21 }
0x1057   :  { %v9173_v11 = vpop.permute.xlu1 %9172 }
0x1058   :  { %14208 = vmatmul.mubr.msk.bf16.vlgmr.msra.gmra.mrb[216].mxu0 %vm3843_vm3, %v8508_v18 }
0x1059   :  { %14218 = vmatpush3.bf16.msra.mxu0 %v8792_v24  ;;  %14219 = vmatprep.mubr.msk.bf16.mxu0 %vm16128_vm0, %v18595_v34 }
0x105a   :  { %v15874_v44 = vpop.eup %15873  ;;  %8993 = vmatprep.subr.bf16.mxu0 %v15623_v55 }
0x105b   :  { %v15876_v51 = vpop.eup %15875  ;;  %14214 = vmatmul.mubr.msk.bf16.vlgmr.msra.gmra.mrb[216].mxu1 %vm3843_vm3, %v8509_v1  ;;  %v8503_v3 = vmul.f32 %v15874_v44, %v17718_v56  ;;  %v15633_v56 = vld [vmem:[#allocation8 + $0x240] ss:$16 sps:$4 sm:$0xff]   ;;  %v9225_v24 = vpop.permute.xlu1 %9224 }
0x105c   :  { %v8502_v32 = vmul.f32 %v15876_v51, %v17720_v39  ;;  %14224 = vmatpush3.bf16.msra.mxu1 %v8838_v29  ;;  %14225 = vmatprep.mubr.msk.bf16.mxu1 %vm16128_vm0, %v18595_v34  ;;  %v15635_v39 = vld [vmem:[#allocation8 + $0x244] ss:$16 sps:$4 sm:$0xff]  }
0x105d   :  { %9066 = vmatprep.subr.bf16.mxu1 %v15626_v40  ;;  %v8511_v22 = vpack.c.bf16 %v8503_v3, %v8503_v3 }
0x105e   :  { %v8510_v38 = vpack.c.bf16 %v8502_v32, %v8502_v32  ;;  %v9280_v32 = vpop.permute.xlu0 %9279 }
0x1060   :  { %14220 = vmatmul.mubr.msk.bf16.vlgmr.msra.gmra.mrb[220].mxu0 %vm3843_vm3, %v8510_v38 }
0x1061   :  { %8994 = vmatpush1.bf16.msra.mxu0 %v15621_v37  ;;  %9025 = vmatprep.mubr.bf16.mxu0 %v16130_v49  ;;  %v9332_v37 = vpop.permute.xlu1 %9331 }
0x1062   :  { %8995 = vmatprep.subr.bf16.mxu0 %v15629_v10 }
0x1063   :  { %14226 = vmatmul.mubr.msk.bf16.vlgmr.msra.gmra.mrb[220].mxu1 %vm3843_vm3, %v8511_v22 }
0x1064   :  { %9067 = vmatpush1.bf16.msra.mxu1 %v15624_v42  ;;  %9098 = vmatprep.mubr.bf16.mxu1 %v16130_v49 }
0x1065   :  { %9068 = vmatprep.subr.bf16.mxu1 %v15632_v19  ;;  %8996 = vmatpush1.bf16.msra.mxu0 %v15627_v14 }
0x1066   :  { %8997 = vmatprep.subr.bf16.mxu0 %v15635_v39 }
0x1068   :  { %9069 = vmatpush1.bf16.msra.mxu1 %v15630_v9  ;;  %v9277_v9 = vpop.permute.xlu0 %9276 }
0x1069   :  { %9070 = vmatprep.subr.bf16.mxu1 %v15638_v63  ;;  %8998 = vmatpush1.bf16.msra.mxu0 %v15633_v56  ;;  %v9329_v56 = vpop.permute.xlu1 %9328  ;;  %v9285_v63 = vsel %vm3474_vm1, %v9280_v32, 0 }
0x106a   :  { %8999 = vmatprep.subr.bf16.mxu0 %v15641_v26  ;;  %v9337_v26 = vsel %vm3474_vm1, %v9332_v37, 0 }
0x106c   :  { %9071 = vmatpush1.bf16.msra.mxu1 %v15636_v59  ;;  %v9384_v59 = vpop.permute.xlu0 %9383 }
0x106d   :  { %9072 = vmatprep.subr.bf16.mxu1 %v15644_v0  ;;  %9000 = vmatpush1.bf16.msra.mxu0 %v15639_v46  ;;  %v9436_v46 = vpop.permute.xlu1 %9435  ;;  %v9389_v48 = vsel %vm3474_vm1, %v9384_v59, 0 }
0x106e   :  { %14229 = vmatprep.subr.bf16.mxu0 %v18595_v34  ;;  %v9441_v53 = vsel %vm3474_vm1, %v9436_v46, 0 }
0x1070   :  { %9073 = vmatpush1.bf16.msra.mxu1 %v15642_v47  ;;  %v9381_v0 = vpop.permute.xlu0 %9380 }
0x1071   :  { %14235 = vmatprep.subr.bf16.mxu1 %v18595_v34  ;;  %v9433_v47 = vpop.permute.xlu1 %9432 }
0x111a   :  { %v8598_v16 = vpop.f32.mrb[208].mxu1 }
0x111b   :  { %v8552_v45 = vpop.f32.mrb[208].mxu0  ;;  %v14191_v2 = vpop.f32.mrb[209].mxu1 }
0x111c   :  { %v8880_v58 = vpack.c.bf16 %v8598_v16, %v8552_v45  ;;  %v14185_v61 = vpop.f32.mrb[209].mxu0  ;;  %v8601_v30 = vpop.f32.mrb[210].mxu1 }
0x111d   :  { %v8555_v7 = vpop.f32.mrb[210].mxu0  ;;  %v14192_v28 = vpop.f32.mrb[211].mxu1 }
0x111e   :  { %v14186_v23 = vpop.f32.mrb[211].mxu0  ;;  %13365 = vmatmul.mubr.msk.bf16.vlgmr.msra.gmra.mrb[112].mxu0 %vm3474_vm1, %v8880_v58  ;;  %13369 = vmatmul.mubr.msk.bf16.vlgmr.msra.gmra.mrb[112].mxu1 %vm3474_vm1, %v8880_v58  ;;  %v9488_v16 = vpop.permute.xlu0 %9487 }
0x111f   :  { %14230 = vmatpush3.bf16.xpose.msra.mxu0 %v9181_v13  ;;  %14236 = vmatpush3.bf16.xpose.msra.mxu1 %v9233_v54  ;;  %v9540_v45 = vpop.permute.xlu1 %9539  ;;  %v9493_v2 = vsel %vm3474_vm1, %v9488_v16, 0 }
0x1120   :  { %9035 = vmatprep.mubr.bf16.mxu0 %v16130_v49  ;;  %9108 = vmatprep.mubr.bf16.mxu1 %v16130_v49  ;;  %v9545_v58 = vsel %vm3474_vm1, %v9540_v45, 0 }
0x1121   :  { %14241 = vmatprep.subr.bf16.mxu0 %v18595_v34  ;;  %14247 = vmatprep.subr.bf16.mxu1 %v18595_v34 }
0x1122   :  { %v9485_v61 = vpop.permute.xlu0 %9484 }
0x1123   :  { %v8644_v4 = vpop.f32.mrb[212].mxu0  ;;  %v9537_v30 = vpop.permute.xlu1 %9536 }
0x1124   :  { %v14197_v52 = vpop.f32.mrb[213].mxu0 }
0x1125   :  { %v8647_v17 = vpop.f32.mrb[214].mxu0 }
0x1126   :  { %v14198_v20 = vpop.f32.mrb[215].mxu0  ;;  %v8690_v5 = vpop.f32.mrb[212].mxu1 }
0x1127   :  { %v8881_v36 = vpack.c.bf16 %v8690_v5, %v8644_v4  ;;  %v14203_v41 = vpop.f32.mrb[213].mxu1 }
0x1128   :  { %v8693_v33 = vpop.f32.mrb[214].mxu1 }
0x1129   :  { %v14204_v12 = vpop.f32.mrb[215].mxu1  ;;  %13366 = vmatmul.mubr.msk.bf16.gmra.mrb[116].mxu0 %vm3474_vm1, %v8881_v36  ;;  %13370 = vmatmul.mubr.msk.bf16.gmra.mrb[116].mxu1 %vm3474_vm1, %v8881_v36 }
0x112a   :  { %9045 = vmatprep.mubr.bf16.mxu0 %v16130_v49  ;;  %9118 = vmatprep.mubr.bf16.mxu1 %v16130_v49 }
0x112b   :  { %v8736_v21 = vpop.f32.mrb[216].mxu0 }
0x112c   :  { %v14209_v57 = vpop.f32.mrb[217].mxu0 }
0x112d   :  { %v8739_v18 = vpop.f32.mrb[218].mxu0 }
0x112e   :  { %v14210_v55 = vpop.f32.mrb[219].mxu0  ;;  %v8782_v6 = vpop.f32.mrb[216].mxu1 }
0x112f   :  { %v8882_v1 = vpack.c.bf16 %v8782_v6, %v8736_v21  ;;  %v14215_v40 = vpop.f32.mrb[217].mxu1 }
0x1130   :  { %v8785_v44 = vpop.f32.mrb[218].mxu1 }
0x1131   :  { %v14216_v51 = vpop.f32.mrb[219].mxu1  ;;  %13367 = vmatmul.mubr.msk.bf16.gmra.mrb[120].mxu0 %vm3474_vm1, %v8882_v1  ;;  %13371 = vmatmul.mubr.msk.bf16.gmra.mrb[120].mxu1 %vm3474_vm1, %v8882_v1 }
0x1132   :  { %9055 = vmatprep.mubr.bf16.mxu0 %v16130_v49  ;;  %9128 = vmatprep.mubr.bf16.mxu1 %v16130_v49 }
0x1133   :  { %v8828_v29 = vpop.f32.mrb[220].mxu0 }
0x1134   :  { %v14221_v3 = vpop.f32.mrb[221].mxu0 }
0x1135   :  { %v8831_v38 = vpop.f32.mrb[222].mxu0 }
0x1136   :  { %v14222_v10 = vpop.f32.mrb[223].mxu0  ;;  %v8874_v42 = vpop.f32.mrb[220].mxu1 }
0x1137   :  { %v8883_v22 = vpack.c.bf16 %v8874_v42, %v8828_v29  ;;  %v14227_v14 = vpop.f32.mrb[221].mxu1 }
0x1138   :  { %v8877_v19 = vpop.f32.mrb[222].mxu1 }
0x1139   :  { %v14228_v39 = vpop.f32.mrb[223].mxu1  ;;  %13368 = vmatmul.mubr.msk.bf16.gmra.mrb[124].mxu0 %vm3474_vm1, %v8883_v22  ;;  %13372 = vmatmul.mubr.msk.bf16.gmra.mrb[124].mxu1 %vm3474_vm1, %v8883_v22 }
0x113a   :  { %14231 = vmatprep.mubr.msk.bf16.mxu0 %vm16128_vm0, %v18595_v34  ;;  %14237 = vmatprep.mubr.msk.bf16.mxu1 %vm16128_vm0, %v18595_v34 }
0x1141   :  { %14232 = vmatmul.mubr.msk.bf16.vlgmr.msra.gmra.mrb[224].mxu0 %vm3474_vm1, %v9173_v11  ;;  %14238 = vmatmul.mubr.msk.bf16.vlgmr.msra.gmra.mrb[224].mxu1 %vm3474_vm1, %v9225_v24 }
0x1142   :  { %14242 = vmatpush3.bf16.xpose.msra.mxu0 %v9285_v63  ;;  %14248 = vmatpush3.bf16.xpose.msra.mxu1 %v9337_v26 }
0x1143   :  { %14243 = vmatprep.mubr.msk.bf16.mxu0 %vm16128_vm0, %v18595_v34  ;;  %14249 = vmatprep.mubr.msk.bf16.mxu1 %vm16128_vm0, %v18595_v34 }
0x1144   :  { %14253 = vmatprep.subr.bf16.mxu0 %v18595_v34  ;;  %14259 = vmatprep.subr.bf16.mxu1 %v18595_v34 }
0x1149   :  { %14244 = vmatmul.mubr.msk.bf16.vlgmr.msra.gmra.mrb[228].mxu0 %vm3474_vm1, %v9277_v9  ;;  %14250 = vmatmul.mubr.msk.bf16.vlgmr.msra.gmra.mrb[228].mxu1 %vm3474_vm1, %v9329_v56 }
0x114a   :  { %14254 = vmatpush3.bf16.xpose.msra.mxu0 %v9389_v48  ;;  %14260 = vmatpush3.bf16.xpose.msra.mxu1 %v9441_v53 }
0x114b   :  { %14255 = vmatprep.mubr.msk.bf16.mxu0 %vm16128_vm0, %v18595_v34  ;;  %14261 = vmatprep.mubr.msk.bf16.mxu1 %vm16128_vm0, %v18595_v34 }
0x114c   :  { %14265 = vmatprep.subr.bf16.mxu0 %v18595_v34  ;;  %14271 = vmatprep.subr.bf16.mxu1 %v18595_v34 }
0x1151   :  { %14256 = vmatmul.mubr.msk.bf16.vlgmr.msra.gmra.mrb[232].mxu0 %vm3474_vm1, %v9381_v0  ;;  %14262 = vmatmul.mubr.msk.bf16.vlgmr.msra.gmra.mrb[232].mxu1 %vm3474_vm1, %v9433_v47 }
0x1152   :  { %14266 = vmatpush3.bf16.xpose.msra.mxu0 %v9493_v2  ;;  %14272 = vmatpush3.bf16.xpose.msra.mxu1 %v9545_v58 }
0x1153   :  { %14267 = vmatprep.mubr.msk.bf16.mxu0 %vm16128_vm0, %v18595_v34  ;;  %14273 = vmatprep.mubr.msk.bf16.mxu1 %vm16128_vm0, %v18595_v34 }
0x1154   :  { %14283 = vmatprep.subr.bf16.mxu1 %v18595_v34  ;;  %14277 = vmatprep.subr.bf16.mxu0 %v18595_v34 }
0x1159   :  { %14268 = vmatmul.mubr.msk.bf16.vlgmr.msra.gmra.mrb[236].mxu0 %vm3474_vm1, %v9485_v61  ;;  %14274 = vmatmul.mubr.msk.bf16.vlgmr.msra.gmra.mrb[236].mxu1 %vm3474_vm1, %v9537_v30 }
0x115a   :  { %14279 = vmatprep.mubr.msk.bf16.mxu0 %vm16128_vm0, %v18595_v34  ;;  %14285 = vmatprep.mubr.msk.bf16.mxu1 %vm16128_vm0, %v18595_v34 }
0x1214   :  { %v9217_v7 = vpop.f32.mrb[224].mxu0  ;;  %v9269_v28 = vpop.f32.mrb[224].mxu1 }
0x1215   :  { %v14233_v54 = vpop.f32.mrb[225].mxu0  ;;  %v14239_v13 = vpop.f32.mrb[225].mxu1  ;;  %v9590_v23 = vsel %vm3843_vm3, %v9269_v28, -inf  ;;  %v9587_v4 = vsel %vm3843_vm3, %v9217_v7, -inf }
0x1216   :  { %9591 = vmax.xlane.f32.xlu1 %v9590_v23  ;;  %v9272_v52 = vpop.f32.mrb[226].mxu1  ;;  %9588 = vmax.xlane.f32.xlu0 %v9587_v4  ;;  %v9220_v17 = vpop.f32.mrb[226].mxu0 }
0x1217   :  { %v14234_v20 = vpop.f32.mrb[227].mxu0  ;;  %v14240_v5 = vpop.f32.mrb[227].mxu1 }
0x121c   :  { %v9321_v36 = vpop.f32.mrb[228].mxu0  ;;  %v17890_v41 = vpop.f32.mrb[228].mxu1 }
0x121d   :  { %v14245_v33 = vpop.f32.mrb[229].mxu0  ;;  %v14251_v11 = vpop.f32.mrb[229].mxu1  ;;  %v9593_v12 = vsel %vm3843_vm3, %v9321_v36, -inf  ;;  %v9596_v6 = vsel %vm3843_vm3, %v17890_v41, -inf }
0x121e   :  { %v9376_v21 = vpop.f32.mrb[230].mxu1  ;;  %9594 = vmax.xlane.f32.xlu0 %v9593_v12  ;;  %v9324_v57 = vpop.f32.mrb[230].mxu0 }
0x121f   :  { %v14246_v18 = vpop.f32.mrb[231].mxu0  ;;  %v14252_v55 = vpop.f32.mrb[231].mxu1 }
0x1222   :  { %9597 = vmax.xlane.f32.xlu0 %v9596_v6 }
0x1224   :  { %v17895_v24 = vpop.f32.mrb[232].mxu0  ;;  %v17897_v1 = vpop.f32.mrb[232].mxu1 }
0x1225   :  { %v14257_v40 = vpop.f32.mrb[233].mxu0  ;;  %v14263_v44 = vpop.f32.mrb[233].mxu1  ;;  %v9602_v51 = vsel %vm3843_vm3, %v17897_v1, -inf  ;;  %v9599_v29 = vsel %vm3843_vm3, %v17895_v24, -inf }
0x1226   :  { %9603 = vmax.xlane.f32.xlu1 %v9602_v51  ;;  %v9480_v32 = vpop.f32.mrb[234].mxu1  ;;  %9600 = vmax.xlane.f32.xlu0 %v9599_v29  ;;  %v9428_v3 = vpop.f32.mrb[234].mxu0 }
0x1227   :  { %v14258_v37 = vpop.f32.mrb[235].mxu0  ;;  %v14264_v38 = vpop.f32.mrb[235].mxu1 }
0x122c   :  { %v9529_v10 = vpop.f32.mrb[236].mxu0  ;;  %v17903_v42 = vpop.f32.mrb[236].mxu1 }
0x122d   :  { %v14269_v22 = vpop.f32.mrb[237].mxu0  ;;  %v14275_v14 = vpop.f32.mrb[237].mxu1  ;;  %v9605_v19 = vsel %vm3843_vm3, %v9529_v10, -inf  ;;  %v9608_v26 = vsel %vm3843_vm3, %v17903_v42, -inf }
0x122e   :  { %v9584_v39 = vpop.f32.mrb[238].mxu1  ;;  %9606 = vmax.xlane.f32.xlu0 %v9605_v19  ;;  %v9532_v9 = vpop.f32.mrb[238].mxu0 }
0x122f   :  { %v14270_v56 = vpop.f32.mrb[239].mxu0  ;;  %v14276_v63 = vpop.f32.mrb[239].mxu1 }
0x1237   :  { %9733 = vrot.lane.b32.xlu1 %v17666_v62, %s16129_s4 }
0x123b   :  { %9782 = vrot.lane.b32.xlu1 %v17765_v50, %s16129_s4 }
0x1244   :  { %9684 = vrot.lane.b32.xlu0 %v17664_v43, %s16129_s4 }
0x125f   :  { %9609 = vmax.xlane.f32.xlu1 %v9608_v26 }
0x1270   :  { %9831 = vrot.lane.b32.xlu1 %v17760_v35, %s16129_s4 }
0x12a3   :  { %v9592_v59 = vpop.xlane.xlu1 %9591  ;;  %v9589_v46 = vpop.xlane.xlu0 %9588 }
0x12a4   :  { %v9612_v0 = vsub.f32 %v9269_v28, %v9592_v59  ;;  %v9611_v47 = vsub.f32 %v9217_v7, %v9589_v46 }
0x12a6   :  { %v9621_v48 = vmul.f32 1.442695, %v9612_v0  ;;  %v9619_v53 = vmul.f32 1.442695, %v9611_v47 }
0x12a8   :  { %15877 = vpow2.f32 %v9621_v48 }
0x12a9   :  { %15879 = vpow2.f32 %v9619_v53 }
0x12ab   :  { %v9595_v62 = vpop.xlane.xlu0 %9594 }
0x12ac   :  { %v9613_v50 = vsub.f32 %v9321_v36, %v9595_v62 }
0x12ae   :  { %v9623_v16 = vmul.f32 1.442695, %v9613_v50 }
0x12af   :  { %v9598_v43 = vpop.xlane.xlu0 %9597 }
0x12b0   :  { %15881 = vpow2.f32 %v9623_v16  ;;  %v9614_v17 = vsub.f32 %v17890_v41, %v9598_v43 }
0x12b2   :  { %v17916_v45 = vpop.eup %15877  ;;  %v9625_v20 = vmul.f32 1.442695, %v9614_v17 }
0x12b3   :  { %v17918_v2 = vpop.eup %15879  ;;  %v9604_v58 = vpop.xlane.xlu1 %9603  ;;  %v9638_v35 = vsel %vm3843_vm3, %v17916_v45, 0.0 }
0x12b4   :  { %9639 = vadd.xlane.f32.xlu1 %v9638_v35  ;;  %v9635_v61 = vsel %vm3843_vm3, %v17918_v2, 0.0  ;;  %v9601_v30 = vpop.xlane.xlu0 %9600  ;;  %v9616_v5 = vsub.f32 %v17897_v1, %v9604_v58  ;;  %15883 = vpow2.f32 %v9625_v20 }
0x12b5   :  { %9636 = vadd.xlane.f32.xlu0 %v9635_v61  ;;  %v9615_v33 = vsub.f32 %v17895_v24, %v9601_v30 }
0x12b6   :  { %v9629_v36 = vmul.f32 1.442695, %v9616_v5 }
0x12b7   :  { %v9734_v7 = vpop.permute.xlu1 %9733  ;;  %v9627_v11 = vmul.f32 1.442695, %v9615_v33 }
0x12b8   :  { %v9739_v28 = vsel %vm3943_vm2, %v9734_v7, 0  ;;  %15885 = vpow2.f32 %v9629_v36  ;;  %v15645_v36 = vld [vmem:[#allocation8 + $0x280] ss:$16 sps:$4 sm:$0xff]  }
0x12b9   :  { %14284 = vmatpush3.bf16.msra.mxu1 %v9739_v28  ;;  %15887 = vpow2.f32 %v9627_v11  ;;  %v15653_v11 = vld [vmem:[#allocation8 + $0x2a4] ss:$16 sps:$4 sm:$0xff]  }
0x12ba   :  { %v17925_v54 = vpop.eup %15881  ;;  %14295 = vmatprep.subr.bf16.mxu1 %v18595_v34 }
0x12bb   :  { %v9607_v13 = vpop.xlane.xlu0 %9606  ;;  %v9641_v23 = vsel %vm3843_vm3, %v17925_v54, 0.0 }
0x12bc   :  { %9642 = vadd.xlane.f32.xlu0 %v9641_v23  ;;  %v9617_v12 = vsub.f32 %v9529_v10, %v9607_v13  ;;  %v15647_v23 = vld [vmem:[#allocation8 + $0x284] ss:$16 sps:$4 sm:$0xff]  }
0x12be   :  { %v9631_v21 = vmul.f32 1.442695, %v9617_v12  ;;  %v17939_v57 = vpop.eup %15883 }
0x12bf   :  { %v9685_v4 = vpop.permute.xlu0 %9684 }
0x12c0   :  { %v9690_v52 = vsel %vm3943_vm2, %v9685_v4, 0  ;;  %15889 = vpow2.f32 %v9631_v21  ;;  %v15650_v4 = vld [vmem:[#allocation8 + $0x28c] ss:$16 sps:$4 sm:$0xff]  }
0x12c1   :  { %14278 = vmatpush3.bf16.msra.mxu0 %v9690_v52 }
0x12c2   :  { %14289 = vmatprep.subr.bf16.mxu0 %v18595_v34  ;;  %v17943_v41 = vpop.eup %15885 }
0x12c3   :  { %v9650_v55 = vsel %vm3843_vm3, %v17943_v41, 0.0  ;;  %v17947_v6 = vpop.eup %15887 }
0x12c4   :  { %v9647_v40 = vsel %vm3843_vm3, %v17947_v6, 0.0 }
0x12c5   :  { %9929 = vrot.lane.b32.xlu1 %v17787_v60, %s16129_s4  ;;  %v9783_v60 = vpop.permute.xlu1 %9782 }
0x12ca   :  { %v17952_v44 = vpop.eup %15889 }
0x12cb   :  { %v9653_v51 = vsel %vm3843_vm3, %v17952_v44, 0.0 }
0x12d2   :  { %9880 = vrot.lane.b32.xlu0 %v17783_v25, %s16129_s4  ;;  %v9644_v25 = vsel %vm3843_vm3, %v17939_v57, 0.0 }
0x12e9   :  { %9645 = vadd.xlane.f32.xlu1 %v9644_v25 }
0x12ec   :  { %v9610_v18 = vpop.xlane.xlu1 %9609 }
0x12ed   :  { %v9618_v24 = vsub.f32 %v17903_v42, %v9610_v18  ;;  %9651 = vadd.xlane.f32.xlu1 %v9650_v55  ;;  %v15659_v18 = vld [vmem:[#allocation8 + $0x2c4] ss:$16 sps:$4 sm:$0xff]   ;;  %v15654_v55 = vld [vmem:[#allocation8 + $0x2a8] ss:$16 sps:$4 sm:$0xff]  }
0x12ef   :  { %v9633_v1 = vmul.f32 1.442695, %v9618_v24  ;;  %v15662_v24 = vld [vmem:[#allocation8 + $0x2cc] ss:$16 sps:$4 sm:$0xff]  }
0x12f0   :  { %v9832_v3 = vpop.permute.xlu1 %9831 }
0x12f1   :  { %15891 = vpow2.f32 %v9633_v1  ;;  %9648 = vadd.xlane.f32.xlu0 %v9647_v40  ;;  %v15665_v1 = vld [vmem:[#allocation8 + $0x2e4] ss:$16 sps:$4 sm:$0xff]   ;;  %v15660_v40 = vld [vmem:[#allocation8 + $0x2c8] ss:$16 sps:$4 sm:$0xff]  }
0x12f5   :  { %9654 = vadd.xlane.f32.xlu0 %v9653_v51  ;;  %v15668_v51 = vld [vmem:[#allocation8 + $0x2ec] ss:$16 sps:$4 sm:$0xff]  }
0x12fb   :  { %v17956_v29 = vpop.eup %15891 }
0x12fc   :  { %v9656_v32 = vsel %vm3843_vm3, %v17956_v29, 0.0 }
0x12fd   :  { %9657 = vadd.xlane.f32.xlu1 %v9656_v32  ;;  %v18672_v32 = vld [vmem:[#allocation41_spill] sm:$0xff] }
0x130b   :  { %9978 = vrot.lane.b32.xlu0 %v17801_v31, %s16129_s4  ;;  %v9837_v31 = vsel %vm3943_vm2, %v9832_v3, 0  ;;  %v18673_v3 = vld [vmem:[#allocation37_spill] sm:$0xff] }
0x130e   :  { %10027 = vrot.lane.b32.xlu1 %v17810_v15, %s16129_s4  ;;  %v9788_v15 = vsel %vm3943_vm2, %v9783_v60, 0  ;;  %v15651_v60 = vld [vmem:[#allocation8 + $0x2a0] ss:$16 sps:$4 sm:$0xff]  }
0x1341   :  { %v9640_v37 = vpop.xlane.xlu1 %9639 }
0x1342   :  { %15893 = vrcp.f32 %v9640_v37  ;;  %v9637_v38 = vpop.xlane.xlu0 %9636  ;;  %v14566_v37 = vadd.f32 %v18673_v3, %v18672_v32 }
0x1343   :  { %15895 = vrcp.f32 %v9637_v38  ;;  %v18674_v38 = vld [vmem:[#allocation39_spill] sm:$0xff] }
0x1345   :  { %v9930_v0 = vpop.permute.xlu1 %9929 }
0x1349   :  { %v9643_v10 = vpop.xlane.xlu0 %9642 }
0x134a   :  { %15897 = vrcp.f32 %v9643_v10  ;;  %v14568_v10 = vadd.f32 %v18674_v38, %v18672_v32  ;;  %v18680_v32 = vld [vmem:[#allocation21_spill] sm:$0xff] }
0x134c   :  { %v15894_v42 = vpop.eup %15893 }
0x134d   :  { %v15896_v22 = vpop.eup %15895  ;;  %v9668_v14 = vmul.f32 %v15894_v42, %v17916_v45  ;;  %v9881_v26 = vpop.permute.xlu0 %9880  ;;  %v18010_v42 = vpack.c.bf16 %v14566_v37, %v14566_v37  ;;  %v18681_v37 = vld [vmem:[#allocation23_spill] sm:$0xff] }
0x134e   :  { %v9667_v19 = vmul.f32 %v15896_v22, %v17918_v2  ;;  %v9886_v46 = vsel %vm3943_vm2, %v9881_v26, 0  ;;  %v9935_v2 = vsel %vm3943_vm2, %v9930_v0, 0  ;;  %v18012_v22 = vpack.c.bf16 %v14568_v10, %v14568_v10  ;;  %v18682_v10 = vld [vmem:[#allocation47_spill] sm:$0xff] }
0x134f   :  { %v9676_v39 = vpack.c.bf16 %v9668_v14, %v9668_v14 }
0x1350   :  { %v9675_v9 = vpack.c.bf16 %v9667_v19, %v9667_v19 }
0x1351   :  { %14286 = vmatmul.mubr.msk.bf16.vlgmr.msra.gmra.mrb[240].mxu1 %vm3843_vm3, %v9676_v39 }
0x1352   :  { %14280 = vmatmul.mubr.msk.bf16.vlgmr.msra.gmra.mrb[240].mxu0 %vm3843_vm3, %v9675_v9  ;;  %14296 = vmatpush3.bf16.msra.mxu1 %v9837_v31 }
0x1353   :  { %14290 = vmatpush3.bf16.msra.mxu0 %v9788_v15  ;;  %14291 = vmatprep.mubr.msk.bf16.mxu0 %vm16128_vm0, %v18595_v34 }
0x1354   :  { %v15898_v56 = vpop.eup %15897  ;;  %14301 = vmatprep.subr.bf16.mxu0 %v18595_v34  ;;  %14297 = vmatprep.mubr.msk.bf16.mxu1 %vm16128_vm0, %v18595_v34 }
0x1355   :  { %v9669_v63 = vmul.f32 %v15898_v56, %v17925_v54  ;;  %14307 = vmatprep.subr.bf16.mxu1 %v18595_v34 }
0x1357   :  { %v9677_v59 = vpack.c.bf16 %v9669_v63, %v9669_v63 }
0x135a   :  { %14292 = vmatmul.mubr.msk.bf16.vlgmr.msra.gmra.mrb[244].mxu0 %vm3843_vm3, %v9677_v59  ;;  %v10370_v59 = vsel %vm3474_vm1, %v18010_v42, 0 }
0x135b   :  { %14302 = vmatpush3.bf16.msra.mxu0 %v9886_v46  ;;  %14303 = vmatprep.mubr.msk.bf16.mxu0 %vm16128_vm0, %v18595_v34  ;;  %v10416_v46 = vsel %vm3474_vm1, %v18012_v22, 0 }
0x135c   :  { %14313 = vmatprep.subr.bf16.mxu0 %v18595_v34 }
0x1376   :  { %v9646_v47 = vpop.xlane.xlu1 %9645 }
0x1377   :  { %15899 = vrcp.f32 %v9646_v47 }
0x137a   :  { %v9652_v48 = vpop.xlane.xlu1 %9651 }
0x137b   :  { %15901 = vrcp.f32 %v9652_v48 }
0x137e   :  { %v9649_v53 = vpop.xlane.xlu0 %9648 }
0x137f   :  { %15903 = vrcp.f32 %v9649_v53 }
0x1381   :  { %v15900_v62 = vpop.eup %15899 }
0x1382   :  { %v9670_v50 = vmul.f32 %v15900_v62, %v17939_v57  ;;  %v9655_v16 = vpop.xlane.xlu0 %9654  ;;  %v15648_v57 = vld [vmem:[#allocation8 + $0x288] ss:$16 sps:$4 sm:$0xff]  }
0x1383   :  { %15905 = vrcp.f32 %v9655_v16 }
0x1384   :  { %v9678_v43 = vpack.c.bf16 %v9670_v50, %v9670_v50 }
0x1385   :  { %v15902_v45 = vpop.eup %15901 }
0x1386   :  { %14298 = vmatmul.mubr.msk.bf16.vlgmr.msra.gmra.mrb[244].mxu1 %vm3843_vm3, %v9678_v43  ;;  %v9672_v58 = vmul.f32 %v15902_v45, %v17943_v41  ;;  %v9979_v7 = vpop.permute.xlu0 %9978  ;;  %v15656_v41 = vld [vmem:[#allocation8 + $0x2ac] ss:$16 sps:$4 sm:$0xff]  }
0x1387   :  { %14308 = vmatpush3.bf16.msra.mxu1 %v9935_v2  ;;  %14309 = vmatprep.mubr.msk.bf16.mxu1 %vm16128_vm0, %v18595_v34  ;;  %v9984_v52 = vsel %vm3943_vm2, %v9979_v7, 0 }
0x1388   :  { %14319 = vmatprep.subr.bf16.mxu1 %v18595_v34  ;;  %v9680_v28 = vpack.c.bf16 %v9672_v58, %v9672_v58 }
0x1389   :  { %v15904_v35 = vpop.eup %15903 }
0x138a   :  { %v9671_v61 = vmul.f32 %v15904_v35, %v17947_v6  ;;  %v9658_v30 = vpop.xlane.xlu1 %9657  ;;  %v15657_v6 = vld [vmem:[#allocation8 + $0x2c0] ss:$16 sps:$4 sm:$0xff]  }
0x138b   :  { %15907 = vrcp.f32 %v9658_v30 }
0x138c   :  { %v9679_v54 = vpack.c.bf16 %v9671_v61, %v9671_v61 }
0x138d   :  { %v15906_v13 = vpop.eup %15905 }
0x138e   :  { %14310 = vmatmul.mubr.msk.bf16.vlgmr.msra.gmra.mrb[248].mxu1 %vm3843_vm3, %v9680_v28  ;;  %v10028_v17 = vpop.permute.xlu1 %10027  ;;  %14304 = vmatmul.mubr.msk.bf16.vlgmr.msra.gmra.mrb[248].mxu0 %vm3843_vm3, %v9679_v54  ;;  %v9673_v5 = vmul.f32 %v15906_v13, %v17952_v44  ;;  %v15663_v44 = vld [vmem:[#allocation8 + $0x2e0] ss:$16 sps:$4 sm:$0xff]  }
0x138f   :  { %v10033_v20 = vsel %vm3943_vm2, %v10028_v17, 0  ;;  %14314 = vmatpush3.bf16.msra.mxu0 %v9984_v52  ;;  %14315 = vmatprep.mubr.msk.bf16.mxu0 %vm16128_vm0, %v18595_v34 }
0x1390   :  { %14320 = vmatpush3.bf16.msra.mxu1 %v10033_v20  ;;  %14321 = vmatprep.mubr.msk.bf16.mxu1 %vm16128_vm0, %v18595_v34  ;;  %v9681_v33 = vpack.c.bf16 %v9673_v5, %v9673_v5  ;;  %v15975_v5 = vld [vmem:[#allocation7] sm:$0xff] }
0x1391   :  { %10188 = vmatprep.subr.bf16.mxu0 %v15647_v23  ;;  %10261 = vmatprep.subr.bf16.mxu1 %v15650_v4 }
0x1395   :  { %v15908_v12 = vpop.eup %15907 }
0x1396   :  { %v9674_v21 = vmul.f32 %v15908_v12, %v17956_v29  ;;  %14316 = vmatmul.mubr.msk.bf16.vlgmr.msra.gmra.mrb[252].mxu0 %vm3843_vm3, %v9681_v33  ;;  %v15666_v29 = vld [vmem:[#allocation8 + $0x2e8] ss:$16 sps:$4 sm:$0xff]  }
0x1397   :  { %10189 = vmatpush1.bf16.msra.mxu0 %v15645_v36  ;;  %10220 = vmatprep.mubr.bf16.mxu0 %v16130_v49  ;;  %v18675_v36 = vld [vmem:[#allocation63_spill] sm:$0xff] }
0x1398   :  { %v9682_v25 = vpack.c.bf16 %v9674_v21, %v9674_v21  ;;  %10190 = vmatprep.subr.bf16.mxu0 %v15653_v11  ;;  %v537_v33 = vrot.slane %v15975_v5, %v18675_v36 }
0x139a   :  { %14322 = vmatmul.mubr.msk.bf16.vlgmr.msra.gmra.mrb[252].mxu1 %vm3843_vm3, %v9682_v25  ;;  %v14538_v3 = vadd.f32 %v18680_v32, %v537_v33  ;;  %v14540_v38 = vadd.f32 %v18681_v37, %v537_v33 }
0x139b   :  { %10262 = vmatpush1.bf16.msra.mxu1 %v15648_v57  ;;  %10191 = vmatpush1.bf16.msra.mxu0 %v15651_v60  ;;  %v18676_v60 = vld [vmem:[#allocation17_spill] sm:$0xff] }
0x139c   :  { %10263 = vmatprep.subr.bf16.mxu1 %v15656_v41  ;;  %10192 = vmatprep.subr.bf16.mxu0 %v15659_v18  ;;  %v14534_v25 = vadd.f32 %v18676_v60, %v537_v33  ;;  %v18677_v41 = vld [vmem:[#allocation19_spill] sm:$0xff] }
0x139d   :  { %10293 = vmatprep.mubr.bf16.mxu1 %v16130_v49  ;;  %v14536_v18 = vadd.f32 %v18677_v41, %v537_v33 }
0x139f   :  { %10264 = vmatpush1.bf16.msra.mxu1 %v15654_v55  ;;  %10193 = vmatpush1.bf16.msra.mxu0 %v15657_v6  ;;  %v18678_v55 = vld [vmem:[#allocation43_spill] sm:$0xff] }
0x13a0   :  { %10265 = vmatprep.subr.bf16.mxu1 %v15662_v24  ;;  %10194 = vmatprep.subr.bf16.mxu0 %v15665_v1  ;;  %v18043_v6 = vpack.c.bf16 %v18678_v55, %v18678_v55  ;;  %v18679_v24 = vld [vmem:[#allocation45_spill] sm:$0xff] }
0x13a1   :  { %v18047_v1 = vpack.c.bf16 %v18679_v24, %v18679_v24 }
0x13a3   :  { %10266 = vmatpush1.bf16.msra.mxu1 %v15660_v40  ;;  %10195 = vmatpush1.bf16.msra.mxu0 %v15663_v44  ;;  %v18049_v40 = vpack.c.bf16 %v14534_v25, %v14534_v25  ;;  %v18051_v44 = vpack.c.bf16 %v14536_v18, %v14536_v18 }
0x13a4   :  { %10267 = vmatprep.subr.bf16.mxu1 %v15668_v51  ;;  %14325 = vmatprep.subr.bf16.mxu0 %v18595_v34  ;;  %v10462_v51 = vsel %vm3474_vm1, %v18043_v6, 0 }
0x13a7   :  { %10268 = vmatpush1.bf16.msra.mxu1 %v15666_v29  ;;  %v10508_v29 = vsel %vm3474_vm1, %v18047_v1, 0 }
0x13a8   :  { %14331 = vmatprep.subr.bf16.mxu1 %v18595_v34 }
0x1424   :  { %v9775_v14 = vpop.f32.mrb[240].mxu1 }
0x1425   :  { %v9726_v19 = vpop.f32.mrb[240].mxu0  ;;  %v14287_v39 = vpop.f32.mrb[241].mxu1 }
0x1426   :  { %v10075_v9 = vpack.c.bf16 %v9775_v14, %v9726_v19  ;;  %v14281_v31 = vpop.f32.mrb[241].mxu0  ;;  %v9778_v15 = vpop.f32.mrb[242].mxu1  ;;  %v18071_v14 = vpack.c.bf16 %v18682_v10, %v18682_v10  ;;  %v18683_v19 = vld [vmem:[#allocation49_spill] sm:$0xff] }
0x1427   :  { %v9729_v56 = vpop.f32.mrb[242].mxu0  ;;  %v14288_v63 = vpop.f32.mrb[243].mxu1  ;;  %v18075_v39 = vpack.c.bf16 %v18683_v19, %v18683_v19  ;;  %v18079_v31 = vpack.c.bf16 %v14540_v38, %v14540_v38 }
0x1428   :  { %v14282_v26 = vpop.f32.mrb[243].mxu0  ;;  %13405 = vmatmul.mubr.msk.bf16.vlgmr.msra.gmra.mrb[112].mxu0 %vm3474_vm1, %v10075_v9  ;;  %13409 = vmatmul.mubr.msk.bf16.vlgmr.msra.gmra.mrb[112].mxu1 %vm3474_vm1, %v10075_v9  ;;  %v18077_v9 = vpack.c.bf16 %v14538_v3, %v14538_v3  ;;  %v10554_v15 = vsel %vm3474_vm1, %v18071_v14, 0  ;;  %v18684_v63 = vld [vmem:[#allocation26_spill] sm:$0xff] }
0x1429   :  { %14326 = vmatpush3.bf16.xpose.msra.mxu0 %v10370_v59  ;;  %14332 = vmatpush3.bf16.xpose.msra.mxu1 %v10416_v46  ;;  %v10600_v56 = vsel %vm3474_vm1, %v18075_v39, 0  ;;  %v14542_v26 = vadd.f32 %v18684_v63, %v537_v33  ;;  %v18685_v59 = vld [vmem:[#allocation29_spill] sm:$0xff] }
0x142a   :  { %10230 = vmatprep.mubr.bf16.mxu0 %v16130_v49  ;;  %10303 = vmatprep.mubr.bf16.mxu1 %v16130_v49  ;;  %v14544_v46 = vadd.f32 %v18685_v59, %v537_v33 }
0x142b   :  { %14337 = vmatprep.subr.bf16.mxu0 %v18595_v34  ;;  %14343 = vmatprep.subr.bf16.mxu1 %v18595_v34 }
0x142d   :  { %v9824_v0 = vpop.f32.mrb[244].mxu0 }
0x142e   :  { %v14293_v47 = vpop.f32.mrb[245].mxu0 }
0x142f   :  { %v9827_v48 = vpop.f32.mrb[246].mxu0 }
0x1430   :  { %v14294_v53 = vpop.f32.mrb[247].mxu0  ;;  %v18687_v48 = vld [vmem:[#allocation53_spill] sm:$0xff] }
0x1431   :  { %v18103_v53 = vpack.c.bf16 %v18687_v48, %v18687_v48 }
0x1459   :  { %v9873_v62 = vpop.f32.mrb[244].mxu1 }
0x145a   :  { %v10076_v50 = vpack.c.bf16 %v9873_v62, %v9824_v0  ;;  %v14299_v16 = vpop.f32.mrb[245].mxu1  ;;  %v18686_v0 = vld [vmem:[#allocation51_spill] sm:$0xff]  ;;  %v18105_v62 = vpack.c.bf16 %v14542_v26, %v14542_v26 }
0x145b   :  { %v9876_v43 = vpop.f32.mrb[246].mxu1  ;;  %v18099_v47 = vpack.c.bf16 %v18686_v0, %v18686_v0  ;;  %v18688_v16 = vld [vmem:[#allocation66_spill] sm:$0xff] }
0x145c   :  { %v14300_v45 = vpop.f32.mrb[247].mxu1  ;;  %13406 = vmatmul.mubr.msk.bf16.gmra.mrb[116].mxu0 %vm3474_vm1, %v10076_v50  ;;  %13410 = vmatmul.mubr.msk.bf16.gmra.mrb[116].mxu1 %vm3474_vm1, %v10076_v50  ;;  %v18107_v50 = vpack.c.bf16 %v14544_v46, %v14544_v46  ;;  %v18689_v43 = vld [vmem:[#allocation57_spill] sm:$0xff] }
0x145d   :  { %10240 = vmatprep.mubr.bf16.mxu0 %v16130_v49  ;;  %10313 = vmatprep.mubr.bf16.mxu1 %v16130_v49  ;;  %v14598_v45 = vadd.f32 %v18689_v43, %v18688_v16 }
0x1461   :  { %v9922_v2 = vpop.f32.mrb[248].mxu0  ;;  %v9971_v58 = vpop.f32.mrb[248].mxu1 }
0x1462   :  { %v10077_v35 = vpack.c.bf16 %v9971_v58, %v9922_v2  ;;  %v14305_v61 = vpop.f32.mrb[249].mxu0  ;;  %v14311_v30 = vpop.f32.mrb[249].mxu1  ;;  %v18690_v2 = vld [vmem:[#allocation60_spill] sm:$0xff] }
0x1463   :  { %v9925_v7 = vpop.f32.mrb[250].mxu0  ;;  %v9974_v28 = vpop.f32.mrb[250].mxu1  ;;  %v14600_v58 = vadd.f32 %v18690_v2, %v18688_v16  ;;  %v10692_v61 = vsel %vm3474_vm1, %v18103_v53, 0  ;;  %v18691_v30 = vld [vmem:[#allocation32_spill] sm:$0xff] }
0x1464   :  { %v14306_v54 = vpop.f32.mrb[251].mxu0  ;;  %v14312_v13 = vpop.f32.mrb[251].mxu1  ;;  %13407 = vmatmul.mubr.msk.bf16.gmra.mrb[120].mxu0 %vm3474_vm1, %v10077_v35  ;;  %13411 = vmatmul.mubr.msk.bf16.gmra.mrb[120].mxu1 %vm3474_vm1, %v10077_v35  ;;  %v10646_v35 = vsel %vm3474_vm1, %v18099_v47, 0  ;;  %v14546_v7 = vadd.f32 %v18691_v30, %v537_v33  ;;  %v18692_v28 = vld [vmem:[#allocation34_spill] sm:$0xff] }
0x1465   :  { %10250 = vmatprep.mubr.bf16.mxu0 %v16130_v49  ;;  %10323 = vmatprep.mubr.bf16.mxu1 %v16130_v49  ;;  %v14548_v54 = vadd.f32 %v18692_v28, %v537_v33  ;;  %v18129_v13 = vpack.c.bf16 %v14598_v45, %v14598_v45 }
0x1469   :  { %v10020_v23 = vpop.f32.mrb[252].mxu0 }
0x146a   :  { %v14317_v4 = vpop.f32.mrb[253].mxu0 }
0x146b   :  { %v10023_v52 = vpop.f32.mrb[254].mxu0  ;;  %v18133_v4 = vpack.c.bf16 %v14546_v7, %v14546_v7 }
0x146c   :  { %v14318_v17 = vpop.f32.mrb[255].mxu0  ;;  %v18135_v52 = vpack.c.bf16 %v14548_v54, %v14548_v54 }
0x146d   :  { %v10069_v20 = vpop.f32.mrb[252].mxu1  ;;  %v10834_v17 = vsel %vm3943_vm2, %v18129_v13, 0 }
0x146e   :  { %v10078_v11 = vpack.c.bf16 %v10069_v20, %v10020_v23  ;;  %v14323_v12 = vpop.f32.mrb[253].mxu1  ;;  %v18131_v23 = vpack.c.bf16 %v14600_v58, %v14600_v58 }
0x146f   :  { %v10072_v21 = vpop.f32.mrb[254].mxu1 }
0x1470   :  { %v14324_v57 = vpop.f32.mrb[255].mxu1  ;;  %13408 = vmatmul.mubr.msk.bf16.gmra.mrb[124].mxu0 %vm3474_vm1, %v10078_v11  ;;  %13412 = vmatmul.mubr.msk.bf16.gmra.mrb[124].mxu1 %vm3474_vm1, %v10078_v11  ;;  %v10880_v20 = vsel %vm3943_vm2, %v18131_v23, 0 }
0x1471   :  { %14327 = vmatprep.mubr.msk.bf16.mxu0 %vm16128_vm0, %v18595_v34  ;;  %14333 = vmatprep.mubr.msk.bf16.mxu1 %vm16128_vm0, %v18595_v34 }
0x1478   :  { %14328 = vmatmul.mubr.msk.bf16.vlgmr.msra.gmra.mrb[0].mxu0 %vm3474_vm1, %v18049_v40  ;;  %14334 = vmatmul.mubr.msk.bf16.vlgmr.msra.gmra.mrb[0].mxu1 %vm3474_vm1, %v18051_v44 }
0x1479   :  { %14338 = vmatpush3.bf16.xpose.msra.mxu0 %v10462_v51  ;;  %14344 = vmatpush3.bf16.xpose.msra.mxu1 %v10508_v29 }
0x147a   :  { %14339 = vmatprep.mubr.msk.bf16.mxu0 %vm16128_vm0, %v18595_v34  ;;  %14345 = vmatprep.mubr.msk.bf16.mxu1 %vm16128_vm0, %v18595_v34 }
0x147b   :  { %14349 = vmatprep.subr.bf16.mxu0 %v18595_v34  ;;  %14355 = vmatprep.subr.bf16.mxu1 %v18595_v34 }
0x1480   :  { %14340 = vmatmul.mubr.msk.bf16.vlgmr.msra.gmra.mrb[4].mxu0 %vm3474_vm1, %v18077_v9  ;;  %14346 = vmatmul.mubr.msk.bf16.vlgmr.msra.gmra.mrb[4].mxu1 %vm3474_vm1, %v18079_v31 }
0x1481   :  { %14350 = vmatpush3.bf16.xpose.msra.mxu0 %v10554_v15  ;;  %14356 = vmatpush3.bf16.xpose.msra.mxu1 %v10600_v56 }
0x1482   :  { %14351 = vmatprep.mubr.msk.bf16.mxu0 %vm16128_vm0, %v18595_v34  ;;  %14357 = vmatprep.mubr.msk.bf16.mxu1 %vm16128_vm0, %v18595_v34 }
0x1483   :  { %14361 = vmatprep.subr.bf16.mxu0 %v18595_v34  ;;  %14367 = vmatprep.subr.bf16.mxu1 %v18595_v34 }
0x1488   :  { %14352 = vmatmul.mubr.msk.bf16.vlgmr.msra.gmra.mrb[8].mxu0 %vm3474_vm1, %v18105_v62  ;;  %14358 = vmatmul.mubr.msk.bf16.vlgmr.msra.gmra.mrb[8].mxu1 %vm3474_vm1, %v18107_v50 }
0x1489   :  { %14362 = vmatpush3.bf16.xpose.msra.mxu0 %v10646_v35  ;;  %14368 = vmatpush3.bf16.xpose.msra.mxu1 %v10692_v61 }
0x148a   :  { %14363 = vmatprep.mubr.msk.bf16.mxu0 %vm16128_vm0, %v18595_v34  ;;  %14369 = vmatprep.mubr.msk.bf16.mxu1 %vm16128_vm0, %v18595_v34 }
0x148b   :  { %14373 = vmatprep.subr.bf16.mxu0 %v18595_v34  ;;  %14379 = vmatprep.subr.bf16.mxu1 %v18595_v34 }
0x1490   :  { %14364 = vmatmul.mubr.msk.bf16.vlgmr.msra.gmra.mrb[12].mxu0 %vm3474_vm1, %v18133_v4  ;;  %14370 = vmatmul.mubr.msk.bf16.vlgmr.msra.gmra.mrb[12].mxu1 %vm3474_vm1, %v18135_v52 }
0x1491   :  { %14374 = vmatpush3.bf16.msra.mxu0 %v10834_v17  ;;  %14380 = vmatpush3.bf16.msra.mxu1 %v10880_v20 }
0x1492   :  { %14375 = vmatprep.mubr.msk.bf16.mxu0 %vm16128_vm0, %v18595_v34  ;;  %14381 = vmatprep.mubr.msk.bf16.mxu1 %vm16128_vm0, %v18595_v34 }
0x1493   :  { %14385 = vmatprep.subr.bf16.mxu0 %v18595_v34  ;;  %14391 = vmatprep.subr.bf16.mxu1 %v18595_v34 }
0x154b   :  { %v10406_v5 = vpop.f32.mrb[0].mxu0  ;;  %v10452_v33 = vpop.f32.mrb[0].mxu1 }
0x154c   :  { %v14329_v11 = vpop.f32.mrb[1].mxu0  ;;  %v14335_v12 = vpop.f32.mrb[1].mxu1  ;;  %v10737_v21 = vsel %vm3843_vm3, %v10452_v33, -inf  ;;  %v10734_v57 = vsel %vm3843_vm3, %v10406_v5, -inf }
0x154d   :  { %10738 = vmax.xlane.f32.xlu1 %v10737_v21  ;;  %v10455_v60 = vpop.f32.mrb[2].mxu1  ;;  %10735 = vmax.xlane.f32.xlu0 %v10734_v57  ;;  %v10409_v25 = vpop.f32.mrb[2].mxu0 }
0x154e   :  { %v14330_v41 = vpop.f32.mrb[3].mxu0  ;;  %v14336_v18 = vpop.f32.mrb[3].mxu1 }
0x1553   :  { %v10498_v55 = vpop.f32.mrb[4].mxu0  ;;  %v10544_v24 = vpop.f32.mrb[4].mxu1 }
0x1554   :  { %v14341_v51 = vpop.f32.mrb[5].mxu0  ;;  %v14347_v29 = vpop.f32.mrb[5].mxu1  ;;  %v10740_v32 = vsel %vm3843_vm3, %v10498_v55, -inf  ;;  %v10743_v19 = vsel %vm3843_vm3, %v10544_v24, -inf }
0x1555   :  { %v10547_v3 = vpop.f32.mrb[6].mxu1  ;;  %10741 = vmax.xlane.f32.xlu0 %v10740_v32  ;;  %v10501_v37 = vpop.f32.mrb[6].mxu0 }
0x1556   :  { %v14342_v38 = vpop.f32.mrb[7].mxu0  ;;  %v14348_v10 = vpop.f32.mrb[7].mxu1 }
0x1559   :  { %10744 = vmax.xlane.f32.xlu0 %v10743_v19 }
0x155b   :  { %v10590_v15 = vpop.f32.mrb[8].mxu0  ;;  %v10636_v56 = vpop.f32.mrb[8].mxu1 }
0x155c   :  { %v14353_v63 = vpop.f32.mrb[9].mxu0  ;;  %v14359_v26 = vpop.f32.mrb[9].mxu1  ;;  %v10749_v59 = vsel %vm3843_vm3, %v10636_v56, -inf  ;;  %v10746_v46 = vsel %vm3843_vm3, %v10590_v15, -inf }
0x155d   :  { %10750 = vmax.xlane.f32.xlu1 %v10749_v59  ;;  %v10639_v0 = vpop.f32.mrb[10].mxu1  ;;  %10747 = vmax.xlane.f32.xlu0 %v10746_v46  ;;  %v10593_v48 = vpop.f32.mrb[10].mxu0 }
0x155e   :  { %v14354_v16 = vpop.f32.mrb[11].mxu0  ;;  %v14360_v43 = vpop.f32.mrb[11].mxu1 }
0x1563   :  { %v10682_v45 = vpop.f32.mrb[12].mxu0  ;;  %v10728_v2 = vpop.f32.mrb[12].mxu1 }
0x1564   :  { %v14365_v58 = vpop.f32.mrb[13].mxu0  ;;  %v14371_v35 = vpop.f32.mrb[13].mxu1  ;;  %v10755_v61 = vsel %vm3843_vm3, %v10728_v2, -inf  ;;  %v10752_v30 = vsel %vm3843_vm3, %v10682_v45, -inf }
0x1565   :  { %10756 = vmax.xlane.f32.xlu1 %v10755_v61  ;;  %v10731_v7 = vpop.f32.mrb[14].mxu1  ;;  %10753 = vmax.xlane.f32.xlu0 %v10752_v30  ;;  %v10685_v28 = vpop.f32.mrb[14].mxu0 }
0x1566   :  { %v14366_v54 = vpop.f32.mrb[15].mxu0  ;;  %v14372_v17 = vpop.f32.mrb[15].mxu1 }
0x15da   :  { %v10739_v20 = vpop.xlane.xlu1 %10738  ;;  %v10736_v11 = vpop.xlane.xlu0 %10735 }
0x15db   :  { %v10759_v12 = vsub.f32 %v10452_v33, %v10739_v20  ;;  %v10758_v21 = vsub.f32 %v10406_v5, %v10736_v11 }
0x15dd   :  { %v10768_v57 = vmul.f32 1.442695, %v10759_v12  ;;  %v10766_v60 = vmul.f32 1.442695, %v10758_v21  ;;  %v18695_v21 = vld [vmem:[#allocation74_spill] sm:$0xff] }
0x15df   :  { %15909 = vpow2.f32 %v10768_v57  ;;  %v18248_v57 = vpack.c.bf16 %v18695_v21, %v18695_v21 }
0x15e0   :  { %15911 = vpow2.f32 %v10766_v60 }
0x15e2   :  { %v10742_v25 = vpop.xlane.xlu0 %10741 }
0x15e3   :  { %v10760_v41 = vsub.f32 %v10498_v55, %v10742_v25 }
0x15e5   :  { %v10770_v18 = vmul.f32 1.442695, %v10760_v41  ;;  %v18696_v41 = vld [vmem:[#allocation76_spill] sm:$0xff] }
0x15e6   :  { %v10745_v51 = vpop.xlane.xlu0 %10744 }
0x15e7   :  { %15913 = vpow2.f32 %v10770_v18  ;;  %v10761_v29 = vsub.f32 %v10544_v24, %v10745_v51  ;;  %v18252_v18 = vpack.c.bf16 %v18696_v41, %v18696_v41 }
0x15e9   :  { %v18159_v32 = vpop.eup %15909  ;;  %v10772_v3 = vmul.f32 1.442695, %v10761_v29 }
0x15ea   :  { %v18161_v37 = vpop.eup %15911  ;;  %v10751_v38 = vpop.xlane.xlu1 %10750  ;;  %v10785_v5 = vsel %vm3843_vm3, %v18159_v32, 0.0 }
0x15eb   :  { %v10748_v10 = vpop.xlane.xlu0 %10747  ;;  %15915 = vpow2.f32 %v10772_v3  ;;  %v10763_v33 = vsub.f32 %v10636_v56, %v10751_v38  ;;  %10786 = vadd.xlane.f32.xlu1 %v10785_v5  ;;  %v10782_v55 = vsel %vm3843_vm3, %v18161_v37, 0.0  ;;  %v11064_v5 = vsel %vm3943_vm2, %v18252_v18, 0 }
0x15ec   :  { %v10762_v19 = vsub.f32 %v10590_v15, %v10748_v10  ;;  %10783 = vadd.xlane.f32.xlu0 %v10782_v55 }
0x15ed   :  { %v10776_v63 = vmul.f32 1.442695, %v10763_v33  ;;  %v18697_v33 = vld [vmem:[#allocation80_spill] sm:$0xff] }
0x15ee   :  { %v10774_v24 = vmul.f32 1.442695, %v10762_v19  ;;  %v18266_v19 = vpack.c.bf16 %v18697_v33, %v18697_v33 }
0x15ef   :  { %15917 = vpow2.f32 %v10776_v63 }
0x15f0   :  { %15919 = vpow2.f32 %v10774_v24 }
0x15f1   :  { %v18167_v26 = vpop.eup %15913 }
0x15f2   :  { %v10757_v59 = vpop.xlane.xlu1 %10756  ;;  %v10754_v46 = vpop.xlane.xlu0 %10753  ;;  %v10788_v0 = vsel %vm3843_vm3, %v18167_v26, 0.0 }
0x15f3   :  { %v10765_v48 = vsub.f32 %v10728_v2, %v10757_v59  ;;  %v10764_v16 = vsub.f32 %v10682_v45, %v10754_v46  ;;  %10789 = vadd.xlane.f32.xlu0 %v10788_v0  ;;  %v18698_v59 = vld [vmem:[#allocation82_spill] sm:$0xff]  ;;  %v11110_v0 = vsel %vm3943_vm2, %v18266_v19, 0 }
0x15f4   :  { %v18275_v46 = vpack.c.bf16 %v18698_v59, %v18698_v59 }
0x15f5   :  { %v18171_v15 = vpop.eup %15915  ;;  %v10780_v56 = vmul.f32 1.442695, %v10765_v48  ;;  %v10778_v43 = vmul.f32 1.442695, %v10764_v16  ;;  %v15674_v16 = vld [vmem:[#allocation8 + $0x30c] ss:$16 sps:$4 sm:$0xff]  }
0x15f6   :  { %v10791_v58 = vsel %vm3843_vm3, %v18171_v15, 0.0 }
0x15f7   :  { %15921 = vpow2.f32 %v10780_v56  ;;  %10792 = vadd.xlane.f32.xlu1 %v10791_v58 }
0x15f8   :  { %15923 = vpow2.f32 %v10778_v43  ;;  %v11156_v43 = vsel %vm3943_vm2, %v18275_v46, 0 }
0x15f9   :  { %v18175_v35 = vpop.eup %15917 }
0x15fa   :  { %v18177_v61 = vpop.eup %15919  ;;  %v10797_v30 = vsel %vm3843_vm3, %v18175_v35, 0.0 }
0x15fb   :  { %10798 = vadd.xlane.f32.xlu1 %v10797_v30  ;;  %v10794_v45 = vsel %vm3843_vm3, %v18177_v61, 0.0 }
0x15fc   :  { %10795 = vadd.xlane.f32.xlu0 %v10794_v45  ;;  %v15677_v45 = vld [vmem:[#allocation8 + $0x324] ss:$16 sps:$4 sm:$0xff]  }
0x1601   :  { %v18183_v2 = vpop.eup %15921 }
0x1602   :  { %v18185_v7 = vpop.eup %15923  ;;  %v10803_v28 = vsel %vm3843_vm3, %v18183_v2, 0.0 }
0x1603   :  { %10804 = vadd.xlane.f32.xlu1 %v10803_v28  ;;  %v10800_v54 = vsel %vm3843_vm3, %v18185_v7, 0.0  ;;  %v15672_v28 = vld [vmem:[#allocation8 + $0x308] ss:$16 sps:$4 sm:$0xff]  }
0x1604   :  { %10801 = vadd.xlane.f32.xlu0 %v10800_v54 }
0x1614   :  { %11545 = vrot.lane.b32.xlu1 %v18012_v22, %s16129_s4 }
0x1618   :  { %11490 = vrot.lane.b32.xlu1 %v18049_v40, %s16129_s4 }
0x161a   :  { %11493 = vrot.lane.b32.xlu0 %v18010_v42, %s16129_s4 }
0x161c   :  { %11542 = vrot.lane.b32.xlu1 %v18051_v44, %s16129_s4  ;;  %v18693_v44 = vld [vmem:[#allocation70_spill] sm:$0xff] }
0x161e   :  { %11597 = vrot.lane.b32.xlu0 %v18043_v6, %s16129_s4 }
0x1620   :  { %11649 = vrot.lane.b32.xlu1 %v18047_v1, %s16129_s4 }
0x1622   :  { %11594 = vrot.lane.b32.xlu0 %v18077_v9, %s16129_s4 }
0x1624   :  { %11646 = vrot.lane.b32.xlu1 %v18079_v31, %s16129_s4  ;;  %v18694_v31 = vld [vmem:[#allocation68_spill] sm:$0xff] }
0x1626   :  { %11701 = vrot.lane.b32.xlu0 %v18071_v14, %s16129_s4  ;;  %v18225_v14 = vpack.c.bf16 %v18693_v44, %v18693_v44  ;;  %v15684_v44 = vld [vmem:[#allocation8 + $0x348] ss:$16 sps:$4 sm:$0xff]  }
0x1628   :  { %11753 = vrot.lane.b32.xlu1 %v18075_v39, %s16129_s4 }
0x162a   :  { %11698 = vrot.lane.b32.xlu0 %v18105_v62, %s16129_s4 }
0x162c   :  { %11750 = vrot.lane.b32.xlu1 %v18107_v50, %s16129_s4 }
0x162e   :  { %11805 = vrot.lane.b32.xlu0 %v18099_v47, %s16129_s4  ;;  %v18230_v47 = vpack.c.bf16 %v18694_v31, %v18694_v31  ;;  %v15690_v31 = vld [vmem:[#allocation8 + $0x368] ss:$16 sps:$4 sm:$0xff]  }
0x1630   :  { %11857 = vrot.lane.b32.xlu1 %v18103_v53, %s16129_s4  ;;  %v10926_v17 = vsel %vm3943_vm2, %v18230_v47, 0 }
0x1632   :  { %11802 = vrot.lane.b32.xlu0 %v18133_v4, %s16129_s4  ;;  %v10972_v4 = vsel %vm3943_vm2, %v18225_v14, 0 }
0x1634   :  { %11854 = vrot.lane.b32.xlu1 %v18135_v52, %s16129_s4 }
0x1678   :  { %v10787_v42 = vpop.xlane.xlu1 %10786 }
0x1679   :  { %15925 = vrcp.f32 %v10787_v42  ;;  %v10784_v22 = vpop.xlane.xlu0 %10783  ;;  %v15675_v42 = vld [vmem:[#allocation8 + $0x320] ss:$16 sps:$4 sm:$0xff]  }
0x167a   :  { %15927 = vrcp.f32 %v10784_v22  ;;  %v15680_v22 = vld [vmem:[#allocation8 + $0x32c] ss:$16 sps:$4 sm:$0xff]  }
0x1680   :  { %v10790_v6 = vpop.xlane.xlu0 %10789 }
0x1681   :  { %15929 = vrcp.f32 %v10790_v6  ;;  %v15678_v6 = vld [vmem:[#allocation8 + $0x328] ss:$16 sps:$4 sm:$0xff]  }
0x1683   :  { %v15926_v1 = vpop.eup %15925 }
0x1684   :  { %v15928_v40 = vpop.eup %15927  ;;  %v10815_v39 = vmul.f32 %v15926_v1, %v18159_v32  ;;  %v10793_v9 = vpop.xlane.xlu1 %10792  ;;  %v11018_v32 = vsel %vm3943_vm2, %v18248_v57, 0  ;;  %v15686_v1 = vld [vmem:[#allocation8 + $0x34c] ss:$16 sps:$4 sm:$0xff]  }
0x1685   :  { %v10814_v53 = vmul.f32 %v15928_v40, %v18161_v37  ;;  %15931 = vrcp.f32 %v10793_v9  ;;  %v15689_v40 = vld [vmem:[#allocation8 + $0x364] ss:$16 sps:$4 sm:$0xff]   ;;  %v15692_v9 = vld [vmem:[#allocation8 + $0x36c] ss:$16 sps:$4 sm:$0xff]  }
0x1686   :  { %v10823_v62 = vpack.c.bf16 %v10815_v39, %v10815_v39  ;;  %v15687_v39 = vld [vmem:[#allocation8 + $0x360] ss:$16 sps:$4 sm:$0xff]  }
0x1687   :  { %v10822_v50 = vpack.c.bf16 %v10814_v53, %v10814_v53 }
0x1688   :  { %14382 = vmatmul.mubr.msk.bf16.vlgmr.msra.gmra.mrb[16].mxu1 %vm3843_vm3, %v10823_v62  ;;  %v10799_v52 = vpop.xlane.xlu1 %10798 }
0x1689   :  { %14392 = vmatpush3.bf16.msra.mxu1 %v10972_v4  ;;  %15933 = vrcp.f32 %v10799_v52  ;;  %14376 = vmatmul.mubr.msk.bf16.vlgmr.msra.gmra.mrb[16].mxu0 %vm3843_vm3, %v10822_v50  ;;  %v10796_v20 = vpop.xlane.xlu0 %10795 }
0x168a   :  { %14386 = vmatpush3.bf16.msra.mxu0 %v10926_v17  ;;  %15935 = vrcp.f32 %v10796_v20  ;;  %14387 = vmatprep.mubr.msk.bf16.mxu0 %vm16128_vm0, %v18595_v34 }
0x168b   :  { %v15930_v11 = vpop.eup %15929  ;;  %14397 = vmatprep.subr.bf16.mxu0 %v18595_v34  ;;  %14393 = vmatprep.mubr.msk.bf16.mxu1 %vm16128_vm0, %v18595_v34 }
0x168c   :  { %v10816_v12 = vmul.f32 %v15930_v11, %v18167_v26  ;;  %14403 = vmatprep.subr.bf16.mxu1 %v18595_v34  ;;  %v15671_v26 = vld [vmem:[#allocation8 + $0x304] ss:$16 sps:$4 sm:$0xff]  }
0x168e   :  { %v10824_v60 = vpack.c.bf16 %v10816_v12, %v10816_v12 }
0x168f   :  { %v15932_v25 = vpop.eup %15931 }
0x1690   :  { %v10817_v51 = vmul.f32 %v15932_v25, %v18171_v15  ;;  %v10805_v29 = vpop.xlane.xlu1 %10804 }
0x1691   :  { %15937 = vrcp.f32 %v10805_v29  ;;  %14388 = vmatmul.mubr.msk.bf16.vlgmr.msra.gmra.mrb[20].mxu0 %vm3843_vm3, %v10824_v60  ;;  %v10802_v3 = vpop.xlane.xlu0 %10801 }
0x1692   :  { %v10825_v37 = vpack.c.bf16 %v10817_v51, %v10817_v51  ;;  %14398 = vmatpush3.bf16.msra.mxu0 %v11018_v32  ;;  %15939 = vrcp.f32 %v10802_v3  ;;  %14399 = vmatprep.mubr.msk.bf16.mxu0 %vm16128_vm0, %v18595_v34 }
0x1693   :  { %v15934_v38 = vpop.eup %15933  ;;  %14409 = vmatprep.subr.bf16.mxu0 %v18595_v34 }
0x1694   :  { %v15936_v10 = vpop.eup %15935  ;;  %14394 = vmatmul.mubr.msk.bf16.vlgmr.msra.gmra.mrb[20].mxu1 %vm3843_vm3, %v10825_v37  ;;  %v10819_v63 = vmul.f32 %v15934_v38, %v18175_v35  ;;  %v11546_v53 = vpop.permute.xlu1 %11545 }
0x1695   :  { %v10818_v55 = vmul.f32 %v15936_v10, %v18177_v61  ;;  %14404 = vmatpush3.bf16.msra.mxu1 %v11064_v5  ;;  %14405 = vmatprep.mubr.msk.bf16.mxu1 %vm16128_vm0, %v18595_v34  ;;  %v15669_v61 = vld [vmem:[#allocation8 + $0x300] ss:$16 sps:$4 sm:$0xff]   ;;  %v11494_v62 = vpop.permute.xlu0 %11493  ;;  %v11551_v60 = vsel %vm3474_vm1, %v11546_v53, 0 }
0x1696   :  { %14415 = vmatprep.subr.bf16.mxu1 %v18595_v34  ;;  %v10827_v48 = vpack.c.bf16 %v10819_v63, %v10819_v63  ;;  %v11499_v25 = vsel %vm3474_vm1, %v11494_v62, 0 }
0x1697   :  { %v10826_v24 = vpack.c.bf16 %v10818_v55, %v10818_v55 }
0x1698   :  { %v11491_v33 = vpop.permute.xlu1 %11490 }
0x1699   :  { %14400 = vmatmul.mubr.msk.bf16.vlgmr.msra.gmra.mrb[24].mxu0 %vm3843_vm3, %v10826_v24 }
0x169a   :  { %14410 = vmatpush3.bf16.msra.mxu0 %v11110_v0  ;;  %14411 = vmatprep.mubr.msk.bf16.mxu0 %vm16128_vm0, %v18595_v34 }
0x169b   :  { %v15938_v15 = vpop.eup %15937  ;;  %11311 = vmatprep.subr.bf16.mxu0 %v15671_v26 }
0x169c   :  { %v15940_v56 = vpop.eup %15939  ;;  %14406 = vmatmul.mubr.msk.bf16.vlgmr.msra.gmra.mrb[24].mxu1 %vm3843_vm3, %v10827_v48  ;;  %v10821_v35 = vmul.f32 %v15938_v15, %v18183_v2  ;;  %v15681_v2 = vld [vmem:[#allocation8 + $0x340] ss:$16 sps:$4 sm:$0xff]   ;;  %v11543_v48 = vpop.permute.xlu1 %11542 }
0x169d   :  { %v10820_v58 = vmul.f32 %v15940_v56, %v18185_v7  ;;  %14416 = vmatpush3.bf16.msra.mxu1 %v11156_v43  ;;  %14417 = vmatprep.mubr.msk.bf16.mxu1 %vm16128_vm0, %v18595_v34  ;;  %v15683_v7 = vld [vmem:[#allocation8 + $0x344] ss:$16 sps:$4 sm:$0xff]  }
0x169e   :  { %11384 = vmatprep.subr.bf16.mxu1 %v15674_v16  ;;  %v10829_v54 = vpack.c.bf16 %v10821_v35, %v10821_v35  ;;  %v11598_v35 = vpop.permute.xlu0 %11597 }
0x169f   :  { %v10828_v30 = vpack.c.bf16 %v10820_v58, %v10820_v58 }
0x16a1   :  { %14412 = vmatmul.mubr.msk.bf16.vlgmr.msra.gmra.mrb[28].mxu0 %vm3843_vm3, %v10828_v30  ;;  %v11650_v30 = vpop.permute.xlu1 %11649 }
0x16a2   :  { %11312 = vmatpush1.bf16.msra.mxu0 %v15669_v61  ;;  %11343 = vmatprep.mubr.bf16.mxu0 %v16130_v49 }
0x16a3   :  { %11313 = vmatprep.subr.bf16.mxu0 %v15677_v45 }
0x16a4   :  { %14418 = vmatmul.mubr.msk.bf16.vlgmr.msra.gmra.mrb[28].mxu1 %vm3843_vm3, %v10829_v54 }
0x16a5   :  { %11385 = vmatpush1.bf16.msra.mxu1 %v15672_v28  ;;  %11416 = vmatprep.mubr.bf16.mxu1 %v16130_v49 }
0x16a6   :  { %11386 = vmatprep.subr.bf16.mxu1 %v15680_v22  ;;  %11314 = vmatpush1.bf16.msra.mxu0 %v15675_v42 }
0x16a7   :  { %11315 = vmatprep.subr.bf16.mxu0 %v15683_v7 }
0x16a9   :  { %11387 = vmatpush1.bf16.msra.mxu1 %v15678_v6 }
0x16aa   :  { %11388 = vmatprep.subr.bf16.mxu1 %v15686_v1  ;;  %11316 = vmatpush1.bf16.msra.mxu0 %v15681_v2  ;;  %v11595_v2 = vpop.permute.xlu0 %11594  ;;  %v11647_v1 = vpop.permute.xlu1 %11646 }
0x16ab   :  { %11317 = vmatprep.subr.bf16.mxu0 %v15689_v40  ;;  %v11603_v40 = vsel %vm3474_vm1, %v11598_v35, 0 }
0x16ad   :  { %11389 = vmatpush1.bf16.msra.mxu1 %v15684_v44  ;;  %v11655_v44 = vsel %vm3474_vm1, %v11650_v30, 0 }
0x16ae   :  { %11390 = vmatprep.subr.bf16.mxu1 %v15692_v9  ;;  %11318 = vmatpush1.bf16.msra.mxu0 %v15687_v39  ;;  %v11702_v39 = vpop.permute.xlu0 %11701  ;;  %v11754_v9 = vpop.permute.xlu1 %11753 }
0x16af   :  { %14421 = vmatprep.subr.bf16.mxu0 %v18595_v34  ;;  %v11707_v62 = vsel %vm3474_vm1, %v11702_v39, 0 }
0x16b1   :  { %11391 = vmatpush1.bf16.msra.mxu1 %v15690_v31 }
0x16b2   :  { %14427 = vmatprep.subr.bf16.mxu1 %v18595_v34  ;;  %v11699_v31 = vpop.permute.xlu0 %11698  ;;  %v11751_v53 = vpop.permute.xlu1 %11750 }
0x175b   :  { %v10916_v50 = vpop.f32.mrb[16].mxu1 }
0x175c   :  { %v10870_v4 = vpop.f32.mrb[16].mxu0  ;;  %v14383_v52 = vpop.f32.mrb[17].mxu1 }
0x175d   :  { %v11198_v17 = vpack.c.bf16 %v10916_v50, %v10870_v4  ;;  %v14377_v20 = vpop.f32.mrb[17].mxu0  ;;  %v10919_v11 = vpop.f32.mrb[18].mxu1  ;;  %v11759_v50 = vsel %vm3474_vm1, %v11754_v9, 0 }
0x175e   :  { %v10873_v12 = vpop.f32.mrb[18].mxu0  ;;  %v14384_v21 = vpop.f32.mrb[19].mxu1 }
0x175f   :  { %v14378_v41 = vpop.f32.mrb[19].mxu0  ;;  %13445 = vmatmul.mubr.msk.bf16.vlgmr.msra.gmra.mrb[112].mxu0 %vm3474_vm1, %v11198_v17  ;;  %13449 = vmatmul.mubr.msk.bf16.vlgmr.msra.gmra.mrb[112].mxu1 %vm3474_vm1, %v11198_v17  ;;  %v11806_v4 = vpop.permute.xlu0 %11805 }
0x1760   :  { %14422 = vmatpush3.bf16.xpose.msra.mxu0 %v11499_v25  ;;  %14428 = vmatpush3.bf16.xpose.msra.mxu1 %v11551_v60  ;;  %v11858_v52 = vpop.permute.xlu1 %11857  ;;  %v11811_v17 = vsel %vm3474_vm1, %v11806_v4, 0 }
0x1761   :  { %11353 = vmatprep.mubr.bf16.mxu0 %v16130_v49  ;;  %11426 = vmatprep.mubr.bf16.mxu1 %v16130_v49  ;;  %v11863_v20 = vsel %vm3474_vm1, %v11858_v52, 0 }
0x1762   :  { %14433 = vmatprep.subr.bf16.mxu0 %v18595_v34  ;;  %14439 = vmatprep.subr.bf16.mxu1 %v18595_v34 }
0x1763   :  { %v11803_v11 = vpop.permute.xlu0 %11802 }
0x1764   :  { %v10962_v51 = vpop.f32.mrb[20].mxu0  ;;  %v11855_v12 = vpop.permute.xlu1 %11854 }
0x1765   :  { %v14389_v29 = vpop.f32.mrb[21].mxu0 }
0x1766   :  { %v10965_v32 = vpop.f32.mrb[22].mxu0 }
0x1767   :  { %v14390_v3 = vpop.f32.mrb[23].mxu0  ;;  %v11008_v37 = vpop.f32.mrb[20].mxu1 }
0x1768   :  { %v11199_v38 = vpack.c.bf16 %v11008_v37, %v10962_v51  ;;  %v14395_v10 = vpop.f32.mrb[21].mxu1 }
0x1769   :  { %v11011_v5 = vpop.f32.mrb[22].mxu1 }
0x176a   :  { %v14396_v55 = vpop.f32.mrb[23].mxu1  ;;  %13446 = vmatmul.mubr.msk.bf16.gmra.mrb[116].mxu0 %vm3474_vm1, %v11199_v38  ;;  %13450 = vmatmul.mubr.msk.bf16.gmra.mrb[116].mxu1 %vm3474_vm1, %v11199_v38 }
0x176b   :  { %11363 = vmatprep.mubr.bf16.mxu0 %v16130_v49  ;;  %11436 = vmatprep.mubr.bf16.mxu1 %v16130_v49 }
0x176c   :  { %v11054_v63 = vpop.f32.mrb[24].mxu0 }
0x176d   :  { %v14401_v24 = vpop.f32.mrb[25].mxu0 }
0x176e   :  { %v11057_v26 = vpop.f32.mrb[26].mxu0 }
0x176f   :  { %v14402_v59 = vpop.f32.mrb[27].mxu0  ;;  %v11100_v0 = vpop.f32.mrb[24].mxu1 }
0x1770   :  { %v11200_v16 = vpack.c.bf16 %v11100_v0, %v11054_v63  ;;  %v14407_v15 = vpop.f32.mrb[25].mxu1 }
0x1771   :  { %v11103_v56 = vpop.f32.mrb[26].mxu1 }
0x1772   :  { %v14408_v43 = vpop.f32.mrb[27].mxu1  ;;  %13447 = vmatmul.mubr.msk.bf16.gmra.mrb[120].mxu0 %vm3474_vm1, %v11200_v16  ;;  %13451 = vmatmul.mubr.msk.bf16.gmra.mrb[120].mxu1 %vm3474_vm1, %v11200_v16 }
0x1773   :  { %11373 = vmatprep.mubr.bf16.mxu0 %v16130_v49  ;;  %11446 = vmatprep.mubr.bf16.mxu1 %v16130_v49 }
0x1774   :  { %v11146_v58 = vpop.f32.mrb[28].mxu0 }
0x1775   :  { %v14413_v61 = vpop.f32.mrb[29].mxu0 }
0x1776   :  { %v11149_v45 = vpop.f32.mrb[30].mxu0 }
0x1777   :  { %v14414_v28 = vpop.f32.mrb[31].mxu0  ;;  %v11192_v54 = vpop.f32.mrb[28].mxu1 }
0x1778   :  { %v11201_v42 = vpack.c.bf16 %v11192_v54, %v11146_v58  ;;  %v14419_v22 = vpop.f32.mrb[29].mxu1 }
0x1779   :  { %v11195_v7 = vpop.f32.mrb[30].mxu1 }
0x177a   :  { %v14420_v6 = vpop.f32.mrb[31].mxu1  ;;  %13448 = vmatmul.mubr.msk.bf16.gmra.mrb[124].mxu0 %vm3474_vm1, %v11201_v42  ;;  %13452 = vmatmul.mubr.msk.bf16.gmra.mrb[124].mxu1 %vm3474_vm1, %v11201_v42 }
0x177b   :  { %14423 = vmatprep.mubr.msk.bf16.mxu0 %vm16128_vm0, %v18595_v34  ;;  %14429 = vmatprep.mubr.msk.bf16.mxu1 %vm16128_vm0, %v18595_v34 }
0x1782   :  { %14424 = vmatmul.mubr.msk.bf16.vlgmr.msra.gmra.mrb[32].mxu0 %vm3474_vm1, %v11491_v33  ;;  %14430 = vmatmul.mubr.msk.bf16.vlgmr.msra.gmra.mrb[32].mxu1 %vm3474_vm1, %v11543_v48 }
0x1783   :  { %14434 = vmatpush3.bf16.xpose.msra.mxu0 %v11603_v40  ;;  %14440 = vmatpush3.bf16.xpose.msra.mxu1 %v11655_v44 }
0x1784   :  { %14435 = vmatprep.mubr.msk.bf16.mxu0 %vm16128_vm0, %v18595_v34  ;;  %14441 = vmatprep.mubr.msk.bf16.mxu1 %vm16128_vm0, %v18595_v34 }
0x1785   :  { %14445 = vmatprep.subr.bf16.mxu0 %v18595_v34  ;;  %14451 = vmatprep.subr.bf16.mxu1 %v18595_v34 }
0x178a   :  { %14436 = vmatmul.mubr.msk.bf16.vlgmr.msra.gmra.mrb[36].mxu0 %vm3474_vm1, %v11595_v2  ;;  %14442 = vmatmul.mubr.msk.bf16.vlgmr.msra.gmra.mrb[36].mxu1 %vm3474_vm1, %v11647_v1 }
0x178b   :  { %14446 = vmatpush3.bf16.xpose.msra.mxu0 %v11707_v62  ;;  %14452 = vmatpush3.bf16.xpose.msra.mxu1 %v11759_v50 }
0x178c   :  { %14447 = vmatprep.mubr.msk.bf16.mxu0 %vm16128_vm0, %v18595_v34  ;;  %14453 = vmatprep.mubr.msk.bf16.mxu1 %vm16128_vm0, %v18595_v34 }
0x178d   :  { %14457 = vmatprep.subr.bf16.mxu0 %v18595_v34  ;;  %14463 = vmatprep.subr.bf16.mxu1 %v18595_v34 }
0x1792   :  { %14448 = vmatmul.mubr.msk.bf16.vlgmr.msra.gmra.mrb[40].mxu0 %vm3474_vm1, %v11699_v31  ;;  %14454 = vmatmul.mubr.msk.bf16.vlgmr.msra.gmra.mrb[40].mxu1 %vm3474_vm1, %v11751_v53 }
0x1793   :  { %14458 = vmatpush3.bf16.xpose.msra.mxu0 %v11811_v17  ;;  %14464 = vmatpush3.bf16.xpose.msra.mxu1 %v11863_v20 }
0x1794   :  { %14459 = vmatprep.mubr.msk.bf16.mxu0 %vm16128_vm0, %v18595_v34  ;;  %14465 = vmatprep.mubr.msk.bf16.mxu1 %vm16128_vm0, %v18595_v34 }
0x1795   :  { %14475 = vmatprep.subr.bf16.mxu1 %v18595_v34  ;;  %14469 = vmatprep.subr.bf16.mxu0 %v18595_v34 }
0x179a   :  { %14460 = vmatmul.mubr.msk.bf16.vlgmr.msra.gmra.mrb[44].mxu0 %vm3474_vm1, %v11803_v11  ;;  %14466 = vmatmul.mubr.msk.bf16.vlgmr.msra.gmra.mrb[44].mxu1 %vm3474_vm1, %v11855_v12 }
0x179b   :  { %14471 = vmatprep.mubr.msk.bf16.mxu0 %vm16128_vm0, %v18595_v34  ;;  %14477 = vmatprep.mubr.msk.bf16.mxu1 %vm16128_vm0, %v18595_v34 }
0x1855   :  { %v11535_v21 = vpop.f32.mrb[32].mxu0  ;;  %v11587_v60 = vpop.f32.mrb[32].mxu1 }
0x1856   :  { %v14425_v25 = vpop.f32.mrb[33].mxu0  ;;  %v14431_v41 = vpop.f32.mrb[33].mxu1  ;;  %v11908_v51 = vsel %vm3843_vm3, %v11587_v60, -inf  ;;  %v11905_v29 = vsel %vm3843_vm3, %v11535_v21, -inf }
0x1857   :  { %11909 = vmax.xlane.f32.xlu1 %v11908_v51  ;;  %v11590_v32 = vpop.f32.mrb[34].mxu1  ;;  %11906 = vmax.xlane.f32.xlu0 %v11905_v29  ;;  %v11538_v3 = vpop.f32.mrb[34].mxu0 }
0x1858   :  { %v14426_v37 = vpop.f32.mrb[35].mxu0  ;;  %v14432_v38 = vpop.f32.mrb[35].mxu1 }
0x185d   :  { %v11639_v10 = vpop.f32.mrb[36].mxu0  ;;  %v18355_v5 = vpop.f32.mrb[36].mxu1 }
0x185e   :  { %v14437_v33 = vpop.f32.mrb[37].mxu0  ;;  %v14443_v55 = vpop.f32.mrb[37].mxu1  ;;  %v11911_v63 = vsel %vm3843_vm3, %v11639_v10, -inf  ;;  %v11914_v48 = vsel %vm3843_vm3, %v18355_v5, -inf }
0x185f   :  { %v11694_v24 = vpop.f32.mrb[38].mxu1  ;;  %11912 = vmax.xlane.f32.xlu0 %v11911_v63  ;;  %v11642_v26 = vpop.f32.mrb[38].mxu0 }
0x1860   :  { %v14438_v59 = vpop.f32.mrb[39].mxu0  ;;  %v14444_v0 = vpop.f32.mrb[39].mxu1 }
0x1863   :  { %11915 = vmax.xlane.f32.xlu0 %v11914_v48 }
0x1865   :  { %v18360_v16 = vpop.f32.mrb[40].mxu0  ;;  %v18362_v15 = vpop.f32.mrb[40].mxu1 }
0x1866   :  { %v14449_v56 = vpop.f32.mrb[41].mxu0  ;;  %v14455_v43 = vpop.f32.mrb[41].mxu1  ;;  %v11920_v58 = vsel %vm3843_vm3, %v18362_v15, -inf  ;;  %v11917_v35 = vsel %vm3843_vm3, %v18360_v16, -inf }
0x1867   :  { %11921 = vmax.xlane.f32.xlu1 %v11920_v58  ;;  %v11798_v61 = vpop.f32.mrb[42].mxu1  ;;  %11918 = vmax.xlane.f32.xlu0 %v11917_v35  ;;  %v11746_v30 = vpop.f32.mrb[42].mxu0 }
0x1868   :  { %v14450_v45 = vpop.f32.mrb[43].mxu0  ;;  %v14456_v28 = vpop.f32.mrb[43].mxu1 }
0x186d   :  { %v11847_v54 = vpop.f32.mrb[44].mxu0  ;;  %v18368_v42 = vpop.f32.mrb[44].mxu1 }
0x186e   :  { %v14461_v22 = vpop.f32.mrb[45].mxu0  ;;  %v14467_v7 = vpop.f32.mrb[45].mxu1  ;;  %v11923_v6 = vsel %vm3843_vm3, %v11847_v54, -inf  ;;  %v11926_v39 = vsel %vm3843_vm3, %v18368_v42, -inf }
0x186f   :  { %v11902_v2 = vpop.f32.mrb[46].mxu1  ;;  %11924 = vmax.xlane.f32.xlu0 %v11923_v6  ;;  %v11850_v1 = vpop.f32.mrb[46].mxu0 }
0x1870   :  { %v14462_v40 = vpop.f32.mrb[47].mxu0  ;;  %v14468_v44 = vpop.f32.mrb[47].mxu1 }
0x1878   :  { %12051 = vrot.lane.b32.xlu1 %v18131_v23, %s16129_s4 }
0x187c   :  { %12100 = vrot.lane.b32.xlu1 %v18230_v47, %s16129_s4 }
0x1885   :  { %12002 = vrot.lane.b32.xlu0 %v18129_v13, %s16129_s4 }
0x18a0   :  { %11927 = vmax.xlane.f32.xlu1 %v11926_v39 }
0x18b1   :  { %12149 = vrot.lane.b32.xlu1 %v18225_v14, %s16129_s4 }
0x18e4   :  { %v11910_v9 = vpop.xlane.xlu1 %11909  ;;  %v11907_v31 = vpop.xlane.xlu0 %11906 }
0x18e5   :  { %v11930_v53 = vsub.f32 %v11587_v60, %v11910_v9  ;;  %v11929_v62 = vsub.f32 %v11535_v21, %v11907_v31 }
0x18e7   :  { %v11939_v50 = vmul.f32 1.442695, %v11930_v53  ;;  %v11937_v4 = vmul.f32 1.442695, %v11929_v62 }
0x18e9   :  { %15941 = vpow2.f32 %v11939_v50 }
0x18ea   :  { %15943 = vpow2.f32 %v11937_v4 }
0x18ec   :  { %v11913_v23 = vpop.xlane.xlu0 %11912 }
0x18ed   :  { %v11931_v47 = vsub.f32 %v11639_v10, %v11913_v23 }
0x18ef   :  { %v11941_v52 = vmul.f32 1.442695, %v11931_v47 }
0x18f0   :  { %v11916_v13 = vpop.xlane.xlu0 %11915 }
0x18f1   :  { %15945 = vpow2.f32 %v11941_v52  ;;  %v11932_v37 = vsub.f32 %v18355_v5, %v11916_v13 }
0x18f3   :  { %v18381_v17 = vpop.eup %15941  ;;  %v11943_v38 = vmul.f32 1.442695, %v11932_v37 }
0x18f4   :  { %v18383_v20 = vpop.eup %15943  ;;  %v11922_v11 = vpop.xlane.xlu1 %11921  ;;  %v11956_v14 = vsel %vm3843_vm3, %v18381_v17, 0.0 }
0x18f5   :  { %11957 = vadd.xlane.f32.xlu1 %v11956_v14  ;;  %v11953_v12 = vsel %vm3843_vm3, %v18383_v20, 0.0  ;;  %v11919_v21 = vpop.xlane.xlu0 %11918  ;;  %v11934_v10 = vsub.f32 %v18362_v15, %v11922_v11  ;;  %15947 = vpow2.f32 %v11943_v38 }
0x18f6   :  { %11954 = vadd.xlane.f32.xlu0 %v11953_v12  ;;  %v11933_v55 = vsub.f32 %v18360_v16, %v11919_v21 }
0x18f7   :  { %v11947_v33 = vmul.f32 1.442695, %v11934_v10 }
0x18f8   :  { %v12052_v60 = vpop.permute.xlu1 %12051  ;;  %v11945_v63 = vmul.f32 1.442695, %v11933_v55  ;;  %v15693_v55 = vld [vmem:[#allocation8 + $0x380] ss:$16 sps:$4 sm:$0xff]  }
0x18f9   :  { %v12057_v25 = vsel %vm3943_vm2, %v12052_v60, 0  ;;  %15949 = vpow2.f32 %v11947_v33 }
0x18fa   :  { %14476 = vmatpush3.bf16.msra.mxu1 %v12057_v25  ;;  %15951 = vpow2.f32 %v11945_v63 }
0x18fb   :  { %v18390_v41 = vpop.eup %15945  ;;  %14487 = vmatprep.subr.bf16.mxu1 %v18595_v34 }
0x18fc   :  { %v11925_v51 = vpop.xlane.xlu0 %11924  ;;  %v11959_v29 = vsel %vm3843_vm3, %v18390_v41, 0.0 }
0x18fd   :  { %11960 = vadd.xlane.f32.xlu0 %v11959_v29  ;;  %v11935_v24 = vsub.f32 %v11847_v54, %v11925_v51 }
0x18ff   :  { %v11949_v26 = vmul.f32 1.442695, %v11935_v24  ;;  %v18404_v59 = vpop.eup %15947  ;;  %v15701_v24 = vld [vmem:[#allocation8 + $0x3a4] ss:$16 sps:$4 sm:$0xff]  }
0x1900   :  { %v12003_v32 = vpop.permute.xlu0 %12002 }
0x1901   :  { %v12008_v3 = vsel %vm3943_vm2, %v12003_v32, 0  ;;  %15953 = vpow2.f32 %v11949_v26  ;;  %v15695_v32 = vld [vmem:[#allocation8 + $0x384] ss:$16 sps:$4 sm:$0xff]  }
0x1902   :  { %14470 = vmatpush3.bf16.msra.mxu0 %v12008_v3  ;;  %v15698_v3 = vld [vmem:[#allocation8 + $0x38c] ss:$16 sps:$4 sm:$0xff]  }
0x1903   :  { %14481 = vmatprep.subr.bf16.mxu0 %v18595_v34  ;;  %v18408_v5 = vpop.eup %15949 }
0x1904   :  { %v11968_v48 = vsel %vm3843_vm3, %v18408_v5, 0.0  ;;  %v18412_v16 = vpop.eup %15951 }
0x1905   :  { %v11965_v43 = vsel %vm3843_vm3, %v18412_v16, 0.0 }
0x1906   :  { %12247 = vrot.lane.b32.xlu1 %v18252_v18, %s16129_s4  ;;  %v12101_v18 = vpop.permute.xlu1 %12100 }
0x190b   :  { %v18417_v58 = vpop.eup %15953 }
0x190c   :  { %v11971_v35 = vsel %vm3843_vm3, %v18417_v58, 0.0 }
0x1913   :  { %12198 = vrot.lane.b32.xlu0 %v18248_v57, %s16129_s4  ;;  %v11962_v57 = vsel %vm3843_vm3, %v18404_v59, 0.0 }
0x192a   :  { %11963 = vadd.xlane.f32.xlu1 %v11962_v57  ;;  %v15699_v57 = vld [vmem:[#allocation8 + $0x3a0] ss:$16 sps:$4 sm:$0xff]  }
0x192d   :  { %v11928_v0 = vpop.xlane.xlu1 %11927 }
0x192e   :  { %v11936_v15 = vsub.f32 %v18368_v42, %v11928_v0  ;;  %11969 = vadd.xlane.f32.xlu1 %v11968_v48  ;;  %v15704_v0 = vld [vmem:[#allocation8 + $0x3ac] ss:$16 sps:$4 sm:$0xff]   ;;  %v15707_v48 = vld [vmem:[#allocation8 + $0x3c4] ss:$16 sps:$4 sm:$0xff]  }
0x1930   :  { %v11951_v56 = vmul.f32 1.442695, %v11936_v15  ;;  %v15710_v15 = vld [vmem:[#allocation8 + $0x3cc] ss:$16 sps:$4 sm:$0xff]  }
0x1931   :  { %v12150_v45 = vpop.permute.xlu1 %12149 }
0x1932   :  { %15955 = vpow2.f32 %v11951_v56  ;;  %11966 = vadd.xlane.f32.xlu0 %v11965_v43  ;;  %v15713_v56 = vld [vmem:[#allocation8 + $0x3e4] ss:$16 sps:$4 sm:$0xff]   ;;  %v15708_v43 = vld [vmem:[#allocation8 + $0x3c8] ss:$16 sps:$4 sm:$0xff]  }
0x1936   :  { %11972 = vadd.xlane.f32.xlu0 %v11971_v35  ;;  %v15716_v35 = vld [vmem:[#allocation8 + $0x3ec] ss:$16 sps:$4 sm:$0xff]  }
0x193c   :  { %v18421_v61 = vpop.eup %15955 }
0x193d   :  { %v11974_v30 = vsel %vm3843_vm3, %v18421_v61, 0.0 }
0x193e   :  { %11975 = vadd.xlane.f32.xlu1 %v11974_v30 }
0x194c   :  { %12296 = vrot.lane.b32.xlu0 %v18266_v19, %s16129_s4  ;;  %v12155_v19 = vsel %vm3943_vm2, %v12150_v45, 0 }
0x194f   :  { %12345 = vrot.lane.b32.xlu1 %v18275_v46, %s16129_s4  ;;  %v12106_v46 = vsel %vm3943_vm2, %v12101_v18, 0  ;;  %v15696_v18 = vld [vmem:[#allocation8 + $0x388] ss:$16 sps:$4 sm:$0xff]  }
0x1982   :  { %v11958_v28 = vpop.xlane.xlu1 %11957 }
0x1983   :  { %15957 = vrcp.f32 %v11958_v28  ;;  %v11955_v54 = vpop.xlane.xlu0 %11954 }
0x1984   :  { %15959 = vrcp.f32 %v11955_v54 }
0x1986   :  { %v12248_v62 = vpop.permute.xlu1 %12247 }
0x1987   :  { %v12253_v11 = vsel %vm3943_vm2, %v12248_v62, 0 }
0x198a   :  { %v11961_v42 = vpop.xlane.xlu0 %11960 }
0x198b   :  { %15961 = vrcp.f32 %v11961_v42 }
0x198d   :  { %v15958_v22 = vpop.eup %15957 }
0x198e   :  { %v15960_v7 = vpop.eup %15959  ;;  %v11986_v6 = vmul.f32 %v15958_v22, %v18381_v17  ;;  %v12199_v31 = vpop.permute.xlu0 %12198 }
0x198f   :  { %v11985_v2 = vmul.f32 %v15960_v7, %v18383_v20  ;;  %v12204_v53 = vsel %vm3943_vm2, %v12199_v31, 0 }
0x1990   :  { %v11994_v1 = vpack.c.bf16 %v11986_v6, %v11986_v6 }
0x1991   :  { %v11993_v40 = vpack.c.bf16 %v11985_v2, %v11985_v2 }
0x1992   :  { %14478 = vmatmul.mubr.msk.bf16.vlgmr.msra.gmra.mrb[48].mxu1 %vm3843_vm3, %v11994_v1 }
0x1993   :  { %14472 = vmatmul.mubr.msk.bf16.vlgmr.msra.gmra.mrb[48].mxu0 %vm3843_vm3, %v11993_v40  ;;  %14488 = vmatpush3.bf16.msra.mxu1 %v12155_v19 }
0x1994   :  { %14482 = vmatpush3.bf16.msra.mxu0 %v12106_v46  ;;  %14483 = vmatprep.mubr.msk.bf16.mxu0 %vm16128_vm0, %v18595_v34 }
0x1995   :  { %v15962_v44 = vpop.eup %15961  ;;  %14493 = vmatprep.subr.bf16.mxu0 %v18595_v34  ;;  %14489 = vmatprep.mubr.msk.bf16.mxu1 %vm16128_vm0, %v18595_v34 }
0x1996   :  { %v11987_v39 = vmul.f32 %v15962_v44, %v18390_v41  ;;  %14499 = vmatprep.subr.bf16.mxu1 %v18595_v34 }
0x1998   :  { %v11995_v9 = vpack.c.bf16 %v11987_v39, %v11987_v39 }
0x199b   :  { %14484 = vmatmul.mubr.msk.bf16.vlgmr.msra.gmra.mrb[52].mxu0 %vm3843_vm3, %v11995_v9 }
0x199c   :  { %14494 = vmatpush3.bf16.msra.mxu0 %v12204_v53  ;;  %14495 = vmatprep.mubr.msk.bf16.mxu0 %vm16128_vm0, %v18595_v34 }
0x199d   :  { %14505 = vmatprep.subr.bf16.mxu0 %v18595_v34 }
0x19b7   :  { %v11964_v50 = vpop.xlane.xlu1 %11963 }
0x19b8   :  { %15963 = vrcp.f32 %v11964_v50 }
0x19bb   :  { %v11970_v4 = vpop.xlane.xlu1 %11969 }
0x19bc   :  { %15965 = vrcp.f32 %v11970_v4 }
0x19bf   :  { %v11967_v23 = vpop.xlane.xlu0 %11966 }
0x19c0   :  { %15967 = vrcp.f32 %v11967_v23 }
0x19c2   :  { %v15964_v47 = vpop.eup %15963 }
0x19c3   :  { %v11988_v52 = vmul.f32 %v15964_v47, %v18404_v59  ;;  %v11973_v13 = vpop.xlane.xlu0 %11972 }
0x19c4   :  { %15969 = vrcp.f32 %v11973_v13 }
0x19c5   :  { %v11996_v17 = vpack.c.bf16 %v11988_v52, %v11988_v52 }
0x19c6   :  { %v15966_v20 = vpop.eup %15965 }
0x19c7   :  { %14490 = vmatmul.mubr.msk.bf16.vlgmr.msra.gmra.mrb[52].mxu1 %vm3843_vm3, %v11996_v17  ;;  %v11990_v14 = vmul.f32 %v15966_v20, %v18408_v5  ;;  %v12297_v25 = vpop.permute.xlu0 %12296 }
0x19c8   :  { %14500 = vmatpush3.bf16.msra.mxu1 %v12253_v11  ;;  %14501 = vmatprep.mubr.msk.bf16.mxu1 %vm16128_vm0, %v18595_v34  ;;  %v12302_v37 = vsel %vm3943_vm2, %v12297_v25, 0 }
0x19c9   :  { %14511 = vmatprep.subr.bf16.mxu1 %v18595_v34  ;;  %v11998_v41 = vpack.c.bf16 %v11990_v14, %v11990_v14 }
0x19ca   :  { %v15968_v12 = vpop.eup %15967 }
0x19cb   :  { %v11989_v21 = vmul.f32 %v15968_v12, %v18412_v16  ;;  %v11976_v60 = vpop.xlane.xlu1 %11975  ;;  %v15705_v16 = vld [vmem:[#allocation8 + $0x3c0] ss:$16 sps:$4 sm:$0xff]  }
0x19cc   :  { %15971 = vrcp.f32 %v11976_v60 }
0x19cd   :  { %v11997_v51 = vpack.c.bf16 %v11989_v21, %v11989_v21 }
0x19ce   :  { %v15970_v29 = vpop.eup %15969 }
0x19cf   :  { %14502 = vmatmul.mubr.msk.bf16.vlgmr.msra.gmra.mrb[56].mxu1 %vm3843_vm3, %v11998_v41  ;;  %v12346_v38 = vpop.permute.xlu1 %12345  ;;  %14496 = vmatmul.mubr.msk.bf16.vlgmr.msra.gmra.mrb[56].mxu0 %vm3843_vm3, %v11997_v51  ;;  %v11991_v33 = vmul.f32 %v15970_v29, %v18417_v58  ;;  %v15711_v58 = vld [vmem:[#allocation8 + $0x3e0] ss:$16 sps:$4 sm:$0xff]  }
0x19d0   :  { %v12351_v10 = vsel %vm3943_vm2, %v12346_v38, 0  ;;  %14506 = vmatpush3.bf16.msra.mxu0 %v12302_v37  ;;  %14507 = vmatprep.mubr.msk.bf16.mxu0 %vm16128_vm0, %v18595_v34 }
0x19d1   :  { %14512 = vmatpush3.bf16.msra.mxu1 %v12351_v10  ;;  %14513 = vmatprep.mubr.msk.bf16.mxu1 %vm16128_vm0, %v18595_v34  ;;  %v11999_v63 = vpack.c.bf16 %v11991_v33, %v11991_v33  ;;  %v15702_v34 = vld [vmem:[#allocation8 + $0x3a8] ss:$16 sps:$4 sm:$0xff]  }
0x19d2   :  { %12506 = vmatprep.subr.bf16.mxu0 %v15695_v32  ;;  %12579 = vmatprep.subr.bf16.mxu1 %v15698_v3  ;;  %v12684_v32 = vld [vmem:[#allocation10] sm:$0xf] }
0x19d3   :  { %v18699_v3 = vld [vmem:[#allocation35_spill] sm:$0xff]  ;;  %v18487_v38 = vrot.slane %v12684_v32, %v18648_v27  ;;  %v18493_v10 = vrot.slane %v12684_v32, %v18675_v36 }
0x19d4   :  { %v18484_v37 = vrot.slane %v12684_v32, %v18699_v3 }
0x19d6   :  { %v15972_v26 = vpop.eup %15971 }
0x19d7   :  { %v11992_v59 = vmul.f32 %v15972_v26, %v18421_v61  ;;  %14508 = vmatmul.mubr.msk.bf16.vlgmr.msra.gmra.mrb[60].mxu0 %vm3843_vm3, %v11999_v63  ;;  %v15714_v61 = vld [vmem:[#allocation8 + $0x3e8] ss:$16 sps:$4 sm:$0xff]  }
0x19d8   :  { %12507 = vmatpush1.bf16.msra.mxu0 %v15693_v55  ;;  %12538 = vmatprep.mubr.bf16.mxu0 %v16130_v49 }
0x19d9   :  { %v12000_v5 = vpack.c.bf16 %v11992_v59, %v11992_v59  ;;  %12508 = vmatprep.subr.bf16.mxu0 %v15701_v24 }
0x19db   :  { %14514 = vmatmul.mubr.msk.bf16.vlgmr.msra.gmra.mrb[60].mxu1 %vm3843_vm3, %v12000_v5 }
0x19dc   :  { %12580 = vmatpush1.bf16.msra.mxu1 %v15696_v18  ;;  %12509 = vmatpush1.bf16.msra.mxu0 %v15699_v57 }
0x19dd   :  { %12581 = vmatprep.subr.bf16.mxu1 %v15704_v0  ;;  %12510 = vmatprep.subr.bf16.mxu0 %v15707_v48 }
0x19de   :  { %12611 = vmatprep.mubr.bf16.mxu1 %v16130_v49 }
0x19e0   :  { %12582 = vmatpush1.bf16.msra.mxu1 %v15702_v34  ;;  %12511 = vmatpush1.bf16.msra.mxu0 %v15705_v16 }
0x19e1   :  { %12583 = vmatprep.subr.bf16.mxu1 %v15710_v15  ;;  %12512 = vmatprep.subr.bf16.mxu0 %v15713_v56 }
0x19e4   :  { %12584 = vmatpush1.bf16.msra.mxu1 %v15708_v43  ;;  %12513 = vmatpush1.bf16.msra.mxu0 %v15711_v58 }
0x19e5   :  { %12585 = vmatprep.subr.bf16.mxu1 %v15716_v35 }
0x19e8   :  { %12586 = vmatpush1.bf16.msra.mxu1 %v15714_v61 }
0x1a65   :  { %v12093_v30 = vpop.f32.mrb[48].mxu1 }
0x1a66   :  { %v12044_v45 = vpop.f32.mrb[48].mxu0  ;;  %v14479_v28 = vpop.f32.mrb[49].mxu1 }
0x1a67   :  { %v12393_v54 = vpack.c.bf16 %v12093_v30, %v12044_v45  ;;  %v14473_v42 = vpop.f32.mrb[49].mxu0  ;;  %v12096_v22 = vpop.f32.mrb[50].mxu1 }
0x1a68   :  { %v12047_v7 = vpop.f32.mrb[50].mxu0  ;;  %v14480_v6 = vpop.f32.mrb[51].mxu1 }
0x1a69   :  { %v14474_v2 = vpop.f32.mrb[51].mxu0  ;;  %13485 = vmatmul.mubr.msk.bf16.vlgmr.msra.gmra.mrb[112].mxu0 %vm3474_vm1, %v12393_v54  ;;  %13489 = vmatmul.mubr.msk.bf16.vlgmr.msra.gmra.mrb[112].mxu1 %vm3474_vm1, %v12393_v54 }
0x1a6a   :  { %12548 = vmatprep.mubr.bf16.mxu0 %v16130_v49  ;;  %12621 = vmatprep.mubr.bf16.mxu1 %v16130_v49 }
0x1a6e   :  { %v12142_v1 = vpop.f32.mrb[52].mxu0 }
0x1a6f   :  { %v14485_v40 = vpop.f32.mrb[53].mxu0 }
0x1a70   :  { %v12145_v19 = vpop.f32.mrb[54].mxu0 }
0x1a71   :  { %v14486_v46 = vpop.f32.mrb[55].mxu0 }
0x1a9a   :  { %v12191_v44 = vpop.f32.mrb[52].mxu1 }
0x1a9b   :  { %v12394_v39 = vpack.c.bf16 %v12191_v44, %v12142_v1  ;;  %v14491_v9 = vpop.f32.mrb[53].mxu1 }
0x1a9c   :  { %v12194_v31 = vpop.f32.mrb[54].mxu1 }
0x1a9d   :  { %v14492_v53 = vpop.f32.mrb[55].mxu1  ;;  %13486 = vmatmul.mubr.msk.bf16.gmra.mrb[116].mxu0 %vm3474_vm1, %v12394_v39  ;;  %13490 = vmatmul.mubr.msk.bf16.gmra.mrb[116].mxu1 %vm3474_vm1, %v12394_v39 }
0x1a9e   :  { %12558 = vmatprep.mubr.bf16.mxu0 %v16130_v49  ;;  %12631 = vmatprep.mubr.bf16.mxu1 %v16130_v49 }
0x1aa2   :  { %v12240_v62 = vpop.f32.mrb[56].mxu0  ;;  %v12289_v50 = vpop.f32.mrb[56].mxu1 }
0x1aa3   :  { %v12395_v4 = vpack.c.bf16 %v12289_v50, %v12240_v62  ;;  %v14497_v23 = vpop.f32.mrb[57].mxu0  ;;  %v14503_v47 = vpop.f32.mrb[57].mxu1 }
0x1aa4   :  { %v12243_v52 = vpop.f32.mrb[58].mxu0  ;;  %v12292_v13 = vpop.f32.mrb[58].mxu1 }
0x1aa5   :  { %v14498_v17 = vpop.f32.mrb[59].mxu0  ;;  %v14504_v20 = vpop.f32.mrb[59].mxu1  ;;  %13487 = vmatmul.mubr.msk.bf16.gmra.mrb[120].mxu0 %vm3474_vm1, %v12395_v4  ;;  %13491 = vmatmul.mubr.msk.bf16.gmra.mrb[120].mxu1 %vm3474_vm1, %v12395_v4 }
0x1aa6   :  { %12568 = vmatprep.mubr.bf16.mxu0 %v16130_v49  ;;  %12641 = vmatprep.mubr.bf16.mxu1 %v16130_v49  ;;  %v18490_v49 = vrot.slane %v12684_v32, %v16628_v8 }
0x1aaa   :  { %v12338_v11 = vpop.f32.mrb[60].mxu0 }
0x1aab   :  { %v14509_v14 = vpop.f32.mrb[61].mxu0 }
0x1aac   :  { %v12341_v12 = vpop.f32.mrb[62].mxu0 }
0x1aad   :  { %v14510_v21 = vpop.f32.mrb[63].mxu0 }
0x1aae   :  { %v12387_v60 = vpop.f32.mrb[60].mxu1 }
0x1aaf   :  { %v12396_v25 = vpack.c.bf16 %v12387_v60, %v12338_v11  ;;  %v14515_v41 = vpop.f32.mrb[61].mxu1 }
0x1ab0   :  { %v12390_v51 = vpop.f32.mrb[62].mxu1 }
0x1ab1   :  { %v14516_v29 = vpop.f32.mrb[63].mxu1  ;;  %13488 = vmatmul.mubr.msk.bf16.gmra.mrb[124].mxu0 %vm3474_vm1, %v12396_v25  ;;  %13492 = vmatmul.mubr.msk.bf16.gmra.mrb[124].mxu1 %vm3474_vm1, %v12396_v25 }
0x1b3c   :  { %v12540_v33 = vpop.f32.mrb[112].mxu0  ;;  %v12613_v55 = vpop.f32.mrb[112].mxu1 }
0x1b3d   :  { %v12706_v63 = vadd.f32 %v18484_v37, %v12540_v33  ;;  %v12708_v24 = vadd.f32 %v18487_v38, %v12613_v55  ;;  %v12542_v26 = vpop.f32.mrb[113].mxu0  ;;  %v12615_v59 = vpop.f32.mrb[113].mxu1 }
0x1b3e   :  { %v12707_v18 = vadd.f32 %v18490_v49, %v12542_v26  ;;  %v12709_v57 = vadd.f32 %v18493_v10, %v12615_v59  ;;  %v12544_v27 = vpop.f32.mrb[114].mxu0  ;;  %v12617_v5 = vpop.f32.mrb[114].mxu1 }
0x1b3f   :  { %12738 = vst [vmem:[#allocation11] sm:$0xff] %v12706_v63  ;;  %12740 = vst [vmem:[#allocation11 + $0x10] sm:$0xff] %v12708_v24  ;;  %v12710_v8 = vadd.f32 %v18484_v37, %v12544_v27  ;;  %v12712_v36 = vadd.f32 %v18487_v38, %v12617_v5  ;;  %v12546_v0 = vpop.f32.mrb[115].mxu0  ;;  %v12619_v48 = vpop.f32.mrb[115].mxu1 }
0x1b40   :  { %12739 = vst [vmem:[#allocation11 + $0x8] sm:$0xff] %v12707_v18  ;;  %12741 = vst [vmem:[#allocation11 + $0x18] sm:$0xff] %v12709_v57  ;;  %v12711_v34 = vadd.f32 %v18490_v49, %v12546_v0  ;;  %v12713_v16 = vadd.f32 %v18493_v10, %v12619_v48 }
0x1b41   :  { %12742 = vst [vmem:[#allocation11 + $0x20] sm:$0xff] %v12710_v8  ;;  %12744 = vst [vmem:[#allocation11 + $0x30] sm:$0xff] %v12712_v36 }
0x1b42   :  { %12743 = vst [vmem:[#allocation11 + $0x28] sm:$0xff] %v12711_v34  ;;  %12745 = vst [vmem:[#allocation11 + $0x38] sm:$0xff] %v12713_v16 }
0x1b70   :  { %v12550_v15 = vpop.f32.mrb[116].mxu0  ;;  %v12623_v56 = vpop.f32.mrb[116].mxu1 }
0x1b71   :  { %v12714_v43 = vadd.f32 %v18484_v37, %v12550_v15  ;;  %v12716_v58 = vadd.f32 %v18487_v38, %v12623_v56  ;;  %v12552_v35 = vpop.f32.mrb[117].mxu0  ;;  %v12625_v61 = vpop.f32.mrb[117].mxu1 }
0x1b72   :  { %v12715_v30 = vadd.f32 %v18490_v49, %v12552_v35  ;;  %v12717_v45 = vadd.f32 %v18493_v10, %v12625_v61  ;;  %v12554_v28 = vpop.f32.mrb[118].mxu0  ;;  %v12627_v54 = vpop.f32.mrb[118].mxu1 }
0x1b73   :  { %12746 = vst [vmem:[#allocation11 + $0x40] sm:$0xff] %v12714_v43  ;;  %12748 = vst [vmem:[#allocation11 + $0x50] sm:$0xff] %v12716_v58  ;;  %v12718_v42 = vadd.f32 %v18484_v37, %v12554_v28  ;;  %v12720_v22 = vadd.f32 %v18487_v38, %v12627_v54  ;;  %v12556_v7 = vpop.f32.mrb[119].mxu0  ;;  %v12629_v6 = vpop.f32.mrb[119].mxu1 }
0x1b74   :  { %12747 = vst [vmem:[#allocation11 + $0x48] sm:$0xff] %v12715_v30  ;;  %12749 = vst [vmem:[#allocation11 + $0x58] sm:$0xff] %v12717_v45  ;;  %v12719_v2 = vadd.f32 %v18490_v49, %v12556_v7  ;;  %v12721_v1 = vadd.f32 %v18493_v10, %v12629_v6 }
0x1b75   :  { %12750 = vst [vmem:[#allocation11 + $0x60] sm:$0xff] %v12718_v42  ;;  %12752 = vst [vmem:[#allocation11 + $0x70] sm:$0xff] %v12720_v22 }
0x1b76   :  { %12751 = vst [vmem:[#allocation11 + $0x68] sm:$0xff] %v12719_v2  ;;  %12753 = vst [vmem:[#allocation11 + $0x78] sm:$0xff] %v12721_v1 }
0x1b78   :  { %v12560_v40 = vpop.f32.mrb[120].mxu0  ;;  %v12633_v19 = vpop.f32.mrb[120].mxu1 }
0x1b79   :  { %v12722_v46 = vadd.f32 %v18484_v37, %v12560_v40  ;;  %v12724_v44 = vadd.f32 %v18487_v38, %v12633_v19  ;;  %v12562_v39 = vpop.f32.mrb[121].mxu0  ;;  %v12635_v9 = vpop.f32.mrb[121].mxu1 }
0x1b7a   :  { %v12723_v31 = vadd.f32 %v18490_v49, %v12562_v39  ;;  %v12725_v53 = vadd.f32 %v18493_v10, %v12635_v9  ;;  %v12564_v62 = vpop.f32.mrb[122].mxu0  ;;  %v12637_v50 = vpop.f32.mrb[122].mxu1 }
0x1b7b   :  { %12754 = vst [vmem:[#allocation11 + $0x80] sm:$0xff] %v12722_v46  ;;  %12756 = vst [vmem:[#allocation11 + $0x90] sm:$0xff] %v12724_v44  ;;  %v12726_v4 = vadd.f32 %v18484_v37, %v12564_v62  ;;  %v12728_v23 = vadd.f32 %v18487_v38, %v12637_v50  ;;  %v12566_v47 = vpop.f32.mrb[123].mxu0  ;;  %v12639_v52 = vpop.f32.mrb[123].mxu1 }
0x1b7c   :  { %12755 = vst [vmem:[#allocation11 + $0x88] sm:$0xff] %v12723_v31  ;;  %12757 = vst [vmem:[#allocation11 + $0x98] sm:$0xff] %v12725_v53  ;;  %v12727_v13 = vadd.f32 %v18490_v49, %v12566_v47  ;;  %v12729_v17 = vadd.f32 %v18493_v10, %v12639_v52 }
0x1b7d   :  { %12758 = vst [vmem:[#allocation11 + $0xa0] sm:$0xff] %v12726_v4  ;;  %12760 = vst [vmem:[#allocation11 + $0xb0] sm:$0xff] %v12728_v23 }
0x1b7e   :  { %12759 = vst [vmem:[#allocation11 + $0xa8] sm:$0xff] %v12727_v13  ;;  %12761 = vst [vmem:[#allocation11 + $0xb8] sm:$0xff] %v12729_v17 }
0x1b84   :  { %v12570_v20 = vpop.f32.mrb[124].mxu0  ;;  %v12643_v11 = vpop.f32.mrb[124].mxu1 }
0x1b85   :  { %v12730_v14 = vadd.f32 %v18484_v37, %v12570_v20  ;;  %v12732_v12 = vadd.f32 %v18487_v38, %v12643_v11  ;;  %v12572_v21 = vpop.f32.mrb[125].mxu0  ;;  %v12645_v60 = vpop.f32.mrb[125].mxu1 }
0x1b86   :  { %v12731_v25 = vadd.f32 %v18490_v49, %v12572_v21  ;;  %v12733_v41 = vadd.f32 %v18493_v10, %v12645_v60  ;;  %v12574_v51 = vpop.f32.mrb[126].mxu0  ;;  %v12647_v29 = vpop.f32.mrb[126].mxu1 }
0x1b87   :  { %12762 = vst [vmem:[#allocation11 + $0xc0] sm:$0xff] %v12730_v14  ;;  %12764 = vst [vmem:[#allocation11 + $0xd0] sm:$0xff] %v12732_v12  ;;  %v12734_v32 = vadd.f32 %v18484_v37, %v12574_v51  ;;  %v12736_v3 = vadd.f32 %v18487_v38, %v12647_v29  ;;  %v12576_v33 = vpop.f32.mrb[127].mxu0  ;;  %v12649_v55 = vpop.f32.mrb[127].mxu1 }
0x1b88   :  { %12763 = vst [vmem:[#allocation11 + $0xc8] sm:$0xff] %v12731_v25  ;;  %12765 = vst [vmem:[#allocation11 + $0xd8] sm:$0xff] %v12733_v41  ;;  %v12735_v63 = vadd.f32 %v18490_v49, %v12576_v33  ;;  %v12737_v24 = vadd.f32 %v18493_v10, %v12649_v55 }
0x1b89   :  { %12766 = vst [vmem:[#allocation11 + $0xe0] sm:$0xff] %v12734_v32  ;;  %12768 = vst [vmem:[#allocation11 + $0xf0] sm:$0xff] %v12736_v3 }
0x1b8a   :  { %12767 = vst [vmem:[#allocation11 + $0xe8] sm:$0xff] %v12735_v63  ;;  %12769 = vst [vmem:[#allocation11 + $0xf8] sm:$0xff] %v12737_v24 }
0x1b8b   :  { %16097 = shalt.err (!%p16094_p2)
}
0x1b8c   :  { %s16098_s10 = scalar_lea.hbm %s18547_s5, 4096 }
0x1b8d   :  { %p16099_p3 = scmp.ne.s32.totalorder %s18547_s5, %s16098_s10  ;;  %p16102_p4 = scmp.lt.u32.totalorder %s16098_s10, %s18547_s5 }
0x1b8f   :  { %p16104_p5 = pnand %p16102_p4, %p16099_p3 }
0x1b91   :  { %16107 = shalt.err (!%p16104_p5)
}
0x1b92   :  { %12781 = dma.vmem_to_hbm [thread:$0]  %s12776_s6, 4096, %s18547_s5, [#allocation4], %s16123_s3, %s16123_s3, %s16124_s30  }
0x1b93   :  { %16114 = dma.done.wait [#allocation4], 4096  }
0x1b94   :  { %16115 = vsyncadd [#allocation4], 4294963200 }
0x1b95   :  { %12785 = vsyncpa [#allocation3], 1 }
0x1b96   :  { %12786 = vsyncpa [#allocation6], 1 }
0x1b97   :  { %12787 = vsyncpa [#allocation9], 1 }
0x1b98   :  { %12788 = vsyncpa [#allocation4], 1 }

</bundles_post_ra>
